<compile_context>
chip_gen: v7x
topology: tpu7x:2x2x1
jax: 0.10.0
libtpu: 0.0.40
codegen_flags: <defaults>
</compile_context>

<pallas_src>
import functools

import numpy as np
import jax
import jax.numpy as jnp
from jax.experimental import pallas as pl
from jax.experimental.pallas import tpu as pltpu


# ----------------------------- fused Pallas kernel ----------------------------- #

def _fused_forward_kernel(
    x_ref,                                       # [1, S, S, S*C]   one sample (NDHW(C))
    bd1, b1r, bd2, b2r,                          # pointwise block (BN0/BN1/BN2 folded)
    sh1e, sh1o, sw1e, sw1o,                      # pool 1 selections
    bB, b3r, sh2e, sh2o, sw2e, sw2o,             # conv3d k=3 #1 (BN3 folded) + pool 2
    bC, b4r, sw3e, sw3o,                         # conv3d k=3 #2 (BN4 folded) + pool 3
    wf1, bf1, wf2, bf2, wf3, bf3,                # FC head (BN1d folded into wf1)
    o_ref,                                       # [1, 1, 2]
    p1_ref, p2_ref,                              # VMEM scratch
    *, S, C):
    C2 = C // 2
    S1 = S // 2          # after pool 1
    S2 = S1 - 2          # after first 3x3x3 conv
    S3 = S2 // 2         # after pool 2
    S4 = S3 - 2          # after second 3x3x3 conv (== 2; pool 3 -> 1)
    f32 = jnp.float32

    def mm(a, b):
        return jnp.dot(a, b, preferred_element_type=f32)

    # ---- BN -> Conv1x1 -> BN -> ReLU -> Conv1x1 -> BN, per depth plane,
    #      fused with MaxPool3d(2) + ReLU --------------------------------------
    def pointwise_plane(d):
        h = mm(x_ref[0, d], bd1[...]) + b1r[...]          # [S, S*C] @ [S*C, S*C2]
        h = jnp.maximum(h, 0.0)                           # ReLU (after folded BN1)
        return mm(h, bd2[...]) + b2r[...]                 # [S, S*C2]   (BN2 folded)

    for do in range(S1):
        m = jnp.maximum(pointwise_plane(2 * do), pointwise_plane(2 * do + 1))  # depth pool
        m = jnp.maximum(mm(sh1e[...], m), mm(sh1o[...], m))                    # height pool
        m = jnp.maximum(mm(m, sw1e[...]), mm(m, sw1o[...]))                    # width  pool
        p1_ref[do] = jnp.maximum(m, 0.0)                                       # ReLU

    # ---- Conv3d(k=3)+BN as 9 banded matmuls, fused with MaxPool3d(2)+ReLU ----
    def conv3_plane(src_ref, bands, brow, h_out, wc_out, d_out):
        acc = jnp.zeros((h_out, wc_out), f32) + brow[...]
        for kd in range(3):
            for kh in range(3):
                rows = src_ref[d_out + kd, pl.ds(kh, h_out), :]
                acc = acc + mm(rows, bands[kd * 3 + kh])
        return acc

    for do in range(S3):
        m = jnp.maximum(conv3_plane(p1_ref, bB, b3r, S2, S2 * C2, 2 * do),
                        conv3_plane(p1_ref, bB, b3r, S2, S2 * C2, 2 * do + 1))
        m = jnp.maximum(mm(sh2e[...], m), mm(sh2o[...], m))
        m = jnp.maximum(mm(m, sw2e[...]), mm(m, sw2o[...]))
        p2_ref[do] = jnp.maximum(m, 0.0)

    # ---- second Conv3d(k=3)+BN, MaxPool3d(2)+ReLU, flatten (spatial -> 1) ----
    m = jnp.maximum(conv3_plane(p2_ref, bC, b4r, S4, S4 * C2, 0),
                    conv3_plane(p2_ref, bC, b4r, S4, S4 * C2, 1))  # depth pool
    m = jnp.maximum(m[0:1, :], m[1:2, :])                          # height pool -> [1, S4*C2]
    m = jnp.maximum(mm(m, sw3e[...]), mm(m, sw3o[...]))            # width  pool -> [1, C2]
    feat = jnp.maximum(m, 0.0)                                     # flattened features (NC order)

    # ---- FC head: BN1d (folded) -> Linear -> ReLU -> Linear -> ReLU -> Linear -> Softmax
    # Dropout layers are eval-mode identities.
    h = jnp.maximum(mm(feat, wf1[...]) + bf1[...], 0.0)
    h = jnp.maximum(mm(h, wf2[...]) + bf2[...], 0.0)
    logits = mm(h, wf3[...]) + bf3[...]                            # [1, 2]
    z = logits - jnp.max(logits, axis=-1, keepdims=True)
    e = jnp.exp(z)
    o_ref[0] = e / jnp.sum(e, axis=-1, keepdims=True)              # softmax over classes


# ------------------------- host-side parameter folding ------------------------- #

def _fold_bn(bn, eps=1e-5):
    g, b, m, v = (np.asarray(bn[k], np.float32) for k in ("gamma", "beta", "mean", "var"))
    s = g / np.sqrt(v + eps)
    return s, b - m * s


def _row_pool_sel(h_in):
    """[h_out, h_in] 0/1 matrices selecting even / odd rows (left-multiply)."""
    h_out = h_in // 2
    e = np.zeros((h_out, h_in), np.float32)
    o = np.zeros((h_out, h_in), np.float32)
    e[np.arange(h_out), 2 * np.arange(h_out)] = 1.0
    o[np.arange(h_out), 2 * np.arange(h_out) + 1] = 1.0
    return e, o


def _lane_pool_sel(w_in, c):
    """[w_in*c, w_out*c] 0/1 matrices selecting even / odd w positions (right-multiply)."""
    w_out = w_in // 2
    e = np.zeros((w_in, w_out), np.float32)
    o = np.zeros((w_in, w_out), np.float32)
    e[2 * np.arange(w_out), np.arange(w_out)] = 1.0
    o[2 * np.arange(w_out) + 1, np.arange(w_out)] = 1.0
    eye_c = np.eye(c, dtype=np.float32)
    return np.kron(e, eye_c), np.kron(o, eye_c)


def _banded_conv_mats(w_folded, w_in, w_out):
    """9 matrices B[kd*3+kh] of shape [w_in*Cin, w_out*Cout]:
       B[(wi,ci),(wo,co)] = W[co,ci,kd,kh,wi-wo] for 0 <= wi-wo <= 2."""
    cout, cin = w_folded.shape[0], w_folded.shape[1]
    mats = np.zeros((9, w_in * cin, w_out * cout), np.float32)
    for kd in range(3):
        for kh in range(3):
            k = kd * 3 + kh
            for kw in range(3):
                tap = w_folded[:, :, kd, kh, kw].T            # [cin, cout]
                for wo in range(w_out):
                    wi = wo + kw
                    mats[k, wi * cin:(wi + 1) * cin, wo * cout:(wo + 1) * cout] = tap
    return mats


def init_raw_params(key, C, flatten_features, num_classes=2):
    """Random parameters mirroring the PyTorch module's layer shapes."""
    C2 = C // 2
    ks = iter(jax.random.split(key, 48))

    def nrm(shape):
        return 0.1 * jax.random.normal(next(ks), shape, jnp.float32)

    def bn(n):
        return dict(gamma=jax.random.uniform(next(ks), (n,), jnp.float32, 0.5, 1.5),
                    beta=0.1 * jax.random.normal(next(ks), (n,), jnp.float32),
                    mean=0.1 * jax.random.normal(next(ks), (n,), jnp.float32),
                    var=jax.random.uniform(next(ks), (n,), jnp.float32, 0.5, 1.5))

    return dict(
        bn0=bn(C),
        conv1_w=nrm((C2, C, 1, 1, 1)), conv1_b=nrm((C2,)),
        bn1=bn(C2),
        conv2_w=nrm((C2, C2, 1, 1, 1)), conv2_b=nrm((C2,)),
        bn2=bn(C2),
        conv3_w=nrm((C2, C2, 3, 3, 3)), conv3_b=nrm((C2,)),
        bn3=bn(C2),
        conv4_w=nrm((C2, C2, 3, 3, 3)), conv4_b=nrm((C2,)),
        bn4=bn(C2),
        bnf=bn(flatten_features),
        fc1_w=nrm((128, flatten_features)), fc1_b=nrm((128,)),
        fc2_w=nrm((128, 128)), fc2_b=nrm((128,)),
        fc3_w=nrm((num_classes, 128)), fc3_b=nrm((num_classes,)),
    )


def prepare_params(raw, C, S):
    """Fold all BatchNorms and build the block-diagonal / banded / selection matrices."""
    C2 = C // 2
    S1 = S // 2
    S2 = S1 - 2
    S3 = S2 // 2
    S4 = S3 - 2
    f32 = np.float32

    s0, t0 = _fold_bn(raw["bn0"])
    s1, t1 = _fold_bn(raw["bn1"])
    s2, t2 = _fold_bn(raw["bn2"])
    s3, t3 = _fold_bn(raw["bn3"])
    s4, t4 = _fold_bn(raw["bn4"])
    sf, tf = _fold_bn(raw["bnf"])

    # pointwise block: BN0 -> conv1 -> BN1 (folded), ReLU, conv2 -> BN2 (folded)
    w1 = np.asarray(raw["conv1_w"], f32)[:, :, 0, 0, 0].T        # [C, C2]
    b1 = np.asarray(raw["conv1_b"], f32)
    w1f = (s0[:, None] * w1) * s1[None, :]
    b1f = s1 * (t0 @ w1 + b1) + t1
    w2 = np.asarray(raw["conv2_w"], f32)[:, :, 0, 0, 0].T        # [C2, C2]
    b2 = np.asarray(raw["conv2_b"], f32)
    w2f = w2 * s2[None, :]
    b2f = s2 * b2 + t2

    bd1 = np.kron(np.eye(S, dtype=f32), w1f)                     # [S*C,  S*C2]
    b1r = np.tile(b1f, S)[None, :]
    bd2 = np.kron(np.eye(S, dtype=f32), w2f)                     # [S*C2, S*C2]
    b2r = np.tile(b2f, S)[None, :]

    sh1e, sh1o = _row_pool_sel(S)
    sw1e, sw1o = _lane_pool_sel(S, C2)

    # conv3d k=3 #1 (+BN3 folded)
    w3f = np.asarray(raw["conv3_w"], f32) * s3[:, None, None, None, None]
    b3f = s3 * np.asarray(raw["conv3_b"], f32) + t3
    bB = _banded_conv_mats(w3f, S1, S2)                          # [9, S1*C2, S2*C2]
    b3r = np.tile(b3f, S2)[None, :]
    sh2e, sh2o = _row_pool_sel(S2)
    sw2e, sw2o = _lane_pool_sel(S2, C2)

    # conv3d k=3 #2 (+BN4 folded)
    w4f = np.asarray(raw["conv4_w"], f32) * s4[:, None, None, None, None]
    b4f = s4 * np.asarray(raw["conv4_b"], f32) + t4
    bC = _banded_conv_mats(w4f, S3, S4)                          # [9, S3*C2, S4*C2]
    b4r = np.tile(b4f, S4)[None, :]
    sw3e, sw3o = _lane_pool_sel(S4, C2)

    # FC head (BN1d folded into the first Linear)
    fc1_w = np.asarray(raw["fc1_w"], f32)
    fc1_b = np.asarray(raw["fc1_b"], f32)
    wf1 = sf[:, None] * fc1_w.T                                  # [F, 128]
    bf1 = (tf @ fc1_w.T + fc1_b)[None, :]
    wf2 = np.asarray(raw["fc2_w"], f32).T
    bf2 = np.asarray(raw["fc2_b"], f32)[None, :]
    wf3 = np.asarray(raw["fc3_w"], f32).T                        # [128, num_classes]
    bf3 = np.asarray(raw["fc3_b"], f32)[None, :]

    ordered = [bd1, b1r, bd2, b2r, sh1e, sh1o, sw1e, sw1o,
               bB, b3r, sh2e, sh2o, sw2e, sw2o,
               bC, b4r, sw3e, sw3o,
               wf1, bf1, wf2, bf2, wf3, bf3]
    return [jnp.asarray(a, jnp.float32) for a in ordered]


# ---------------------------------- forward ------------------------------------ #

def _const_spec(arr):
    nd = arr.ndim
    return pl.BlockSpec(arr.shape, lambda i, _nd=nd: (0,) * _nd)


def forward(x_ncdhw, weights):
    """x_ncdhw: [N, C, S, S, S] float32 (PyTorch layout). Returns softmax probs [N, 2]."""
    N, C, D, H, W = x_ncdhw.shape
    assert D == H == W, "cubic input expected"
    S = D
    C2 = C // 2
    S1 = S // 2
    S2 = S1 - 2
    S3 = S2 // 2
    S4 = S3 - 2
    # TODO(synk): the fused pool-3/flatten tail assumes the final spatial size is 1.
    assert S4 == 2 and S4 // 2 == 1, "kernel assumes final conv output spatial size 2 -> pool 1"

    # Single host-side layout op on the input: NCDHW -> [N, D, H, W*C] (w-major, c-minor lanes)
    x_prep = jnp.transpose(x_ncdhw, (0, 2, 3, 4, 1)).reshape(N, S, S, S * C).astype(jnp.float32)

    kernel = functools.partial(_fused_forward_kernel, S=S, C=C)

    out = pl.pallas_call(
        kernel,
        out_shape=jax.ShapeDtypeStruct((N, 1, 2), jnp.float32),
        grid=(N,),
        in_specs=[pl.BlockSpec((1, S, S, S * C), lambda i: (i, 0, 0, 0))]
                 + [_const_spec(w) for w in weights],
        out_specs=pl.BlockSpec((1, 1, 2), lambda i: (i, 0, 0)),
        scratch_shapes=[
            pltpu.VMEM((S1, S1, S1 * C2), jnp.float32),   # activations after pool 1
            pltpu.VMEM((S3, S3, S3 * C2), jnp.float32),   # activations after pool 2
        ],
        compiler_params=pltpu.CompilerParams(dimension_semantics=("parallel",)),
    )(x_prep, *weights)
    return out.reshape(N, 2)


# ----------------------------------- main --------------------------------------- #

if __name__ == "__main__":
    N, C, S = 2, 8, 20          # input_shape = (C, S, S, S); S=20 survives all convs/pools
    C2 = C // 2
    final_spatial = (((S // 2) - 2) // 2 - 2) // 2        # 20 -> 10 -> 8 -> 4 -> 2 -> 1
    flatten_features = C2 * final_spatial ** 3

    key = jax.random.PRNGKey(0)
    kx, kp = jax.random.split(key)
    x = jax.random.normal(kx, (N, C, S, S, S), jnp.float32)

    raw = init_raw_params(kp, C, flatten_features, num_classes=2)
    weights = prepare_params(raw, C, S)

    out = jax.jit(forward)(x, weights)
    out = jax.block_until_ready(out)

    assert out.shape == (N, 2), out.shape
    assert bool(jnp.all(jnp.isfinite(out))), "non-finite output"
    assert bool(jnp.allclose(jnp.sum(out, axis=-1), 1.0, atol=1e-3)), "softmax rows must sum to 1"
    print("KERNEL_OK")
</pallas_src>

<mosaic_0001>
module attributes {stable_mosaic.version = 11 : i64} {
  func.func @_fused_forward_kernel(%arg0: i32, %arg1: memref<1x20x20x160xf32, #tpu.memory_space<vmem>>, %arg2: memref<160x80xf32, #tpu.memory_space<vmem>>, %arg3: memref<1x80xf32, #tpu.memory_space<vmem>>, %arg4: memref<80x80xf32, #tpu.memory_space<vmem>>, %arg5: memref<1x80xf32, #tpu.memory_space<vmem>>, %arg6: memref<10x20xf32, #tpu.memory_space<vmem>>, %arg7: memref<10x20xf32, #tpu.memory_space<vmem>>, %arg8: memref<80x40xf32, #tpu.memory_space<vmem>>, %arg9: memref<80x40xf32, #tpu.memory_space<vmem>>, %arg10: memref<9x40x32xf32, #tpu.memory_space<vmem>>, %arg11: memref<1x32xf32, #tpu.memory_space<vmem>>, %arg12: memref<4x8xf32, #tpu.memory_space<vmem>>, %arg13: memref<4x8xf32, #tpu.memory_space<vmem>>, %arg14: memref<32x16xf32, #tpu.memory_space<vmem>>, %arg15: memref<32x16xf32, #tpu.memory_space<vmem>>, %arg16: memref<9x16x8xf32, #tpu.memory_space<vmem>>, %arg17: memref<1x8xf32, #tpu.memory_space<vmem>>, %arg18: memref<8x4xf32, #tpu.memory_space<vmem>>, %arg19: memref<8x4xf32, #tpu.memory_space<vmem>>, %arg20: memref<4x128xf32, #tpu.memory_space<vmem>>, %arg21: memref<1x128xf32, #tpu.memory_space<vmem>>, %arg22: memref<128x128xf32, #tpu.memory_space<vmem>>, %arg23: memref<1x128xf32, #tpu.memory_space<vmem>>, %arg24: memref<128x2xf32, #tpu.memory_space<vmem>>, %arg25: memref<1x2xf32, #tpu.memory_space<vmem>>, %arg26: memref<1x1x2xf32, #tpu.memory_space<vmem>>, %arg27: memref<10x10x40xf32, #tpu.memory_space<vmem>>, %arg28: memref<4x4x16xf32, #tpu.memory_space<vmem>>) attributes {dimension_semantics = [#tpu.dimension_semantics<parallel>], iteration_bounds = array<i64: 2>, scalar_prefetch = 0 : i64, scratch_operands = 2 : i64, tpu.core_type = #tpu.core_type<tc>, window_params = [{transform_indices = @transform_0, window_bounds = array<i64: 1, 20, 20, 160>}, {pipeline_mode = #tpu.pipeline_mode<synchronous>, transform_indices = @transform_1, window_bounds = array<i64: 160, 80>}, {pipeline_mode = #tpu.pipeline_mode<synchronous>, transform_indices = @transform_2, window_bounds = array<i64: 1, 80>}, {pipeline_mode = #tpu.pipeline_mode<synchronous>, transform_indices = @transform_3, window_bounds = array<i64: 80, 80>}, {pipeline_mode = #tpu.pipeline_mode<synchronous>, transform_indices = @transform_4, window_bounds = array<i64: 1, 80>}, {pipeline_mode = #tpu.pipeline_mode<synchronous>, transform_indices = @transform_5, window_bounds = array<i64: 10, 20>}, {pipeline_mode = #tpu.pipeline_mode<synchronous>, transform_indices = @transform_6, window_bounds = array<i64: 10, 20>}, {pipeline_mode = #tpu.pipeline_mode<synchronous>, transform_indices = @transform_7, window_bounds = array<i64: 80, 40>}, {pipeline_mode = #tpu.pipeline_mode<synchronous>, transform_indices = @transform_8, window_bounds = array<i64: 80, 40>}, {pipeline_mode = #tpu.pipeline_mode<synchronous>, transform_indices = @transform_9, window_bounds = array<i64: 9, 40, 32>}, {pipeline_mode = #tpu.pipeline_mode<synchronous>, transform_indices = @transform_10, window_bounds = array<i64: 1, 32>}, {pipeline_mode = #tpu.pipeline_mode<synchronous>, transform_indices = @transform_11, window_bounds = array<i64: 4, 8>}, {pipeline_mode = #tpu.pipeline_mode<synchronous>, transform_indices = @transform_12, window_bounds = array<i64: 4, 8>}, {pipeline_mode = #tpu.pipeline_mode<synchronous>, transform_indices = @transform_13, window_bounds = array<i64: 32, 16>}, {pipeline_mode = #tpu.pipeline_mode<synchronous>, transform_indices = @transform_14, window_bounds = array<i64: 32, 16>}, {pipeline_mode = #tpu.pipeline_mode<synchronous>, transform_indices = @transform_15, window_bounds = array<i64: 9, 16, 8>}, {pipeline_mode = #tpu.pipeline_mode<synchronous>, transform_indices = @transform_16, window_bounds = array<i64: 1, 8>}, {pipeline_mode = #tpu.pipeline_mode<synchronous>, transform_indices = @transform_17, window_bounds = array<i64: 8, 4>}, {pipeline_mode = #tpu.pipeline_mode<synchronous>, transform_indices = @transform_18, window_bounds = array<i64: 8, 4>}, {pipeline_mode = #tpu.pipeline_mode<synchronous>, transform_indices = @transform_19, window_bounds = array<i64: 4, 128>}, {pipeline_mode = #tpu.pipeline_mode<synchronous>, transform_indices = @transform_20, window_bounds = array<i64: 1, 128>}, {pipeline_mode = #tpu.pipeline_mode<synchronous>, transform_indices = @transform_21, window_bounds = array<i64: 128, 128>}, {pipeline_mode = #tpu.pipeline_mode<synchronous>, transform_indices = @transform_22, window_bounds = array<i64: 1, 128>}, {pipeline_mode = #tpu.pipeline_mode<synchronous>, transform_indices = @transform_23, window_bounds = array<i64: 128, 2>}, {pipeline_mode = #tpu.pipeline_mode<synchronous>, transform_indices = @transform_24, window_bounds = array<i64: 1, 2>}, {transform_indices = @transform_25, window_bounds = array<i64: 1, 1, 2>}]} {
    %c0 = arith.constant 0 : index
    %c0_0 = arith.constant 0 : index
    %c0_1 = arith.constant 0 : index
    %c0_2 = arith.constant 0 : index
    %0 = vector.load %arg1[%c0, %c0_0, %c0_1, %c0_2] : memref<1x20x20x160xf32, #tpu.memory_space<vmem>>, vector<1x1x20x160xf32>
    %1 = vector.shape_cast %0 : vector<1x1x20x160xf32> to vector<20x160xf32>
    %c0_3 = arith.constant 0 : index
    %c0_4 = arith.constant 0 : index
    %2 = vector.load %arg2[%c0_3, %c0_4] : memref<160x80xf32, #tpu.memory_space<vmem>>, vector<160x80xf32>
    %cst = arith.constant dense<0.000000e+00> : vector<20x80xf32>
    %3 = tpu.matmul %1, %2, %cst {dimension_numbers = #tpu.dot_dimension_numbers<[1], [0], [0], [1], [0, 0, 1, 1], [], []>} : vector<20x160xf32>, vector<160x80xf32>, vector<20x80xf32> -> vector<20x80xf32>
    %c0_5 = arith.constant 0 : index
    %c0_6 = arith.constant 0 : index
    %4 = vector.load %arg3[%c0_5, %c0_6] : memref<1x80xf32, #tpu.memory_space<vmem>>, vector<1x80xf32>
    %5 = vector.broadcast %4 : vector<1x80xf32> to vector<20x80xf32>
    %6 = arith.addf %3, %5 : vector<20x80xf32>
    %cst_7 = arith.constant 0.000000e+00 : f32
    %7 = vector.broadcast %cst_7 : f32 to vector<20x80xf32>
    %8 = arith.maximumf %6, %7 : vector<20x80xf32>
    %c0_8 = arith.constant 0 : index
    %c0_9 = arith.constant 0 : index
    %9 = vector.load %arg4[%c0_8, %c0_9] : memref<80x80xf32, #tpu.memory_space<vmem>>, vector<80x80xf32>
    %cst_10 = arith.constant dense<0.000000e+00> : vector<20x80xf32>
    %10 = tpu.matmul %8, %9, %cst_10 {dimension_numbers = #tpu.dot_dimension_numbers<[1], [0], [0], [1], [0, 0, 1, 1], [], []>} : vector<20x80xf32>, vector<80x80xf32>, vector<20x80xf32> -> vector<20x80xf32>
    %c0_11 = arith.constant 0 : index
    %c0_12 = arith.constant 0 : index
    %11 = vector.load %arg5[%c0_11, %c0_12] : memref<1x80xf32, #tpu.memory_space<vmem>>, vector<1x80xf32>
    %12 = vector.broadcast %11 : vector<1x80xf32> to vector<20x80xf32>
    %13 = arith.addf %10, %12 : vector<20x80xf32>
    %c0_13 = arith.constant 0 : index
    %c1 = arith.constant 1 : index
    %c0_14 = arith.constant 0 : index
    %c0_15 = arith.constant 0 : index
    %14 = vector.load %arg1[%c0_13, %c1, %c0_14, %c0_15] : memref<1x20x20x160xf32, #tpu.memory_space<vmem>>, vector<1x1x20x160xf32>
    %15 = vector.shape_cast %14 : vector<1x1x20x160xf32> to vector<20x160xf32>
    %c0_16 = arith.constant 0 : index
    %c0_17 = arith.constant 0 : index
    %16 = vector.load %arg2[%c0_16, %c0_17] : memref<160x80xf32, #tpu.memory_space<vmem>>, vector<160x80xf32>
    %cst_18 = arith.constant dense<0.000000e+00> : vector<20x80xf32>
    %17 = tpu.matmul %15, %16, %cst_18 {dimension_numbers = #tpu.dot_dimension_numbers<[1], [0], [0], [1], [0, 0, 1, 1], [], []>} : vector<20x160xf32>, vector<160x80xf32>, vector<20x80xf32> -> vector<20x80xf32>
    %c0_19 = arith.constant 0 : index
    %c0_20 = arith.constant 0 : index
    %18 = vector.load %arg3[%c0_19, %c0_20] : memref<1x80xf32, #tpu.memory_space<vmem>>, vector<1x80xf32>
    %19 = vector.broadcast %18 : vector<1x80xf32> to vector<20x80xf32>
    %20 = arith.addf %17, %19 : vector<20x80xf32>
    %cst_21 = arith.constant 0.000000e+00 : f32
    %21 = vector.broadcast %cst_21 : f32 to vector<20x80xf32>
    %22 = arith.maximumf %20, %21 : vector<20x80xf32>
    %c0_22 = arith.constant 0 : index
    %c0_23 = arith.constant 0 : index
    %23 = vector.load %arg4[%c0_22, %c0_23] : memref<80x80xf32, #tpu.memory_space<vmem>>, vector<80x80xf32>
    %cst_24 = arith.constant dense<0.000000e+00> : vector<20x80xf32>
    %24 = tpu.matmul %22, %23, %cst_24 {dimension_numbers = #tpu.dot_dimension_numbers<[1], [0], [0], [1], [0, 0, 1, 1], [], []>} : vector<20x80xf32>, vector<80x80xf32>, vector<20x80xf32> -> vector<20x80xf32>
    %c0_25 = arith.constant 0 : index
    %c0_26 = arith.constant 0 : index
    %25 = vector.load %arg5[%c0_25, %c0_26] : memref<1x80xf32, #tpu.memory_space<vmem>>, vector<1x80xf32>
    %26 = vector.broadcast %25 : vector<1x80xf32> to vector<20x80xf32>
    %27 = arith.addf %24, %26 : vector<20x80xf32>
    %28 = arith.maximumf %13, %27 : vector<20x80xf32>
    %c0_27 = arith.constant 0 : index
    %c0_28 = arith.constant 0 : index
    %29 = vector.load %arg6[%c0_27, %c0_28] : memref<10x20xf32, #tpu.memory_space<vmem>>, vector<10x20xf32>
    %cst_29 = arith.constant dense<0.000000e+00> : vector<10x80xf32>
    %30 = tpu.matmul %29, %28, %cst_29 {dimension_numbers = #tpu.dot_dimension_numbers<[1], [0], [0], [1], [0, 0, 1, 1], [], []>} : vector<10x20xf32>, vector<20x80xf32>, vector<10x80xf32> -> vector<10x80xf32>
    %c0_30 = arith.constant 0 : index
    %c0_31 = arith.constant 0 : index
    %31 = vector.load %arg7[%c0_30, %c0_31] : memref<10x20xf32, #tpu.memory_space<vmem>>, vector<10x20xf32>
    %cst_32 = arith.constant dense<0.000000e+00> : vector<10x80xf32>
    %32 = tpu.matmul %31, %28, %cst_32 {dimension_numbers = #tpu.dot_dimension_numbers<[1], [0], [0], [1], [0, 0, 1, 1], [], []>} : vector<10x20xf32>, vector<20x80xf32>, vector<10x80xf32> -> vector<10x80xf32>
    %33 = arith.maximumf %30, %32 : vector<10x80xf32>
    %c0_33 = arith.constant 0 : index
    %c0_34 = arith.constant 0 : index
    %34 = vector.load %arg8[%c0_33, %c0_34] : memref<80x40xf32, #tpu.memory_space<vmem>>, vector<80x40xf32>
    %cst_35 = arith.constant dense<0.000000e+00> : vector<10x40xf32>
    %35 = tpu.matmul %33, %34, %cst_35 {dimension_numbers = #tpu.dot_dimension_numbers<[1], [0], [0], [1], [0, 0, 1, 1], [], []>} : vector<10x80xf32>, vector<80x40xf32>, vector<10x40xf32> -> vector<10x40xf32>
    %c0_36 = arith.constant 0 : index
    %c0_37 = arith.constant 0 : index
    %36 = vector.load %arg9[%c0_36, %c0_37] : memref<80x40xf32, #tpu.memory_space<vmem>>, vector<80x40xf32>
    %cst_38 = arith.constant dense<0.000000e+00> : vector<10x40xf32>
    %37 = tpu.matmul %33, %36, %cst_38 {dimension_numbers = #tpu.dot_dimension_numbers<[1], [0], [0], [1], [0, 0, 1, 1], [], []>} : vector<10x80xf32>, vector<80x40xf32>, vector<10x40xf32> -> vector<10x40xf32>
    %38 = arith.maximumf %35, %37 : vector<10x40xf32>
    %cst_39 = arith.constant 0.000000e+00 : f32
    %39 = vector.broadcast %cst_39 : f32 to vector<10x40xf32>
    %40 = arith.maximumf %38, %39 : vector<10x40xf32>
    %c0_40 = arith.constant 0 : index
    %c0_41 = arith.constant 0 : index
    %c0_42 = arith.constant 0 : index
    %41 = vector.load %arg27[%c0_40, %c0_41, %c0_42] : memref<10x10x40xf32, #tpu.memory_space<vmem>>, vector<1x10x40xf32>
    %42 = vector.shape_cast %41 : vector<1x10x40xf32> to vector<10x40xf32>
    %43 = vector.shape_cast %40 : vector<10x40xf32> to vector<1x10x40xf32>
    tpu.vector_store %arg27[%c0_40, %c0_41, %c0_42], %43 {strides = array<i32>} : memref<10x10x40xf32, #tpu.memory_space<vmem>>, vector<1x10x40xf32>,
    %c0_43 = arith.constant 0 : index
    %c2 = arith.constant 2 : index
    %c0_44 = arith.constant 0 : index
    %c0_45 = arith.constant 0 : index
    %44 = vector.load %arg1[%c0_43, %c2, %c0_44, %c0_45] : memref<1x20x20x160xf32, #tpu.memory_space<vmem>>, vector<1x1x20x160xf32>
    %45 = vector.shape_cast %44 : vector<1x1x20x160xf32> to vector<20x160xf32>
    %c0_46 = arith.constant 0 : index
    %c0_47 = arith.constant 0 : index
    %46 = vector.load %arg2[%c0_46, %c0_47] : memref<160x80xf32, #tpu.memory_space<vmem>>, vector<160x80xf32>
    %cst_48 = arith.constant dense<0.000000e+00> : vector<20x80xf32>
    %47 = tpu.matmul %45, %46, %cst_48 {dimension_numbers = #tpu.dot_dimension_numbers<[1], [0], [0], [1], [0, 0, 1, 1], [], []>} : vector<20x160xf32>, vector<160x80xf32>, vector<20x80xf32> -> vector<20x80xf32>
    %c0_49 = arith.constant 0 : index
    %c0_50 = arith.constant 0 : index
    %48 = vector.load %arg3[%c0_49, %c0_50] : memref<1x80xf32, #tpu.memory_space<vmem>>, vector<1x80xf32>
    %49 = vector.broadcast %48 : vector<1x80xf32> to vector<20x80xf32>
    %50 = arith.addf %47, %49 : vector<20x80xf32>
    %cst_51 = arith.constant 0.000000e+00 : f32
    %51 = vector.broadcast %cst_51 : f32 to vector<20x80xf32>
    %52 = arith.maximumf %50, %51 : vector<20x80xf32>
    %c0_52 = arith.constant 0 : index
    %c0_53 = arith.constant 0 : index
    %53 = vector.load %arg4[%c0_52, %c0_53] : memref<80x80xf32, #tpu.memory_space<vmem>>, vector<80x80xf32>
    %cst_54 = arith.constant dense<0.000000e+00> : vector<20x80xf32>
    %54 = tpu.matmul %52, %53, %cst_54 {dimension_numbers = #tpu.dot_dimension_numbers<[1], [0], [0], [1], [0, 0, 1, 1], [], []>} : vector<20x80xf32>, vector<80x80xf32>, vector<20x80xf32> -> vector<20x80xf32>
    %c0_55 = arith.constant 0 : index
    %c0_56 = arith.constant 0 : index
    %55 = vector.load %arg5[%c0_55, %c0_56] : memref<1x80xf32, #tpu.memory_space<vmem>>, vector<1x80xf32>
    %56 = vector.broadcast %55 : vector<1x80xf32> to vector<20x80xf32>
    %57 = arith.addf %54, %56 : vector<20x80xf32>
    %c0_57 = arith.constant 0 : index
    %c3 = arith.constant 3 : index
    %c0_58 = arith.constant 0 : index
    %c0_59 = arith.constant 0 : index
    %58 = vector.load %arg1[%c0_57, %c3, %c0_58, %c0_59] : memref<1x20x20x160xf32, #tpu.memory_space<vmem>>, vector<1x1x20x160xf32>
    %59 = vector.shape_cast %58 : vector<1x1x20x160xf32> to vector<20x160xf32>
    %c0_60 = arith.constant 0 : index
    %c0_61 = arith.constant 0 : index
    %60 = vector.load %arg2[%c0_60, %c0_61] : memref<160x80xf32, #tpu.memory_space<vmem>>, vector<160x80xf32>
    %cst_62 = arith.constant dense<0.000000e+00> : vector<20x80xf32>
    %61 = tpu.matmul %59, %60, %cst_62 {dimension_numbers = #tpu.dot_dimension_numbers<[1], [0], [0], [1], [0, 0, 1, 1], [], []>} : vector<20x160xf32>, vector<160x80xf32>, vector<20x80xf32> -> vector<20x80xf32>
    %c0_63 = arith.constant 0 : index
    %c0_64 = arith.constant 0 : index
    %62 = vector.load %arg3[%c0_63, %c0_64] : memref<1x80xf32, #tpu.memory_space<vmem>>, vector<1x80xf32>
    %63 = vector.broadcast %62 : vector<1x80xf32> to vector<20x80xf32>
    %64 = arith.addf %61, %63 : vector<20x80xf32>
    %cst_65 = arith.constant 0.000000e+00 : f32
    %65 = vector.broadcast %cst_65 : f32 to vector<20x80xf32>
    %66 = arith.maximumf %64, %65 : vector<20x80xf32>
    %c0_66 = arith.constant 0 : index
    %c0_67 = arith.constant 0 : index
    %67 = vector.load %arg4[%c0_66, %c0_67] : memref<80x80xf32, #tpu.memory_space<vmem>>, vector<80x80xf32>
    %cst_68 = arith.constant dense<0.000000e+00> : vector<20x80xf32>
    %68 = tpu.matmul %66, %67, %cst_68 {dimension_numbers = #tpu.dot_dimension_numbers<[1], [0], [0], [1], [0, 0, 1, 1], [], []>} : vector<20x80xf32>, vector<80x80xf32>, vector<20x80xf32> -> vector<20x80xf32>
    %c0_69 = arith.constant 0 : index
    %c0_70 = arith.constant 0 : index
    %69 = vector.load %arg5[%c0_69, %c0_70] : memref<1x80xf32, #tpu.memory_space<vmem>>, vector<1x80xf32>
    %70 = vector.broadcast %69 : vector<1x80xf32> to vector<20x80xf32>
    %71 = arith.addf %68, %70 : vector<20x80xf32>
    %72 = arith.maximumf %57, %71 : vector<20x80xf32>
    %c0_71 = arith.constant 0 : index
    %c0_72 = arith.constant 0 : index
    %73 = vector.load %arg6[%c0_71, %c0_72] : memref<10x20xf32, #tpu.memory_space<vmem>>, vector<10x20xf32>
    %cst_73 = arith.constant dense<0.000000e+00> : vector<10x80xf32>
    %74 = tpu.matmul %73, %72, %cst_73 {dimension_numbers = #tpu.dot_dimension_numbers<[1], [0], [0], [1], [0, 0, 1, 1], [], []>} : vector<10x20xf32>, vector<20x80xf32>, vector<10x80xf32> -> vector<10x80xf32>
    %c0_74 = arith.constant 0 : index
    %c0_75 = arith.constant 0 : index
    %75 = vector.load %arg7[%c0_74, %c0_75] : memref<10x20xf32, #tpu.memory_space<vmem>>, vector<10x20xf32>
    %cst_76 = arith.constant dense<0.000000e+00> : vector<10x80xf32>
    %76 = tpu.matmul %75, %72, %cst_76 {dimension_numbers = #tpu.dot_dimension_numbers<[1], [0], [0], [1], [0, 0, 1, 1], [], []>} : vector<10x20xf32>, vector<20x80xf32>, vector<10x80xf32> -> vector<10x80xf32>
    %77 = arith.maximumf %74, %76 : vector<10x80xf32>
    %c0_77 = arith.constant 0 : index
    %c0_78 = arith.constant 0 : index
    %78 = vector.load %arg8[%c0_77, %c0_78] : memref<80x40xf32, #tpu.memory_space<vmem>>, vector<80x40xf32>
    %cst_79 = arith.constant dense<0.000000e+00> : vector<10x40xf32>
    %79 = tpu.matmul %77, %78, %cst_79 {dimension_numbers = #tpu.dot_dimension_numbers<[1], [0], [0], [1], [0, 0, 1, 1], [], []>} : vector<10x80xf32>, vector<80x40xf32>, vector<10x40xf32> -> vector<10x40xf32>
    %c0_80 = arith.constant 0 : index
    %c0_81 = arith.constant 0 : index
    %80 = vector.load %arg9[%c0_80, %c0_81] : memref<80x40xf32, #tpu.memory_space<vmem>>, vector<80x40xf32>
    %cst_82 = arith.constant dense<0.000000e+00> : vector<10x40xf32>
    %81 = tpu.matmul %77, %80, %cst_82 {dimension_numbers = #tpu.dot_dimension_numbers<[1], [0], [0], [1], [0, 0, 1, 1], [], []>} : vector<10x80xf32>, vector<80x40xf32>, vector<10x40xf32> -> vector<10x40xf32>
    %82 = arith.maximumf %79, %81 : vector<10x40xf32>
    %cst_83 = arith.constant 0.000000e+00 : f32
    %83 = vector.broadcast %cst_83 : f32 to vector<10x40xf32>
    %84 = arith.maximumf %82, %83 : vector<10x40xf32>
    %c1_84 = arith.constant 1 : index
    %c0_85 = arith.constant 0 : index
    %c0_86 = arith.constant 0 : index
    %85 = vector.load %arg27[%c1_84, %c0_85, %c0_86] : memref<10x10x40xf32, #tpu.memory_space<vmem>>, vector<1x10x40xf32>
    %86 = vector.shape_cast %85 : vector<1x10x40xf32> to vector<10x40xf32>
    %87 = vector.shape_cast %84 : vector<10x40xf32> to vector<1x10x40xf32>
    tpu.vector_store %arg27[%c1_84, %c0_85, %c0_86], %87 {strides = array<i32>} : memref<10x10x40xf32, #tpu.memory_space<vmem>>, vector<1x10x40xf32>,
    %c0_87 = arith.constant 0 : index
    %c4 = arith.constant 4 : index
    %c0_88 = arith.constant 0 : index
    %c0_89 = arith.constant 0 : index
    %88 = vector.load %arg1[%c0_87, %c4, %c0_88, %c0_89] : memref<1x20x20x160xf32, #tpu.memory_space<vmem>>, vector<1x1x20x160xf32>
    %89 = vector.shape_cast %88 : vector<1x1x20x160xf32> to vector<20x160xf32>
    %c0_90 = arith.constant 0 : index
    %c0_91 = arith.constant 0 : index
    %90 = vector.load %arg2[%c0_90, %c0_91] : memref<160x80xf32, #tpu.memory_space<vmem>>, vector<160x80xf32>
    %cst_92 = arith.constant dense<0.000000e+00> : vector<20x80xf32>
    %91 = tpu.matmul %89, %90, %cst_92 {dimension_numbers = #tpu.dot_dimension_numbers<[1], [0], [0], [1], [0, 0, 1, 1], [], []>} : vector<20x160xf32>, vector<160x80xf32>, vector<20x80xf32> -> vector<20x80xf32>
    %c0_93 = arith.constant 0 : index
    %c0_94 = arith.constant 0 : index
    %92 = vector.load %arg3[%c0_93, %c0_94] : memref<1x80xf32, #tpu.memory_space<vmem>>, vector<1x80xf32>
    %93 = vector.broadcast %92 : vector<1x80xf32> to vector<20x80xf32>
    %94 = arith.addf %91, %93 : vector<20x80xf32>
    %cst_95 = arith.constant 0.000000e+00 : f32
    %95 = vector.broadcast %cst_95 : f32 to vector<20x80xf32>
    %96 = arith.maximumf %94, %95 : vector<20x80xf32>
    %c0_96 = arith.constant 0 : index
    %c0_97 = arith.constant 0 : index
    %97 = vector.load %arg4[%c0_96, %c0_97] : memref<80x80xf32, #tpu.memory_space<vmem>>, vector<80x80xf32>
    %cst_98 = arith.constant dense<0.000000e+00> : vector<20x80xf32>
    %98 = tpu.matmul %96, %97, %cst_98 {dimension_numbers = #tpu.dot_dimension_numbers<[1], [0], [0], [1], [0, 0, 1, 1], [], []>} : vector<20x80xf32>, vector<80x80xf32>, vector<20x80xf32> -> vector<20x80xf32>
    %c0_99 = arith.constant 0 : index
    %c0_100 = arith.constant 0 : index
    %99 = vector.load %arg5[%c0_99, %c0_100] : memref<1x80xf32, #tpu.memory_space<vmem>>, vector<1x80xf32>
    %100 = vector.broadcast %99 : vector<1x80xf32> to vector<20x80xf32>
    %101 = arith.addf %98, %100 : vector<20x80xf32>
    %c0_101 = arith.constant 0 : index
    %c5 = arith.constant 5 : index
    %c0_102 = arith.constant 0 : index
    %c0_103 = arith.constant 0 : index
    %102 = vector.load %arg1[%c0_101, %c5, %c0_102, %c0_103] : memref<1x20x20x160xf32, #tpu.memory_space<vmem>>, vector<1x1x20x160xf32>
    %103 = vector.shape_cast %102 : vector<1x1x20x160xf32> to vector<20x160xf32>
    %c0_104 = arith.constant 0 : index
    %c0_105 = arith.constant 0 : index
    %104 = vector.load %arg2[%c0_104, %c0_105] : memref<160x80xf32, #tpu.memory_space<vmem>>, vector<160x80xf32>
    %cst_106 = arith.constant dense<0.000000e+00> : vector<20x80xf32>
    %105 = tpu.matmul %103, %104, %cst_106 {dimension_numbers = #tpu.dot_dimension_numbers<[1], [0], [0], [1], [0, 0, 1, 1], [], []>} : vector<20x160xf32>, vector<160x80xf32>, vector<20x80xf32> -> vector<20x80xf32>
    %c0_107 = arith.constant 0 : index
    %c0_108 = arith.constant 0 : index
    %106 = vector.load %arg3[%c0_107, %c0_108] : memref<1x80xf32, #tpu.memory_space<vmem>>, vector<1x80xf32>
    %107 = vector.broadcast %106 : vector<1x80xf32> to vector<20x80xf32>
    %108 = arith.addf %105, %107 : vector<20x80xf32>
    %cst_109 = arith.constant 0.000000e+00 : f32
    %109 = vector.broadcast %cst_109 : f32 to vector<20x80xf32>
    %110 = arith.maximumf %108, %109 : vector<20x80xf32>
    %c0_110 = arith.constant 0 : index
    %c0_111 = arith.constant 0 : index
    %111 = vector.load %arg4[%c0_110, %c0_111] : memref<80x80xf32, #tpu.memory_space<vmem>>, vector<80x80xf32>
    %cst_112 = arith.constant dense<0.000000e+00> : vector<20x80xf32>
    %112 = tpu.matmul %110, %111, %cst_112 {dimension_numbers = #tpu.dot_dimension_numbers<[1], [0], [0], [1], [0, 0, 1, 1], [], []>} : vector<20x80xf32>, vector<80x80xf32>, vector<20x80xf32> -> vector<20x80xf32>
    %c0_113 = arith.constant 0 : index
    %c0_114 = arith.constant 0 : index
    %113 = vector.load %arg5[%c0_113, %c0_114] : memref<1x80xf32, #tpu.memory_space<vmem>>, vector<1x80xf32>
    %114 = vector.broadcast %113 : vector<1x80xf32> to vector<20x80xf32>
    %115 = arith.addf %112, %114 : vector<20x80xf32>
    %116 = arith.maximumf %101, %115 : vector<20x80xf32>
    %c0_115 = arith.constant 0 : index
    %c0_116 = arith.constant 0 : index
    %117 = vector.load %arg6[%c0_115, %c0_116] : memref<10x20xf32, #tpu.memory_space<vmem>>, vector<10x20xf32>
    %cst_117 = arith.constant dense<0.000000e+00> : vector<10x80xf32>
    %118 = tpu.matmul %117, %116, %cst_117 {dimension_numbers = #tpu.dot_dimension_numbers<[1], [0], [0], [1], [0, 0, 1, 1], [], []>} : vector<10x20xf32>, vector<20x80xf32>, vector<10x80xf32> -> vector<10x80xf32>
    %c0_118 = arith.constant 0 : index
    %c0_119 = arith.constant 0 : index
    %119 = vector.load %arg7[%c0_118, %c0_119] : memref<10x20xf32, #tpu.memory_space<vmem>>, vector<10x20xf32>
    %cst_120 = arith.constant dense<0.000000e+00> : vector<10x80xf32>
    %120 = tpu.matmul %119, %116, %cst_120 {dimension_numbers = #tpu.dot_dimension_numbers<[1], [0], [0], [1], [0, 0, 1, 1], [], []>} : vector<10x20xf32>, vector<20x80xf32>, vector<10x80xf32> -> vector<10x80xf32>
    %121 = arith.maximumf %118, %120 : vector<10x80xf32>
    %c0_121 = arith.constant 0 : index
    %c0_122 = arith.constant 0 : index
    %122 = vector.load %arg8[%c0_121, %c0_122] : memref<80x40xf32, #tpu.memory_space<vmem>>, vector<80x40xf32>
    %cst_123 = arith.constant dense<0.000000e+00> : vector<10x40xf32>
    %123 = tpu.matmul %121, %122, %cst_123 {dimension_numbers = #tpu.dot_dimension_numbers<[1], [0], [0], [1], [0, 0, 1, 1], [], []>} : vector<10x80xf32>, vector<80x40xf32>, vector<10x40xf32> -> vector<10x40xf32>
    %c0_124 = arith.constant 0 : index
    %c0_125 = arith.constant 0 : index
    %124 = vector.load %arg9[%c0_124, %c0_125] : memref<80x40xf32, #tpu.memory_space<vmem>>, vector<80x40xf32>
    %cst_126 = arith.constant dense<0.000000e+00> : vector<10x40xf32>
    %125 = tpu.matmul %121, %124, %cst_126 {dimension_numbers = #tpu.dot_dimension_numbers<[1], [0], [0], [1], [0, 0, 1, 1], [], []>} : vector<10x80xf32>, vector<80x40xf32>, vector<10x40xf32> -> vector<10x40xf32>
    %126 = arith.maximumf %123, %125 : vector<10x40xf32>
    %cst_127 = arith.constant 0.000000e+00 : f32
    %127 = vector.broadcast %cst_127 : f32 to vector<10x40xf32>
    %128 = arith.maximumf %126, %127 : vector<10x40xf32>
    %c2_128 = arith.constant 2 : index
    %c0_129 = arith.constant 0 : index
    %c0_130 = arith.constant 0 : index
    %129 = vector.load %arg27[%c2_128, %c0_129, %c0_130] : memref<10x10x40xf32, #tpu.memory_space<vmem>>, vector<1x10x40xf32>
    %130 = vector.shape_cast %129 : vector<1x10x40xf32> to vector<10x40xf32>
    %131 = vector.shape_cast %128 : vector<10x40xf32> to vector<1x10x40xf32>
    tpu.vector_store %arg27[%c2_128, %c0_129, %c0_130], %131 {strides = array<i32>} : memref<10x10x40xf32, #tpu.memory_space<vmem>>, vector<1x10x40xf32>,
    %c0_131 = arith.constant 0 : index
    %c6 = arith.constant 6 : index
    %c0_132 = arith.constant 0 : index
    %c0_133 = arith.constant 0 : index
    %132 = vector.load %arg1[%c0_131, %c6, %c0_132, %c0_133] : memref<1x20x20x160xf32, #tpu.memory_space<vmem>>, vector<1x1x20x160xf32>
    %133 = vector.shape_cast %132 : vector<1x1x20x160xf32> to vector<20x160xf32>
    %c0_134 = arith.constant 0 : index
    %c0_135 = arith.constant 0 : index
    %134 = vector.load %arg2[%c0_134, %c0_135] : memref<160x80xf32, #tpu.memory_space<vmem>>, vector<160x80xf32>
    %cst_136 = arith.constant dense<0.000000e+00> : vector<20x80xf32>
    %135 = tpu.matmul %133, %134, %cst_136 {dimension_numbers = #tpu.dot_dimension_numbers<[1], [0], [0], [1], [0, 0, 1, 1], [], []>} : vector<20x160xf32>, vector<160x80xf32>, vector<20x80xf32> -> vector<20x80xf32>
    %c0_137 = arith.constant 0 : index
    %c0_138 = arith.constant 0 : index
    %136 = vector.load %arg3[%c0_137, %c0_138] : memref<1x80xf32, #tpu.memory_space<vmem>>, vector<1x80xf32>
    %137 = vector.broadcast %136 : vector<1x80xf32> to vector<20x80xf32>
    %138 = arith.addf %135, %137 : vector<20x80xf32>
    %cst_139 = arith.constant 0.000000e+00 : f32
    %139 = vector.broadcast %cst_139 : f32 to vector<20x80xf32>
    %140 = arith.maximumf %138, %139 : vector<20x80xf32>
    %c0_140 = arith.constant 0 : index
    %c0_141 = arith.constant 0 : index
    %141 = vector.load %arg4[%c0_140, %c0_141] : memref<80x80xf32, #tpu.memory_space<vmem>>, vector<80x80xf32>
    %cst_142 = arith.constant dense<0.000000e+00> : vector<20x80xf32>
    %142 = tpu.matmul %140, %141, %cst_142 {dimension_numbers = #tpu.dot_dimension_numbers<[1], [0], [0], [1], [0, 0, 1, 1], [], []>} : vector<20x80xf32>, vector<80x80xf32>, vector<20x80xf32> -> vector<20x80xf32>
    %c0_143 = arith.constant 0 : index
    %c0_144 = arith.constant 0 : index
    %143 = vector.load %arg5[%c0_143, %c0_144] : memref<1x80xf32, #tpu.memory_space<vmem>>, vector<1x80xf32>
    %144 = vector.broadcast %143 : vector<1x80xf32> to vector<20x80xf32>
    %145 = arith.addf %142, %144 : vector<20x80xf32>
    %c0_145 = arith.constant 0 : index
    %c7 = arith.constant 7 : index
    %c0_146 = arith.constant 0 : index
    %c0_147 = arith.constant 0 : index
    %146 = vector.load %arg1[%c0_145, %c7, %c0_146, %c0_147] : memref<1x20x20x160xf32, #tpu.memory_space<vmem>>, vector<1x1x20x160xf32>
    %147 = vector.shape_cast %146 : vector<1x1x20x160xf32> to vector<20x160xf32>
    %c0_148 = arith.constant 0 : index
    %c0_149 = arith.constant 0 : index
    %148 = vector.load %arg2[%c0_148, %c0_149] : memref<160x80xf32, #tpu.memory_space<vmem>>, vector<160x80xf32>
    %cst_150 = arith.constant dense<0.000000e+00> : vector<20x80xf32>
    %149 = tpu.matmul %147, %148, %cst_150 {dimension_numbers = #tpu.dot_dimension_numbers<[1], [0], [0], [1], [0, 0, 1, 1], [], []>} : vector<20x160xf32>, vector<160x80xf32>, vector<20x80xf32> -> vector<20x80xf32>
    %c0_151 = arith.constant 0 : index
    %c0_152 = arith.constant 0 : index
    %150 = vector.load %arg3[%c0_151, %c0_152] : memref<1x80xf32, #tpu.memory_space<vmem>>, vector<1x80xf32>
    %151 = vector.broadcast %150 : vector<1x80xf32> to vector<20x80xf32>
    %152 = arith.addf %149, %151 : vector<20x80xf32>
    %cst_153 = arith.constant 0.000000e+00 : f32
    %153 = vector.broadcast %cst_153 : f32 to vector<20x80xf32>
    %154 = arith.maximumf %152, %153 : vector<20x80xf32>
    %c0_154 = arith.constant 0 : index
    %c0_155 = arith.constant 0 : index
    %155 = vector.load %arg4[%c0_154, %c0_155] : memref<80x80xf32, #tpu.memory_space<vmem>>, vector<80x80xf32>
    %cst_156 = arith.constant dense<0.000000e+00> : vector<20x80xf32>
    %156 = tpu.matmul %154, %155, %cst_156 {dimension_numbers = #tpu.dot_dimension_numbers<[1], [0], [0], [1], [0, 0, 1, 1], [], []>} : vector<20x80xf32>, vector<80x80xf32>, vector<20x80xf32> -> vector<20x80xf32>
    %c0_157 = arith.constant 0 : index
    %c0_158 = arith.constant 0 : index
    %157 = vector.load %arg5[%c0_157, %c0_158] : memref<1x80xf32, #tpu.memory_space<vmem>>, vector<1x80xf32>
    %158 = vector.broadcast %157 : vector<1x80xf32> to vector<20x80xf32>
    %159 = arith.addf %156, %158 : vector<20x80xf32>
    %160 = arith.maximumf %145, %159 : vector<20x80xf32>
    %c0_159 = arith.constant 0 : index
    %c0_160 = arith.constant 0 : index
    %161 = vector.load %arg6[%c0_159, %c0_160] : memref<10x20xf32, #tpu.memory_space<vmem>>, vector<10x20xf32>
    %cst_161 = arith.constant dense<0.000000e+00> : vector<10x80xf32>
    %162 = tpu.matmul %161, %160, %cst_161 {dimension_numbers = #tpu.dot_dimension_numbers<[1], [0], [0], [1], [0, 0, 1, 1], [], []>} : vector<10x20xf32>, vector<20x80xf32>, vector<10x80xf32> -> vector<10x80xf32>
    %c0_162 = arith.constant 0 : index
    %c0_163 = arith.constant 0 : index
    %163 = vector.load %arg7[%c0_162, %c0_163] : memref<10x20xf32, #tpu.memory_space<vmem>>, vector<10x20xf32>
    %cst_164 = arith.constant dense<0.000000e+00> : vector<10x80xf32>
    %164 = tpu.matmul %163, %160, %cst_164 {dimension_numbers = #tpu.dot_dimension_numbers<[1], [0], [0], [1], [0, 0, 1, 1], [], []>} : vector<10x20xf32>, vector<20x80xf32>, vector<10x80xf32> -> vector<10x80xf32>
    %165 = arith.maximumf %162, %164 : vector<10x80xf32>
    %c0_165 = arith.constant 0 : index
    %c0_166 = arith.constant 0 : index
    %166 = vector.load %arg8[%c0_165, %c0_166] : memref<80x40xf32, #tpu.memory_space<vmem>>, vector<80x40xf32>
    %cst_167 = arith.constant dense<0.000000e+00> : vector<10x40xf32>
    %167 = tpu.matmul %165, %166, %cst_167 {dimension_numbers = #tpu.dot_dimension_numbers<[1], [0], [0], [1], [0, 0, 1, 1], [], []>} : vector<10x80xf32>, vector<80x40xf32>, vector<10x40xf32> -> vector<10x40xf32>
    %c0_168 = arith.constant 0 : index
    %c0_169 = arith.constant 0 : index
    %168 = vector.load %arg9[%c0_168, %c0_169] : memref<80x40xf32, #tpu.memory_space<vmem>>, vector<80x40xf32>
    %cst_170 = arith.constant dense<0.000000e+00> : vector<10x40xf32>
    %169 = tpu.matmul %165, %168, %cst_170 {dimension_numbers = #tpu.dot_dimension_numbers<[1], [0], [0], [1], [0, 0, 1, 1], [], []>} : vector<10x80xf32>, vector<80x40xf32>, vector<10x40xf32> -> vector<10x40xf32>
    %170 = arith.maximumf %167, %169 : vector<10x40xf32>
    %cst_171 = arith.constant 0.000000e+00 : f32
    %171 = vector.broadcast %cst_171 : f32 to vector<10x40xf32>
    %172 = arith.maximumf %170, %171 : vector<10x40xf32>
    %c3_172 = arith.constant 3 : index
    %c0_173 = arith.constant 0 : index
    %c0_174 = arith.constant 0 : index
    %173 = vector.load %arg27[%c3_172, %c0_173, %c0_174] : memref<10x10x40xf32, #tpu.memory_space<vmem>>, vector<1x10x40xf32>
    %174 = vector.shape_cast %173 : vector<1x10x40xf32> to vector<10x40xf32>
    %175 = vector.shape_cast %172 : vector<10x40xf32> to vector<1x10x40xf32>
    tpu.vector_store %arg27[%c3_172, %c0_173, %c0_174], %175 {strides = array<i32>} : memref<10x10x40xf32, #tpu.memory_space<vmem>>, vector<1x10x40xf32>,
    %c0_175 = arith.constant 0 : index
    %c8 = arith.constant 8 : index
    %c0_176 = arith.constant 0 : index
    %c0_177 = arith.constant 0 : index
    %176 = vector.load %arg1[%c0_175, %c8, %c0_176, %c0_177] : memref<1x20x20x160xf32, #tpu.memory_space<vmem>>, vector<1x1x20x160xf32>
    %177 = vector.shape_cast %176 : vector<1x1x20x160xf32> to vector<20x160xf32>
    %c0_178 = arith.constant 0 : index
    %c0_179 = arith.constant 0 : index
    %178 = vector.load %arg2[%c0_178, %c0_179] : memref<160x80xf32, #tpu.memory_space<vmem>>, vector<160x80xf32>
    %cst_180 = arith.constant dense<0.000000e+00> : vector<20x80xf32>
    %179 = tpu.matmul %177, %178, %cst_180 {dimension_numbers = #tpu.dot_dimension_numbers<[1], [0], [0], [1], [0, 0, 1, 1], [], []>} : vector<20x160xf32>, vector<160x80xf32>, vector<20x80xf32> -> vector<20x80xf32>
    %c0_181 = arith.constant 0 : index
    %c0_182 = arith.constant 0 : index
    %180 = vector.load %arg3[%c0_181, %c0_182] : memref<1x80xf32, #tpu.memory_space<vmem>>, vector<1x80xf32>
    %181 = vector.broadcast %180 : vector<1x80xf32> to vector<20x80xf32>
    %182 = arith.addf %179, %181 : vector<20x80xf32>
    %cst_183 = arith.constant 0.000000e+00 : f32
    %183 = vector.broadcast %cst_183 : f32 to vector<20x80xf32>
    %184 = arith.maximumf %182, %183 : vector<20x80xf32>
    %c0_184 = arith.constant 0 : index
    %c0_185 = arith.constant 0 : index
    %185 = vector.load %arg4[%c0_184, %c0_185] : memref<80x80xf32, #tpu.memory_space<vmem>>, vector<80x80xf32>
    %cst_186 = arith.constant dense<0.000000e+00> : vector<20x80xf32>
    %186 = tpu.matmul %184, %185, %cst_186 {dimension_numbers = #tpu.dot_dimension_numbers<[1], [0], [0], [1], [0, 0, 1, 1], [], []>} : vector<20x80xf32>, vector<80x80xf32>, vector<20x80xf32> -> vector<20x80xf32>
    %c0_187 = arith.constant 0 : index
    %c0_188 = arith.constant 0 : index
    %187 = vector.load %arg5[%c0_187, %c0_188] : memref<1x80xf32, #tpu.memory_space<vmem>>, vector<1x80xf32>
    %188 = vector.broadcast %187 : vector<1x80xf32> to vector<20x80xf32>
    %189 = arith.addf %186, %188 : vector<20x80xf32>
    %c0_189 = arith.constant 0 : index
    %c9 = arith.constant 9 : index
    %c0_190 = arith.constant 0 : index
    %c0_191 = arith.constant 0 : index
    %190 = vector.load %arg1[%c0_189, %c9, %c0_190, %c0_191] : memref<1x20x20x160xf32, #tpu.memory_space<vmem>>, vector<1x1x20x160xf32>
    %191 = vector.shape_cast %190 : vector<1x1x20x160xf32> to vector<20x160xf32>
    %c0_192 = arith.constant 0 : index
    %c0_193 = arith.constant 0 : index
    %192 = vector.load %arg2[%c0_192, %c0_193] : memref<160x80xf32, #tpu.memory_space<vmem>>, vector<160x80xf32>
    %cst_194 = arith.constant dense<0.000000e+00> : vector<20x80xf32>
    %193 = tpu.matmul %191, %192, %cst_194 {dimension_numbers = #tpu.dot_dimension_numbers<[1], [0], [0], [1], [0, 0, 1, 1], [], []>} : vector<20x160xf32>, vector<160x80xf32>, vector<20x80xf32> -> vector<20x80xf32>
    %c0_195 = arith.constant 0 : index
    %c0_196 = arith.constant 0 : index
    %194 = vector.load %arg3[%c0_195, %c0_196] : memref<1x80xf32, #tpu.memory_space<vmem>>, vector<1x80xf32>
    %195 = vector.broadcast %194 : vector<1x80xf32> to vector<20x80xf32>
    %196 = arith.addf %193, %195 : vector<20x80xf32>
    %cst_197 = arith.constant 0.000000e+00 : f32
    %197 = vector.broadcast %cst_197 : f32 to vector<20x80xf32>
    %198 = arith.maximumf %196, %197 : vector<20x80xf32>
    %c0_198 = arith.constant 0 : index
    %c0_199 = arith.constant 0 : index
    %199 = vector.load %arg4[%c0_198, %c0_199] : memref<80x80xf32, #tpu.memory_space<vmem>>, vector<80x80xf32>
    %cst_200 = arith.constant dense<0.000000e+00> : vector<20x80xf32>
    %200 = tpu.matmul %198, %199, %cst_200 {dimension_numbers = #tpu.dot_dimension_numbers<[1], [0], [0], [1], [0, 0, 1, 1], [], []>} : vector<20x80xf32>, vector<80x80xf32>, vector<20x80xf32> -> vector<20x80xf32>
    %c0_201 = arith.constant 0 : index
    %c0_202 = arith.constant 0 : index
    %201 = vector.load %arg5[%c0_201, %c0_202] : memref<1x80xf32, #tpu.memory_space<vmem>>, vector<1x80xf32>
    %202 = vector.broadcast %201 : vector<1x80xf32> to vector<20x80xf32>
    %203 = arith.addf %200, %202 : vector<20x80xf32>
    %204 = arith.maximumf %189, %203 : vector<20x80xf32>
    %c0_203 = arith.constant 0 : index
    %c0_204 = arith.constant 0 : index
    %205 = vector.load %arg6[%c0_203, %c0_204] : memref<10x20xf32, #tpu.memory_space<vmem>>, vector<10x20xf32>
    %cst_205 = arith.constant dense<0.000000e+00> : vector<10x80xf32>
    %206 = tpu.matmul %205, %204, %cst_205 {dimension_numbers = #tpu.dot_dimension_numbers<[1], [0], [0], [1], [0, 0, 1, 1], [], []>} : vector<10x20xf32>, vector<20x80xf32>, vector<10x80xf32> -> vector<10x80xf32>
    %c0_206 = arith.constant 0 : index
    %c0_207 = arith.constant 0 : index
    %207 = vector.load %arg7[%c0_206, %c0_207] : memref<10x20xf32, #tpu.memory_space<vmem>>, vector<10x20xf32>
    %cst_208 = arith.constant dense<0.000000e+00> : vector<10x80xf32>
    %208 = tpu.matmul %207, %204, %cst_208 {dimension_numbers = #tpu.dot_dimension_numbers<[1], [0], [0], [1], [0, 0, 1, 1], [], []>} : vector<10x20xf32>, vector<20x80xf32>, vector<10x80xf32> -> vector<10x80xf32>
    %209 = arith.maximumf %206, %208 : vector<10x80xf32>
    %c0_209 = arith.constant 0 : index
    %c0_210 = arith.constant 0 : index
    %210 = vector.load %arg8[%c0_209, %c0_210] : memref<80x40xf32, #tpu.memory_space<vmem>>, vector<80x40xf32>
    %cst_211 = arith.constant dense<0.000000e+00> : vector<10x40xf32>
    %211 = tpu.matmul %209, %210, %cst_211 {dimension_numbers = #tpu.dot_dimension_numbers<[1], [0], [0], [1], [0, 0, 1, 1], [], []>} : vector<10x80xf32>, vector<80x40xf32>, vector<10x40xf32> -> vector<10x40xf32>
    %c0_212 = arith.constant 0 : index
    %c0_213 = arith.constant 0 : index
    %212 = vector.load %arg9[%c0_212, %c0_213] : memref<80x40xf32, #tpu.memory_space<vmem>>, vector<80x40xf32>
    %cst_214 = arith.constant dense<0.000000e+00> : vector<10x40xf32>
    %213 = tpu.matmul %209, %212, %cst_214 {dimension_numbers = #tpu.dot_dimension_numbers<[1], [0], [0], [1], [0, 0, 1, 1], [], []>} : vector<10x80xf32>, vector<80x40xf32>, vector<10x40xf32> -> vector<10x40xf32>
    %214 = arith.maximumf %211, %213 : vector<10x40xf32>
    %cst_215 = arith.constant 0.000000e+00 : f32
    %215 = vector.broadcast %cst_215 : f32 to vector<10x40xf32>
    %216 = arith.maximumf %214, %215 : vector<10x40xf32>
    %c4_216 = arith.constant 4 : index
    %c0_217 = arith.constant 0 : index
    %c0_218 = arith.constant 0 : index
    %217 = vector.load %arg27[%c4_216, %c0_217, %c0_218] : memref<10x10x40xf32, #tpu.memory_space<vmem>>, vector<1x10x40xf32>
    %218 = vector.shape_cast %217 : vector<1x10x40xf32> to vector<10x40xf32>
    %219 = vector.shape_cast %216 : vector<10x40xf32> to vector<1x10x40xf32>
    tpu.vector_store %arg27[%c4_216, %c0_217, %c0_218], %219 {strides = array<i32>} : memref<10x10x40xf32, #tpu.memory_space<vmem>>, vector<1x10x40xf32>,
    %c0_219 = arith.constant 0 : index
    %c10 = arith.constant 10 : index
    %c0_220 = arith.constant 0 : index
    %c0_221 = arith.constant 0 : index
    %220 = vector.load %arg1[%c0_219, %c10, %c0_220, %c0_221] : memref<1x20x20x160xf32, #tpu.memory_space<vmem>>, vector<1x1x20x160xf32>
    %221 = vector.shape_cast %220 : vector<1x1x20x160xf32> to vector<20x160xf32>
    %c0_222 = arith.constant 0 : index
    %c0_223 = arith.constant 0 : index
    %222 = vector.load %arg2[%c0_222, %c0_223] : memref<160x80xf32, #tpu.memory_space<vmem>>, vector<160x80xf32>
    %cst_224 = arith.constant dense<0.000000e+00> : vector<20x80xf32>
    %223 = tpu.matmul %221, %222, %cst_224 {dimension_numbers = #tpu.dot_dimension_numbers<[1], [0], [0], [1], [0, 0, 1, 1], [], []>} : vector<20x160xf32>, vector<160x80xf32>, vector<20x80xf32> -> vector<20x80xf32>
    %c0_225 = arith.constant 0 : index
    %c0_226 = arith.constant 0 : index
    %224 = vector.load %arg3[%c0_225, %c0_226] : memref<1x80xf32, #tpu.memory_space<vmem>>, vector<1x80xf32>
    %225 = vector.broadcast %224 : vector<1x80xf32> to vector<20x80xf32>
    %226 = arith.addf %223, %225 : vector<20x80xf32>
    %cst_227 = arith.constant 0.000000e+00 : f32
    %227 = vector.broadcast %cst_227 : f32 to vector<20x80xf32>
    %228 = arith.maximumf %226, %227 : vector<20x80xf32>
    %c0_228 = arith.constant 0 : index
    %c0_229 = arith.constant 0 : index
    %229 = vector.load %arg4[%c0_228, %c0_229] : memref<80x80xf32, #tpu.memory_space<vmem>>, vector<80x80xf32>
    %cst_230 = arith.constant dense<0.000000e+00> : vector<20x80xf32>
    %230 = tpu.matmul %228, %229, %cst_230 {dimension_numbers = #tpu.dot_dimension_numbers<[1], [0], [0], [1], [0, 0, 1, 1], [], []>} : vector<20x80xf32>, vector<80x80xf32>, vector<20x80xf32> -> vector<20x80xf32>
    %c0_231 = arith.constant 0 : index
    %c0_232 = arith.constant 0 : index
    %231 = vector.load %arg5[%c0_231, %c0_232] : memref<1x80xf32, #tpu.memory_space<vmem>>, vector<1x80xf32>
    %232 = vector.broadcast %231 : vector<1x80xf32> to vector<20x80xf32>
    %233 = arith.addf %230, %232 : vector<20x80xf32>
    %c0_233 = arith.constant 0 : index
    %c11 = arith.constant 11 : index
    %c0_234 = arith.constant 0 : index
    %c0_235 = arith.constant 0 : index
    %234 = vector.load %arg1[%c0_233, %c11, %c0_234, %c0_235] : memref<1x20x20x160xf32, #tpu.memory_space<vmem>>, vector<1x1x20x160xf32>
    %235 = vector.shape_cast %234 : vector<1x1x20x160xf32> to vector<20x160xf32>
    %c0_236 = arith.constant 0 : index
    %c0_237 = arith.constant 0 : index
    %236 = vector.load %arg2[%c0_236, %c0_237] : memref<160x80xf32, #tpu.memory_space<vmem>>, vector<160x80xf32>
    %cst_238 = arith.constant dense<0.000000e+00> : vector<20x80xf32>
    %237 = tpu.matmul %235, %236, %cst_238 {dimension_numbers = #tpu.dot_dimension_numbers<[1], [0], [0], [1], [0, 0, 1, 1], [], []>} : vector<20x160xf32>, vector<160x80xf32>, vector<20x80xf32> -> vector<20x80xf32>
    %c0_239 = arith.constant 0 : index
    %c0_240 = arith.constant 0 : index
    %238 = vector.load %arg3[%c0_239, %c0_240] : memref<1x80xf32, #tpu.memory_space<vmem>>, vector<1x80xf32>
    %239 = vector.broadcast %238 : vector<1x80xf32> to vector<20x80xf32>
    %240 = arith.addf %237, %239 : vector<20x80xf32>
    %cst_241 = arith.constant 0.000000e+00 : f32
    %241 = vector.broadcast %cst_241 : f32 to vector<20x80xf32>
    %242 = arith.maximumf %240, %241 : vector<20x80xf32>
    %c0_242 = arith.constant 0 : index
    %c0_243 = arith.constant 0 : index
    %243 = vector.load %arg4[%c0_242, %c0_243] : memref<80x80xf32, #tpu.memory_space<vmem>>, vector<80x80xf32>
    %cst_244 = arith.constant dense<0.000000e+00> : vector<20x80xf32>
    %244 = tpu.matmul %242, %243, %cst_244 {dimension_numbers = #tpu.dot_dimension_numbers<[1], [0], [0], [1], [0, 0, 1, 1], [], []>} : vector<20x80xf32>, vector<80x80xf32>, vector<20x80xf32> -> vector<20x80xf32>
    %c0_245 = arith.constant 0 : index
    %c0_246 = arith.constant 0 : index
    %245 = vector.load %arg5[%c0_245, %c0_246] : memref<1x80xf32, #tpu.memory_space<vmem>>, vector<1x80xf32>
    %246 = vector.broadcast %245 : vector<1x80xf32> to vector<20x80xf32>
    %247 = arith.addf %244, %246 : vector<20x80xf32>
    %248 = arith.maximumf %233, %247 : vector<20x80xf32>
    %c0_247 = arith.constant 0 : index
    %c0_248 = arith.constant 0 : index
    %249 = vector.load %arg6[%c0_247, %c0_248] : memref<10x20xf32, #tpu.memory_space<vmem>>, vector<10x20xf32>
    %cst_249 = arith.constant dense<0.000000e+00> : vector<10x80xf32>
    %250 = tpu.matmul %249, %248, %cst_249 {dimension_numbers = #tpu.dot_dimension_numbers<[1], [0], [0], [1], [0, 0, 1, 1], [], []>} : vector<10x20xf32>, vector<20x80xf32>, vector<10x80xf32> -> vector<10x80xf32>
    %c0_250 = arith.constant 0 : index
    %c0_251 = arith.constant 0 : index
    %251 = vector.load %arg7[%c0_250, %c0_251] : memref<10x20xf32, #tpu.memory_space<vmem>>, vector<10x20xf32>
    %cst_252 = arith.constant dense<0.000000e+00> : vector<10x80xf32>
    %252 = tpu.matmul %251, %248, %cst_252 {dimension_numbers = #tpu.dot_dimension_numbers<[1], [0], [0], [1], [0, 0, 1, 1], [], []>} : vector<10x20xf32>, vector<20x80xf32>, vector<10x80xf32> -> vector<10x80xf32>
    %253 = arith.maximumf %250, %252 : vector<10x80xf32>
    %c0_253 = arith.constant 0 : index
    %c0_254 = arith.constant 0 : index
    %254 = vector.load %arg8[%c0_253, %c0_254] : memref<80x40xf32, #tpu.memory_space<vmem>>, vector<80x40xf32>
    %cst_255 = arith.constant dense<0.000000e+00> : vector<10x40xf32>
    %255 = tpu.matmul %253, %254, %cst_255 {dimension_numbers = #tpu.dot_dimension_numbers<[1], [0], [0], [1], [0, 0, 1, 1], [], []>} : vector<10x80xf32>, vector<80x40xf32>, vector<10x40xf32> -> vector<10x40xf32>
    %c0_256 = arith.constant 0 : index
    %c0_257 = arith.constant 0 : index
    %256 = vector.load %arg9[%c0_256, %c0_257] : memref<80x40xf32, #tpu.memory_space<vmem>>, vector<80x40xf32>
    %cst_258 = arith.constant dense<0.000000e+00> : vector<10x40xf32>
    %257 = tpu.matmul %253, %256, %cst_258 {dimension_numbers = #tpu.dot_dimension_numbers<[1], [0], [0], [1], [0, 0, 1, 1], [], []>} : vector<10x80xf32>, vector<80x40xf32>, vector<10x40xf32> -> vector<10x40xf32>
    %258 = arith.maximumf %255, %257 : vector<10x40xf32>
    %cst_259 = arith.constant 0.000000e+00 : f32
    %259 = vector.broadcast %cst_259 : f32 to vector<10x40xf32>
    %260 = arith.maximumf %258, %259 : vector<10x40xf32>
    %c5_260 = arith.constant 5 : index
    %c0_261 = arith.constant 0 : index
    %c0_262 = arith.constant 0 : index
    %261 = vector.load %arg27[%c5_260, %c0_261, %c0_262] : memref<10x10x40xf32, #tpu.memory_space<vmem>>, vector<1x10x40xf32>
    %262 = vector.shape_cast %261 : vector<1x10x40xf32> to vector<10x40xf32>
    %263 = vector.shape_cast %260 : vector<10x40xf32> to vector<1x10x40xf32>
    tpu.vector_store %arg27[%c5_260, %c0_261, %c0_262], %263 {strides = array<i32>} : memref<10x10x40xf32, #tpu.memory_space<vmem>>, vector<1x10x40xf32>,
    %c0_263 = arith.constant 0 : index
    %c12 = arith.constant 12 : index
    %c0_264 = arith.constant 0 : index
    %c0_265 = arith.constant 0 : index
    %264 = vector.load %arg1[%c0_263, %c12, %c0_264, %c0_265] : memref<1x20x20x160xf32, #tpu.memory_space<vmem>>, vector<1x1x20x160xf32>
    %265 = vector.shape_cast %264 : vector<1x1x20x160xf32> to vector<20x160xf32>
    %c0_266 = arith.constant 0 : index
    %c0_267 = arith.constant 0 : index
    %266 = vector.load %arg2[%c0_266, %c0_267] : memref<160x80xf32, #tpu.memory_space<vmem>>, vector<160x80xf32>
    %cst_268 = arith.constant dense<0.000000e+00> : vector<20x80xf32>
    %267 = tpu.matmul %265, %266, %cst_268 {dimension_numbers = #tpu.dot_dimension_numbers<[1], [0], [0], [1], [0, 0, 1, 1], [], []>} : vector<20x160xf32>, vector<160x80xf32>, vector<20x80xf32> -> vector<20x80xf32>
    %c0_269 = arith.constant 0 : index
    %c0_270 = arith.constant 0 : index
    %268 = vector.load %arg3[%c0_269, %c0_270] : memref<1x80xf32, #tpu.memory_space<vmem>>, vector<1x80xf32>
    %269 = vector.broadcast %268 : vector<1x80xf32> to vector<20x80xf32>
    %270 = arith.addf %267, %269 : vector<20x80xf32>
    %cst_271 = arith.constant 0.000000e+00 : f32
    %271 = vector.broadcast %cst_271 : f32 to vector<20x80xf32>
    %272 = arith.maximumf %270, %271 : vector<20x80xf32>
    %c0_272 = arith.constant 0 : index
    %c0_273 = arith.constant 0 : index
    %273 = vector.load %arg4[%c0_272, %c0_273] : memref<80x80xf32, #tpu.memory_space<vmem>>, vector<80x80xf32>
    %cst_274 = arith.constant dense<0.000000e+00> : vector<20x80xf32>
    %274 = tpu.matmul %272, %273, %cst_274 {dimension_numbers = #tpu.dot_dimension_numbers<[1], [0], [0], [1], [0, 0, 1, 1], [], []>} : vector<20x80xf32>, vector<80x80xf32>, vector<20x80xf32> -> vector<20x80xf32>
    %c0_275 = arith.constant 0 : index
    %c0_276 = arith.constant 0 : index
    %275 = vector.load %arg5[%c0_275, %c0_276] : memref<1x80xf32, #tpu.memory_space<vmem>>, vector<1x80xf32>
    %276 = vector.broadcast %275 : vector<1x80xf32> to vector<20x80xf32>
    %277 = arith.addf %274, %276 : vector<20x80xf32>
    %c0_277 = arith.constant 0 : index
    %c13 = arith.constant 13 : index
    %c0_278 = arith.constant 0 : index
    %c0_279 = arith.constant 0 : index
    %278 = vector.load %arg1[%c0_277, %c13, %c0_278, %c0_279] : memref<1x20x20x160xf32, #tpu.memory_space<vmem>>, vector<1x1x20x160xf32>
    %279 = vector.shape_cast %278 : vector<1x1x20x160xf32> to vector<20x160xf32>
    %c0_280 = arith.constant 0 : index
    %c0_281 = arith.constant 0 : index
    %280 = vector.load %arg2[%c0_280, %c0_281] : memref<160x80xf32, #tpu.memory_space<vmem>>, vector<160x80xf32>
    %cst_282 = arith.constant dense<0.000000e+00> : vector<20x80xf32>
    %281 = tpu.matmul %279, %280, %cst_282 {dimension_numbers = #tpu.dot_dimension_numbers<[1], [0], [0], [1], [0, 0, 1, 1], [], []>} : vector<20x160xf32>, vector<160x80xf32>, vector<20x80xf32> -> vector<20x80xf32>
    %c0_283 = arith.constant 0 : index
    %c0_284 = arith.constant 0 : index
    %282 = vector.load %arg3[%c0_283, %c0_284] : memref<1x80xf32, #tpu.memory_space<vmem>>, vector<1x80xf32>
    %283 = vector.broadcast %282 : vector<1x80xf32> to vector<20x80xf32>
    %284 = arith.addf %281, %283 : vector<20x80xf32>
    %cst_285 = arith.constant 0.000000e+00 : f32
    %285 = vector.broadcast %cst_285 : f32 to vector<20x80xf32>
    %286 = arith.maximumf %284, %285 : vector<20x80xf32>
    %c0_286 = arith.constant 0 : index
    %c0_287 = arith.constant 0 : index
    %287 = vector.load %arg4[%c0_286, %c0_287] : memref<80x80xf32, #tpu.memory_space<vmem>>, vector<80x80xf32>
    %cst_288 = arith.constant dense<0.000000e+00> : vector<20x80xf32>
    %288 = tpu.matmul %286, %287, %cst_288 {dimension_numbers = #tpu.dot_dimension_numbers<[1], [0], [0], [1], [0, 0, 1, 1], [], []>} : vector<20x80xf32>, vector<80x80xf32>, vector<20x80xf32> -> vector<20x80xf32>
    %c0_289 = arith.constant 0 : index
    %c0_290 = arith.constant 0 : index
    %289 = vector.load %arg5[%c0_289, %c0_290] : memref<1x80xf32, #tpu.memory_space<vmem>>, vector<1x80xf32>
    %290 = vector.broadcast %289 : vector<1x80xf32> to vector<20x80xf32>
    %291 = arith.addf %288, %290 : vector<20x80xf32>
    %292 = arith.maximumf %277, %291 : vector<20x80xf32>
    %c0_291 = arith.constant 0 : index
    %c0_292 = arith.constant 0 : index
    %293 = vector.load %arg6[%c0_291, %c0_292] : memref<10x20xf32, #tpu.memory_space<vmem>>, vector<10x20xf32>
    %cst_293 = arith.constant dense<0.000000e+00> : vector<10x80xf32>
    %294 = tpu.matmul %293, %292, %cst_293 {dimension_numbers = #tpu.dot_dimension_numbers<[1], [0], [0], [1], [0, 0, 1, 1], [], []>} : vector<10x20xf32>, vector<20x80xf32>, vector<10x80xf32> -> vector<10x80xf32>
    %c0_294 = arith.constant 0 : index
    %c0_295 = arith.constant 0 : index
    %295 = vector.load %arg7[%c0_294, %c0_295] : memref<10x20xf32, #tpu.memory_space<vmem>>, vector<10x20xf32>
    %cst_296 = arith.constant dense<0.000000e+00> : vector<10x80xf32>
    %296 = tpu.matmul %295, %292, %cst_296 {dimension_numbers = #tpu.dot_dimension_numbers<[1], [0], [0], [1], [0, 0, 1, 1], [], []>} : vector<10x20xf32>, vector<20x80xf32>, vector<10x80xf32> -> vector<10x80xf32>
    %297 = arith.maximumf %294, %296 : vector<10x80xf32>
    %c0_297 = arith.constant 0 : index
    %c0_298 = arith.constant 0 : index
    %298 = vector.load %arg8[%c0_297, %c0_298] : memref<80x40xf32, #tpu.memory_space<vmem>>, vector<80x40xf32>
    %cst_299 = arith.constant dense<0.000000e+00> : vector<10x40xf32>
    %299 = tpu.matmul %297, %298, %cst_299 {dimension_numbers = #tpu.dot_dimension_numbers<[1], [0], [0], [1], [0, 0, 1, 1], [], []>} : vector<10x80xf32>, vector<80x40xf32>, vector<10x40xf32> -> vector<10x40xf32>
    %c0_300 = arith.constant 0 : index
    %c0_301 = arith.constant 0 : index
    %300 = vector.load %arg9[%c0_300, %c0_301] : memref<80x40xf32, #tpu.memory_space<vmem>>, vector<80x40xf32>
    %cst_302 = arith.constant dense<0.000000e+00> : vector<10x40xf32>
    %301 = tpu.matmul %297, %300, %cst_302 {dimension_numbers = #tpu.dot_dimension_numbers<[1], [0], [0], [1], [0, 0, 1, 1], [], []>} : vector<10x80xf32>, vector<80x40xf32>, vector<10x40xf32> -> vector<10x40xf32>
    %302 = arith.maximumf %299, %301 : vector<10x40xf32>
    %cst_303 = arith.constant 0.000000e+00 : f32
    %303 = vector.broadcast %cst_303 : f32 to vector<10x40xf32>
    %304 = arith.maximumf %302, %303 : vector<10x40xf32>
    %c6_304 = arith.constant 6 : index
    %c0_305 = arith.constant 0 : index
    %c0_306 = arith.constant 0 : index
    %305 = vector.load %arg27[%c6_304, %c0_305, %c0_306] : memref<10x10x40xf32, #tpu.memory_space<vmem>>, vector<1x10x40xf32>
    %306 = vector.shape_cast %305 : vector<1x10x40xf32> to vector<10x40xf32>
    %307 = vector.shape_cast %304 : vector<10x40xf32> to vector<1x10x40xf32>
    tpu.vector_store %arg27[%c6_304, %c0_305, %c0_306], %307 {strides = array<i32>} : memref<10x10x40xf32, #tpu.memory_space<vmem>>, vector<1x10x40xf32>,
    %c0_307 = arith.constant 0 : index
    %c14 = arith.constant 14 : index
    %c0_308 = arith.constant 0 : index
    %c0_309 = arith.constant 0 : index
    %308 = vector.load %arg1[%c0_307, %c14, %c0_308, %c0_309] : memref<1x20x20x160xf32, #tpu.memory_space<vmem>>, vector<1x1x20x160xf32>
    %309 = vector.shape_cast %308 : vector<1x1x20x160xf32> to vector<20x160xf32>
    %c0_310 = arith.constant 0 : index
    %c0_311 = arith.constant 0 : index
    %310 = vector.load %arg2[%c0_310, %c0_311] : memref<160x80xf32, #tpu.memory_space<vmem>>, vector<160x80xf32>
    %cst_312 = arith.constant dense<0.000000e+00> : vector<20x80xf32>
    %311 = tpu.matmul %309, %310, %cst_312 {dimension_numbers = #tpu.dot_dimension_numbers<[1], [0], [0], [1], [0, 0, 1, 1], [], []>} : vector<20x160xf32>, vector<160x80xf32>, vector<20x80xf32> -> vector<20x80xf32>
    %c0_313 = arith.constant 0 : index
    %c0_314 = arith.constant 0 : index
    %312 = vector.load %arg3[%c0_313, %c0_314] : memref<1x80xf32, #tpu.memory_space<vmem>>, vector<1x80xf32>
    %313 = vector.broadcast %312 : vector<1x80xf32> to vector<20x80xf32>
    %314 = arith.addf %311, %313 : vector<20x80xf32>
    %cst_315 = arith.constant 0.000000e+00 : f32
    %315 = vector.broadcast %cst_315 : f32 to vector<20x80xf32>
    %316 = arith.maximumf %314, %315 : vector<20x80xf32>
    %c0_316 = arith.constant 0 : index
    %c0_317 = arith.constant 0 : index
    %317 = vector.load %arg4[%c0_316, %c0_317] : memref<80x80xf32, #tpu.memory_space<vmem>>, vector<80x80xf32>
    %cst_318 = arith.constant dense<0.000000e+00> : vector<20x80xf32>
    %318 = tpu.matmul %316, %317, %cst_318 {dimension_numbers = #tpu.dot_dimension_numbers<[1], [0], [0], [1], [0, 0, 1, 1], [], []>} : vector<20x80xf32>, vector<80x80xf32>, vector<20x80xf32> -> vector<20x80xf32>
    %c0_319 = arith.constant 0 : index
    %c0_320 = arith.constant 0 : index
    %319 = vector.load %arg5[%c0_319, %c0_320] : memref<1x80xf32, #tpu.memory_space<vmem>>, vector<1x80xf32>
    %320 = vector.broadcast %319 : vector<1x80xf32> to vector<20x80xf32>
    %321 = arith.addf %318, %320 : vector<20x80xf32>
    %c0_321 = arith.constant 0 : index
    %c15 = arith.constant 15 : index
    %c0_322 = arith.constant 0 : index
    %c0_323 = arith.constant 0 : index
    %322 = vector.load %arg1[%c0_321, %c15, %c0_322, %c0_323] : memref<1x20x20x160xf32, #tpu.memory_space<vmem>>, vector<1x1x20x160xf32>
    %323 = vector.shape_cast %322 : vector<1x1x20x160xf32> to vector<20x160xf32>
    %c0_324 = arith.constant 0 : index
    %c0_325 = arith.constant 0 : index
    %324 = vector.load %arg2[%c0_324, %c0_325] : memref<160x80xf32, #tpu.memory_space<vmem>>, vector<160x80xf32>
    %cst_326 = arith.constant dense<0.000000e+00> : vector<20x80xf32>
    %325 = tpu.matmul %323, %324, %cst_326 {dimension_numbers = #tpu.dot_dimension_numbers<[1], [0], [0], [1], [0, 0, 1, 1], [], []>} : vector<20x160xf32>, vector<160x80xf32>, vector<20x80xf32> -> vector<20x80xf32>
    %c0_327 = arith.constant 0 : index
    %c0_328 = arith.constant 0 : index
    %326 = vector.load %arg3[%c0_327, %c0_328] : memref<1x80xf32, #tpu.memory_space<vmem>>, vector<1x80xf32>
    %327 = vector.broadcast %326 : vector<1x80xf32> to vector<20x80xf32>
    %328 = arith.addf %325, %327 : vector<20x80xf32>
    %cst_329 = arith.constant 0.000000e+00 : f32
    %329 = vector.broadcast %cst_329 : f32 to vector<20x80xf32>
    %330 = arith.maximumf %328, %329 : vector<20x80xf32>
    %c0_330 = arith.constant 0 : index
    %c0_331 = arith.constant 0 : index
    %331 = vector.load %arg4[%c0_330, %c0_331] : memref<80x80xf32, #tpu.memory_space<vmem>>, vector<80x80xf32>
    %cst_332 = arith.constant dense<0.000000e+00> : vector<20x80xf32>
    %332 = tpu.matmul %330, %331, %cst_332 {dimension_numbers = #tpu.dot_dimension_numbers<[1], [0], [0], [1], [0, 0, 1, 1], [], []>} : vector<20x80xf32>, vector<80x80xf32>, vector<20x80xf32> -> vector<20x80xf32>
    %c0_333 = arith.constant 0 : index
    %c0_334 = arith.constant 0 : index
    %333 = vector.load %arg5[%c0_333, %c0_334] : memref<1x80xf32, #tpu.memory_space<vmem>>, vector<1x80xf32>
    %334 = vector.broadcast %333 : vector<1x80xf32> to vector<20x80xf32>
    %335 = arith.addf %332, %334 : vector<20x80xf32>
    %336 = arith.maximumf %321, %335 : vector<20x80xf32>
    %c0_335 = arith.constant 0 : index
    %c0_336 = arith.constant 0 : index
    %337 = vector.load %arg6[%c0_335, %c0_336] : memref<10x20xf32, #tpu.memory_space<vmem>>, vector<10x20xf32>
    %cst_337 = arith.constant dense<0.000000e+00> : vector<10x80xf32>
    %338 = tpu.matmul %337, %336, %cst_337 {dimension_numbers = #tpu.dot_dimension_numbers<[1], [0], [0], [1], [0, 0, 1, 1], [], []>} : vector<10x20xf32>, vector<20x80xf32>, vector<10x80xf32> -> vector<10x80xf32>
    %c0_338 = arith.constant 0 : index
    %c0_339 = arith.constant 0 : index
    %339 = vector.load %arg7[%c0_338, %c0_339] : memref<10x20xf32, #tpu.memory_space<vmem>>, vector<10x20xf32>
    %cst_340 = arith.constant dense<0.000000e+00> : vector<10x80xf32>
    %340 = tpu.matmul %339, %336, %cst_340 {dimension_numbers = #tpu.dot_dimension_numbers<[1], [0], [0], [1], [0, 0, 1, 1], [], []>} : vector<10x20xf32>, vector<20x80xf32>, vector<10x80xf32> -> vector<10x80xf32>
    %341 = arith.maximumf %338, %340 : vector<10x80xf32>
    %c0_341 = arith.constant 0 : index
    %c0_342 = arith.constant 0 : index
    %342 = vector.load %arg8[%c0_341, %c0_342] : memref<80x40xf32, #tpu.memory_space<vmem>>, vector<80x40xf32>
    %cst_343 = arith.constant dense<0.000000e+00> : vector<10x40xf32>
    %343 = tpu.matmul %341, %342, %cst_343 {dimension_numbers = #tpu.dot_dimension_numbers<[1], [0], [0], [1], [0, 0, 1, 1], [], []>} : vector<10x80xf32>, vector<80x40xf32>, vector<10x40xf32> -> vector<10x40xf32>
    %c0_344 = arith.constant 0 : index
    %c0_345 = arith.constant 0 : index
    %344 = vector.load %arg9[%c0_344, %c0_345] : memref<80x40xf32, #tpu.memory_space<vmem>>, vector<80x40xf32>
    %cst_346 = arith.constant dense<0.000000e+00> : vector<10x40xf32>
    %345 = tpu.matmul %341, %344, %cst_346 {dimension_numbers = #tpu.dot_dimension_numbers<[1], [0], [0], [1], [0, 0, 1, 1], [], []>} : vector<10x80xf32>, vector<80x40xf32>, vector<10x40xf32> -> vector<10x40xf32>
    %346 = arith.maximumf %343, %345 : vector<10x40xf32>
    %cst_347 = arith.constant 0.000000e+00 : f32
    %347 = vector.broadcast %cst_347 : f32 to vector<10x40xf32>
    %348 = arith.maximumf %346, %347 : vector<10x40xf32>
    %c7_348 = arith.constant 7 : index
    %c0_349 = arith.constant 0 : index
    %c0_350 = arith.constant 0 : index
    %349 = vector.load %arg27[%c7_348, %c0_349, %c0_350] : memref<10x10x40xf32, #tpu.memory_space<vmem>>, vector<1x10x40xf32>
    %350 = vector.shape_cast %349 : vector<1x10x40xf32> to vector<10x40xf32>
    %351 = vector.shape_cast %348 : vector<10x40xf32> to vector<1x10x40xf32>
    tpu.vector_store %arg27[%c7_348, %c0_349, %c0_350], %351 {strides = array<i32>} : memref<10x10x40xf32, #tpu.memory_space<vmem>>, vector<1x10x40xf32>,
    %c0_351 = arith.constant 0 : index
    %c16 = arith.constant 16 : index
    %c0_352 = arith.constant 0 : index
    %c0_353 = arith.constant 0 : index
    %352 = vector.load %arg1[%c0_351, %c16, %c0_352, %c0_353] : memref<1x20x20x160xf32, #tpu.memory_space<vmem>>, vector<1x1x20x160xf32>
    %353 = vector.shape_cast %352 : vector<1x1x20x160xf32> to vector<20x160xf32>
    %c0_354 = arith.constant 0 : index
    %c0_355 = arith.constant 0 : index
    %354 = vector.load %arg2[%c0_354, %c0_355] : memref<160x80xf32, #tpu.memory_space<vmem>>, vector<160x80xf32>
    %cst_356 = arith.constant dense<0.000000e+00> : vector<20x80xf32>
    %355 = tpu.matmul %353, %354, %cst_356 {dimension_numbers = #tpu.dot_dimension_numbers<[1], [0], [0], [1], [0, 0, 1, 1], [], []>} : vector<20x160xf32>, vector<160x80xf32>, vector<20x80xf32> -> vector<20x80xf32>
    %c0_357 = arith.constant 0 : index
    %c0_358 = arith.constant 0 : index
    %356 = vector.load %arg3[%c0_357, %c0_358] : memref<1x80xf32, #tpu.memory_space<vmem>>, vector<1x80xf32>
    %357 = vector.broadcast %356 : vector<1x80xf32> to vector<20x80xf32>
    %358 = arith.addf %355, %357 : vector<20x80xf32>
    %cst_359 = arith.constant 0.000000e+00 : f32
    %359 = vector.broadcast %cst_359 : f32 to vector<20x80xf32>
    %360 = arith.maximumf %358, %359 : vector<20x80xf32>
    %c0_360 = arith.constant 0 : index
    %c0_361 = arith.constant 0 : index
    %361 = vector.load %arg4[%c0_360, %c0_361] : memref<80x80xf32, #tpu.memory_space<vmem>>, vector<80x80xf32>
    %cst_362 = arith.constant dense<0.000000e+00> : vector<20x80xf32>
    %362 = tpu.matmul %360, %361, %cst_362 {dimension_numbers = #tpu.dot_dimension_numbers<[1], [0], [0], [1], [0, 0, 1, 1], [], []>} : vector<20x80xf32>, vector<80x80xf32>, vector<20x80xf32> -> vector<20x80xf32>
    %c0_363 = arith.constant 0 : index
    %c0_364 = arith.constant 0 : index
    %363 = vector.load %arg5[%c0_363, %c0_364] : memref<1x80xf32, #tpu.memory_space<vmem>>, vector<1x80xf32>
    %364 = vector.broadcast %363 : vector<1x80xf32> to vector<20x80xf32>
    %365 = arith.addf %362, %364 : vector<20x80xf32>
    %c0_365 = arith.constant 0 : index
    %c17 = arith.constant 17 : index
    %c0_366 = arith.constant 0 : index
    %c0_367 = arith.constant 0 : index
    %366 = vector.load %arg1[%c0_365, %c17, %c0_366, %c0_367] : memref<1x20x20x160xf32, #tpu.memory_space<vmem>>, vector<1x1x20x160xf32>
    %367 = vector.shape_cast %366 : vector<1x1x20x160xf32> to vector<20x160xf32>
    %c0_368 = arith.constant 0 : index
    %c0_369 = arith.constant 0 : index
    %368 = vector.load %arg2[%c0_368, %c0_369] : memref<160x80xf32, #tpu.memory_space<vmem>>, vector<160x80xf32>
    %cst_370 = arith.constant dense<0.000000e+00> : vector<20x80xf32>
    %369 = tpu.matmul %367, %368, %cst_370 {dimension_numbers = #tpu.dot_dimension_numbers<[1], [0], [0], [1], [0, 0, 1, 1], [], []>} : vector<20x160xf32>, vector<160x80xf32>, vector<20x80xf32> -> vector<20x80xf32>
    %c0_371 = arith.constant 0 : index
    %c0_372 = arith.constant 0 : index
    %370 = vector.load %arg3[%c0_371, %c0_372] : memref<1x80xf32, #tpu.memory_space<vmem>>, vector<1x80xf32>
    %371 = vector.broadcast %370 : vector<1x80xf32> to vector<20x80xf32>
    %372 = arith.addf %369, %371 : vector<20x80xf32>
    %cst_373 = arith.constant 0.000000e+00 : f32
    %373 = vector.broadcast %cst_373 : f32 to vector<20x80xf32>
    %374 = arith.maximumf %372, %373 : vector<20x80xf32>
    %c0_374 = arith.constant 0 : index
    %c0_375 = arith.constant 0 : index
    %375 = vector.load %arg4[%c0_374, %c0_375] : memref<80x80xf32, #tpu.memory_space<vmem>>, vector<80x80xf32>
    %cst_376 = arith.constant dense<0.000000e+00> : vector<20x80xf32>
    %376 = tpu.matmul %374, %375, %cst_376 {dimension_numbers = #tpu.dot_dimension_numbers<[1], [0], [0], [1], [0, 0, 1, 1], [], []>} : vector<20x80xf32>, vector<80x80xf32>, vector<20x80xf32> -> vector<20x80xf32>
    %c0_377 = arith.constant 0 : index
    %c0_378 = arith.constant 0 : index
    %377 = vector.load %arg5[%c0_377, %c0_378] : memref<1x80xf32, #tpu.memory_space<vmem>>, vector<1x80xf32>
    %378 = vector.broadcast %377 : vector<1x80xf32> to vector<20x80xf32>
    %379 = arith.addf %376, %378 : vector<20x80xf32>
    %380 = arith.maximumf %365, %379 : vector<20x80xf32>
    %c0_379 = arith.constant 0 : index
    %c0_380 = arith.constant 0 : index
    %381 = vector.load %arg6[%c0_379, %c0_380] : memref<10x20xf32, #tpu.memory_space<vmem>>, vector<10x20xf32>
    %cst_381 = arith.constant dense<0.000000e+00> : vector<10x80xf32>
    %382 = tpu.matmul %381, %380, %cst_381 {dimension_numbers = #tpu.dot_dimension_numbers<[1], [0], [0], [1], [0, 0, 1, 1], [], []>} : vector<10x20xf32>, vector<20x80xf32>, vector<10x80xf32> -> vector<10x80xf32>
    %c0_382 = arith.constant 0 : index
    %c0_383 = arith.constant 0 : index
    %383 = vector.load %arg7[%c0_382, %c0_383] : memref<10x20xf32, #tpu.memory_space<vmem>>, vector<10x20xf32>
    %cst_384 = arith.constant dense<0.000000e+00> : vector<10x80xf32>
    %384 = tpu.matmul %383, %380, %cst_384 {dimension_numbers = #tpu.dot_dimension_numbers<[1], [0], [0], [1], [0, 0, 1, 1], [], []>} : vector<10x20xf32>, vector<20x80xf32>, vector<10x80xf32> -> vector<10x80xf32>
    %385 = arith.maximumf %382, %384 : vector<10x80xf32>
    %c0_385 = arith.constant 0 : index
    %c0_386 = arith.constant 0 : index
    %386 = vector.load %arg8[%c0_385, %c0_386] : memref<80x40xf32, #tpu.memory_space<vmem>>, vector<80x40xf32>
    %cst_387 = arith.constant dense<0.000000e+00> : vector<10x40xf32>
    %387 = tpu.matmul %385, %386, %cst_387 {dimension_numbers = #tpu.dot_dimension_numbers<[1], [0], [0], [1], [0, 0, 1, 1], [], []>} : vector<10x80xf32>, vector<80x40xf32>, vector<10x40xf32> -> vector<10x40xf32>
    %c0_388 = arith.constant 0 : index
    %c0_389 = arith.constant 0 : index
    %388 = vector.load %arg9[%c0_388, %c0_389] : memref<80x40xf32, #tpu.memory_space<vmem>>, vector<80x40xf32>
    %cst_390 = arith.constant dense<0.000000e+00> : vector<10x40xf32>
    %389 = tpu.matmul %385, %388, %cst_390 {dimension_numbers = #tpu.dot_dimension_numbers<[1], [0], [0], [1], [0, 0, 1, 1], [], []>} : vector<10x80xf32>, vector<80x40xf32>, vector<10x40xf32> -> vector<10x40xf32>
    %390 = arith.maximumf %387, %389 : vector<10x40xf32>
    %cst_391 = arith.constant 0.000000e+00 : f32
    %391 = vector.broadcast %cst_391 : f32 to vector<10x40xf32>
    %392 = arith.maximumf %390, %391 : vector<10x40xf32>
    %c8_392 = arith.constant 8 : index
    %c0_393 = arith.constant 0 : index
    %c0_394 = arith.constant 0 : index
    %393 = vector.load %arg27[%c8_392, %c0_393, %c0_394] : memref<10x10x40xf32, #tpu.memory_space<vmem>>, vector<1x10x40xf32>
    %394 = vector.shape_cast %393 : vector<1x10x40xf32> to vector<10x40xf32>
    %395 = vector.shape_cast %392 : vector<10x40xf32> to vector<1x10x40xf32>
    tpu.vector_store %arg27[%c8_392, %c0_393, %c0_394], %395 {strides = array<i32>} : memref<10x10x40xf32, #tpu.memory_space<vmem>>, vector<1x10x40xf32>,
    %c0_395 = arith.constant 0 : index
    %c18 = arith.constant 18 : index
    %c0_396 = arith.constant 0 : index
    %c0_397 = arith.constant 0 : index
    %396 = vector.load %arg1[%c0_395, %c18, %c0_396, %c0_397] : memref<1x20x20x160xf32, #tpu.memory_space<vmem>>, vector<1x1x20x160xf32>
    %397 = vector.shape_cast %396 : vector<1x1x20x160xf32> to vector<20x160xf32>
    %c0_398 = arith.constant 0 : index
    %c0_399 = arith.constant 0 : index
    %398 = vector.load %arg2[%c0_398, %c0_399] : memref<160x80xf32, #tpu.memory_space<vmem>>, vector<160x80xf32>
    %cst_400 = arith.constant dense<0.000000e+00> : vector<20x80xf32>
    %399 = tpu.matmul %397, %398, %cst_400 {dimension_numbers = #tpu.dot_dimension_numbers<[1], [0], [0], [1], [0, 0, 1, 1], [], []>} : vector<20x160xf32>, vector<160x80xf32>, vector<20x80xf32> -> vector<20x80xf32>
    %c0_401 = arith.constant 0 : index
    %c0_402 = arith.constant 0 : index
    %400 = vector.load %arg3[%c0_401, %c0_402] : memref<1x80xf32, #tpu.memory_space<vmem>>, vector<1x80xf32>
    %401 = vector.broadcast %400 : vector<1x80xf32> to vector<20x80xf32>
    %402 = arith.addf %399, %401 : vector<20x80xf32>
    %cst_403 = arith.constant 0.000000e+00 : f32
    %403 = vector.broadcast %cst_403 : f32 to vector<20x80xf32>
    %404 = arith.maximumf %402, %403 : vector<20x80xf32>
    %c0_404 = arith.constant 0 : index
    %c0_405 = arith.constant 0 : index
    %405 = vector.load %arg4[%c0_404, %c0_405] : memref<80x80xf32, #tpu.memory_space<vmem>>, vector<80x80xf32>
    %cst_406 = arith.constant dense<0.000000e+00> : vector<20x80xf32>
    %406 = tpu.matmul %404, %405, %cst_406 {dimension_numbers = #tpu.dot_dimension_numbers<[1], [0], [0], [1], [0, 0, 1, 1], [], []>} : vector<20x80xf32>, vector<80x80xf32>, vector<20x80xf32> -> vector<20x80xf32>
    %c0_407 = arith.constant 0 : index
    %c0_408 = arith.constant 0 : index
    %407 = vector.load %arg5[%c0_407, %c0_408] : memref<1x80xf32, #tpu.memory_space<vmem>>, vector<1x80xf32>
    %408 = vector.broadcast %407 : vector<1x80xf32> to vector<20x80xf32>
    %409 = arith.addf %406, %408 : vector<20x80xf32>
    %c0_409 = arith.constant 0 : index
    %c19 = arith.constant 19 : index
    %c0_410 = arith.constant 0 : index
    %c0_411 = arith.constant 0 : index
    %410 = vector.load %arg1[%c0_409, %c19, %c0_410, %c0_411] : memref<1x20x20x160xf32, #tpu.memory_space<vmem>>, vector<1x1x20x160xf32>
    %411 = vector.shape_cast %410 : vector<1x1x20x160xf32> to vector<20x160xf32>
    %c0_412 = arith.constant 0 : index
    %c0_413 = arith.constant 0 : index
    %412 = vector.load %arg2[%c0_412, %c0_413] : memref<160x80xf32, #tpu.memory_space<vmem>>, vector<160x80xf32>
    %cst_414 = arith.constant dense<0.000000e+00> : vector<20x80xf32>
    %413 = tpu.matmul %411, %412, %cst_414 {dimension_numbers = #tpu.dot_dimension_numbers<[1], [0], [0], [1], [0, 0, 1, 1], [], []>} : vector<20x160xf32>, vector<160x80xf32>, vector<20x80xf32> -> vector<20x80xf32>
    %c0_415 = arith.constant 0 : index
    %c0_416 = arith.constant 0 : index
    %414 = vector.load %arg3[%c0_415, %c0_416] : memref<1x80xf32, #tpu.memory_space<vmem>>, vector<1x80xf32>
    %415 = vector.broadcast %414 : vector<1x80xf32> to vector<20x80xf32>
    %416 = arith.addf %413, %415 : vector<20x80xf32>
    %cst_417 = arith.constant 0.000000e+00 : f32
    %417 = vector.broadcast %cst_417 : f32 to vector<20x80xf32>
    %418 = arith.maximumf %416, %417 : vector<20x80xf32>
    %c0_418 = arith.constant 0 : index
    %c0_419 = arith.constant 0 : index
    %419 = vector.load %arg4[%c0_418, %c0_419] : memref<80x80xf32, #tpu.memory_space<vmem>>, vector<80x80xf32>
    %cst_420 = arith.constant dense<0.000000e+00> : vector<20x80xf32>
    %420 = tpu.matmul %418, %419, %cst_420 {dimension_numbers = #tpu.dot_dimension_numbers<[1], [0], [0], [1], [0, 0, 1, 1], [], []>} : vector<20x80xf32>, vector<80x80xf32>, vector<20x80xf32> -> vector<20x80xf32>
    %c0_421 = arith.constant 0 : index
    %c0_422 = arith.constant 0 : index
    %421 = vector.load %arg5[%c0_421, %c0_422] : memref<1x80xf32, #tpu.memory_space<vmem>>, vector<1x80xf32>
    %422 = vector.broadcast %421 : vector<1x80xf32> to vector<20x80xf32>
    %423 = arith.addf %420, %422 : vector<20x80xf32>
    %424 = arith.maximumf %409, %423 : vector<20x80xf32>
    %c0_423 = arith.constant 0 : index
    %c0_424 = arith.constant 0 : index
    %425 = vector.load %arg6[%c0_423, %c0_424] : memref<10x20xf32, #tpu.memory_space<vmem>>, vector<10x20xf32>
    %cst_425 = arith.constant dense<0.000000e+00> : vector<10x80xf32>
    %426 = tpu.matmul %425, %424, %cst_425 {dimension_numbers = #tpu.dot_dimension_numbers<[1], [0], [0], [1], [0, 0, 1, 1], [], []>} : vector<10x20xf32>, vector<20x80xf32>, vector<10x80xf32> -> vector<10x80xf32>
    %c0_426 = arith.constant 0 : index
    %c0_427 = arith.constant 0 : index
    %427 = vector.load %arg7[%c0_426, %c0_427] : memref<10x20xf32, #tpu.memory_space<vmem>>, vector<10x20xf32>
    %cst_428 = arith.constant dense<0.000000e+00> : vector<10x80xf32>
    %428 = tpu.matmul %427, %424, %cst_428 {dimension_numbers = #tpu.dot_dimension_numbers<[1], [0], [0], [1], [0, 0, 1, 1], [], []>} : vector<10x20xf32>, vector<20x80xf32>, vector<10x80xf32> -> vector<10x80xf32>
    %429 = arith.maximumf %426, %428 : vector<10x80xf32>
    %c0_429 = arith.constant 0 : index
    %c0_430 = arith.constant 0 : index
    %430 = vector.load %arg8[%c0_429, %c0_430] : memref<80x40xf32, #tpu.memory_space<vmem>>, vector<80x40xf32>
    %cst_431 = arith.constant dense<0.000000e+00> : vector<10x40xf32>
    %431 = tpu.matmul %429, %430, %cst_431 {dimension_numbers = #tpu.dot_dimension_numbers<[1], [0], [0], [1], [0, 0, 1, 1], [], []>} : vector<10x80xf32>, vector<80x40xf32>, vector<10x40xf32> -> vector<10x40xf32>
    %c0_432 = arith.constant 0 : index
    %c0_433 = arith.constant 0 : index
    %432 = vector.load %arg9[%c0_432, %c0_433] : memref<80x40xf32, #tpu.memory_space<vmem>>, vector<80x40xf32>
    %cst_434 = arith.constant dense<0.000000e+00> : vector<10x40xf32>
    %433 = tpu.matmul %429, %432, %cst_434 {dimension_numbers = #tpu.dot_dimension_numbers<[1], [0], [0], [1], [0, 0, 1, 1], [], []>} : vector<10x80xf32>, vector<80x40xf32>, vector<10x40xf32> -> vector<10x40xf32>
    %434 = arith.maximumf %431, %433 : vector<10x40xf32>
    %cst_435 = arith.constant 0.000000e+00 : f32
    %435 = vector.broadcast %cst_435 : f32 to vector<10x40xf32>
    %436 = arith.maximumf %434, %435 : vector<10x40xf32>
    %c9_436 = arith.constant 9 : index
    %c0_437 = arith.constant 0 : index
    %c0_438 = arith.constant 0 : index
    %437 = vector.load %arg27[%c9_436, %c0_437, %c0_438] : memref<10x10x40xf32, #tpu.memory_space<vmem>>, vector<1x10x40xf32>
    %438 = vector.shape_cast %437 : vector<1x10x40xf32> to vector<10x40xf32>
    %439 = vector.shape_cast %436 : vector<10x40xf32> to vector<1x10x40xf32>
    tpu.vector_store %arg27[%c9_436, %c0_437, %c0_438], %439 {strides = array<i32>} : memref<10x10x40xf32, #tpu.memory_space<vmem>>, vector<1x10x40xf32>,
    %cst_439 = arith.constant 0.000000e+00 : f32
    %440 = vector.broadcast %cst_439 : f32 to vector<8x32xf32>
    %c0_440 = arith.constant 0 : index
    %c0_441 = arith.constant 0 : index
    %441 = vector.load %arg11[%c0_440, %c0_441] : memref<1x32xf32, #tpu.memory_space<vmem>>, vector<1x32xf32>
    %442 = vector.broadcast %441 : vector<1x32xf32> to vector<8x32xf32>
    %443 = arith.addf %440, %442 : vector<8x32xf32>
    %c0_442 = arith.constant 0 : index
    %c0_443 = arith.constant 0 : index
    %c0_444 = arith.constant 0 : index
    %444 = vector.load %arg27[%c0_442, %c0_443, %c0_444] : memref<10x10x40xf32, #tpu.memory_space<vmem>>, vector<1x8x40xf32>
    %445 = vector.shape_cast %444 : vector<1x8x40xf32> to vector<8x40xf32>
    %c0_445 = arith.constant 0 : index
    %c0_446 = arith.constant 0 : index
    %c0_447 = arith.constant 0 : index
    %446 = vector.load %arg10[%c0_445, %c0_446, %c0_447] : memref<9x40x32xf32, #tpu.memory_space<vmem>>, vector<1x40x32xf32>
    %447 = vector.shape_cast %446 : vector<1x40x32xf32> to vector<40x32xf32>
    %cst_448 = arith.constant dense<0.000000e+00> : vector<8x32xf32>
    %448 = tpu.matmul %445, %447, %cst_448 {dimension_numbers = #tpu.dot_dimension_numbers<[1], [0], [0], [1], [0, 0, 1, 1], [], []>} : vector<8x40xf32>, vector<40x32xf32>, vector<8x32xf32> -> vector<8x32xf32>
    %449 = arith.addf %443, %448 : vector<8x32xf32>
    %c0_449 = arith.constant 0 : index
    %c1_450 = arith.constant 1 : index
    %c0_451 = arith.constant 0 : index
    %450 = vector.load %arg27[%c0_449, %c1_450, %c0_451] : memref<10x10x40xf32, #tpu.memory_space<vmem>>, vector<1x8x40xf32>
    %451 = vector.shape_cast %450 : vector<1x8x40xf32> to vector<8x40xf32>
    %c1_452 = arith.constant 1 : index
    %c0_453 = arith.constant 0 : index
    %c0_454 = arith.constant 0 : index
    %452 = vector.load %arg10[%c1_452, %c0_453, %c0_454] : memref<9x40x32xf32, #tpu.memory_space<vmem>>, vector<1x40x32xf32>
    %453 = vector.shape_cast %452 : vector<1x40x32xf32> to vector<40x32xf32>
    %cst_455 = arith.constant dense<0.000000e+00> : vector<8x32xf32>
    %454 = tpu.matmul %451, %453, %cst_455 {dimension_numbers = #tpu.dot_dimension_numbers<[1], [0], [0], [1], [0, 0, 1, 1], [], []>} : vector<8x40xf32>, vector<40x32xf32>, vector<8x32xf32> -> vector<8x32xf32>
    %455 = arith.addf %449, %454 : vector<8x32xf32>
    %c0_456 = arith.constant 0 : index
    %c2_457 = arith.constant 2 : index
    %c0_458 = arith.constant 0 : index
    %456 = vector.load %arg27[%c0_456, %c2_457, %c0_458] : memref<10x10x40xf32, #tpu.memory_space<vmem>>, vector<1x8x40xf32>
    %457 = vector.shape_cast %456 : vector<1x8x40xf32> to vector<8x40xf32>
    %c2_459 = arith.constant 2 : index
    %c0_460 = arith.constant 0 : index
    %c0_461 = arith.constant 0 : index
    %458 = vector.load %arg10[%c2_459, %c0_460, %c0_461] : memref<9x40x32xf32, #tpu.memory_space<vmem>>, vector<1x40x32xf32>
    %459 = vector.shape_cast %458 : vector<1x40x32xf32> to vector<40x32xf32>
    %cst_462 = arith.constant dense<0.000000e+00> : vector<8x32xf32>
    %460 = tpu.matmul %457, %459, %cst_462 {dimension_numbers = #tpu.dot_dimension_numbers<[1], [0], [0], [1], [0, 0, 1, 1], [], []>} : vector<8x40xf32>, vector<40x32xf32>, vector<8x32xf32> -> vector<8x32xf32>
    %461 = arith.addf %455, %460 : vector<8x32xf32>
    %c1_463 = arith.constant 1 : index
    %c0_464 = arith.constant 0 : index
    %c0_465 = arith.constant 0 : index
    %462 = vector.load %arg27[%c1_463, %c0_464, %c0_465] : memref<10x10x40xf32, #tpu.memory_space<vmem>>, vector<1x8x40xf32>
    %463 = vector.shape_cast %462 : vector<1x8x40xf32> to vector<8x40xf32>
    %c3_466 = arith.constant 3 : index
    %c0_467 = arith.constant 0 : index
    %c0_468 = arith.constant 0 : index
    %464 = vector.load %arg10[%c3_466, %c0_467, %c0_468] : memref<9x40x32xf32, #tpu.memory_space<vmem>>, vector<1x40x32xf32>
    %465 = vector.shape_cast %464 : vector<1x40x32xf32> to vector<40x32xf32>
    %cst_469 = arith.constant dense<0.000000e+00> : vector<8x32xf32>
    %466 = tpu.matmul %463, %465, %cst_469 {dimension_numbers = #tpu.dot_dimension_numbers<[1], [0], [0], [1], [0, 0, 1, 1], [], []>} : vector<8x40xf32>, vector<40x32xf32>, vector<8x32xf32> -> vector<8x32xf32>
    %467 = arith.addf %461, %466 : vector<8x32xf32>
    %c1_470 = arith.constant 1 : index
    %c1_471 = arith.constant 1 : index
    %c0_472 = arith.constant 0 : index
    %468 = vector.load %arg27[%c1_470, %c1_471, %c0_472] : memref<10x10x40xf32, #tpu.memory_space<vmem>>, vector<1x8x40xf32>
    %469 = vector.shape_cast %468 : vector<1x8x40xf32> to vector<8x40xf32>
    %c4_473 = arith.constant 4 : index
    %c0_474 = arith.constant 0 : index
    %c0_475 = arith.constant 0 : index
    %470 = vector.load %arg10[%c4_473, %c0_474, %c0_475] : memref<9x40x32xf32, #tpu.memory_space<vmem>>, vector<1x40x32xf32>
    %471 = vector.shape_cast %470 : vector<1x40x32xf32> to vector<40x32xf32>
    %cst_476 = arith.constant dense<0.000000e+00> : vector<8x32xf32>
    %472 = tpu.matmul %469, %471, %cst_476 {dimension_numbers = #tpu.dot_dimension_numbers<[1], [0], [0], [1], [0, 0, 1, 1], [], []>} : vector<8x40xf32>, vector<40x32xf32>, vector<8x32xf32> -> vector<8x32xf32>
    %473 = arith.addf %467, %472 : vector<8x32xf32>
    %c1_477 = arith.constant 1 : index
    %c2_478 = arith.constant 2 : index
    %c0_479 = arith.constant 0 : index
    %474 = vector.load %arg27[%c1_477, %c2_478, %c0_479] : memref<10x10x40xf32, #tpu.memory_space<vmem>>, vector<1x8x40xf32>
    %475 = vector.shape_cast %474 : vector<1x8x40xf32> to vector<8x40xf32>
    %c5_480 = arith.constant 5 : index
    %c0_481 = arith.constant 0 : index
    %c0_482 = arith.constant 0 : index
    %476 = vector.load %arg10[%c5_480, %c0_481, %c0_482] : memref<9x40x32xf32, #tpu.memory_space<vmem>>, vector<1x40x32xf32>
    %477 = vector.shape_cast %476 : vector<1x40x32xf32> to vector<40x32xf32>
    %cst_483 = arith.constant dense<0.000000e+00> : vector<8x32xf32>
    %478 = tpu.matmul %475, %477, %cst_483 {dimension_numbers = #tpu.dot_dimension_numbers<[1], [0], [0], [1], [0, 0, 1, 1], [], []>} : vector<8x40xf32>, vector<40x32xf32>, vector<8x32xf32> -> vector<8x32xf32>
    %479 = arith.addf %473, %478 : vector<8x32xf32>
    %c2_484 = arith.constant 2 : index
    %c0_485 = arith.constant 0 : index
    %c0_486 = arith.constant 0 : index
    %480 = vector.load %arg27[%c2_484, %c0_485, %c0_486] : memref<10x10x40xf32, #tpu.memory_space<vmem>>, vector<1x8x40xf32>
    %481 = vector.shape_cast %480 : vector<1x8x40xf32> to vector<8x40xf32>
    %c6_487 = arith.constant 6 : index
    %c0_488 = arith.constant 0 : index
    %c0_489 = arith.constant 0 : index
    %482 = vector.load %arg10[%c6_487, %c0_488, %c0_489] : memref<9x40x32xf32, #tpu.memory_space<vmem>>, vector<1x40x32xf32>
    %483 = vector.shape_cast %482 : vector<1x40x32xf32> to vector<40x32xf32>
    %cst_490 = arith.constant dense<0.000000e+00> : vector<8x32xf32>
    %484 = tpu.matmul %481, %483, %cst_490 {dimension_numbers = #tpu.dot_dimension_numbers<[1], [0], [0], [1], [0, 0, 1, 1], [], []>} : vector<8x40xf32>, vector<40x32xf32>, vector<8x32xf32> -> vector<8x32xf32>
    %485 = arith.addf %479, %484 : vector<8x32xf32>
    %c2_491 = arith.constant 2 : index
    %c1_492 = arith.constant 1 : index
    %c0_493 = arith.constant 0 : index
    %486 = vector.load %arg27[%c2_491, %c1_492, %c0_493] : memref<10x10x40xf32, #tpu.memory_space<vmem>>, vector<1x8x40xf32>
    %487 = vector.shape_cast %486 : vector<1x8x40xf32> to vector<8x40xf32>
    %c7_494 = arith.constant 7 : index
    %c0_495 = arith.constant 0 : index
    %c0_496 = arith.constant 0 : index
    %488 = vector.load %arg10[%c7_494, %c0_495, %c0_496] : memref<9x40x32xf32, #tpu.memory_space<vmem>>, vector<1x40x32xf32>
    %489 = vector.shape_cast %488 : vector<1x40x32xf32> to vector<40x32xf32>
    %cst_497 = arith.constant dense<0.000000e+00> : vector<8x32xf32>
    %490 = tpu.matmul %487, %489, %cst_497 {dimension_numbers = #tpu.dot_dimension_numbers<[1], [0], [0], [1], [0, 0, 1, 1], [], []>} : vector<8x40xf32>, vector<40x32xf32>, vector<8x32xf32> -> vector<8x32xf32>
    %491 = arith.addf %485, %490 : vector<8x32xf32>
    %c2_498 = arith.constant 2 : index
    %c2_499 = arith.constant 2 : index
    %c0_500 = arith.constant 0 : index
    %492 = vector.load %arg27[%c2_498, %c2_499, %c0_500] : memref<10x10x40xf32, #tpu.memory_space<vmem>>, vector<1x8x40xf32>
    %493 = vector.shape_cast %492 : vector<1x8x40xf32> to vector<8x40xf32>
    %c8_501 = arith.constant 8 : index
    %c0_502 = arith.constant 0 : index
    %c0_503 = arith.constant 0 : index
    %494 = vector.load %arg10[%c8_501, %c0_502, %c0_503] : memref<9x40x32xf32, #tpu.memory_space<vmem>>, vector<1x40x32xf32>
    %495 = vector.shape_cast %494 : vector<1x40x32xf32> to vector<40x32xf32>
    %cst_504 = arith.constant dense<0.000000e+00> : vector<8x32xf32>
    %496 = tpu.matmul %493, %495, %cst_504 {dimension_numbers = #tpu.dot_dimension_numbers<[1], [0], [0], [1], [0, 0, 1, 1], [], []>} : vector<8x40xf32>, vector<40x32xf32>, vector<8x32xf32> -> vector<8x32xf32>
    %497 = arith.addf %491, %496 : vector<8x32xf32>
    %cst_505 = arith.constant 0.000000e+00 : f32
    %498 = vector.broadcast %cst_505 : f32 to vector<8x32xf32>
    %c0_506 = arith.constant 0 : index
    %c0_507 = arith.constant 0 : index
    %499 = vector.load %arg11[%c0_506, %c0_507] : memref<1x32xf32, #tpu.memory_space<vmem>>, vector<1x32xf32>
    %500 = vector.broadcast %499 : vector<1x32xf32> to vector<8x32xf32>
    %501 = arith.addf %498, %500 : vector<8x32xf32>
    %c1_508 = arith.constant 1 : index
    %c0_509 = arith.constant 0 : index
    %c0_510 = arith.constant 0 : index
    %502 = vector.load %arg27[%c1_508, %c0_509, %c0_510] : memref<10x10x40xf32, #tpu.memory_space<vmem>>, vector<1x8x40xf32>
    %503 = vector.shape_cast %502 : vector<1x8x40xf32> to vector<8x40xf32>
    %c0_511 = arith.constant 0 : index
    %c0_512 = arith.constant 0 : index
    %c0_513 = arith.constant 0 : index
    %504 = vector.load %arg10[%c0_511, %c0_512, %c0_513] : memref<9x40x32xf32, #tpu.memory_space<vmem>>, vector<1x40x32xf32>
    %505 = vector.shape_cast %504 : vector<1x40x32xf32> to vector<40x32xf32>
    %cst_514 = arith.constant dense<0.000000e+00> : vector<8x32xf32>
    %506 = tpu.matmul %503, %505, %cst_514 {dimension_numbers = #tpu.dot_dimension_numbers<[1], [0], [0], [1], [0, 0, 1, 1], [], []>} : vector<8x40xf32>, vector<40x32xf32>, vector<8x32xf32> -> vector<8x32xf32>
    %507 = arith.addf %501, %506 : vector<8x32xf32>
    %c1_515 = arith.constant 1 : index
    %c1_516 = arith.constant 1 : index
    %c0_517 = arith.constant 0 : index
    %508 = vector.load %arg27[%c1_515, %c1_516, %c0_517] : memref<10x10x40xf32, #tpu.memory_space<vmem>>, vector<1x8x40xf32>
    %509 = vector.shape_cast %508 : vector<1x8x40xf32> to vector<8x40xf32>
    %c1_518 = arith.constant 1 : index
    %c0_519 = arith.constant 0 : index
    %c0_520 = arith.constant 0 : index
    %510 = vector.load %arg10[%c1_518, %c0_519, %c0_520] : memref<9x40x32xf32, #tpu.memory_space<vmem>>, vector<1x40x32xf32>
    %511 = vector.shape_cast %510 : vector<1x40x32xf32> to vector<40x32xf32>
    %cst_521 = arith.constant dense<0.000000e+00> : vector<8x32xf32>
    %512 = tpu.matmul %509, %511, %cst_521 {dimension_numbers = #tpu.dot_dimension_numbers<[1], [0], [0], [1], [0, 0, 1, 1], [], []>} : vector<8x40xf32>, vector<40x32xf32>, vector<8x32xf32> -> vector<8x32xf32>
    %513 = arith.addf %507, %512 : vector<8x32xf32>
    %c1_522 = arith.constant 1 : index
    %c2_523 = arith.constant 2 : index
    %c0_524 = arith.constant 0 : index
    %514 = vector.load %arg27[%c1_522, %c2_523, %c0_524] : memref<10x10x40xf32, #tpu.memory_space<vmem>>, vector<1x8x40xf32>
    %515 = vector.shape_cast %514 : vector<1x8x40xf32> to vector<8x40xf32>
    %c2_525 = arith.constant 2 : index
    %c0_526 = arith.constant 0 : index
    %c0_527 = arith.constant 0 : index
    %516 = vector.load %arg10[%c2_525, %c0_526, %c0_527] : memref<9x40x32xf32, #tpu.memory_space<vmem>>, vector<1x40x32xf32>
    %517 = vector.shape_cast %516 : vector<1x40x32xf32> to vector<40x32xf32>
    %cst_528 = arith.constant dense<0.000000e+00> : vector<8x32xf32>
    %518 = tpu.matmul %515, %517, %cst_528 {dimension_numbers = #tpu.dot_dimension_numbers<[1], [0], [0], [1], [0, 0, 1, 1], [], []>} : vector<8x40xf32>, vector<40x32xf32>, vector<8x32xf32> -> vector<8x32xf32>
    %519 = arith.addf %513, %518 : vector<8x32xf32>
    %c2_529 = arith.constant 2 : index
    %c0_530 = arith.constant 0 : index
    %c0_531 = arith.constant 0 : index
    %520 = vector.load %arg27[%c2_529, %c0_530, %c0_531] : memref<10x10x40xf32, #tpu.memory_space<vmem>>, vector<1x8x40xf32>
    %521 = vector.shape_cast %520 : vector<1x8x40xf32> to vector<8x40xf32>
    %c3_532 = arith.constant 3 : index
    %c0_533 = arith.constant 0 : index
    %c0_534 = arith.constant 0 : index
    %522 = vector.load %arg10[%c3_532, %c0_533, %c0_534] : memref<9x40x32xf32, #tpu.memory_space<vmem>>, vector<1x40x32xf32>
    %523 = vector.shape_cast %522 : vector<1x40x32xf32> to vector<40x32xf32>
    %cst_535 = arith.constant dense<0.000000e+00> : vector<8x32xf32>
    %524 = tpu.matmul %521, %523, %cst_535 {dimension_numbers = #tpu.dot_dimension_numbers<[1], [0], [0], [1], [0, 0, 1, 1], [], []>} : vector<8x40xf32>, vector<40x32xf32>, vector<8x32xf32> -> vector<8x32xf32>
    %525 = arith.addf %519, %524 : vector<8x32xf32>
    %c2_536 = arith.constant 2 : index
    %c1_537 = arith.constant 1 : index
    %c0_538 = arith.constant 0 : index
    %526 = vector.load %arg27[%c2_536, %c1_537, %c0_538] : memref<10x10x40xf32, #tpu.memory_space<vmem>>, vector<1x8x40xf32>
    %527 = vector.shape_cast %526 : vector<1x8x40xf32> to vector<8x40xf32>
    %c4_539 = arith.constant 4 : index
    %c0_540 = arith.constant 0 : index
    %c0_541 = arith.constant 0 : index
    %528 = vector.load %arg10[%c4_539, %c0_540, %c0_541] : memref<9x40x32xf32, #tpu.memory_space<vmem>>, vector<1x40x32xf32>
    %529 = vector.shape_cast %528 : vector<1x40x32xf32> to vector<40x32xf32>
    %cst_542 = arith.constant dense<0.000000e+00> : vector<8x32xf32>
    %530 = tpu.matmul %527, %529, %cst_542 {dimension_numbers = #tpu.dot_dimension_numbers<[1], [0], [0], [1], [0, 0, 1, 1], [], []>} : vector<8x40xf32>, vector<40x32xf32>, vector<8x32xf32> -> vector<8x32xf32>
    %531 = arith.addf %525, %530 : vector<8x32xf32>
    %c2_543 = arith.constant 2 : index
    %c2_544 = arith.constant 2 : index
    %c0_545 = arith.constant 0 : index
    %532 = vector.load %arg27[%c2_543, %c2_544, %c0_545] : memref<10x10x40xf32, #tpu.memory_space<vmem>>, vector<1x8x40xf32>
    %533 = vector.shape_cast %532 : vector<1x8x40xf32> to vector<8x40xf32>
    %c5_546 = arith.constant 5 : index
    %c0_547 = arith.constant 0 : index
    %c0_548 = arith.constant 0 : index
    %534 = vector.load %arg10[%c5_546, %c0_547, %c0_548] : memref<9x40x32xf32, #tpu.memory_space<vmem>>, vector<1x40x32xf32>
    %535 = vector.shape_cast %534 : vector<1x40x32xf32> to vector<40x32xf32>
    %cst_549 = arith.constant dense<0.000000e+00> : vector<8x32xf32>
    %536 = tpu.matmul %533, %535, %cst_549 {dimension_numbers = #tpu.dot_dimension_numbers<[1], [0], [0], [1], [0, 0, 1, 1], [], []>} : vector<8x40xf32>, vector<40x32xf32>, vector<8x32xf32> -> vector<8x32xf32>
    %537 = arith.addf %531, %536 : vector<8x32xf32>
    %c3_550 = arith.constant 3 : index
    %c0_551 = arith.constant 0 : index
    %c0_552 = arith.constant 0 : index
    %538 = vector.load %arg27[%c3_550, %c0_551, %c0_552] : memref<10x10x40xf32, #tpu.memory_space<vmem>>, vector<1x8x40xf32>
    %539 = vector.shape_cast %538 : vector<1x8x40xf32> to vector<8x40xf32>
    %c6_553 = arith.constant 6 : index
    %c0_554 = arith.constant 0 : index
    %c0_555 = arith.constant 0 : index
    %540 = vector.load %arg10[%c6_553, %c0_554, %c0_555] : memref<9x40x32xf32, #tpu.memory_space<vmem>>, vector<1x40x32xf32>
    %541 = vector.shape_cast %540 : vector<1x40x32xf32> to vector<40x32xf32>
    %cst_556 = arith.constant dense<0.000000e+00> : vector<8x32xf32>
    %542 = tpu.matmul %539, %541, %cst_556 {dimension_numbers = #tpu.dot_dimension_numbers<[1], [0], [0], [1], [0, 0, 1, 1], [], []>} : vector<8x40xf32>, vector<40x32xf32>, vector<8x32xf32> -> vector<8x32xf32>
    %543 = arith.addf %537, %542 : vector<8x32xf32>
    %c3_557 = arith.constant 3 : index
    %c1_558 = arith.constant 1 : index
    %c0_559 = arith.constant 0 : index
    %544 = vector.load %arg27[%c3_557, %c1_558, %c0_559] : memref<10x10x40xf32, #tpu.memory_space<vmem>>, vector<1x8x40xf32>
    %545 = vector.shape_cast %544 : vector<1x8x40xf32> to vector<8x40xf32>
    %c7_560 = arith.constant 7 : index
    %c0_561 = arith.constant 0 : index
    %c0_562 = arith.constant 0 : index
    %546 = vector.load %arg10[%c7_560, %c0_561, %c0_562] : memref<9x40x32xf32, #tpu.memory_space<vmem>>, vector<1x40x32xf32>
    %547 = vector.shape_cast %546 : vector<1x40x32xf32> to vector<40x32xf32>
    %cst_563 = arith.constant dense<0.000000e+00> : vector<8x32xf32>
    %548 = tpu.matmul %545, %547, %cst_563 {dimension_numbers = #tpu.dot_dimension_numbers<[1], [0], [0], [1], [0, 0, 1, 1], [], []>} : vector<8x40xf32>, vector<40x32xf32>, vector<8x32xf32> -> vector<8x32xf32>
    %549 = arith.addf %543, %548 : vector<8x32xf32>
    %c3_564 = arith.constant 3 : index
    %c2_565 = arith.constant 2 : index
    %c0_566 = arith.constant 0 : index
    %550 = vector.load %arg27[%c3_564, %c2_565, %c0_566] : memref<10x10x40xf32, #tpu.memory_space<vmem>>, vector<1x8x40xf32>
    %551 = vector.shape_cast %550 : vector<1x8x40xf32> to vector<8x40xf32>
    %c8_567 = arith.constant 8 : index
    %c0_568 = arith.constant 0 : index
    %c0_569 = arith.constant 0 : index
    %552 = vector.load %arg10[%c8_567, %c0_568, %c0_569] : memref<9x40x32xf32, #tpu.memory_space<vmem>>, vector<1x40x32xf32>
    %553 = vector.shape_cast %552 : vector<1x40x32xf32> to vector<40x32xf32>
    %cst_570 = arith.constant dense<0.000000e+00> : vector<8x32xf32>
    %554 = tpu.matmul %551, %553, %cst_570 {dimension_numbers = #tpu.dot_dimension_numbers<[1], [0], [0], [1], [0, 0, 1, 1], [], []>} : vector<8x40xf32>, vector<40x32xf32>, vector<8x32xf32> -> vector<8x32xf32>
    %555 = arith.addf %549, %554 : vector<8x32xf32>
    %556 = arith.maximumf %497, %555 : vector<8x32xf32>
    %c0_571 = arith.constant 0 : index
    %c0_572 = arith.constant 0 : index
    %557 = vector.load %arg12[%c0_571, %c0_572] : memref<4x8xf32, #tpu.memory_space<vmem>>, vector<4x8xf32>
    %cst_573 = arith.constant dense<0.000000e+00> : vector<4x32xf32>
    %558 = tpu.matmul %557, %556, %cst_573 {dimension_numbers = #tpu.dot_dimension_numbers<[1], [0], [0], [1], [0, 0, 1, 1], [], []>} : vector<4x8xf32>, vector<8x32xf32>, vector<4x32xf32> -> vector<4x32xf32>
    %c0_574 = arith.constant 0 : index
    %c0_575 = arith.constant 0 : index
    %559 = vector.load %arg13[%c0_574, %c0_575] : memref<4x8xf32, #tpu.memory_space<vmem>>, vector<4x8xf32>
    %cst_576 = arith.constant dense<0.000000e+00> : vector<4x32xf32>
    %560 = tpu.matmul %559, %556, %cst_576 {dimension_numbers = #tpu.dot_dimension_numbers<[1], [0], [0], [1], [0, 0, 1, 1], [], []>} : vector<4x8xf32>, vector<8x32xf32>, vector<4x32xf32> -> vector<4x32xf32>
    %561 = arith.maximumf %558, %560 : vector<4x32xf32>
    %c0_577 = arith.constant 0 : index
    %c0_578 = arith.constant 0 : index
    %562 = vector.load %arg14[%c0_577, %c0_578] : memref<32x16xf32, #tpu.memory_space<vmem>>, vector<32x16xf32>
    %cst_579 = arith.constant dense<0.000000e+00> : vector<4x16xf32>
    %563 = tpu.matmul %561, %562, %cst_579 {dimension_numbers = #tpu.dot_dimension_numbers<[1], [0], [0], [1], [0, 0, 1, 1], [], []>} : vector<4x32xf32>, vector<32x16xf32>, vector<4x16xf32> -> vector<4x16xf32>
    %c0_580 = arith.constant 0 : index
    %c0_581 = arith.constant 0 : index
    %564 = vector.load %arg15[%c0_580, %c0_581] : memref<32x16xf32, #tpu.memory_space<vmem>>, vector<32x16xf32>
    %cst_582 = arith.constant dense<0.000000e+00> : vector<4x16xf32>
    %565 = tpu.matmul %561, %564, %cst_582 {dimension_numbers = #tpu.dot_dimension_numbers<[1], [0], [0], [1], [0, 0, 1, 1], [], []>} : vector<4x32xf32>, vector<32x16xf32>, vector<4x16xf32> -> vector<4x16xf32>
    %566 = arith.maximumf %563, %565 : vector<4x16xf32>
    %cst_583 = arith.constant 0.000000e+00 : f32
    %567 = vector.broadcast %cst_583 : f32 to vector<4x16xf32>
    %568 = arith.maximumf %566, %567 : vector<4x16xf32>
    %c0_584 = arith.constant 0 : index
    %c0_585 = arith.constant 0 : index
    %c0_586 = arith.constant 0 : index
    %569 = vector.load %arg28[%c0_584, %c0_585, %c0_586] : memref<4x4x16xf32, #tpu.memory_space<vmem>>, vector<1x4x16xf32>
    %570 = vector.shape_cast %569 : vector<1x4x16xf32> to vector<4x16xf32>
    %571 = vector.shape_cast %568 : vector<4x16xf32> to vector<1x4x16xf32>
    tpu.vector_store %arg28[%c0_584, %c0_585, %c0_586], %571 {strides = array<i32>} : memref<4x4x16xf32, #tpu.memory_space<vmem>>, vector<1x4x16xf32>,
    %cst_587 = arith.constant 0.000000e+00 : f32
    %572 = vector.broadcast %cst_587 : f32 to vector<8x32xf32>
    %c0_588 = arith.constant 0 : index
    %c0_589 = arith.constant 0 : index
    %573 = vector.load %arg11[%c0_588, %c0_589] : memref<1x32xf32, #tpu.memory_space<vmem>>, vector<1x32xf32>
    %574 = vector.broadcast %573 : vector<1x32xf32> to vector<8x32xf32>
    %575 = arith.addf %572, %574 : vector<8x32xf32>
    %c2_590 = arith.constant 2 : index
    %c0_591 = arith.constant 0 : index
    %c0_592 = arith.constant 0 : index
    %576 = vector.load %arg27[%c2_590, %c0_591, %c0_592] : memref<10x10x40xf32, #tpu.memory_space<vmem>>, vector<1x8x40xf32>
    %577 = vector.shape_cast %576 : vector<1x8x40xf32> to vector<8x40xf32>
    %c0_593 = arith.constant 0 : index
    %c0_594 = arith.constant 0 : index
    %c0_595 = arith.constant 0 : index
    %578 = vector.load %arg10[%c0_593, %c0_594, %c0_595] : memref<9x40x32xf32, #tpu.memory_space<vmem>>, vector<1x40x32xf32>
    %579 = vector.shape_cast %578 : vector<1x40x32xf32> to vector<40x32xf32>
    %cst_596 = arith.constant dense<0.000000e+00> : vector<8x32xf32>
    %580 = tpu.matmul %577, %579, %cst_596 {dimension_numbers = #tpu.dot_dimension_numbers<[1], [0], [0], [1], [0, 0, 1, 1], [], []>} : vector<8x40xf32>, vector<40x32xf32>, vector<8x32xf32> -> vector<8x32xf32>
    %581 = arith.addf %575, %580 : vector<8x32xf32>
    %c2_597 = arith.constant 2 : index
    %c1_598 = arith.constant 1 : index
    %c0_599 = arith.constant 0 : index
    %582 = vector.load %arg27[%c2_597, %c1_598, %c0_599] : memref<10x10x40xf32, #tpu.memory_space<vmem>>, vector<1x8x40xf32>
    %583 = vector.shape_cast %582 : vector<1x8x40xf32> to vector<8x40xf32>
    %c1_600 = arith.constant 1 : index
    %c0_601 = arith.constant 0 : index
    %c0_602 = arith.constant 0 : index
    %584 = vector.load %arg10[%c1_600, %c0_601, %c0_602] : memref<9x40x32xf32, #tpu.memory_space<vmem>>, vector<1x40x32xf32>
    %585 = vector.shape_cast %584 : vector<1x40x32xf32> to vector<40x32xf32>
    %cst_603 = arith.constant dense<0.000000e+00> : vector<8x32xf32>
    %586 = tpu.matmul %583, %585, %cst_603 {dimension_numbers = #tpu.dot_dimension_numbers<[1], [0], [0], [1], [0, 0, 1, 1], [], []>} : vector<8x40xf32>, vector<40x32xf32>, vector<8x32xf32> -> vector<8x32xf32>
    %587 = arith.addf %581, %586 : vector<8x32xf32>
    %c2_604 = arith.constant 2 : index
    %c2_605 = arith.constant 2 : index
    %c0_606 = arith.constant 0 : index
    %588 = vector.load %arg27[%c2_604, %c2_605, %c0_606] : memref<10x10x40xf32, #tpu.memory_space<vmem>>, vector<1x8x40xf32>
    %589 = vector.shape_cast %588 : vector<1x8x40xf32> to vector<8x40xf32>
    %c2_607 = arith.constant 2 : index
    %c0_608 = arith.constant 0 : index
    %c0_609 = arith.constant 0 : index
    %590 = vector.load %arg10[%c2_607, %c0_608, %c0_609] : memref<9x40x32xf32, #tpu.memory_space<vmem>>, vector<1x40x32xf32>
    %591 = vector.shape_cast %590 : vector<1x40x32xf32> to vector<40x32xf32>
    %cst_610 = arith.constant dense<0.000000e+00> : vector<8x32xf32>
    %592 = tpu.matmul %589, %591, %cst_610 {dimension_numbers = #tpu.dot_dimension_numbers<[1], [0], [0], [1], [0, 0, 1, 1], [], []>} : vector<8x40xf32>, vector<40x32xf32>, vector<8x32xf32> -> vector<8x32xf32>
    %593 = arith.addf %587, %592 : vector<8x32xf32>
    %c3_611 = arith.constant 3 : index
    %c0_612 = arith.constant 0 : index
    %c0_613 = arith.constant 0 : index
    %594 = vector.load %arg27[%c3_611, %c0_612, %c0_613] : memref<10x10x40xf32, #tpu.memory_space<vmem>>, vector<1x8x40xf32>
    %595 = vector.shape_cast %594 : vector<1x8x40xf32> to vector<8x40xf32>
    %c3_614 = arith.constant 3 : index
    %c0_615 = arith.constant 0 : index
    %c0_616 = arith.constant 0 : index
    %596 = vector.load %arg10[%c3_614, %c0_615, %c0_616] : memref<9x40x32xf32, #tpu.memory_space<vmem>>, vector<1x40x32xf32>
    %597 = vector.shape_cast %596 : vector<1x40x32xf32> to vector<40x32xf32>
    %cst_617 = arith.constant dense<0.000000e+00> : vector<8x32xf32>
    %598 = tpu.matmul %595, %597, %cst_617 {dimension_numbers = #tpu.dot_dimension_numbers<[1], [0], [0], [1], [0, 0, 1, 1], [], []>} : vector<8x40xf32>, vector<40x32xf32>, vector<8x32xf32> -> vector<8x32xf32>
    %599 = arith.addf %593, %598 : vector<8x32xf32>
    %c3_618 = arith.constant 3 : index
    %c1_619 = arith.constant 1 : index
    %c0_620 = arith.constant 0 : index
    %600 = vector.load %arg27[%c3_618, %c1_619, %c0_620] : memref<10x10x40xf32, #tpu.memory_space<vmem>>, vector<1x8x40xf32>
    %601 = vector.shape_cast %600 : vector<1x8x40xf32> to vector<8x40xf32>
    %c4_621 = arith.constant 4 : index
    %c0_622 = arith.constant 0 : index
    %c0_623 = arith.constant 0 : index
    %602 = vector.load %arg10[%c4_621, %c0_622, %c0_623] : memref<9x40x32xf32, #tpu.memory_space<vmem>>, vector<1x40x32xf32>
    %603 = vector.shape_cast %602 : vector<1x40x32xf32> to vector<40x32xf32>
    %cst_624 = arith.constant dense<0.000000e+00> : vector<8x32xf32>
    %604 = tpu.matmul %601, %603, %cst_624 {dimension_numbers = #tpu.dot_dimension_numbers<[1], [0], [0], [1], [0, 0, 1, 1], [], []>} : vector<8x40xf32>, vector<40x32xf32>, vector<8x32xf32> -> vector<8x32xf32>
    %605 = arith.addf %599, %604 : vector<8x32xf32>
    %c3_625 = arith.constant 3 : index
    %c2_626 = arith.constant 2 : index
    %c0_627 = arith.constant 0 : index
    %606 = vector.load %arg27[%c3_625, %c2_626, %c0_627] : memref<10x10x40xf32, #tpu.memory_space<vmem>>, vector<1x8x40xf32>
    %607 = vector.shape_cast %606 : vector<1x8x40xf32> to vector<8x40xf32>
    %c5_628 = arith.constant 5 : index
    %c0_629 = arith.constant 0 : index
    %c0_630 = arith.constant 0 : index
    %608 = vector.load %arg10[%c5_628, %c0_629, %c0_630] : memref<9x40x32xf32, #tpu.memory_space<vmem>>, vector<1x40x32xf32>
    %609 = vector.shape_cast %608 : vector<1x40x32xf32> to vector<40x32xf32>
    %cst_631 = arith.constant dense<0.000000e+00> : vector<8x32xf32>
    %610 = tpu.matmul %607, %609, %cst_631 {dimension_numbers = #tpu.dot_dimension_numbers<[1], [0], [0], [1], [0, 0, 1, 1], [], []>} : vector<8x40xf32>, vector<40x32xf32>, vector<8x32xf32> -> vector<8x32xf32>
    %611 = arith.addf %605, %610 : vector<8x32xf32>
    %c4_632 = arith.constant 4 : index
    %c0_633 = arith.constant 0 : index
    %c0_634 = arith.constant 0 : index
    %612 = vector.load %arg27[%c4_632, %c0_633, %c0_634] : memref<10x10x40xf32, #tpu.memory_space<vmem>>, vector<1x8x40xf32>
    %613 = vector.shape_cast %612 : vector<1x8x40xf32> to vector<8x40xf32>
    %c6_635 = arith.constant 6 : index
    %c0_636 = arith.constant 0 : index
    %c0_637 = arith.constant 0 : index
    %614 = vector.load %arg10[%c6_635, %c0_636, %c0_637] : memref<9x40x32xf32, #tpu.memory_space<vmem>>, vector<1x40x32xf32>
    %615 = vector.shape_cast %614 : vector<1x40x32xf32> to vector<40x32xf32>
    %cst_638 = arith.constant dense<0.000000e+00> : vector<8x32xf32>
    %616 = tpu.matmul %613, %615, %cst_638 {dimension_numbers = #tpu.dot_dimension_numbers<[1], [0], [0], [1], [0, 0, 1, 1], [], []>} : vector<8x40xf32>, vector<40x32xf32>, vector<8x32xf32> -> vector<8x32xf32>
    %617 = arith.addf %611, %616 : vector<8x32xf32>
    %c4_639 = arith.constant 4 : index
    %c1_640 = arith.constant 1 : index
    %c0_641 = arith.constant 0 : index
    %618 = vector.load %arg27[%c4_639, %c1_640, %c0_641] : memref<10x10x40xf32, #tpu.memory_space<vmem>>, vector<1x8x40xf32>
    %619 = vector.shape_cast %618 : vector<1x8x40xf32> to vector<8x40xf32>
    %c7_642 = arith.constant 7 : index
    %c0_643 = arith.constant 0 : index
    %c0_644 = arith.constant 0 : index
    %620 = vector.load %arg10[%c7_642, %c0_643, %c0_644] : memref<9x40x32xf32, #tpu.memory_space<vmem>>, vector<1x40x32xf32>
    %621 = vector.shape_cast %620 : vector<1x40x32xf32> to vector<40x32xf32>
    %cst_645 = arith.constant dense<0.000000e+00> : vector<8x32xf32>
    %622 = tpu.matmul %619, %621, %cst_645 {dimension_numbers = #tpu.dot_dimension_numbers<[1], [0], [0], [1], [0, 0, 1, 1], [], []>} : vector<8x40xf32>, vector<40x32xf32>, vector<8x32xf32> -> vector<8x32xf32>
    %623 = arith.addf %617, %622 : vector<8x32xf32>
    %c4_646 = arith.constant 4 : index
    %c2_647 = arith.constant 2 : index
    %c0_648 = arith.constant 0 : index
    %624 = vector.load %arg27[%c4_646, %c2_647, %c0_648] : memref<10x10x40xf32, #tpu.memory_space<vmem>>, vector<1x8x40xf32>
    %625 = vector.shape_cast %624 : vector<1x8x40xf32> to vector<8x40xf32>
    %c8_649 = arith.constant 8 : index
    %c0_650 = arith.constant 0 : index
    %c0_651 = arith.constant 0 : index
    %626 = vector.load %arg10[%c8_649, %c0_650, %c0_651] : memref<9x40x32xf32, #tpu.memory_space<vmem>>, vector<1x40x32xf32>
    %627 = vector.shape_cast %626 : vector<1x40x32xf32> to vector<40x32xf32>
    %cst_652 = arith.constant dense<0.000000e+00> : vector<8x32xf32>
    %628 = tpu.matmul %625, %627, %cst_652 {dimension_numbers = #tpu.dot_dimension_numbers<[1], [0], [0], [1], [0, 0, 1, 1], [], []>} : vector<8x40xf32>, vector<40x32xf32>, vector<8x32xf32> -> vector<8x32xf32>
    %629 = arith.addf %623, %628 : vector<8x32xf32>
    %cst_653 = arith.constant 0.000000e+00 : f32
    %630 = vector.broadcast %cst_653 : f32 to vector<8x32xf32>
    %c0_654 = arith.constant 0 : index
    %c0_655 = arith.constant 0 : index
    %631 = vector.load %arg11[%c0_654, %c0_655] : memref<1x32xf32, #tpu.memory_space<vmem>>, vector<1x32xf32>
    %632 = vector.broadcast %631 : vector<1x32xf32> to vector<8x32xf32>
    %633 = arith.addf %630, %632 : vector<8x32xf32>
    %c3_656 = arith.constant 3 : index
    %c0_657 = arith.constant 0 : index
    %c0_658 = arith.constant 0 : index
    %634 = vector.load %arg27[%c3_656, %c0_657, %c0_658] : memref<10x10x40xf32, #tpu.memory_space<vmem>>, vector<1x8x40xf32>
    %635 = vector.shape_cast %634 : vector<1x8x40xf32> to vector<8x40xf32>
    %c0_659 = arith.constant 0 : index
    %c0_660 = arith.constant 0 : index
    %c0_661 = arith.constant 0 : index
    %636 = vector.load %arg10[%c0_659, %c0_660, %c0_661] : memref<9x40x32xf32, #tpu.memory_space<vmem>>, vector<1x40x32xf32>
    %637 = vector.shape_cast %636 : vector<1x40x32xf32> to vector<40x32xf32>
    %cst_662 = arith.constant dense<0.000000e+00> : vector<8x32xf32>
    %638 = tpu.matmul %635, %637, %cst_662 {dimension_numbers = #tpu.dot_dimension_numbers<[1], [0], [0], [1], [0, 0, 1, 1], [], []>} : vector<8x40xf32>, vector<40x32xf32>, vector<8x32xf32> -> vector<8x32xf32>
    %639 = arith.addf %633, %638 : vector<8x32xf32>
    %c3_663 = arith.constant 3 : index
    %c1_664 = arith.constant 1 : index
    %c0_665 = arith.constant 0 : index
    %640 = vector.load %arg27[%c3_663, %c1_664, %c0_665] : memref<10x10x40xf32, #tpu.memory_space<vmem>>, vector<1x8x40xf32>
    %641 = vector.shape_cast %640 : vector<1x8x40xf32> to vector<8x40xf32>
    %c1_666 = arith.constant 1 : index
    %c0_667 = arith.constant 0 : index
    %c0_668 = arith.constant 0 : index
    %642 = vector.load %arg10[%c1_666, %c0_667, %c0_668] : memref<9x40x32xf32, #tpu.memory_space<vmem>>, vector<1x40x32xf32>
    %643 = vector.shape_cast %642 : vector<1x40x32xf32> to vector<40x32xf32>
    %cst_669 = arith.constant dense<0.000000e+00> : vector<8x32xf32>
    %644 = tpu.matmul %641, %643, %cst_669 {dimension_numbers = #tpu.dot_dimension_numbers<[1], [0], [0], [1], [0, 0, 1, 1], [], []>} : vector<8x40xf32>, vector<40x32xf32>, vector<8x32xf32> -> vector<8x32xf32>
    %645 = arith.addf %639, %644 : vector<8x32xf32>
    %c3_670 = arith.constant 3 : index
    %c2_671 = arith.constant 2 : index
    %c0_672 = arith.constant 0 : index
    %646 = vector.load %arg27[%c3_670, %c2_671, %c0_672] : memref<10x10x40xf32, #tpu.memory_space<vmem>>, vector<1x8x40xf32>
    %647 = vector.shape_cast %646 : vector<1x8x40xf32> to vector<8x40xf32>
    %c2_673 = arith.constant 2 : index
    %c0_674 = arith.constant 0 : index
    %c0_675 = arith.constant 0 : index
    %648 = vector.load %arg10[%c2_673, %c0_674, %c0_675] : memref<9x40x32xf32, #tpu.memory_space<vmem>>, vector<1x40x32xf32>
    %649 = vector.shape_cast %648 : vector<1x40x32xf32> to vector<40x32xf32>
    %cst_676 = arith.constant dense<0.000000e+00> : vector<8x32xf32>
    %650 = tpu.matmul %647, %649, %cst_676 {dimension_numbers = #tpu.dot_dimension_numbers<[1], [0], [0], [1], [0, 0, 1, 1], [], []>} : vector<8x40xf32>, vector<40x32xf32>, vector<8x32xf32> -> vector<8x32xf32>
    %651 = arith.addf %645, %650 : vector<8x32xf32>
    %c4_677 = arith.constant 4 : index
    %c0_678 = arith.constant 0 : index
    %c0_679 = arith.constant 0 : index
    %652 = vector.load %arg27[%c4_677, %c0_678, %c0_679] : memref<10x10x40xf32, #tpu.memory_space<vmem>>, vector<1x8x40xf32>
    %653 = vector.shape_cast %652 : vector<1x8x40xf32> to vector<8x40xf32>
    %c3_680 = arith.constant 3 : index
    %c0_681 = arith.constant 0 : index
    %c0_682 = arith.constant 0 : index
    %654 = vector.load %arg10[%c3_680, %c0_681, %c0_682] : memref<9x40x32xf32, #tpu.memory_space<vmem>>, vector<1x40x32xf32>
    %655 = vector.shape_cast %654 : vector<1x40x32xf32> to vector<40x32xf32>
    %cst_683 = arith.constant dense<0.000000e+00> : vector<8x32xf32>
    %656 = tpu.matmul %653, %655, %cst_683 {dimension_numbers = #tpu.dot_dimension_numbers<[1], [0], [0], [1], [0, 0, 1, 1], [], []>} : vector<8x40xf32>, vector<40x32xf32>, vector<8x32xf32> -> vector<8x32xf32>
    %657 = arith.addf %651, %656 : vector<8x32xf32>
    %c4_684 = arith.constant 4 : index
    %c1_685 = arith.constant 1 : index
    %c0_686 = arith.constant 0 : index
    %658 = vector.load %arg27[%c4_684, %c1_685, %c0_686] : memref<10x10x40xf32, #tpu.memory_space<vmem>>, vector<1x8x40xf32>
    %659 = vector.shape_cast %658 : vector<1x8x40xf32> to vector<8x40xf32>
    %c4_687 = arith.constant 4 : index
    %c0_688 = arith.constant 0 : index
    %c0_689 = arith.constant 0 : index
    %660 = vector.load %arg10[%c4_687, %c0_688, %c0_689] : memref<9x40x32xf32, #tpu.memory_space<vmem>>, vector<1x40x32xf32>
    %661 = vector.shape_cast %660 : vector<1x40x32xf32> to vector<40x32xf32>
    %cst_690 = arith.constant dense<0.000000e+00> : vector<8x32xf32>
    %662 = tpu.matmul %659, %661, %cst_690 {dimension_numbers = #tpu.dot_dimension_numbers<[1], [0], [0], [1], [0, 0, 1, 1], [], []>} : vector<8x40xf32>, vector<40x32xf32>, vector<8x32xf32> -> vector<8x32xf32>
    %663 = arith.addf %657, %662 : vector<8x32xf32>
    %c4_691 = arith.constant 4 : index
    %c2_692 = arith.constant 2 : index
    %c0_693 = arith.constant 0 : index
    %664 = vector.load %arg27[%c4_691, %c2_692, %c0_693] : memref<10x10x40xf32, #tpu.memory_space<vmem>>, vector<1x8x40xf32>
    %665 = vector.shape_cast %664 : vector<1x8x40xf32> to vector<8x40xf32>
    %c5_694 = arith.constant 5 : index
    %c0_695 = arith.constant 0 : index
    %c0_696 = arith.constant 0 : index
    %666 = vector.load %arg10[%c5_694, %c0_695, %c0_696] : memref<9x40x32xf32, #tpu.memory_space<vmem>>, vector<1x40x32xf32>
    %667 = vector.shape_cast %666 : vector<1x40x32xf32> to vector<40x32xf32>
    %cst_697 = arith.constant dense<0.000000e+00> : vector<8x32xf32>
    %668 = tpu.matmul %665, %667, %cst_697 {dimension_numbers = #tpu.dot_dimension_numbers<[1], [0], [0], [1], [0, 0, 1, 1], [], []>} : vector<8x40xf32>, vector<40x32xf32>, vector<8x32xf32> -> vector<8x32xf32>
    %669 = arith.addf %663, %668 : vector<8x32xf32>
    %c5_698 = arith.constant 5 : index
    %c0_699 = arith.constant 0 : index
    %c0_700 = arith.constant 0 : index
    %670 = vector.load %arg27[%c5_698, %c0_699, %c0_700] : memref<10x10x40xf32, #tpu.memory_space<vmem>>, vector<1x8x40xf32>
    %671 = vector.shape_cast %670 : vector<1x8x40xf32> to vector<8x40xf32>
    %c6_701 = arith.constant 6 : index
    %c0_702 = arith.constant 0 : index
    %c0_703 = arith.constant 0 : index
    %672 = vector.load %arg10[%c6_701, %c0_702, %c0_703] : memref<9x40x32xf32, #tpu.memory_space<vmem>>, vector<1x40x32xf32>
    %673 = vector.shape_cast %672 : vector<1x40x32xf32> to vector<40x32xf32>
    %cst_704 = arith.constant dense<0.000000e+00> : vector<8x32xf32>
    %674 = tpu.matmul %671, %673, %cst_704 {dimension_numbers = #tpu.dot_dimension_numbers<[1], [0], [0], [1], [0, 0, 1, 1], [], []>} : vector<8x40xf32>, vector<40x32xf32>, vector<8x32xf32> -> vector<8x32xf32>
    %675 = arith.addf %669, %674 : vector<8x32xf32>
    %c5_705 = arith.constant 5 : index
    %c1_706 = arith.constant 1 : index
    %c0_707 = arith.constant 0 : index
    %676 = vector.load %arg27[%c5_705, %c1_706, %c0_707] : memref<10x10x40xf32, #tpu.memory_space<vmem>>, vector<1x8x40xf32>
    %677 = vector.shape_cast %676 : vector<1x8x40xf32> to vector<8x40xf32>
    %c7_708 = arith.constant 7 : index
    %c0_709 = arith.constant 0 : index
    %c0_710 = arith.constant 0 : index
    %678 = vector.load %arg10[%c7_708, %c0_709, %c0_710] : memref<9x40x32xf32, #tpu.memory_space<vmem>>, vector<1x40x32xf32>
    %679 = vector.shape_cast %678 : vector<1x40x32xf32> to vector<40x32xf32>
    %cst_711 = arith.constant dense<0.000000e+00> : vector<8x32xf32>
    %680 = tpu.matmul %677, %679, %cst_711 {dimension_numbers = #tpu.dot_dimension_numbers<[1], [0], [0], [1], [0, 0, 1, 1], [], []>} : vector<8x40xf32>, vector<40x32xf32>, vector<8x32xf32> -> vector<8x32xf32>
    %681 = arith.addf %675, %680 : vector<8x32xf32>
    %c5_712 = arith.constant 5 : index
    %c2_713 = arith.constant 2 : index
    %c0_714 = arith.constant 0 : index
    %682 = vector.load %arg27[%c5_712, %c2_713, %c0_714] : memref<10x10x40xf32, #tpu.memory_space<vmem>>, vector<1x8x40xf32>
    %683 = vector.shape_cast %682 : vector<1x8x40xf32> to vector<8x40xf32>
    %c8_715 = arith.constant 8 : index
    %c0_716 = arith.constant 0 : index
    %c0_717 = arith.constant 0 : index
    %684 = vector.load %arg10[%c8_715, %c0_716, %c0_717] : memref<9x40x32xf32, #tpu.memory_space<vmem>>, vector<1x40x32xf32>
    %685 = vector.shape_cast %684 : vector<1x40x32xf32> to vector<40x32xf32>
    %cst_718 = arith.constant dense<0.000000e+00> : vector<8x32xf32>
    %686 = tpu.matmul %683, %685, %cst_718 {dimension_numbers = #tpu.dot_dimension_numbers<[1], [0], [0], [1], [0, 0, 1, 1], [], []>} : vector<8x40xf32>, vector<40x32xf32>, vector<8x32xf32> -> vector<8x32xf32>
    %687 = arith.addf %681, %686 : vector<8x32xf32>
    %688 = arith.maximumf %629, %687 : vector<8x32xf32>
    %c0_719 = arith.constant 0 : index
    %c0_720 = arith.constant 0 : index
    %689 = vector.load %arg12[%c0_719, %c0_720] : memref<4x8xf32, #tpu.memory_space<vmem>>, vector<4x8xf32>
    %cst_721 = arith.constant dense<0.000000e+00> : vector<4x32xf32>
    %690 = tpu.matmul %689, %688, %cst_721 {dimension_numbers = #tpu.dot_dimension_numbers<[1], [0], [0], [1], [0, 0, 1, 1], [], []>} : vector<4x8xf32>, vector<8x32xf32>, vector<4x32xf32> -> vector<4x32xf32>
    %c0_722 = arith.constant 0 : index
    %c0_723 = arith.constant 0 : index
    %691 = vector.load %arg13[%c0_722, %c0_723] : memref<4x8xf32, #tpu.memory_space<vmem>>, vector<4x8xf32>
    %cst_724 = arith.constant dense<0.000000e+00> : vector<4x32xf32>
    %692 = tpu.matmul %691, %688, %cst_724 {dimension_numbers = #tpu.dot_dimension_numbers<[1], [0], [0], [1], [0, 0, 1, 1], [], []>} : vector<4x8xf32>, vector<8x32xf32>, vector<4x32xf32> -> vector<4x32xf32>
    %693 = arith.maximumf %690, %692 : vector<4x32xf32>
    %c0_725 = arith.constant 0 : index
    %c0_726 = arith.constant 0 : index
    %694 = vector.load %arg14[%c0_725, %c0_726] : memref<32x16xf32, #tpu.memory_space<vmem>>, vector<32x16xf32>
    %cst_727 = arith.constant dense<0.000000e+00> : vector<4x16xf32>
    %695 = tpu.matmul %693, %694, %cst_727 {dimension_numbers = #tpu.dot_dimension_numbers<[1], [0], [0], [1], [0, 0, 1, 1], [], []>} : vector<4x32xf32>, vector<32x16xf32>, vector<4x16xf32> -> vector<4x16xf32>
    %c0_728 = arith.constant 0 : index
    %c0_729 = arith.constant 0 : index
    %696 = vector.load %arg15[%c0_728, %c0_729] : memref<32x16xf32, #tpu.memory_space<vmem>>, vector<32x16xf32>
    %cst_730 = arith.constant dense<0.000000e+00> : vector<4x16xf32>
    %697 = tpu.matmul %693, %696, %cst_730 {dimension_numbers = #tpu.dot_dimension_numbers<[1], [0], [0], [1], [0, 0, 1, 1], [], []>} : vector<4x32xf32>, vector<32x16xf32>, vector<4x16xf32> -> vector<4x16xf32>
    %698 = arith.maximumf %695, %697 : vector<4x16xf32>
    %cst_731 = arith.constant 0.000000e+00 : f32
    %699 = vector.broadcast %cst_731 : f32 to vector<4x16xf32>
    %700 = arith.maximumf %698, %699 : vector<4x16xf32>
    %c1_732 = arith.constant 1 : index
    %c0_733 = arith.constant 0 : index
    %c0_734 = arith.constant 0 : index
    %701 = vector.load %arg28[%c1_732, %c0_733, %c0_734] : memref<4x4x16xf32, #tpu.memory_space<vmem>>, vector<1x4x16xf32>
    %702 = vector.shape_cast %701 : vector<1x4x16xf32> to vector<4x16xf32>
    %703 = vector.shape_cast %700 : vector<4x16xf32> to vector<1x4x16xf32>
    tpu.vector_store %arg28[%c1_732, %c0_733, %c0_734], %703 {strides = array<i32>} : memref<4x4x16xf32, #tpu.memory_space<vmem>>, vector<1x4x16xf32>,
    %cst_735 = arith.constant 0.000000e+00 : f32
    %704 = vector.broadcast %cst_735 : f32 to vector<8x32xf32>
    %c0_736 = arith.constant 0 : index
    %c0_737 = arith.constant 0 : index
    %705 = vector.load %arg11[%c0_736, %c0_737] : memref<1x32xf32, #tpu.memory_space<vmem>>, vector<1x32xf32>
    %706 = vector.broadcast %705 : vector<1x32xf32> to vector<8x32xf32>
    %707 = arith.addf %704, %706 : vector<8x32xf32>
    %c4_738 = arith.constant 4 : index
    %c0_739 = arith.constant 0 : index
    %c0_740 = arith.constant 0 : index
    %708 = vector.load %arg27[%c4_738, %c0_739, %c0_740] : memref<10x10x40xf32, #tpu.memory_space<vmem>>, vector<1x8x40xf32>
    %709 = vector.shape_cast %708 : vector<1x8x40xf32> to vector<8x40xf32>
    %c0_741 = arith.constant 0 : index
    %c0_742 = arith.constant 0 : index
    %c0_743 = arith.constant 0 : index
    %710 = vector.load %arg10[%c0_741, %c0_742, %c0_743] : memref<9x40x32xf32, #tpu.memory_space<vmem>>, vector<1x40x32xf32>
    %711 = vector.shape_cast %710 : vector<1x40x32xf32> to vector<40x32xf32>
    %cst_744 = arith.constant dense<0.000000e+00> : vector<8x32xf32>
    %712 = tpu.matmul %709, %711, %cst_744 {dimension_numbers = #tpu.dot_dimension_numbers<[1], [0], [0], [1], [0, 0, 1, 1], [], []>} : vector<8x40xf32>, vector<40x32xf32>, vector<8x32xf32> -> vector<8x32xf32>
    %713 = arith.addf %707, %712 : vector<8x32xf32>
    %c4_745 = arith.constant 4 : index
    %c1_746 = arith.constant 1 : index
    %c0_747 = arith.constant 0 : index
    %714 = vector.load %arg27[%c4_745, %c1_746, %c0_747] : memref<10x10x40xf32, #tpu.memory_space<vmem>>, vector<1x8x40xf32>
    %715 = vector.shape_cast %714 : vector<1x8x40xf32> to vector<8x40xf32>
    %c1_748 = arith.constant 1 : index
    %c0_749 = arith.constant 0 : index
    %c0_750 = arith.constant 0 : index
    %716 = vector.load %arg10[%c1_748, %c0_749, %c0_750] : memref<9x40x32xf32, #tpu.memory_space<vmem>>, vector<1x40x32xf32>
    %717 = vector.shape_cast %716 : vector<1x40x32xf32> to vector<40x32xf32>
    %cst_751 = arith.constant dense<0.000000e+00> : vector<8x32xf32>
    %718 = tpu.matmul %715, %717, %cst_751 {dimension_numbers = #tpu.dot_dimension_numbers<[1], [0], [0], [1], [0, 0, 1, 1], [], []>} : vector<8x40xf32>, vector<40x32xf32>, vector<8x32xf32> -> vector<8x32xf32>
    %719 = arith.addf %713, %718 : vector<8x32xf32>
    %c4_752 = arith.constant 4 : index
    %c2_753 = arith.constant 2 : index
    %c0_754 = arith.constant 0 : index
    %720 = vector.load %arg27[%c4_752, %c2_753, %c0_754] : memref<10x10x40xf32, #tpu.memory_space<vmem>>, vector<1x8x40xf32>
    %721 = vector.shape_cast %720 : vector<1x8x40xf32> to vector<8x40xf32>
    %c2_755 = arith.constant 2 : index
    %c0_756 = arith.constant 0 : index
    %c0_757 = arith.constant 0 : index
    %722 = vector.load %arg10[%c2_755, %c0_756, %c0_757] : memref<9x40x32xf32, #tpu.memory_space<vmem>>, vector<1x40x32xf32>
    %723 = vector.shape_cast %722 : vector<1x40x32xf32> to vector<40x32xf32>
    %cst_758 = arith.constant dense<0.000000e+00> : vector<8x32xf32>
    %724 = tpu.matmul %721, %723, %cst_758 {dimension_numbers = #tpu.dot_dimension_numbers<[1], [0], [0], [1], [0, 0, 1, 1], [], []>} : vector<8x40xf32>, vector<40x32xf32>, vector<8x32xf32> -> vector<8x32xf32>
    %725 = arith.addf %719, %724 : vector<8x32xf32>
    %c5_759 = arith.constant 5 : index
    %c0_760 = arith.constant 0 : index
    %c0_761 = arith.constant 0 : index
    %726 = vector.load %arg27[%c5_759, %c0_760, %c0_761] : memref<10x10x40xf32, #tpu.memory_space<vmem>>, vector<1x8x40xf32>
    %727 = vector.shape_cast %726 : vector<1x8x40xf32> to vector<8x40xf32>
    %c3_762 = arith.constant 3 : index
    %c0_763 = arith.constant 0 : index
    %c0_764 = arith.constant 0 : index
    %728 = vector.load %arg10[%c3_762, %c0_763, %c0_764] : memref<9x40x32xf32, #tpu.memory_space<vmem>>, vector<1x40x32xf32>
    %729 = vector.shape_cast %728 : vector<1x40x32xf32> to vector<40x32xf32>
    %cst_765 = arith.constant dense<0.000000e+00> : vector<8x32xf32>
    %730 = tpu.matmul %727, %729, %cst_765 {dimension_numbers = #tpu.dot_dimension_numbers<[1], [0], [0], [1], [0, 0, 1, 1], [], []>} : vector<8x40xf32>, vector<40x32xf32>, vector<8x32xf32> -> vector<8x32xf32>
    %731 = arith.addf %725, %730 : vector<8x32xf32>
    %c5_766 = arith.constant 5 : index
    %c1_767 = arith.constant 1 : index
    %c0_768 = arith.constant 0 : index
    %732 = vector.load %arg27[%c5_766, %c1_767, %c0_768] : memref<10x10x40xf32, #tpu.memory_space<vmem>>, vector<1x8x40xf32>
    %733 = vector.shape_cast %732 : vector<1x8x40xf32> to vector<8x40xf32>
    %c4_769 = arith.constant 4 : index
    %c0_770 = arith.constant 0 : index
    %c0_771 = arith.constant 0 : index
    %734 = vector.load %arg10[%c4_769, %c0_770, %c0_771] : memref<9x40x32xf32, #tpu.memory_space<vmem>>, vector<1x40x32xf32>
    %735 = vector.shape_cast %734 : vector<1x40x32xf32> to vector<40x32xf32>
    %cst_772 = arith.constant dense<0.000000e+00> : vector<8x32xf32>
    %736 = tpu.matmul %733, %735, %cst_772 {dimension_numbers = #tpu.dot_dimension_numbers<[1], [0], [0], [1], [0, 0, 1, 1], [], []>} : vector<8x40xf32>, vector<40x32xf32>, vector<8x32xf32> -> vector<8x32xf32>
    %737 = arith.addf %731, %736 : vector<8x32xf32>
    %c5_773 = arith.constant 5 : index
    %c2_774 = arith.constant 2 : index
    %c0_775 = arith.constant 0 : index
    %738 = vector.load %arg27[%c5_773, %c2_774, %c0_775] : memref<10x10x40xf32, #tpu.memory_space<vmem>>, vector<1x8x40xf32>
    %739 = vector.shape_cast %738 : vector<1x8x40xf32> to vector<8x40xf32>
    %c5_776 = arith.constant 5 : index
    %c0_777 = arith.constant 0 : index
    %c0_778 = arith.constant 0 : index
    %740 = vector.load %arg10[%c5_776, %c0_777, %c0_778] : memref<9x40x32xf32, #tpu.memory_space<vmem>>, vector<1x40x32xf32>
    %741 = vector.shape_cast %740 : vector<1x40x32xf32> to vector<40x32xf32>
    %cst_779 = arith.constant dense<0.000000e+00> : vector<8x32xf32>
    %742 = tpu.matmul %739, %741, %cst_779 {dimension_numbers = #tpu.dot_dimension_numbers<[1], [0], [0], [1], [0, 0, 1, 1], [], []>} : vector<8x40xf32>, vector<40x32xf32>, vector<8x32xf32> -> vector<8x32xf32>
    %743 = arith.addf %737, %742 : vector<8x32xf32>
    %c6_780 = arith.constant 6 : index
    %c0_781 = arith.constant 0 : index
    %c0_782 = arith.constant 0 : index
    %744 = vector.load %arg27[%c6_780, %c0_781, %c0_782] : memref<10x10x40xf32, #tpu.memory_space<vmem>>, vector<1x8x40xf32>
    %745 = vector.shape_cast %744 : vector<1x8x40xf32> to vector<8x40xf32>
    %c6_783 = arith.constant 6 : index
    %c0_784 = arith.constant 0 : index
    %c0_785 = arith.constant 0 : index
    %746 = vector.load %arg10[%c6_783, %c0_784, %c0_785] : memref<9x40x32xf32, #tpu.memory_space<vmem>>, vector<1x40x32xf32>
    %747 = vector.shape_cast %746 : vector<1x40x32xf32> to vector<40x32xf32>
    %cst_786 = arith.constant dense<0.000000e+00> : vector<8x32xf32>
    %748 = tpu.matmul %745, %747, %cst_786 {dimension_numbers = #tpu.dot_dimension_numbers<[1], [0], [0], [1], [0, 0, 1, 1], [], []>} : vector<8x40xf32>, vector<40x32xf32>, vector<8x32xf32> -> vector<8x32xf32>
    %749 = arith.addf %743, %748 : vector<8x32xf32>
    %c6_787 = arith.constant 6 : index
    %c1_788 = arith.constant 1 : index
    %c0_789 = arith.constant 0 : index
    %750 = vector.load %arg27[%c6_787, %c1_788, %c0_789] : memref<10x10x40xf32, #tpu.memory_space<vmem>>, vector<1x8x40xf32>
    %751 = vector.shape_cast %750 : vector<1x8x40xf32> to vector<8x40xf32>
    %c7_790 = arith.constant 7 : index
    %c0_791 = arith.constant 0 : index
    %c0_792 = arith.constant 0 : index
    %752 = vector.load %arg10[%c7_790, %c0_791, %c0_792] : memref<9x40x32xf32, #tpu.memory_space<vmem>>, vector<1x40x32xf32>
    %753 = vector.shape_cast %752 : vector<1x40x32xf32> to vector<40x32xf32>
    %cst_793 = arith.constant dense<0.000000e+00> : vector<8x32xf32>
    %754 = tpu.matmul %751, %753, %cst_793 {dimension_numbers = #tpu.dot_dimension_numbers<[1], [0], [0], [1], [0, 0, 1, 1], [], []>} : vector<8x40xf32>, vector<40x32xf32>, vector<8x32xf32> -> vector<8x32xf32>
    %755 = arith.addf %749, %754 : vector<8x32xf32>
    %c6_794 = arith.constant 6 : index
    %c2_795 = arith.constant 2 : index
    %c0_796 = arith.constant 0 : index
    %756 = vector.load %arg27[%c6_794, %c2_795, %c0_796] : memref<10x10x40xf32, #tpu.memory_space<vmem>>, vector<1x8x40xf32>
    %757 = vector.shape_cast %756 : vector<1x8x40xf32> to vector<8x40xf32>
    %c8_797 = arith.constant 8 : index
    %c0_798 = arith.constant 0 : index
    %c0_799 = arith.constant 0 : index
    %758 = vector.load %arg10[%c8_797, %c0_798, %c0_799] : memref<9x40x32xf32, #tpu.memory_space<vmem>>, vector<1x40x32xf32>
    %759 = vector.shape_cast %758 : vector<1x40x32xf32> to vector<40x32xf32>
    %cst_800 = arith.constant dense<0.000000e+00> : vector<8x32xf32>
    %760 = tpu.matmul %757, %759, %cst_800 {dimension_numbers = #tpu.dot_dimension_numbers<[1], [0], [0], [1], [0, 0, 1, 1], [], []>} : vector<8x40xf32>, vector<40x32xf32>, vector<8x32xf32> -> vector<8x32xf32>
    %761 = arith.addf %755, %760 : vector<8x32xf32>
    %cst_801 = arith.constant 0.000000e+00 : f32
    %762 = vector.broadcast %cst_801 : f32 to vector<8x32xf32>
    %c0_802 = arith.constant 0 : index
    %c0_803 = arith.constant 0 : index
    %763 = vector.load %arg11[%c0_802, %c0_803] : memref<1x32xf32, #tpu.memory_space<vmem>>, vector<1x32xf32>
    %764 = vector.broadcast %763 : vector<1x32xf32> to vector<8x32xf32>
    %765 = arith.addf %762, %764 : vector<8x32xf32>
    %c5_804 = arith.constant 5 : index
    %c0_805 = arith.constant 0 : index
    %c0_806 = arith.constant 0 : index
    %766 = vector.load %arg27[%c5_804, %c0_805, %c0_806] : memref<10x10x40xf32, #tpu.memory_space<vmem>>, vector<1x8x40xf32>
    %767 = vector.shape_cast %766 : vector<1x8x40xf32> to vector<8x40xf32>
    %c0_807 = arith.constant 0 : index
    %c0_808 = arith.constant 0 : index
    %c0_809 = arith.constant 0 : index
    %768 = vector.load %arg10[%c0_807, %c0_808, %c0_809] : memref<9x40x32xf32, #tpu.memory_space<vmem>>, vector<1x40x32xf32>
    %769 = vector.shape_cast %768 : vector<1x40x32xf32> to vector<40x32xf32>
    %cst_810 = arith.constant dense<0.000000e+00> : vector<8x32xf32>
    %770 = tpu.matmul %767, %769, %cst_810 {dimension_numbers = #tpu.dot_dimension_numbers<[1], [0], [0], [1], [0, 0, 1, 1], [], []>} : vector<8x40xf32>, vector<40x32xf32>, vector<8x32xf32> -> vector<8x32xf32>
    %771 = arith.addf %765, %770 : vector<8x32xf32>
    %c5_811 = arith.constant 5 : index
    %c1_812 = arith.constant 1 : index
    %c0_813 = arith.constant 0 : index
    %772 = vector.load %arg27[%c5_811, %c1_812, %c0_813] : memref<10x10x40xf32, #tpu.memory_space<vmem>>, vector<1x8x40xf32>
    %773 = vector.shape_cast %772 : vector<1x8x40xf32> to vector<8x40xf32>
    %c1_814 = arith.constant 1 : index
    %c0_815 = arith.constant 0 : index
    %c0_816 = arith.constant 0 : index
    %774 = vector.load %arg10[%c1_814, %c0_815, %c0_816] : memref<9x40x32xf32, #tpu.memory_space<vmem>>, vector<1x40x32xf32>
    %775 = vector.shape_cast %774 : vector<1x40x32xf32> to vector<40x32xf32>
    %cst_817 = arith.constant dense<0.000000e+00> : vector<8x32xf32>
    %776 = tpu.matmul %773, %775, %cst_817 {dimension_numbers = #tpu.dot_dimension_numbers<[1], [0], [0], [1], [0, 0, 1, 1], [], []>} : vector<8x40xf32>, vector<40x32xf32>, vector<8x32xf32> -> vector<8x32xf32>
    %777 = arith.addf %771, %776 : vector<8x32xf32>
    %c5_818 = arith.constant 5 : index
    %c2_819 = arith.constant 2 : index
    %c0_820 = arith.constant 0 : index
    %778 = vector.load %arg27[%c5_818, %c2_819, %c0_820] : memref<10x10x40xf32, #tpu.memory_space<vmem>>, vector<1x8x40xf32>
    %779 = vector.shape_cast %778 : vector<1x8x40xf32> to vector<8x40xf32>
    %c2_821 = arith.constant 2 : index
    %c0_822 = arith.constant 0 : index
    %c0_823 = arith.constant 0 : index
    %780 = vector.load %arg10[%c2_821, %c0_822, %c0_823] : memref<9x40x32xf32, #tpu.memory_space<vmem>>, vector<1x40x32xf32>
    %781 = vector.shape_cast %780 : vector<1x40x32xf32> to vector<40x32xf32>
    %cst_824 = arith.constant dense<0.000000e+00> : vector<8x32xf32>
    %782 = tpu.matmul %779, %781, %cst_824 {dimension_numbers = #tpu.dot_dimension_numbers<[1], [0], [0], [1], [0, 0, 1, 1], [], []>} : vector<8x40xf32>, vector<40x32xf32>, vector<8x32xf32> -> vector<8x32xf32>
    %783 = arith.addf %777, %782 : vector<8x32xf32>
    %c6_825 = arith.constant 6 : index
    %c0_826 = arith.constant 0 : index
    %c0_827 = arith.constant 0 : index
    %784 = vector.load %arg27[%c6_825, %c0_826, %c0_827] : memref<10x10x40xf32, #tpu.memory_space<vmem>>, vector<1x8x40xf32>
    %785 = vector.shape_cast %784 : vector<1x8x40xf32> to vector<8x40xf32>
    %c3_828 = arith.constant 3 : index
    %c0_829 = arith.constant 0 : index
    %c0_830 = arith.constant 0 : index
    %786 = vector.load %arg10[%c3_828, %c0_829, %c0_830] : memref<9x40x32xf32, #tpu.memory_space<vmem>>, vector<1x40x32xf32>
    %787 = vector.shape_cast %786 : vector<1x40x32xf32> to vector<40x32xf32>
    %cst_831 = arith.constant dense<0.000000e+00> : vector<8x32xf32>
    %788 = tpu.matmul %785, %787, %cst_831 {dimension_numbers = #tpu.dot_dimension_numbers<[1], [0], [0], [1], [0, 0, 1, 1], [], []>} : vector<8x40xf32>, vector<40x32xf32>, vector<8x32xf32> -> vector<8x32xf32>
    %789 = arith.addf %783, %788 : vector<8x32xf32>
    %c6_832 = arith.constant 6 : index
    %c1_833 = arith.constant 1 : index
    %c0_834 = arith.constant 0 : index
    %790 = vector.load %arg27[%c6_832, %c1_833, %c0_834] : memref<10x10x40xf32, #tpu.memory_space<vmem>>, vector<1x8x40xf32>
    %791 = vector.shape_cast %790 : vector<1x8x40xf32> to vector<8x40xf32>
    %c4_835 = arith.constant 4 : index
    %c0_836 = arith.constant 0 : index
    %c0_837 = arith.constant 0 : index
    %792 = vector.load %arg10[%c4_835, %c0_836, %c0_837] : memref<9x40x32xf32, #tpu.memory_space<vmem>>, vector<1x40x32xf32>
    %793 = vector.shape_cast %792 : vector<1x40x32xf32> to vector<40x32xf32>
    %cst_838 = arith.constant dense<0.000000e+00> : vector<8x32xf32>
    %794 = tpu.matmul %791, %793, %cst_838 {dimension_numbers = #tpu.dot_dimension_numbers<[1], [0], [0], [1], [0, 0, 1, 1], [], []>} : vector<8x40xf32>, vector<40x32xf32>, vector<8x32xf32> -> vector<8x32xf32>
    %795 = arith.addf %789, %794 : vector<8x32xf32>
    %c6_839 = arith.constant 6 : index
    %c2_840 = arith.constant 2 : index
    %c0_841 = arith.constant 0 : index
    %796 = vector.load %arg27[%c6_839, %c2_840, %c0_841] : memref<10x10x40xf32, #tpu.memory_space<vmem>>, vector<1x8x40xf32>
    %797 = vector.shape_cast %796 : vector<1x8x40xf32> to vector<8x40xf32>
    %c5_842 = arith.constant 5 : index
    %c0_843 = arith.constant 0 : index
    %c0_844 = arith.constant 0 : index
    %798 = vector.load %arg10[%c5_842, %c0_843, %c0_844] : memref<9x40x32xf32, #tpu.memory_space<vmem>>, vector<1x40x32xf32>
    %799 = vector.shape_cast %798 : vector<1x40x32xf32> to vector<40x32xf32>
    %cst_845 = arith.constant dense<0.000000e+00> : vector<8x32xf32>
    %800 = tpu.matmul %797, %799, %cst_845 {dimension_numbers = #tpu.dot_dimension_numbers<[1], [0], [0], [1], [0, 0, 1, 1], [], []>} : vector<8x40xf32>, vector<40x32xf32>, vector<8x32xf32> -> vector<8x32xf32>
    %801 = arith.addf %795, %800 : vector<8x32xf32>
    %c7_846 = arith.constant 7 : index
    %c0_847 = arith.constant 0 : index
    %c0_848 = arith.constant 0 : index
    %802 = vector.load %arg27[%c7_846, %c0_847, %c0_848] : memref<10x10x40xf32, #tpu.memory_space<vmem>>, vector<1x8x40xf32>
    %803 = vector.shape_cast %802 : vector<1x8x40xf32> to vector<8x40xf32>
    %c6_849 = arith.constant 6 : index
    %c0_850 = arith.constant 0 : index
    %c0_851 = arith.constant 0 : index
    %804 = vector.load %arg10[%c6_849, %c0_850, %c0_851] : memref<9x40x32xf32, #tpu.memory_space<vmem>>, vector<1x40x32xf32>
    %805 = vector.shape_cast %804 : vector<1x40x32xf32> to vector<40x32xf32>
    %cst_852 = arith.constant dense<0.000000e+00> : vector<8x32xf32>
    %806 = tpu.matmul %803, %805, %cst_852 {dimension_numbers = #tpu.dot_dimension_numbers<[1], [0], [0], [1], [0, 0, 1, 1], [], []>} : vector<8x40xf32>, vector<40x32xf32>, vector<8x32xf32> -> vector<8x32xf32>
    %807 = arith.addf %801, %806 : vector<8x32xf32>
    %c7_853 = arith.constant 7 : index
    %c1_854 = arith.constant 1 : index
    %c0_855 = arith.constant 0 : index
    %808 = vector.load %arg27[%c7_853, %c1_854, %c0_855] : memref<10x10x40xf32, #tpu.memory_space<vmem>>, vector<1x8x40xf32>
    %809 = vector.shape_cast %808 : vector<1x8x40xf32> to vector<8x40xf32>
    %c7_856 = arith.constant 7 : index
    %c0_857 = arith.constant 0 : index
    %c0_858 = arith.constant 0 : index
    %810 = vector.load %arg10[%c7_856, %c0_857, %c0_858] : memref<9x40x32xf32, #tpu.memory_space<vmem>>, vector<1x40x32xf32>
    %811 = vector.shape_cast %810 : vector<1x40x32xf32> to vector<40x32xf32>
    %cst_859 = arith.constant dense<0.000000e+00> : vector<8x32xf32>
    %812 = tpu.matmul %809, %811, %cst_859 {dimension_numbers = #tpu.dot_dimension_numbers<[1], [0], [0], [1], [0, 0, 1, 1], [], []>} : vector<8x40xf32>, vector<40x32xf32>, vector<8x32xf32> -> vector<8x32xf32>
    %813 = arith.addf %807, %812 : vector<8x32xf32>
    %c7_860 = arith.constant 7 : index
    %c2_861 = arith.constant 2 : index
    %c0_862 = arith.constant 0 : index
    %814 = vector.load %arg27[%c7_860, %c2_861, %c0_862] : memref<10x10x40xf32, #tpu.memory_space<vmem>>, vector<1x8x40xf32>
    %815 = vector.shape_cast %814 : vector<1x8x40xf32> to vector<8x40xf32>
    %c8_863 = arith.constant 8 : index
    %c0_864 = arith.constant 0 : index
    %c0_865 = arith.constant 0 : index
    %816 = vector.load %arg10[%c8_863, %c0_864, %c0_865] : memref<9x40x32xf32, #tpu.memory_space<vmem>>, vector<1x40x32xf32>
    %817 = vector.shape_cast %816 : vector<1x40x32xf32> to vector<40x32xf32>
    %cst_866 = arith.constant dense<0.000000e+00> : vector<8x32xf32>
    %818 = tpu.matmul %815, %817, %cst_866 {dimension_numbers = #tpu.dot_dimension_numbers<[1], [0], [0], [1], [0, 0, 1, 1], [], []>} : vector<8x40xf32>, vector<40x32xf32>, vector<8x32xf32> -> vector<8x32xf32>
    %819 = arith.addf %813, %818 : vector<8x32xf32>
    %820 = arith.maximumf %761, %819 : vector<8x32xf32>
    %c0_867 = arith.constant 0 : index
    %c0_868 = arith.constant 0 : index
    %821 = vector.load %arg12[%c0_867, %c0_868] : memref<4x8xf32, #tpu.memory_space<vmem>>, vector<4x8xf32>
    %cst_869 = arith.constant dense<0.000000e+00> : vector<4x32xf32>
    %822 = tpu.matmul %821, %820, %cst_869 {dimension_numbers = #tpu.dot_dimension_numbers<[1], [0], [0], [1], [0, 0, 1, 1], [], []>} : vector<4x8xf32>, vector<8x32xf32>, vector<4x32xf32> -> vector<4x32xf32>
    %c0_870 = arith.constant 0 : index
    %c0_871 = arith.constant 0 : index
    %823 = vector.load %arg13[%c0_870, %c0_871] : memref<4x8xf32, #tpu.memory_space<vmem>>, vector<4x8xf32>
    %cst_872 = arith.constant dense<0.000000e+00> : vector<4x32xf32>
    %824 = tpu.matmul %823, %820, %cst_872 {dimension_numbers = #tpu.dot_dimension_numbers<[1], [0], [0], [1], [0, 0, 1, 1], [], []>} : vector<4x8xf32>, vector<8x32xf32>, vector<4x32xf32> -> vector<4x32xf32>
    %825 = arith.maximumf %822, %824 : vector<4x32xf32>
    %c0_873 = arith.constant 0 : index
    %c0_874 = arith.constant 0 : index
    %826 = vector.load %arg14[%c0_873, %c0_874] : memref<32x16xf32, #tpu.memory_space<vmem>>, vector<32x16xf32>
    %cst_875 = arith.constant dense<0.000000e+00> : vector<4x16xf32>
    %827 = tpu.matmul %825, %826, %cst_875 {dimension_numbers = #tpu.dot_dimension_numbers<[1], [0], [0], [1], [0, 0, 1, 1], [], []>} : vector<4x32xf32>, vector<32x16xf32>, vector<4x16xf32> -> vector<4x16xf32>
    %c0_876 = arith.constant 0 : index
    %c0_877 = arith.constant 0 : index
    %828 = vector.load %arg15[%c0_876, %c0_877] : memref<32x16xf32, #tpu.memory_space<vmem>>, vector<32x16xf32>
    %cst_878 = arith.constant dense<0.000000e+00> : vector<4x16xf32>
    %829 = tpu.matmul %825, %828, %cst_878 {dimension_numbers = #tpu.dot_dimension_numbers<[1], [0], [0], [1], [0, 0, 1, 1], [], []>} : vector<4x32xf32>, vector<32x16xf32>, vector<4x16xf32> -> vector<4x16xf32>
    %830 = arith.maximumf %827, %829 : vector<4x16xf32>
    %cst_879 = arith.constant 0.000000e+00 : f32
    %831 = vector.broadcast %cst_879 : f32 to vector<4x16xf32>
    %832 = arith.maximumf %830, %831 : vector<4x16xf32>
    %c2_880 = arith.constant 2 : index
    %c0_881 = arith.constant 0 : index
    %c0_882 = arith.constant 0 : index
    %833 = vector.load %arg28[%c2_880, %c0_881, %c0_882] : memref<4x4x16xf32, #tpu.memory_space<vmem>>, vector<1x4x16xf32>
    %834 = vector.shape_cast %833 : vector<1x4x16xf32> to vector<4x16xf32>
    %835 = vector.shape_cast %832 : vector<4x16xf32> to vector<1x4x16xf32>
    tpu.vector_store %arg28[%c2_880, %c0_881, %c0_882], %835 {strides = array<i32>} : memref<4x4x16xf32, #tpu.memory_space<vmem>>, vector<1x4x16xf32>,
    %cst_883 = arith.constant 0.000000e+00 : f32
    %836 = vector.broadcast %cst_883 : f32 to vector<8x32xf32>
    %c0_884 = arith.constant 0 : index
    %c0_885 = arith.constant 0 : index
    %837 = vector.load %arg11[%c0_884, %c0_885] : memref<1x32xf32, #tpu.memory_space<vmem>>, vector<1x32xf32>
    %838 = vector.broadcast %837 : vector<1x32xf32> to vector<8x32xf32>
    %839 = arith.addf %836, %838 : vector<8x32xf32>
    %c6_886 = arith.constant 6 : index
    %c0_887 = arith.constant 0 : index
    %c0_888 = arith.constant 0 : index
    %840 = vector.load %arg27[%c6_886, %c0_887, %c0_888] : memref<10x10x40xf32, #tpu.memory_space<vmem>>, vector<1x8x40xf32>
    %841 = vector.shape_cast %840 : vector<1x8x40xf32> to vector<8x40xf32>
    %c0_889 = arith.constant 0 : index
    %c0_890 = arith.constant 0 : index
    %c0_891 = arith.constant 0 : index
    %842 = vector.load %arg10[%c0_889, %c0_890, %c0_891] : memref<9x40x32xf32, #tpu.memory_space<vmem>>, vector<1x40x32xf32>
    %843 = vector.shape_cast %842 : vector<1x40x32xf32> to vector<40x32xf32>
    %cst_892 = arith.constant dense<0.000000e+00> : vector<8x32xf32>
    %844 = tpu.matmul %841, %843, %cst_892 {dimension_numbers = #tpu.dot_dimension_numbers<[1], [0], [0], [1], [0, 0, 1, 1], [], []>} : vector<8x40xf32>, vector<40x32xf32>, vector<8x32xf32> -> vector<8x32xf32>
    %845 = arith.addf %839, %844 : vector<8x32xf32>
    %c6_893 = arith.constant 6 : index
    %c1_894 = arith.constant 1 : index
    %c0_895 = arith.constant 0 : index
    %846 = vector.load %arg27[%c6_893, %c1_894, %c0_895] : memref<10x10x40xf32, #tpu.memory_space<vmem>>, vector<1x8x40xf32>
    %847 = vector.shape_cast %846 : vector<1x8x40xf32> to vector<8x40xf32>
    %c1_896 = arith.constant 1 : index
    %c0_897 = arith.constant 0 : index
    %c0_898 = arith.constant 0 : index
    %848 = vector.load %arg10[%c1_896, %c0_897, %c0_898] : memref<9x40x32xf32, #tpu.memory_space<vmem>>, vector<1x40x32xf32>
    %849 = vector.shape_cast %848 : vector<1x40x32xf32> to vector<40x32xf32>
    %cst_899 = arith.constant dense<0.000000e+00> : vector<8x32xf32>
    %850 = tpu.matmul %847, %849, %cst_899 {dimension_numbers = #tpu.dot_dimension_numbers<[1], [0], [0], [1], [0, 0, 1, 1], [], []>} : vector<8x40xf32>, vector<40x32xf32>, vector<8x32xf32> -> vector<8x32xf32>
    %851 = arith.addf %845, %850 : vector<8x32xf32>
    %c6_900 = arith.constant 6 : index
    %c2_901 = arith.constant 2 : index
    %c0_902 = arith.constant 0 : index
    %852 = vector.load %arg27[%c6_900, %c2_901, %c0_902] : memref<10x10x40xf32, #tpu.memory_space<vmem>>, vector<1x8x40xf32>
    %853 = vector.shape_cast %852 : vector<1x8x40xf32> to vector<8x40xf32>
    %c2_903 = arith.constant 2 : index
    %c0_904 = arith.constant 0 : index
    %c0_905 = arith.constant 0 : index
    %854 = vector.load %arg10[%c2_903, %c0_904, %c0_905] : memref<9x40x32xf32, #tpu.memory_space<vmem>>, vector<1x40x32xf32>
    %855 = vector.shape_cast %854 : vector<1x40x32xf32> to vector<40x32xf32>
    %cst_906 = arith.constant dense<0.000000e+00> : vector<8x32xf32>
    %856 = tpu.matmul %853, %855, %cst_906 {dimension_numbers = #tpu.dot_dimension_numbers<[1], [0], [0], [1], [0, 0, 1, 1], [], []>} : vector<8x40xf32>, vector<40x32xf32>, vector<8x32xf32> -> vector<8x32xf32>
    %857 = arith.addf %851, %856 : vector<8x32xf32>
    %c7_907 = arith.constant 7 : index
    %c0_908 = arith.constant 0 : index
    %c0_909 = arith.constant 0 : index
    %858 = vector.load %arg27[%c7_907, %c0_908, %c0_909] : memref<10x10x40xf32, #tpu.memory_space<vmem>>, vector<1x8x40xf32>
    %859 = vector.shape_cast %858 : vector<1x8x40xf32> to vector<8x40xf32>
    %c3_910 = arith.constant 3 : index
    %c0_911 = arith.constant 0 : index
    %c0_912 = arith.constant 0 : index
    %860 = vector.load %arg10[%c3_910, %c0_911, %c0_912] : memref<9x40x32xf32, #tpu.memory_space<vmem>>, vector<1x40x32xf32>
    %861 = vector.shape_cast %860 : vector<1x40x32xf32> to vector<40x32xf32>
    %cst_913 = arith.constant dense<0.000000e+00> : vector<8x32xf32>
    %862 = tpu.matmul %859, %861, %cst_913 {dimension_numbers = #tpu.dot_dimension_numbers<[1], [0], [0], [1], [0, 0, 1, 1], [], []>} : vector<8x40xf32>, vector<40x32xf32>, vector<8x32xf32> -> vector<8x32xf32>
    %863 = arith.addf %857, %862 : vector<8x32xf32>
    %c7_914 = arith.constant 7 : index
    %c1_915 = arith.constant 1 : index
    %c0_916 = arith.constant 0 : index
    %864 = vector.load %arg27[%c7_914, %c1_915, %c0_916] : memref<10x10x40xf32, #tpu.memory_space<vmem>>, vector<1x8x40xf32>
    %865 = vector.shape_cast %864 : vector<1x8x40xf32> to vector<8x40xf32>
    %c4_917 = arith.constant 4 : index
    %c0_918 = arith.constant 0 : index
    %c0_919 = arith.constant 0 : index
    %866 = vector.load %arg10[%c4_917, %c0_918, %c0_919] : memref<9x40x32xf32, #tpu.memory_space<vmem>>, vector<1x40x32xf32>
    %867 = vector.shape_cast %866 : vector<1x40x32xf32> to vector<40x32xf32>
    %cst_920 = arith.constant dense<0.000000e+00> : vector<8x32xf32>
    %868 = tpu.matmul %865, %867, %cst_920 {dimension_numbers = #tpu.dot_dimension_numbers<[1], [0], [0], [1], [0, 0, 1, 1], [], []>} : vector<8x40xf32>, vector<40x32xf32>, vector<8x32xf32> -> vector<8x32xf32>
    %869 = arith.addf %863, %868 : vector<8x32xf32>
    %c7_921 = arith.constant 7 : index
    %c2_922 = arith.constant 2 : index
    %c0_923 = arith.constant 0 : index
    %870 = vector.load %arg27[%c7_921, %c2_922, %c0_923] : memref<10x10x40xf32, #tpu.memory_space<vmem>>, vector<1x8x40xf32>
    %871 = vector.shape_cast %870 : vector<1x8x40xf32> to vector<8x40xf32>
    %c5_924 = arith.constant 5 : index
    %c0_925 = arith.constant 0 : index
    %c0_926 = arith.constant 0 : index
    %872 = vector.load %arg10[%c5_924, %c0_925, %c0_926] : memref<9x40x32xf32, #tpu.memory_space<vmem>>, vector<1x40x32xf32>
    %873 = vector.shape_cast %872 : vector<1x40x32xf32> to vector<40x32xf32>
    %cst_927 = arith.constant dense<0.000000e+00> : vector<8x32xf32>
    %874 = tpu.matmul %871, %873, %cst_927 {dimension_numbers = #tpu.dot_dimension_numbers<[1], [0], [0], [1], [0, 0, 1, 1], [], []>} : vector<8x40xf32>, vector<40x32xf32>, vector<8x32xf32> -> vector<8x32xf32>
    %875 = arith.addf %869, %874 : vector<8x32xf32>
    %c8_928 = arith.constant 8 : index
    %c0_929 = arith.constant 0 : index
    %c0_930 = arith.constant 0 : index
    %876 = vector.load %arg27[%c8_928, %c0_929, %c0_930] : memref<10x10x40xf32, #tpu.memory_space<vmem>>, vector<1x8x40xf32>
    %877 = vector.shape_cast %876 : vector<1x8x40xf32> to vector<8x40xf32>
    %c6_931 = arith.constant 6 : index
    %c0_932 = arith.constant 0 : index
    %c0_933 = arith.constant 0 : index
    %878 = vector.load %arg10[%c6_931, %c0_932, %c0_933] : memref<9x40x32xf32, #tpu.memory_space<vmem>>, vector<1x40x32xf32>
    %879 = vector.shape_cast %878 : vector<1x40x32xf32> to vector<40x32xf32>
    %cst_934 = arith.constant dense<0.000000e+00> : vector<8x32xf32>
    %880 = tpu.matmul %877, %879, %cst_934 {dimension_numbers = #tpu.dot_dimension_numbers<[1], [0], [0], [1], [0, 0, 1, 1], [], []>} : vector<8x40xf32>, vector<40x32xf32>, vector<8x32xf32> -> vector<8x32xf32>
    %881 = arith.addf %875, %880 : vector<8x32xf32>
    %c8_935 = arith.constant 8 : index
    %c1_936 = arith.constant 1 : index
    %c0_937 = arith.constant 0 : index
    %882 = vector.load %arg27[%c8_935, %c1_936, %c0_937] : memref<10x10x40xf32, #tpu.memory_space<vmem>>, vector<1x8x40xf32>
    %883 = vector.shape_cast %882 : vector<1x8x40xf32> to vector<8x40xf32>
    %c7_938 = arith.constant 7 : index
    %c0_939 = arith.constant 0 : index
    %c0_940 = arith.constant 0 : index
    %884 = vector.load %arg10[%c7_938, %c0_939, %c0_940] : memref<9x40x32xf32, #tpu.memory_space<vmem>>, vector<1x40x32xf32>
    %885 = vector.shape_cast %884 : vector<1x40x32xf32> to vector<40x32xf32>
    %cst_941 = arith.constant dense<0.000000e+00> : vector<8x32xf32>
    %886 = tpu.matmul %883, %885, %cst_941 {dimension_numbers = #tpu.dot_dimension_numbers<[1], [0], [0], [1], [0, 0, 1, 1], [], []>} : vector<8x40xf32>, vector<40x32xf32>, vector<8x32xf32> -> vector<8x32xf32>
    %887 = arith.addf %881, %886 : vector<8x32xf32>
    %c8_942 = arith.constant 8 : index
    %c2_943 = arith.constant 2 : index
    %c0_944 = arith.constant 0 : index
    %888 = vector.load %arg27[%c8_942, %c2_943, %c0_944] : memref<10x10x40xf32, #tpu.memory_space<vmem>>, vector<1x8x40xf32>
    %889 = vector.shape_cast %888 : vector<1x8x40xf32> to vector<8x40xf32>
    %c8_945 = arith.constant 8 : index
    %c0_946 = arith.constant 0 : index
    %c0_947 = arith.constant 0 : index
    %890 = vector.load %arg10[%c8_945, %c0_946, %c0_947] : memref<9x40x32xf32, #tpu.memory_space<vmem>>, vector<1x40x32xf32>
    %891 = vector.shape_cast %890 : vector<1x40x32xf32> to vector<40x32xf32>
    %cst_948 = arith.constant dense<0.000000e+00> : vector<8x32xf32>
    %892 = tpu.matmul %889, %891, %cst_948 {dimension_numbers = #tpu.dot_dimension_numbers<[1], [0], [0], [1], [0, 0, 1, 1], [], []>} : vector<8x40xf32>, vector<40x32xf32>, vector<8x32xf32> -> vector<8x32xf32>
    %893 = arith.addf %887, %892 : vector<8x32xf32>
    %cst_949 = arith.constant 0.000000e+00 : f32
    %894 = vector.broadcast %cst_949 : f32 to vector<8x32xf32>
    %c0_950 = arith.constant 0 : index
    %c0_951 = arith.constant 0 : index
    %895 = vector.load %arg11[%c0_950, %c0_951] : memref<1x32xf32, #tpu.memory_space<vmem>>, vector<1x32xf32>
    %896 = vector.broadcast %895 : vector<1x32xf32> to vector<8x32xf32>
    %897 = arith.addf %894, %896 : vector<8x32xf32>
    %c7_952 = arith.constant 7 : index
    %c0_953 = arith.constant 0 : index
    %c0_954 = arith.constant 0 : index
    %898 = vector.load %arg27[%c7_952, %c0_953, %c0_954] : memref<10x10x40xf32, #tpu.memory_space<vmem>>, vector<1x8x40xf32>
    %899 = vector.shape_cast %898 : vector<1x8x40xf32> to vector<8x40xf32>
    %c0_955 = arith.constant 0 : index
    %c0_956 = arith.constant 0 : index
    %c0_957 = arith.constant 0 : index
    %900 = vector.load %arg10[%c0_955, %c0_956, %c0_957] : memref<9x40x32xf32, #tpu.memory_space<vmem>>, vector<1x40x32xf32>
    %901 = vector.shape_cast %900 : vector<1x40x32xf32> to vector<40x32xf32>
    %cst_958 = arith.constant dense<0.000000e+00> : vector<8x32xf32>
    %902 = tpu.matmul %899, %901, %cst_958 {dimension_numbers = #tpu.dot_dimension_numbers<[1], [0], [0], [1], [0, 0, 1, 1], [], []>} : vector<8x40xf32>, vector<40x32xf32>, vector<8x32xf32> -> vector<8x32xf32>
    %903 = arith.addf %897, %902 : vector<8x32xf32>
    %c7_959 = arith.constant 7 : index
    %c1_960 = arith.constant 1 : index
    %c0_961 = arith.constant 0 : index
    %904 = vector.load %arg27[%c7_959, %c1_960, %c0_961] : memref<10x10x40xf32, #tpu.memory_space<vmem>>, vector<1x8x40xf32>
    %905 = vector.shape_cast %904 : vector<1x8x40xf32> to vector<8x40xf32>
    %c1_962 = arith.constant 1 : index
    %c0_963 = arith.constant 0 : index
    %c0_964 = arith.constant 0 : index
    %906 = vector.load %arg10[%c1_962, %c0_963, %c0_964] : memref<9x40x32xf32, #tpu.memory_space<vmem>>, vector<1x40x32xf32>
    %907 = vector.shape_cast %906 : vector<1x40x32xf32> to vector<40x32xf32>
    %cst_965 = arith.constant dense<0.000000e+00> : vector<8x32xf32>
    %908 = tpu.matmul %905, %907, %cst_965 {dimension_numbers = #tpu.dot_dimension_numbers<[1], [0], [0], [1], [0, 0, 1, 1], [], []>} : vector<8x40xf32>, vector<40x32xf32>, vector<8x32xf32> -> vector<8x32xf32>
    %909 = arith.addf %903, %908 : vector<8x32xf32>
    %c7_966 = arith.constant 7 : index
    %c2_967 = arith.constant 2 : index
    %c0_968 = arith.constant 0 : index
    %910 = vector.load %arg27[%c7_966, %c2_967, %c0_968] : memref<10x10x40xf32, #tpu.memory_space<vmem>>, vector<1x8x40xf32>
    %911 = vector.shape_cast %910 : vector<1x8x40xf32> to vector<8x40xf32>
    %c2_969 = arith.constant 2 : index
    %c0_970 = arith.constant 0 : index
    %c0_971 = arith.constant 0 : index
    %912 = vector.load %arg10[%c2_969, %c0_970, %c0_971] : memref<9x40x32xf32, #tpu.memory_space<vmem>>, vector<1x40x32xf32>
    %913 = vector.shape_cast %912 : vector<1x40x32xf32> to vector<40x32xf32>
    %cst_972 = arith.constant dense<0.000000e+00> : vector<8x32xf32>
    %914 = tpu.matmul %911, %913, %cst_972 {dimension_numbers = #tpu.dot_dimension_numbers<[1], [0], [0], [1], [0, 0, 1, 1], [], []>} : vector<8x40xf32>, vector<40x32xf32>, vector<8x32xf32> -> vector<8x32xf32>
    %915 = arith.addf %909, %914 : vector<8x32xf32>
    %c8_973 = arith.constant 8 : index
    %c0_974 = arith.constant 0 : index
    %c0_975 = arith.constant 0 : index
    %916 = vector.load %arg27[%c8_973, %c0_974, %c0_975] : memref<10x10x40xf32, #tpu.memory_space<vmem>>, vector<1x8x40xf32>
    %917 = vector.shape_cast %916 : vector<1x8x40xf32> to vector<8x40xf32>
    %c3_976 = arith.constant 3 : index
    %c0_977 = arith.constant 0 : index
    %c0_978 = arith.constant 0 : index
    %918 = vector.load %arg10[%c3_976, %c0_977, %c0_978] : memref<9x40x32xf32, #tpu.memory_space<vmem>>, vector<1x40x32xf32>
    %919 = vector.shape_cast %918 : vector<1x40x32xf32> to vector<40x32xf32>
    %cst_979 = arith.constant dense<0.000000e+00> : vector<8x32xf32>
    %920 = tpu.matmul %917, %919, %cst_979 {dimension_numbers = #tpu.dot_dimension_numbers<[1], [0], [0], [1], [0, 0, 1, 1], [], []>} : vector<8x40xf32>, vector<40x32xf32>, vector<8x32xf32> -> vector<8x32xf32>
    %921 = arith.addf %915, %920 : vector<8x32xf32>
    %c8_980 = arith.constant 8 : index
    %c1_981 = arith.constant 1 : index
    %c0_982 = arith.constant 0 : index
    %922 = vector.load %arg27[%c8_980, %c1_981, %c0_982] : memref<10x10x40xf32, #tpu.memory_space<vmem>>, vector<1x8x40xf32>
    %923 = vector.shape_cast %922 : vector<1x8x40xf32> to vector<8x40xf32>
    %c4_983 = arith.constant 4 : index
    %c0_984 = arith.constant 0 : index
    %c0_985 = arith.constant 0 : index
    %924 = vector.load %arg10[%c4_983, %c0_984, %c0_985] : memref<9x40x32xf32, #tpu.memory_space<vmem>>, vector<1x40x32xf32>
    %925 = vector.shape_cast %924 : vector<1x40x32xf32> to vector<40x32xf32>
    %cst_986 = arith.constant dense<0.000000e+00> : vector<8x32xf32>
    %926 = tpu.matmul %923, %925, %cst_986 {dimension_numbers = #tpu.dot_dimension_numbers<[1], [0], [0], [1], [0, 0, 1, 1], [], []>} : vector<8x40xf32>, vector<40x32xf32>, vector<8x32xf32> -> vector<8x32xf32>
    %927 = arith.addf %921, %926 : vector<8x32xf32>
    %c8_987 = arith.constant 8 : index
    %c2_988 = arith.constant 2 : index
    %c0_989 = arith.constant 0 : index
    %928 = vector.load %arg27[%c8_987, %c2_988, %c0_989] : memref<10x10x40xf32, #tpu.memory_space<vmem>>, vector<1x8x40xf32>
    %929 = vector.shape_cast %928 : vector<1x8x40xf32> to vector<8x40xf32>
    %c5_990 = arith.constant 5 : index
    %c0_991 = arith.constant 0 : index
    %c0_992 = arith.constant 0 : index
    %930 = vector.load %arg10[%c5_990, %c0_991, %c0_992] : memref<9x40x32xf32, #tpu.memory_space<vmem>>, vector<1x40x32xf32>
    %931 = vector.shape_cast %930 : vector<1x40x32xf32> to vector<40x32xf32>
    %cst_993 = arith.constant dense<0.000000e+00> : vector<8x32xf32>
    %932 = tpu.matmul %929, %931, %cst_993 {dimension_numbers = #tpu.dot_dimension_numbers<[1], [0], [0], [1], [0, 0, 1, 1], [], []>} : vector<8x40xf32>, vector<40x32xf32>, vector<8x32xf32> -> vector<8x32xf32>
    %933 = arith.addf %927, %932 : vector<8x32xf32>
    %c9_994 = arith.constant 9 : index
    %c0_995 = arith.constant 0 : index
    %c0_996 = arith.constant 0 : index
    %934 = vector.load %arg27[%c9_994, %c0_995, %c0_996] : memref<10x10x40xf32, #tpu.memory_space<vmem>>, vector<1x8x40xf32>
    %935 = vector.shape_cast %934 : vector<1x8x40xf32> to vector<8x40xf32>
    %c6_997 = arith.constant 6 : index
    %c0_998 = arith.constant 0 : index
    %c0_999 = arith.constant 0 : index
    %936 = vector.load %arg10[%c6_997, %c0_998, %c0_999] : memref<9x40x32xf32, #tpu.memory_space<vmem>>, vector<1x40x32xf32>
    %937 = vector.shape_cast %936 : vector<1x40x32xf32> to vector<40x32xf32>
    %cst_1000 = arith.constant dense<0.000000e+00> : vector<8x32xf32>
    %938 = tpu.matmul %935, %937, %cst_1000 {dimension_numbers = #tpu.dot_dimension_numbers<[1], [0], [0], [1], [0, 0, 1, 1], [], []>} : vector<8x40xf32>, vector<40x32xf32>, vector<8x32xf32> -> vector<8x32xf32>
    %939 = arith.addf %933, %938 : vector<8x32xf32>
    %c9_1001 = arith.constant 9 : index
    %c1_1002 = arith.constant 1 : index
    %c0_1003 = arith.constant 0 : index
    %940 = vector.load %arg27[%c9_1001, %c1_1002, %c0_1003] : memref<10x10x40xf32, #tpu.memory_space<vmem>>, vector<1x8x40xf32>
    %941 = vector.shape_cast %940 : vector<1x8x40xf32> to vector<8x40xf32>
    %c7_1004 = arith.constant 7 : index
    %c0_1005 = arith.constant 0 : index
    %c0_1006 = arith.constant 0 : index
    %942 = vector.load %arg10[%c7_1004, %c0_1005, %c0_1006] : memref<9x40x32xf32, #tpu.memory_space<vmem>>, vector<1x40x32xf32>
    %943 = vector.shape_cast %942 : vector<1x40x32xf32> to vector<40x32xf32>
    %cst_1007 = arith.constant dense<0.000000e+00> : vector<8x32xf32>
    %944 = tpu.matmul %941, %943, %cst_1007 {dimension_numbers = #tpu.dot_dimension_numbers<[1], [0], [0], [1], [0, 0, 1, 1], [], []>} : vector<8x40xf32>, vector<40x32xf32>, vector<8x32xf32> -> vector<8x32xf32>
    %945 = arith.addf %939, %944 : vector<8x32xf32>
    %c9_1008 = arith.constant 9 : index
    %c2_1009 = arith.constant 2 : index
    %c0_1010 = arith.constant 0 : index
    %946 = vector.load %arg27[%c9_1008, %c2_1009, %c0_1010] : memref<10x10x40xf32, #tpu.memory_space<vmem>>, vector<1x8x40xf32>
    %947 = vector.shape_cast %946 : vector<1x8x40xf32> to vector<8x40xf32>
    %c8_1011 = arith.constant 8 : index
    %c0_1012 = arith.constant 0 : index
    %c0_1013 = arith.constant 0 : index
    %948 = vector.load %arg10[%c8_1011, %c0_1012, %c0_1013] : memref<9x40x32xf32, #tpu.memory_space<vmem>>, vector<1x40x32xf32>
    %949 = vector.shape_cast %948 : vector<1x40x32xf32> to vector<40x32xf32>
    %cst_1014 = arith.constant dense<0.000000e+00> : vector<8x32xf32>
    %950 = tpu.matmul %947, %949, %cst_1014 {dimension_numbers = #tpu.dot_dimension_numbers<[1], [0], [0], [1], [0, 0, 1, 1], [], []>} : vector<8x40xf32>, vector<40x32xf32>, vector<8x32xf32> -> vector<8x32xf32>
    %951 = arith.addf %945, %950 : vector<8x32xf32>
    %952 = arith.maximumf %893, %951 : vector<8x32xf32>
    %c0_1015 = arith.constant 0 : index
    %c0_1016 = arith.constant 0 : index
    %953 = vector.load %arg12[%c0_1015, %c0_1016] : memref<4x8xf32, #tpu.memory_space<vmem>>, vector<4x8xf32>
    %cst_1017 = arith.constant dense<0.000000e+00> : vector<4x32xf32>
    %954 = tpu.matmul %953, %952, %cst_1017 {dimension_numbers = #tpu.dot_dimension_numbers<[1], [0], [0], [1], [0, 0, 1, 1], [], []>} : vector<4x8xf32>, vector<8x32xf32>, vector<4x32xf32> -> vector<4x32xf32>
    %c0_1018 = arith.constant 0 : index
    %c0_1019 = arith.constant 0 : index
    %955 = vector.load %arg13[%c0_1018, %c0_1019] : memref<4x8xf32, #tpu.memory_space<vmem>>, vector<4x8xf32>
    %cst_1020 = arith.constant dense<0.000000e+00> : vector<4x32xf32>
    %956 = tpu.matmul %955, %952, %cst_1020 {dimension_numbers = #tpu.dot_dimension_numbers<[1], [0], [0], [1], [0, 0, 1, 1], [], []>} : vector<4x8xf32>, vector<8x32xf32>, vector<4x32xf32> -> vector<4x32xf32>
    %957 = arith.maximumf %954, %956 : vector<4x32xf32>
    %c0_1021 = arith.constant 0 : index
    %c0_1022 = arith.constant 0 : index
    %958 = vector.load %arg14[%c0_1021, %c0_1022] : memref<32x16xf32, #tpu.memory_space<vmem>>, vector<32x16xf32>
    %cst_1023 = arith.constant dense<0.000000e+00> : vector<4x16xf32>
    %959 = tpu.matmul %957, %958, %cst_1023 {dimension_numbers = #tpu.dot_dimension_numbers<[1], [0], [0], [1], [0, 0, 1, 1], [], []>} : vector<4x32xf32>, vector<32x16xf32>, vector<4x16xf32> -> vector<4x16xf32>
    %c0_1024 = arith.constant 0 : index
    %c0_1025 = arith.constant 0 : index
    %960 = vector.load %arg15[%c0_1024, %c0_1025] : memref<32x16xf32, #tpu.memory_space<vmem>>, vector<32x16xf32>
    %cst_1026 = arith.constant dense<0.000000e+00> : vector<4x16xf32>
    %961 = tpu.matmul %957, %960, %cst_1026 {dimension_numbers = #tpu.dot_dimension_numbers<[1], [0], [0], [1], [0, 0, 1, 1], [], []>} : vector<4x32xf32>, vector<32x16xf32>, vector<4x16xf32> -> vector<4x16xf32>
    %962 = arith.maximumf %959, %961 : vector<4x16xf32>
    %cst_1027 = arith.constant 0.000000e+00 : f32
    %963 = vector.broadcast %cst_1027 : f32 to vector<4x16xf32>
    %964 = arith.maximumf %962, %963 : vector<4x16xf32>
    %c3_1028 = arith.constant 3 : index
    %c0_1029 = arith.constant 0 : index
    %c0_1030 = arith.constant 0 : index
    %965 = vector.load %arg28[%c3_1028, %c0_1029, %c0_1030] : memref<4x4x16xf32, #tpu.memory_space<vmem>>, vector<1x4x16xf32>
    %966 = vector.shape_cast %965 : vector<1x4x16xf32> to vector<4x16xf32>
    %967 = vector.shape_cast %964 : vector<4x16xf32> to vector<1x4x16xf32>
    tpu.vector_store %arg28[%c3_1028, %c0_1029, %c0_1030], %967 {strides = array<i32>} : memref<4x4x16xf32, #tpu.memory_space<vmem>>, vector<1x4x16xf32>,
    %cst_1031 = arith.constant 0.000000e+00 : f32
    %968 = vector.broadcast %cst_1031 : f32 to vector<2x8xf32>
    %c0_1032 = arith.constant 0 : index
    %c0_1033 = arith.constant 0 : index
    %969 = vector.load %arg17[%c0_1032, %c0_1033] : memref<1x8xf32, #tpu.memory_space<vmem>>, vector<1x8xf32>
    %970 = vector.broadcast %969 : vector<1x8xf32> to vector<2x8xf32>
    %971 = arith.addf %968, %970 : vector<2x8xf32>
    %c0_1034 = arith.constant 0 : index
    %c0_1035 = arith.constant 0 : index
    %c0_1036 = arith.constant 0 : index
    %972 = vector.load %arg28[%c0_1034, %c0_1035, %c0_1036] : memref<4x4x16xf32, #tpu.memory_space<vmem>>, vector<1x2x16xf32>
    %973 = vector.shape_cast %972 : vector<1x2x16xf32> to vector<2x16xf32>
    %c0_1037 = arith.constant 0 : index
    %c0_1038 = arith.constant 0 : index
    %c0_1039 = arith.constant 0 : index
    %974 = vector.load %arg16[%c0_1037, %c0_1038, %c0_1039] : memref<9x16x8xf32, #tpu.memory_space<vmem>>, vector<1x16x8xf32>
    %975 = vector.shape_cast %974 : vector<1x16x8xf32> to vector<16x8xf32>
    %cst_1040 = arith.constant dense<0.000000e+00> : vector<2x8xf32>
    %976 = tpu.matmul %973, %975, %cst_1040 {dimension_numbers = #tpu.dot_dimension_numbers<[1], [0], [0], [1], [0, 0, 1, 1], [], []>} : vector<2x16xf32>, vector<16x8xf32>, vector<2x8xf32> -> vector<2x8xf32>
    %977 = arith.addf %971, %976 : vector<2x8xf32>
    %c0_1041 = arith.constant 0 : index
    %c1_1042 = arith.constant 1 : index
    %c0_1043 = arith.constant 0 : index
    %978 = vector.load %arg28[%c0_1041, %c1_1042, %c0_1043] : memref<4x4x16xf32, #tpu.memory_space<vmem>>, vector<1x2x16xf32>
    %979 = vector.shape_cast %978 : vector<1x2x16xf32> to vector<2x16xf32>
    %c1_1044 = arith.constant 1 : index
    %c0_1045 = arith.constant 0 : index
    %c0_1046 = arith.constant 0 : index
    %980 = vector.load %arg16[%c1_1044, %c0_1045, %c0_1046] : memref<9x16x8xf32, #tpu.memory_space<vmem>>, vector<1x16x8xf32>
    %981 = vector.shape_cast %980 : vector<1x16x8xf32> to vector<16x8xf32>
    %cst_1047 = arith.constant dense<0.000000e+00> : vector<2x8xf32>
    %982 = tpu.matmul %979, %981, %cst_1047 {dimension_numbers = #tpu.dot_dimension_numbers<[1], [0], [0], [1], [0, 0, 1, 1], [], []>} : vector<2x16xf32>, vector<16x8xf32>, vector<2x8xf32> -> vector<2x8xf32>
    %983 = arith.addf %977, %982 : vector<2x8xf32>
    %c0_1048 = arith.constant 0 : index
    %c2_1049 = arith.constant 2 : index
    %c0_1050 = arith.constant 0 : index
    %984 = vector.load %arg28[%c0_1048, %c2_1049, %c0_1050] : memref<4x4x16xf32, #tpu.memory_space<vmem>>, vector<1x2x16xf32>
    %985 = vector.shape_cast %984 : vector<1x2x16xf32> to vector<2x16xf32>
    %c2_1051 = arith.constant 2 : index
    %c0_1052 = arith.constant 0 : index
    %c0_1053 = arith.constant 0 : index
    %986 = vector.load %arg16[%c2_1051, %c0_1052, %c0_1053] : memref<9x16x8xf32, #tpu.memory_space<vmem>>, vector<1x16x8xf32>
    %987 = vector.shape_cast %986 : vector<1x16x8xf32> to vector<16x8xf32>
    %cst_1054 = arith.constant dense<0.000000e+00> : vector<2x8xf32>
    %988 = tpu.matmul %985, %987, %cst_1054 {dimension_numbers = #tpu.dot_dimension_numbers<[1], [0], [0], [1], [0, 0, 1, 1], [], []>} : vector<2x16xf32>, vector<16x8xf32>, vector<2x8xf32> -> vector<2x8xf32>
    %989 = arith.addf %983, %988 : vector<2x8xf32>
    %c1_1055 = arith.constant 1 : index
    %c0_1056 = arith.constant 0 : index
    %c0_1057 = arith.constant 0 : index
    %990 = vector.load %arg28[%c1_1055, %c0_1056, %c0_1057] : memref<4x4x16xf32, #tpu.memory_space<vmem>>, vector<1x2x16xf32>
    %991 = vector.shape_cast %990 : vector<1x2x16xf32> to vector<2x16xf32>
    %c3_1058 = arith.constant 3 : index
    %c0_1059 = arith.constant 0 : index
    %c0_1060 = arith.constant 0 : index
    %992 = vector.load %arg16[%c3_1058, %c0_1059, %c0_1060] : memref<9x16x8xf32, #tpu.memory_space<vmem>>, vector<1x16x8xf32>
    %993 = vector.shape_cast %992 : vector<1x16x8xf32> to vector<16x8xf32>
    %cst_1061 = arith.constant dense<0.000000e+00> : vector<2x8xf32>
    %994 = tpu.matmul %991, %993, %cst_1061 {dimension_numbers = #tpu.dot_dimension_numbers<[1], [0], [0], [1], [0, 0, 1, 1], [], []>} : vector<2x16xf32>, vector<16x8xf32>, vector<2x8xf32> -> vector<2x8xf32>
    %995 = arith.addf %989, %994 : vector<2x8xf32>
    %c1_1062 = arith.constant 1 : index
    %c1_1063 = arith.constant 1 : index
    %c0_1064 = arith.constant 0 : index
    %996 = vector.load %arg28[%c1_1062, %c1_1063, %c0_1064] : memref<4x4x16xf32, #tpu.memory_space<vmem>>, vector<1x2x16xf32>
    %997 = vector.shape_cast %996 : vector<1x2x16xf32> to vector<2x16xf32>
    %c4_1065 = arith.constant 4 : index
    %c0_1066 = arith.constant 0 : index
    %c0_1067 = arith.constant 0 : index
    %998 = vector.load %arg16[%c4_1065, %c0_1066, %c0_1067] : memref<9x16x8xf32, #tpu.memory_space<vmem>>, vector<1x16x8xf32>
    %999 = vector.shape_cast %998 : vector<1x16x8xf32> to vector<16x8xf32>
    %cst_1068 = arith.constant dense<0.000000e+00> : vector<2x8xf32>
    %1000 = tpu.matmul %997, %999, %cst_1068 {dimension_numbers = #tpu.dot_dimension_numbers<[1], [0], [0], [1], [0, 0, 1, 1], [], []>} : vector<2x16xf32>, vector<16x8xf32>, vector<2x8xf32> -> vector<2x8xf32>
    %1001 = arith.addf %995, %1000 : vector<2x8xf32>
    %c1_1069 = arith.constant 1 : index
    %c2_1070 = arith.constant 2 : index
    %c0_1071 = arith.constant 0 : index
    %1002 = vector.load %arg28[%c1_1069, %c2_1070, %c0_1071] : memref<4x4x16xf32, #tpu.memory_space<vmem>>, vector<1x2x16xf32>
    %1003 = vector.shape_cast %1002 : vector<1x2x16xf32> to vector<2x16xf32>
    %c5_1072 = arith.constant 5 : index
    %c0_1073 = arith.constant 0 : index
    %c0_1074 = arith.constant 0 : index
    %1004 = vector.load %arg16[%c5_1072, %c0_1073, %c0_1074] : memref<9x16x8xf32, #tpu.memory_space<vmem>>, vector<1x16x8xf32>
    %1005 = vector.shape_cast %1004 : vector<1x16x8xf32> to vector<16x8xf32>
    %cst_1075 = arith.constant dense<0.000000e+00> : vector<2x8xf32>
    %1006 = tpu.matmul %1003, %1005, %cst_1075 {dimension_numbers = #tpu.dot_dimension_numbers<[1], [0], [0], [1], [0, 0, 1, 1], [], []>} : vector<2x16xf32>, vector<16x8xf32>, vector<2x8xf32> -> vector<2x8xf32>
    %1007 = arith.addf %1001, %1006 : vector<2x8xf32>
    %c2_1076 = arith.constant 2 : index
    %c0_1077 = arith.constant 0 : index
    %c0_1078 = arith.constant 0 : index
    %1008 = vector.load %arg28[%c2_1076, %c0_1077, %c0_1078] : memref<4x4x16xf32, #tpu.memory_space<vmem>>, vector<1x2x16xf32>
    %1009 = vector.shape_cast %1008 : vector<1x2x16xf32> to vector<2x16xf32>
    %c6_1079 = arith.constant 6 : index
    %c0_1080 = arith.constant 0 : index
    %c0_1081 = arith.constant 0 : index
    %1010 = vector.load %arg16[%c6_1079, %c0_1080, %c0_1081] : memref<9x16x8xf32, #tpu.memory_space<vmem>>, vector<1x16x8xf32>
    %1011 = vector.shape_cast %1010 : vector<1x16x8xf32> to vector<16x8xf32>
    %cst_1082 = arith.constant dense<0.000000e+00> : vector<2x8xf32>
    %1012 = tpu.matmul %1009, %1011, %cst_1082 {dimension_numbers = #tpu.dot_dimension_numbers<[1], [0], [0], [1], [0, 0, 1, 1], [], []>} : vector<2x16xf32>, vector<16x8xf32>, vector<2x8xf32> -> vector<2x8xf32>
    %1013 = arith.addf %1007, %1012 : vector<2x8xf32>
    %c2_1083 = arith.constant 2 : index
    %c1_1084 = arith.constant 1 : index
    %c0_1085 = arith.constant 0 : index
    %1014 = vector.load %arg28[%c2_1083, %c1_1084, %c0_1085] : memref<4x4x16xf32, #tpu.memory_space<vmem>>, vector<1x2x16xf32>
    %1015 = vector.shape_cast %1014 : vector<1x2x16xf32> to vector<2x16xf32>
    %c7_1086 = arith.constant 7 : index
    %c0_1087 = arith.constant 0 : index
    %c0_1088 = arith.constant 0 : index
    %1016 = vector.load %arg16[%c7_1086, %c0_1087, %c0_1088] : memref<9x16x8xf32, #tpu.memory_space<vmem>>, vector<1x16x8xf32>
    %1017 = vector.shape_cast %1016 : vector<1x16x8xf32> to vector<16x8xf32>
    %cst_1089 = arith.constant dense<0.000000e+00> : vector<2x8xf32>
    %1018 = tpu.matmul %1015, %1017, %cst_1089 {dimension_numbers = #tpu.dot_dimension_numbers<[1], [0], [0], [1], [0, 0, 1, 1], [], []>} : vector<2x16xf32>, vector<16x8xf32>, vector<2x8xf32> -> vector<2x8xf32>
    %1019 = arith.addf %1013, %1018 : vector<2x8xf32>
    %c2_1090 = arith.constant 2 : index
    %c2_1091 = arith.constant 2 : index
    %c0_1092 = arith.constant 0 : index
    %1020 = vector.load %arg28[%c2_1090, %c2_1091, %c0_1092] : memref<4x4x16xf32, #tpu.memory_space<vmem>>, vector<1x2x16xf32>
    %1021 = vector.shape_cast %1020 : vector<1x2x16xf32> to vector<2x16xf32>
    %c8_1093 = arith.constant 8 : index
    %c0_1094 = arith.constant 0 : index
    %c0_1095 = arith.constant 0 : index
    %1022 = vector.load %arg16[%c8_1093, %c0_1094, %c0_1095] : memref<9x16x8xf32, #tpu.memory_space<vmem>>, vector<1x16x8xf32>
    %1023 = vector.shape_cast %1022 : vector<1x16x8xf32> to vector<16x8xf32>
    %cst_1096 = arith.constant dense<0.000000e+00> : vector<2x8xf32>
    %1024 = tpu.matmul %1021, %1023, %cst_1096 {dimension_numbers = #tpu.dot_dimension_numbers<[1], [0], [0], [1], [0, 0, 1, 1], [], []>} : vector<2x16xf32>, vector<16x8xf32>, vector<2x8xf32> -> vector<2x8xf32>
    %1025 = arith.addf %1019, %1024 : vector<2x8xf32>
    %cst_1097 = arith.constant 0.000000e+00 : f32
    %1026 = vector.broadcast %cst_1097 : f32 to vector<2x8xf32>
    %c0_1098 = arith.constant 0 : index
    %c0_1099 = arith.constant 0 : index
    %1027 = vector.load %arg17[%c0_1098, %c0_1099] : memref<1x8xf32, #tpu.memory_space<vmem>>, vector<1x8xf32>
    %1028 = vector.broadcast %1027 : vector<1x8xf32> to vector<2x8xf32>
    %1029 = arith.addf %1026, %1028 : vector<2x8xf32>
    %c1_1100 = arith.constant 1 : index
    %c0_1101 = arith.constant 0 : index
    %c0_1102 = arith.constant 0 : index
    %1030 = vector.load %arg28[%c1_1100, %c0_1101, %c0_1102] : memref<4x4x16xf32, #tpu.memory_space<vmem>>, vector<1x2x16xf32>
    %1031 = vector.shape_cast %1030 : vector<1x2x16xf32> to vector<2x16xf32>
    %c0_1103 = arith.constant 0 : index
    %c0_1104 = arith.constant 0 : index
    %c0_1105 = arith.constant 0 : index
    %1032 = vector.load %arg16[%c0_1103, %c0_1104, %c0_1105] : memref<9x16x8xf32, #tpu.memory_space<vmem>>, vector<1x16x8xf32>
    %1033 = vector.shape_cast %1032 : vector<1x16x8xf32> to vector<16x8xf32>
    %cst_1106 = arith.constant dense<0.000000e+00> : vector<2x8xf32>
    %1034 = tpu.matmul %1031, %1033, %cst_1106 {dimension_numbers = #tpu.dot_dimension_numbers<[1], [0], [0], [1], [0, 0, 1, 1], [], []>} : vector<2x16xf32>, vector<16x8xf32>, vector<2x8xf32> -> vector<2x8xf32>
    %1035 = arith.addf %1029, %1034 : vector<2x8xf32>
    %c1_1107 = arith.constant 1 : index
    %c1_1108 = arith.constant 1 : index
    %c0_1109 = arith.constant 0 : index
    %1036 = vector.load %arg28[%c1_1107, %c1_1108, %c0_1109] : memref<4x4x16xf32, #tpu.memory_space<vmem>>, vector<1x2x16xf32>
    %1037 = vector.shape_cast %1036 : vector<1x2x16xf32> to vector<2x16xf32>
    %c1_1110 = arith.constant 1 : index
    %c0_1111 = arith.constant 0 : index
    %c0_1112 = arith.constant 0 : index
    %1038 = vector.load %arg16[%c1_1110, %c0_1111, %c0_1112] : memref<9x16x8xf32, #tpu.memory_space<vmem>>, vector<1x16x8xf32>
    %1039 = vector.shape_cast %1038 : vector<1x16x8xf32> to vector<16x8xf32>
    %cst_1113 = arith.constant dense<0.000000e+00> : vector<2x8xf32>
    %1040 = tpu.matmul %1037, %1039, %cst_1113 {dimension_numbers = #tpu.dot_dimension_numbers<[1], [0], [0], [1], [0, 0, 1, 1], [], []>} : vector<2x16xf32>, vector<16x8xf32>, vector<2x8xf32> -> vector<2x8xf32>
    %1041 = arith.addf %1035, %1040 : vector<2x8xf32>
    %c1_1114 = arith.constant 1 : index
    %c2_1115 = arith.constant 2 : index
    %c0_1116 = arith.constant 0 : index
    %1042 = vector.load %arg28[%c1_1114, %c2_1115, %c0_1116] : memref<4x4x16xf32, #tpu.memory_space<vmem>>, vector<1x2x16xf32>
    %1043 = vector.shape_cast %1042 : vector<1x2x16xf32> to vector<2x16xf32>
    %c2_1117 = arith.constant 2 : index
    %c0_1118 = arith.constant 0 : index
    %c0_1119 = arith.constant 0 : index
    %1044 = vector.load %arg16[%c2_1117, %c0_1118, %c0_1119] : memref<9x16x8xf32, #tpu.memory_space<vmem>>, vector<1x16x8xf32>
    %1045 = vector.shape_cast %1044 : vector<1x16x8xf32> to vector<16x8xf32>
    %cst_1120 = arith.constant dense<0.000000e+00> : vector<2x8xf32>
    %1046 = tpu.matmul %1043, %1045, %cst_1120 {dimension_numbers = #tpu.dot_dimension_numbers<[1], [0], [0], [1], [0, 0, 1, 1], [], []>} : vector<2x16xf32>, vector<16x8xf32>, vector<2x8xf32> -> vector<2x8xf32>
    %1047 = arith.addf %1041, %1046 : vector<2x8xf32>
    %c2_1121 = arith.constant 2 : index
    %c0_1122 = arith.constant 0 : index
    %c0_1123 = arith.constant 0 : index
    %1048 = vector.load %arg28[%c2_1121, %c0_1122, %c0_1123] : memref<4x4x16xf32, #tpu.memory_space<vmem>>, vector<1x2x16xf32>
    %1049 = vector.shape_cast %1048 : vector<1x2x16xf32> to vector<2x16xf32>
    %c3_1124 = arith.constant 3 : index
    %c0_1125 = arith.constant 0 : index
    %c0_1126 = arith.constant 0 : index
    %1050 = vector.load %arg16[%c3_1124, %c0_1125, %c0_1126] : memref<9x16x8xf32, #tpu.memory_space<vmem>>, vector<1x16x8xf32>
    %1051 = vector.shape_cast %1050 : vector<1x16x8xf32> to vector<16x8xf32>
    %cst_1127 = arith.constant dense<0.000000e+00> : vector<2x8xf32>
    %1052 = tpu.matmul %1049, %1051, %cst_1127 {dimension_numbers = #tpu.dot_dimension_numbers<[1], [0], [0], [1], [0, 0, 1, 1], [], []>} : vector<2x16xf32>, vector<16x8xf32>, vector<2x8xf32> -> vector<2x8xf32>
    %1053 = arith.addf %1047, %1052 : vector<2x8xf32>
    %c2_1128 = arith.constant 2 : index
    %c1_1129 = arith.constant 1 : index
    %c0_1130 = arith.constant 0 : index
    %1054 = vector.load %arg28[%c2_1128, %c1_1129, %c0_1130] : memref<4x4x16xf32, #tpu.memory_space<vmem>>, vector<1x2x16xf32>
    %1055 = vector.shape_cast %1054 : vector<1x2x16xf32> to vector<2x16xf32>
    %c4_1131 = arith.constant 4 : index
    %c0_1132 = arith.constant 0 : index
    %c0_1133 = arith.constant 0 : index
    %1056 = vector.load %arg16[%c4_1131, %c0_1132, %c0_1133] : memref<9x16x8xf32, #tpu.memory_space<vmem>>, vector<1x16x8xf32>
    %1057 = vector.shape_cast %1056 : vector<1x16x8xf32> to vector<16x8xf32>
    %cst_1134 = arith.constant dense<0.000000e+00> : vector<2x8xf32>
    %1058 = tpu.matmul %1055, %1057, %cst_1134 {dimension_numbers = #tpu.dot_dimension_numbers<[1], [0], [0], [1], [0, 0, 1, 1], [], []>} : vector<2x16xf32>, vector<16x8xf32>, vector<2x8xf32> -> vector<2x8xf32>
    %1059 = arith.addf %1053, %1058 : vector<2x8xf32>
    %c2_1135 = arith.constant 2 : index
    %c2_1136 = arith.constant 2 : index
    %c0_1137 = arith.constant 0 : index
    %1060 = vector.load %arg28[%c2_1135, %c2_1136, %c0_1137] : memref<4x4x16xf32, #tpu.memory_space<vmem>>, vector<1x2x16xf32>
    %1061 = vector.shape_cast %1060 : vector<1x2x16xf32> to vector<2x16xf32>
    %c5_1138 = arith.constant 5 : index
    %c0_1139 = arith.constant 0 : index
    %c0_1140 = arith.constant 0 : index
    %1062 = vector.load %arg16[%c5_1138, %c0_1139, %c0_1140] : memref<9x16x8xf32, #tpu.memory_space<vmem>>, vector<1x16x8xf32>
    %1063 = vector.shape_cast %1062 : vector<1x16x8xf32> to vector<16x8xf32>
    %cst_1141 = arith.constant dense<0.000000e+00> : vector<2x8xf32>
    %1064 = tpu.matmul %1061, %1063, %cst_1141 {dimension_numbers = #tpu.dot_dimension_numbers<[1], [0], [0], [1], [0, 0, 1, 1], [], []>} : vector<2x16xf32>, vector<16x8xf32>, vector<2x8xf32> -> vector<2x8xf32>
    %1065 = arith.addf %1059, %1064 : vector<2x8xf32>
    %c3_1142 = arith.constant 3 : index
    %c0_1143 = arith.constant 0 : index
    %c0_1144 = arith.constant 0 : index
    %1066 = vector.load %arg28[%c3_1142, %c0_1143, %c0_1144] : memref<4x4x16xf32, #tpu.memory_space<vmem>>, vector<1x2x16xf32>
    %1067 = vector.shape_cast %1066 : vector<1x2x16xf32> to vector<2x16xf32>
    %c6_1145 = arith.constant 6 : index
    %c0_1146 = arith.constant 0 : index
    %c0_1147 = arith.constant 0 : index
    %1068 = vector.load %arg16[%c6_1145, %c0_1146, %c0_1147] : memref<9x16x8xf32, #tpu.memory_space<vmem>>, vector<1x16x8xf32>
    %1069 = vector.shape_cast %1068 : vector<1x16x8xf32> to vector<16x8xf32>
    %cst_1148 = arith.constant dense<0.000000e+00> : vector<2x8xf32>
    %1070 = tpu.matmul %1067, %1069, %cst_1148 {dimension_numbers = #tpu.dot_dimension_numbers<[1], [0], [0], [1], [0, 0, 1, 1], [], []>} : vector<2x16xf32>, vector<16x8xf32>, vector<2x8xf32> -> vector<2x8xf32>
    %1071 = arith.addf %1065, %1070 : vector<2x8xf32>
    %c3_1149 = arith.constant 3 : index
    %c1_1150 = arith.constant 1 : index
    %c0_1151 = arith.constant 0 : index
    %1072 = vector.load %arg28[%c3_1149, %c1_1150, %c0_1151] : memref<4x4x16xf32, #tpu.memory_space<vmem>>, vector<1x2x16xf32>
    %1073 = vector.shape_cast %1072 : vector<1x2x16xf32> to vector<2x16xf32>
    %c7_1152 = arith.constant 7 : index
    %c0_1153 = arith.constant 0 : index
    %c0_1154 = arith.constant 0 : index
    %1074 = vector.load %arg16[%c7_1152, %c0_1153, %c0_1154] : memref<9x16x8xf32, #tpu.memory_space<vmem>>, vector<1x16x8xf32>
    %1075 = vector.shape_cast %1074 : vector<1x16x8xf32> to vector<16x8xf32>
    %cst_1155 = arith.constant dense<0.000000e+00> : vector<2x8xf32>
    %1076 = tpu.matmul %1073, %1075, %cst_1155 {dimension_numbers = #tpu.dot_dimension_numbers<[1], [0], [0], [1], [0, 0, 1, 1], [], []>} : vector<2x16xf32>, vector<16x8xf32>, vector<2x8xf32> -> vector<2x8xf32>
    %1077 = arith.addf %1071, %1076 : vector<2x8xf32>
    %c3_1156 = arith.constant 3 : index
    %c2_1157 = arith.constant 2 : index
    %c0_1158 = arith.constant 0 : index
    %1078 = vector.load %arg28[%c3_1156, %c2_1157, %c0_1158] : memref<4x4x16xf32, #tpu.memory_space<vmem>>, vector<1x2x16xf32>
    %1079 = vector.shape_cast %1078 : vector<1x2x16xf32> to vector<2x16xf32>
    %c8_1159 = arith.constant 8 : index
    %c0_1160 = arith.constant 0 : index
    %c0_1161 = arith.constant 0 : index
    %1080 = vector.load %arg16[%c8_1159, %c0_1160, %c0_1161] : memref<9x16x8xf32, #tpu.memory_space<vmem>>, vector<1x16x8xf32>
    %1081 = vector.shape_cast %1080 : vector<1x16x8xf32> to vector<16x8xf32>
    %cst_1162 = arith.constant dense<0.000000e+00> : vector<2x8xf32>
    %1082 = tpu.matmul %1079, %1081, %cst_1162 {dimension_numbers = #tpu.dot_dimension_numbers<[1], [0], [0], [1], [0, 0, 1, 1], [], []>} : vector<2x16xf32>, vector<16x8xf32>, vector<2x8xf32> -> vector<2x8xf32>
    %1083 = arith.addf %1077, %1082 : vector<2x8xf32>
    %1084 = arith.maximumf %1025, %1083 : vector<2x8xf32>
    %1085 = vector.extract_strided_slice %1084 {offsets = [0, 0], sizes = [1, 8], strides = [1, 1]} : vector<2x8xf32> to vector<1x8xf32>
    %1086 = vector.extract_strided_slice %1084 {offsets = [1, 0], sizes = [1, 8], strides = [1, 1]} : vector<2x8xf32> to vector<1x8xf32>
    %1087 = arith.maximumf %1085, %1086 : vector<1x8xf32>
    %c0_1163 = arith.constant 0 : index
    %c0_1164 = arith.constant 0 : index
    %1088 = vector.load %arg18[%c0_1163, %c0_1164] : memref<8x4xf32, #tpu.memory_space<vmem>>, vector<8x4xf32>
    %cst_1165 = arith.constant dense<0.000000e+00> : vector<1x4xf32>
    %1089 = tpu.matmul %1087, %1088, %cst_1165 {dimension_numbers = #tpu.dot_dimension_numbers<[1], [0], [0], [1], [0, 0, 1, 1], [], []>} : vector<1x8xf32>, vector<8x4xf32>, vector<1x4xf32> -> vector<1x4xf32>
    %c0_1166 = arith.constant 0 : index
    %c0_1167 = arith.constant 0 : index
    %1090 = vector.load %arg19[%c0_1166, %c0_1167] : memref<8x4xf32, #tpu.memory_space<vmem>>, vector<8x4xf32>
    %cst_1168 = arith.constant dense<0.000000e+00> : vector<1x4xf32>
    %1091 = tpu.matmul %1087, %1090, %cst_1168 {dimension_numbers = #tpu.dot_dimension_numbers<[1], [0], [0], [1], [0, 0, 1, 1], [], []>} : vector<1x8xf32>, vector<8x4xf32>, vector<1x4xf32> -> vector<1x4xf32>
    %1092 = arith.maximumf %1089, %1091 : vector<1x4xf32>
    %cst_1169 = arith.constant 0.000000e+00 : f32
    %1093 = vector.broadcast %cst_1169 : f32 to vector<1x4xf32>
    %1094 = arith.maximumf %1092, %1093 : vector<1x4xf32>
    %c0_1170 = arith.constant 0 : index
    %c0_1171 = arith.constant 0 : index
    %1095 = vector.load %arg20[%c0_1170, %c0_1171] : memref<4x128xf32, #tpu.memory_space<vmem>>, vector<4x128xf32>
    %cst_1172 = arith.constant dense<0.000000e+00> : vector<1x128xf32>
    %1096 = tpu.matmul %1094, %1095, %cst_1172 {dimension_numbers = #tpu.dot_dimension_numbers<[1], [0], [0], [1], [0, 0, 1, 1], [], []>} : vector<1x4xf32>, vector<4x128xf32>, vector<1x128xf32> -> vector<1x128xf32>
    %c0_1173 = arith.constant 0 : index
    %c0_1174 = arith.constant 0 : index
    %1097 = vector.load %arg21[%c0_1173, %c0_1174] : memref<1x128xf32, #tpu.memory_space<vmem>>, vector<1x128xf32>
    %1098 = arith.addf %1096, %1097 : vector<1x128xf32>
    %cst_1175 = arith.constant 0.000000e+00 : f32
    %1099 = vector.broadcast %cst_1175 : f32 to vector<1x128xf32>
    %1100 = arith.maximumf %1098, %1099 : vector<1x128xf32>
    %c0_1176 = arith.constant 0 : index
    %c0_1177 = arith.constant 0 : index
    %1101 = vector.load %arg22[%c0_1176, %c0_1177] : memref<128x128xf32, #tpu.memory_space<vmem>>, vector<128x128xf32>
    %cst_1178 = arith.constant dense<0.000000e+00> : vector<1x128xf32>
    %1102 = tpu.matmul %1100, %1101, %cst_1178 {dimension_numbers = #tpu.dot_dimension_numbers<[1], [0], [0], [1], [0, 0, 1, 1], [], []>} : vector<1x128xf32>, vector<128x128xf32>, vector<1x128xf32> -> vector<1x128xf32>
    %c0_1179 = arith.constant 0 : index
    %c0_1180 = arith.constant 0 : index
    %1103 = vector.load %arg23[%c0_1179, %c0_1180] : memref<1x128xf32, #tpu.memory_space<vmem>>, vector<1x128xf32>
    %1104 = arith.addf %1102, %1103 : vector<1x128xf32>
    %cst_1181 = arith.constant 0.000000e+00 : f32
    %1105 = vector.broadcast %cst_1181 : f32 to vector<1x128xf32>
    %1106 = arith.maximumf %1104, %1105 : vector<1x128xf32>
    %c0_1182 = arith.constant 0 : index
    %c0_1183 = arith.constant 0 : index
    %1107 = vector.load %arg24[%c0_1182, %c0_1183] : memref<128x2xf32, #tpu.memory_space<vmem>>, vector<128x2xf32>
    %cst_1184 = arith.constant dense<0.000000e+00> : vector<1x2xf32>
    %1108 = tpu.matmul %1106, %1107, %cst_1184 {dimension_numbers = #tpu.dot_dimension_numbers<[1], [0], [0], [1], [0, 0, 1, 1], [], []>} : vector<1x128xf32>, vector<128x2xf32>, vector<1x2xf32> -> vector<1x2xf32>
    %c0_1185 = arith.constant 0 : index
    %c0_1186 = arith.constant 0 : index
    %1109 = vector.load %arg25[%c0_1185, %c0_1186] : memref<1x2xf32, #tpu.memory_space<vmem>>, vector<1x2xf32>
    %1110 = arith.addf %1108, %1109 : vector<1x2xf32>
    %cst_1187 = arith.constant dense<0xFF800000> : vector<1xf32>
    %1111 = vector.multi_reduction <maximumf>, %1110, %cst_1187 [1] : vector<1x2xf32> to vector<1xf32>
    %1112 = vector.shape_cast %1111 : vector<1xf32> to vector<1x1xf32>
    %1113 = vector.broadcast %1112 : vector<1x1xf32> to vector<1x2xf32>
    %1114 = arith.subf %1110, %1113 : vector<1x2xf32>
    %1115 = math.exp %1114 : vector<1x2xf32>
    %cst_1188 = arith.constant dense<0.000000e+00> : vector<1xf32>
    %1116 = vector.multi_reduction <add>, %1115, %cst_1188 [1] : vector<1x2xf32> to vector<1xf32>
    %1117 = vector.shape_cast %1116 : vector<1xf32> to vector<1x1xf32>
    %1118 = vector.broadcast %1117 : vector<1x1xf32> to vector<1x2xf32>
    %1119 = arith.divf %1115, %1118 : vector<1x2xf32>
    %c0_1189 = arith.constant 0 : index
    %c0_1190 = arith.constant 0 : index
    %c0_1191 = arith.constant 0 : index
    %1120 = vector.load %arg26[%c0_1189, %c0_1190, %c0_1191] : memref<1x1x2xf32, #tpu.memory_space<vmem>>, vector<1x1x2xf32>
    %1121 = vector.shape_cast %1120 : vector<1x1x2xf32> to vector<1x2xf32>
    %1122 = vector.shape_cast %1119 : vector<1x2xf32> to vector<1x1x2xf32>
    tpu.vector_store %arg26[%c0_1189, %c0_1190, %c0_1191], %1122 {strides = array<i32>} : memref<1x1x2xf32, #tpu.memory_space<vmem>>, vector<1x1x2xf32>,
    return
  }
  func.func @transform_0(%arg0: i32) -> (i32, i32, i32, i32) {
    %c0_i32 = arith.constant 0 : i32
    %c0_i32_0 = arith.constant 0 : i32
    %c0_i32_1 = arith.constant 0 : i32
    %c0_i32_2 = arith.constant 0 : i32
    return %arg0, %c0_i32, %c0_i32_0, %c0_i32_1 : i32, i32, i32, i32
  }
  func.func @transform_1(%arg0: i32) -> (i32, i32) {
    %c0_i32 = arith.constant 0 : i32
    %c0_i32_0 = arith.constant 0 : i32
    %c0_i32_1 = arith.constant 0 : i32
    return %c0_i32, %c0_i32_0 : i32, i32
  }
  func.func @transform_2(%arg0: i32) -> (i32, i32) {
    %c0_i32 = arith.constant 0 : i32
    %c0_i32_0 = arith.constant 0 : i32
    %c0_i32_1 = arith.constant 0 : i32
    return %c0_i32, %c0_i32_0 : i32, i32
  }
  func.func @transform_3(%arg0: i32) -> (i32, i32) {
    %c0_i32 = arith.constant 0 : i32
    %c0_i32_0 = arith.constant 0 : i32
    %c0_i32_1 = arith.constant 0 : i32
    return %c0_i32, %c0_i32_0 : i32, i32
  }
  func.func @transform_4(%arg0: i32) -> (i32, i32) {
    %c0_i32 = arith.constant 0 : i32
    %c0_i32_0 = arith.constant 0 : i32
    %c0_i32_1 = arith.constant 0 : i32
    return %c0_i32, %c0_i32_0 : i32, i32
  }
  func.func @transform_5(%arg0: i32) -> (i32, i32) {
    %c0_i32 = arith.constant 0 : i32
    %c0_i32_0 = arith.constant 0 : i32
    %c0_i32_1 = arith.constant 0 : i32
    return %c0_i32, %c0_i32_0 : i32, i32
  }
  func.func @transform_6(%arg0: i32) -> (i32, i32) {
    %c0_i32 = arith.constant 0 : i32
    %c0_i32_0 = arith.constant 0 : i32
    %c0_i32_1 = arith.constant 0 : i32
    return %c0_i32, %c0_i32_0 : i32, i32
  }
  func.func @transform_7(%arg0: i32) -> (i32, i32) {
    %c0_i32 = arith.constant 0 : i32
    %c0_i32_0 = arith.constant 0 : i32
    %c0_i32_1 = arith.constant 0 : i32
    return %c0_i32, %c0_i32_0 : i32, i32
  }
  func.func @transform_8(%arg0: i32) -> (i32, i32) {
    %c0_i32 = arith.constant 0 : i32
    %c0_i32_0 = arith.constant 0 : i32
    %c0_i32_1 = arith.constant 0 : i32
    return %c0_i32, %c0_i32_0 : i32, i32
  }
  func.func @transform_9(%arg0: i32) -> (i32, i32, i32) {
    %c0_i32 = arith.constant 0 : i32
    %c0_i32_0 = arith.constant 0 : i32
    %c0_i32_1 = arith.constant 0 : i32
    %c0_i32_2 = arith.constant 0 : i32
    return %c0_i32, %c0_i32_0, %c0_i32_1 : i32, i32, i32
  }
  func.func @transform_10(%arg0: i32) -> (i32, i32) {
    %c0_i32 = arith.constant 0 : i32
    %c0_i32_0 = arith.constant 0 : i32
    %c0_i32_1 = arith.constant 0 : i32
    return %c0_i32, %c0_i32_0 : i32, i32
  }
  func.func @transform_11(%arg0: i32) -> (i32, i32) {
    %c0_i32 = arith.constant 0 : i32
    %c0_i32_0 = arith.constant 0 : i32
    %c0_i32_1 = arith.constant 0 : i32
    return %c0_i32, %c0_i32_0 : i32, i32
  }
  func.func @transform_12(%arg0: i32) -> (i32, i32) {
    %c0_i32 = arith.constant 0 : i32
    %c0_i32_0 = arith.constant 0 : i32
    %c0_i32_1 = arith.constant 0 : i32
    return %c0_i32, %c0_i32_0 : i32, i32
  }
  func.func @transform_13(%arg0: i32) -> (i32, i32) {
    %c0_i32 = arith.constant 0 : i32
    %c0_i32_0 = arith.constant 0 : i32
    %c0_i32_1 = arith.constant 0 : i32
    return %c0_i32, %c0_i32_0 : i32, i32
  }
  func.func @transform_14(%arg0: i32) -> (i32, i32) {
    %c0_i32 = arith.constant 0 : i32
    %c0_i32_0 = arith.constant 0 : i32
    %c0_i32_1 = arith.constant 0 : i32
    return %c0_i32, %c0_i32_0 : i32, i32
  }
  func.func @transform_15(%arg0: i32) -> (i32, i32, i32) {
    %c0_i32 = arith.constant 0 : i32
    %c0_i32_0 = arith.constant 0 : i32
    %c0_i32_1 = arith.constant 0 : i32
    %c0_i32_2 = arith.constant 0 : i32
    return %c0_i32, %c0_i32_0, %c0_i32_1 : i32, i32, i32
  }
  func.func @transform_16(%arg0: i32) -> (i32, i32) {
    %c0_i32 = arith.constant 0 : i32
    %c0_i32_0 = arith.constant 0 : i32
    %c0_i32_1 = arith.constant 0 : i32
    return %c0_i32, %c0_i32_0 : i32, i32
  }
  func.func @transform_17(%arg0: i32) -> (i32, i32) {
    %c0_i32 = arith.constant 0 : i32
    %c0_i32_0 = arith.constant 0 : i32
    %c0_i32_1 = arith.constant 0 : i32
    return %c0_i32, %c0_i32_0 : i32, i32
  }
  func.func @transform_18(%arg0: i32) -> (i32, i32) {
    %c0_i32 = arith.constant 0 : i32
    %c0_i32_0 = arith.constant 0 : i32
    %c0_i32_1 = arith.constant 0 : i32
    return %c0_i32, %c0_i32_0 : i32, i32
  }
  func.func @transform_19(%arg0: i32) -> (i32, i32) {
    %c0_i32 = arith.constant 0 : i32
    %c0_i32_0 = arith.constant 0 : i32
    %c0_i32_1 = arith.constant 0 : i32
    return %c0_i32, %c0_i32_0 : i32, i32
  }
  func.func @transform_20(%arg0: i32) -> (i32, i32) {
    %c0_i32 = arith.constant 0 : i32
    %c0_i32_0 = arith.constant 0 : i32
    %c0_i32_1 = arith.constant 0 : i32
    return %c0_i32, %c0_i32_0 : i32, i32
  }
  func.func @transform_21(%arg0: i32) -> (i32, i32) {
    %c0_i32 = arith.constant 0 : i32
    %c0_i32_0 = arith.constant 0 : i32
    %c0_i32_1 = arith.constant 0 : i32
    return %c0_i32, %c0_i32_0 : i32, i32
  }
  func.func @transform_22(%arg0: i32) -> (i32, i32) {
    %c0_i32 = arith.constant 0 : i32
    %c0_i32_0 = arith.constant 0 : i32
    %c0_i32_1 = arith.constant 0 : i32
    return %c0_i32, %c0_i32_0 : i32, i32
  }
  func.func @transform_23(%arg0: i32) -> (i32, i32) {
    %c0_i32 = arith.constant 0 : i32
    %c0_i32_0 = arith.constant 0 : i32
    %c0_i32_1 = arith.constant 0 : i32
    return %c0_i32, %c0_i32_0 : i32, i32
  }
  func.func @transform_24(%arg0: i32) -> (i32, i32) {
    %c0_i32 = arith.constant 0 : i32
    %c0_i32_0 = arith.constant 0 : i32
    %c0_i32_1 = arith.constant 0 : i32
    return %c0_i32, %c0_i32_0 : i32, i32
  }
  func.func @transform_25(%arg0: i32) -> (i32, i32, i32) {
    %c0_i32 = arith.constant 0 : i32
    %c0_i32_0 = arith.constant 0 : i32
    %c0_i32_1 = arith.constant 0 : i32
    return %arg0, %c0_i32, %c0_i32_0 : i32, i32, i32
  }
}

</mosaic_0001>

<bundles_post_ra>
// kernel: forward.1
= control target key start
LH: loop header
LB: loop body
LE: loop exit
PB: predicated region body
PF: predicated region fallthrough
CT: control target
= control target key end

     0   :  { %s28143_s0 = inlined_call_operand.vmem [shape: f32[2,20,20,160], index: 0, kind: input, shape index: {}]   ;;  %s28144_s1 = inlined_call_operand.vmem [shape: f32[160,80], index: 1, kind: input, shape index: {}]   ;;  %s28145_s2 = inlined_call_operand.vmem [shape: f32[1,80], index: 2, kind: input, shape index: {}]   ;;  %s28146_s3 = inlined_call_operand.vmem [shape: f32[80,80], index: 3, kind: input, shape index: {}]   ;;  %s28147_s4 = inlined_call_operand.vmem [shape: f32[1,80], index: 4, kind: input, shape index: {}]   ;;  %s28148_s5 = inlined_call_operand.vmem [shape: f32[10,20], index: 5, kind: input, shape index: {}]   ;;  %s28149_s6 = inlined_call_operand.vmem [shape: f32[10,20], index: 6, kind: input, shape index: {}]   ;;  %s28150_s7 = inlined_call_operand.vmem [shape: f32[80,40], index: 7, kind: input, shape index: {}]   ;;  %s28151_s8 = inlined_call_operand.vmem [shape: f32[80,40], index: 8, kind: input, shape index: {}]   ;;  %s28152_s9 = inlined_call_operand.vmem [shape: f32[9,40,32], index: 9, kind: input, shape index: {}]   ;;  %s28153_s10 = inlined_call_operand.vmem [shape: f32[1,32], index: 10, kind: input, shape index: {}]   ;;  %s28154_s11 = inlined_call_operand.vmem [shape: f32[4,8], index: 11, kind: input, shape index: {}]   ;;  %s28155_s12 = inlined_call_operand.vmem [shape: f32[4,8], index: 12, kind: input, shape index: {}]   ;;  %s28156_s13 = inlined_call_operand.vmem [shape: f32[32,16], index: 13, kind: input, shape index: {}]   ;;  %s28157_s14 = inlined_call_operand.vmem [shape: f32[32,16], index: 14, kind: input, shape index: {}]   ;;  %s28158_s15 = inlined_call_operand.vmem [shape: f32[9,16,8], index: 15, kind: input, shape index: {}]   ;;  %s28159_s16 = inlined_call_operand.vmem [shape: f32[1,8], index: 16, kind: input, shape index: {}]   ;;  %s28160_s17 = inlined_call_operand.vmem [shape: f32[8,4], index: 17, kind: input, shape index: {}]   ;;  %s28161_s18 = inlined_call_operand.vmem [shape: f32[8,4], index: 18, kind: input, shape index: {}]   ;;  %s28162_s19 = inlined_call_operand.vmem [shape: f32[4,128], index: 19, kind: input, shape index: {}]   ;;  %s28163_s20 = inlined_call_operand.vmem [shape: f32[1,128], index: 20, kind: input, shape index: {}]   ;;  %s28164_s21 = inlined_call_operand.vmem [shape: f32[128,128], index: 21, kind: input, shape index: {}]   ;;  %s28165_s22 = inlined_call_operand.vmem [shape: f32[1,128], index: 22, kind: input, shape index: {}]   ;;  %s28166_s23 = inlined_call_operand.vmem [shape: f32[128,2], index: 23, kind: input, shape index: {}]   ;;  %s28167_s24 = inlined_call_operand.vmem [shape: f32[1,2], index: 24, kind: input, shape index: {}]   ;;  %s28168_s25 = inlined_call_operand.hbm [shape: f32[2,1,2], index: 25, kind: output, shape index: {}]  }
   0x1   :  { %28195 = sst [smem:[#allocation16_spill]] %s28143_s0 }
   0x2   :  { %28196 = sst [smem:[#allocation17_spill]] %s28144_s1 }
   0x3   :  { %28197 = sst [smem:[#allocation18_spill]] %s28145_s2 }
   0x4   :  { %28198 = sst [smem:[#allocation19_spill]] %s28146_s3 }
   0x5   :  { %28199 = sst [smem:[#allocation20_spill]] %s28147_s4 }
   0x6   :  { %28200 = sst [smem:[#allocation21_spill]] %s28148_s5 }
   0x7   :  { %28201 = sst [smem:[#allocation22_spill]] %s28149_s6 }
   0x8   :  { %28202 = sst [smem:[#allocation23_spill]] %s28150_s7 }
   0x9   :  { %28203 = sst [smem:[#allocation24_spill]] %s28151_s8 }
   0xa   :  { %28204 = sst [smem:[#allocation25_spill]] %s28152_s9 }
   0xb   :  { %28205 = sst [smem:[#allocation26_spill]] %s28163_s20 }
   0xc   :  { %28206 = sst [smem:[#allocation27_spill]] %s28165_s22 }
   0xd   :  { %28207 = sst [smem:[#allocation28_spill]] %s28166_s23 }
   0xe   :  { %28208 = sst [smem:[#allocation29_spill]] %s28167_s24 }
   0xf   :  { %28209 = sst [smem:[#allocation30_spill]] %s28168_s25 }
  0x10   :  { %30 = vsyncpa [#allocation5], 0 }
  0x11   :  { %32 = vsyncpa [#allocation5 + $0x1], 0  ;;  %s23837_s29 = smov 0   ;;  %s23839_s2 = smov 0  }
  0x12   :  { %s23841_s6 = smov 0   ;;  %s23843_s30 = smov 0  }
  0x13 LB: > { %28210 = sst [smem:[#allocation7_spill]] %s23689_s29  ;;  %s23858_s7 = sadd.s32 4294967295, %s23701_s30   ;;  %s23701_s30 = sphi %s23843_s30, %s28248_s30   ;;  %s23697_s6 = sphi %s23841_s6, %s28251_s6   ;;  %s23693_s2 = sphi %s23839_s2, %s28250_s2   ;;  %s23689_s29 = sphi %s23837_s29, %s28249_s29  }
  0x14   : > { %28211 = sst [smem:[#allocation8_spill]] %s23693_s2  ;;  %s17130_s3 = sadd.s32 4294967294, %s23701_s30  }
  0x15   : > { %28212 = sst [smem:[#allocation9_spill]] %s23697_s6  ;;  %s23862_s26 = sadd.s32 1, %s23701_s30  }
  0x16   : > { %28213 = sst [smem:[#allocation10_spill]] %s23701_s30  ;;  %s575_s1 = sadd.s32 1, %s23697_s6 }
  0x17   : > { %28214 = sst [smem:[#allocation11_spill]] %s23858_s7  ;;  %s572_s8 = ssub.s32 %s23701_s30, %s23862_s26 }
  0x18   : > { %28215 = sst [smem:[#allocation12_spill]] %s23862_s26  ;;  %p585_p0 = scmp.ne.s32.totalorder %s23697_s6, %s23693_s2 }
  0x19   : > { %p573_p1 = scmp.eq.s32.totalorder %s572_s8, 0  ;;  %p586_p2 = scmp.eq.s32.totalorder %s23858_s7, 1 }
  0x1a   : > { %p591_p3 = scmp.ne.s32.totalorder %s23693_s2, %s23689_s29  ;;  %p592_p4 = scmp.eq.s32.totalorder %s17130_s3, 1 }
  0x1b   : > { %s23873_s27 = scalar_select %p573_p1, %s23697_s6, %s575_s1  }
  0x1c   : > { %p23875_p5 = por %p586_p2, %p585_p0  ;;  %p23879_p6 = por %p592_p4, %p591_p3 }
  0x1d   : > { %28216 = sst [smem:[#allocation13_spill]] %s23873_s27  ;;  %p17133_p7 = scmp.ge.s32.totalorder %s23701_s30, 1 }
  0x1e   : > { %s28217_s4 = scalar_select %p23875_p5, 1, 0 }
  0x1f   : > { %s28219_s28 = scalar_select %p23879_p6, 1, 0 }
  0x20   : > { %28218 = sst [smem:[#allocation14_spill]] %s28217_s4  ;;  %p690_p8 = scmp.lt.s32.totalorder %s23701_s30, 3 }
  0x21   : > { %28220 = sst [smem:[#allocation15_spill]] %s28219_s28 }
  0x22   : > { %p691_p9 = pnand %p17133_p7, %p690_p8 }
  0x23   : > { %s28221_s0 = sld [smem:[#allocation17_spill]] (!%p691_p9)  ;;  %p757_p10 = scmp.lt.s32.totalorder (!%p691_p9), %s23858_s7, 1  ;;  %v23703_v3 = vmov (!%p691_p9), 0.0|0.0   ;;  %vm795_vm0 = vcmask (!%p691_p9), 261120   ;;  %vm23704_vm1 = vmmov (!%p691_p9), 0   ;;  %v23705_v52 = vmov (!%p691_p9), 0.0  }
  0x24   : > { %694 = sbr.rel (%p691_p9) target bundleno = 13369 (0x3439), region = 120  ;;  %21460 = vmatprep.subr.bf16.mxu0 (!%p691_p9), %v23703_v3  ;;  %21490 = vmatprep.subr.bf16.mxu1 (!%p691_p9), %v23703_v3  ;;  %s28222_s28 = sld [smem:[#allocation16_spill]] (!%p691_p9)  ;;  %vm905_vm2 = vcmask (!%p691_p9), 654336   ;;  %vm1188_vm3 = vcmask (!%p691_p9), 162816   ;;  %vm1195_vm4 = vcmask (!%p691_p9), 1043456   ;;  %vm1541_vm5 = vcmask (!%p691_p9), 320512  }
  0x25   : > { %s28223_s5 = sld [smem:[#allocation19_spill]] (!%p691_p9)  ;;  %18985 = vmatprep.mubr.msk.f32.mxu1 (!%p691_p9), %vm23704_vm1, %v23705_v52  ;;  %s28224_s30 = sld [smem:[#allocation18_spill]] (!%p691_p9)  ;;  %vm1539_vm6 = vcmask (!%p691_p9), 326656   ;;  %vm9925_vm7 = vcmask (!%p691_p9), 64512   ;;  %vm10227_vm8 = vcmask (!%p691_p9), 125952   ;;  %vm15292_vm9 = vcmask (!%p691_p9), 130048  }
  0x26   : > { %s28226_s1 = sld [smem:[#allocation21_spill]] (!%p691_p9)  ;;  %s28230_s6 = sld [smem:[#allocation23_spill]] (!%p691_p9)  ;;  %vm16796_vm10 = vcmask (!%p691_p9), 31744   ;;  %vm17049_vm11 = vcmask (!%p691_p9), 8192  }
  0x27   : > { %s28232_s2 = sld [smem:[#allocation24_spill]] (!%p691_p9)  ;;  %s28234_s23 = sld [smem:[#allocation25_spill]] (!%p691_p9) }
  0x28   : > { %s28237_s20 = sld [smem:[#allocation26_spill]] (!%p691_p9)  ;;  %s28241_s22 = sld [smem:[#allocation11_spill]] (!%p691_p9) }
  0x29   : > { %v768_v0 = vld [vmem:[%s28221_s0] sm:$0xff] (!%p691_p9)  ;;  %v769_v1 = vld [vmem:[%s28221_s0 + $0x8] sm:$0xff] (!%p691_p9)  ;;  %v770_v2 = vld [vmem:[%s28221_s0 + $0x10] sm:$0xff] (!%p691_p9) }
  0x2a   : > { %v23896_v4 = vpack.c.bf16 (!%p691_p9), %v769_v1, %v768_v0  ;;  %v771_v5 = vld [vmem:[%s28221_s0 + $0x18] sm:$0xff] (!%p691_p9)  ;;  %v772_v7 = vld [vmem:[%s28221_s0 + $0x20] sm:$0xff] (!%p691_p9)  ;;  %v773_v8 = vld [vmem:[%s28221_s0 + $0x28] sm:$0xff] (!%p691_p9) }
  0x2b   : > { %s758_s9 = scalar_select %p757_p10, %s23858_s7, 1  ;;  %v23904_v6 = vpack.c.bf16 %v771_v5, %v770_v2  ;;  %v23919_v9 = vpack.c.bf16 %v773_v8, %v772_v7  ;;  %v888_v11 = vld [vmem:[%s28223_s5] sm:$0xff]  ;;  %v774_v12 = vld [vmem:[%s28221_s0 + $0x30] sm:$0xff]  ;;  %v775_v13 = vld [vmem:[%s28221_s0 + $0x38] sm:$0xff] }
  0x2c   : > { %21462 = vmatpush1.bf16.msra.mxu0 %v23896_v4  ;;  %v889_v14 = vld [vmem:[%s28223_s5 + $0x8] sm:$0xff]  ;;  %v890_v15 = vld [vmem:[%s28223_s5 + $0x10] sm:$0xff]  ;;  %v891_v16 = vld [vmem:[%s28223_s5 + $0x18] sm:$0xff]  ;;  %v23945_v18 = vpack.c.bf16 %v775_v13, %v774_v12  ;;  %s28225_s27 = smov %s28224_s30  ;;  %s28231_s25 = smov %s28230_s6 }
  0x2d   : > { %21463 = vmatprep.subr.bf16.mxu0 %v23703_v3  ;;  %s23592_s8 = smul.u32 960, %s758_s9  ;;  %v23942_v17 = vpack.c.bf16 %v889_v14, %v888_v11  ;;  %v776_v19 = vld [vmem:[%s28221_s0 + $0x40] sm:$0xff]  ;;  %v777_v20 = vld [vmem:[%s28221_s0 + $0x48] sm:$0xff]  ;;  %v23955_v21 = vpack.c.bf16 %v891_v16, %v890_v15  ;;  %v778_v25 = vld [vmem:[%s28221_s0 + $0x50] sm:$0xff]  ;;  %s28233_s24 = smov %s28232_s2 }
  0x2e   : > { %v892_v22 = vld [vmem:[%s28223_s5 + $0x20] sm:$0xff]  ;;  %v893_v23 = vld [vmem:[%s28223_s5 + $0x28] sm:$0xff]  ;;  %v23965_v24 = vpack.c.bf16 %v777_v20, %v776_v19  ;;  %v779_v26 = vld [vmem:[%s28221_s0 + $0x58] sm:$0xff] }
  0x2f   : > { %s23916_s29 = scalar_lea.vmem %s28222_s28, %s23592_s8  ;;  %21492 = vmatpush3.bf16.msra.mxu1 %v23942_v17  ;;  %v23975_v27 = vpack.c.bf16 %v893_v23, %v892_v22  ;;  %v894_v28 = vld [vmem:[%s28223_s5 + $0x30] sm:$0xff]  ;;  %v895_v29 = vld [vmem:[%s28223_s5 + $0x38] sm:$0xff]  ;;  %v23985_v30 = vpack.c.bf16 %v779_v26, %v778_v25  ;;  %v780_v31 = vld [vmem:[%s28221_s0 + $0x60] sm:$0xff]  ;;  %s28227_s28 = sld [smem:[#allocation22_spill]] }
  0x30   : > { %21465 = vmatpush1.bf16.msra.mxu0 %v23904_v6  ;;  %v763_v10 = vld [vmem:[%s23916_s29 + $0x8] sm:$0xff]  ;;  %21493 = vmatprep.subr.bf16.mxu1 %v23703_v3  ;;  %v23995_v33 = vpack.c.bf16 %v895_v29, %v894_v28  ;;  %v782_v35 = vld [vmem:[%s28221_s0 + $0x70] sm:$0xff]  ;;  %v783_v36 = vld [vmem:[%s28221_s0 + $0x78] sm:$0xff] }
  0x31   : > { %21466 = vmatprep.subr.bf16.mxu0 %v23703_v3  ;;  %17136 = vmatprep.mubr.msk.f32.mxu0 %vm795_vm0, %v763_v10  ;;  %v781_v32 = vld [vmem:[%s28221_s0 + $0x68] sm:$0xff]  ;;  %v24011_v37 = vpack.c.bf16 %v783_v36, %v782_v35  ;;  %v784_v38 = vld [vmem:[%s28221_s0 + $0x80] sm:$0xff]  ;;  %v786_v41 = vld [vmem:[%s28221_s0 + $0x90] sm:$0xff] }
  0x32   : > { %v23999_v34 = vpack.c.bf16 %v781_v32, %v780_v31  ;;  %v785_v39 = vld [vmem:[%s28221_s0 + $0x88] sm:$0xff]  ;;  %v787_v42 = vld [vmem:[%s28221_s0 + $0x98] sm:$0xff]  ;;  %v762_v44 = vld [vmem:[%s23916_s29] sm:$0xff] }
  0x33   : > { %21495 = vmatpush3.bf16.msra.mxu1 %v23955_v21  ;;  %v24021_v40 = vpack.c.bf16 %v785_v39, %v784_v38  ;;  %v24031_v43 = vpack.c.bf16 %v787_v42, %v786_v41  ;;  %v765_v45 = vld [vmem:[%s23916_s29 + $0x18] sm:$0xff]  ;;  %v764_v46 = vld [vmem:[%s23916_s29 + $0x10] sm:$0xff]  ;;  %v767_v47 = vld [vmem:[%s23916_s29 + $0x28] sm:$0xf] }
  0x34   : > { %21468 = vmatpush1.bf16.msra.mxu0 %v23919_v9  ;;  %21496 = vmatprep.subr.bf16.mxu1 %v23703_v3  ;;  %v766_v48 = vld [vmem:[%s23916_s29 + $0x20] sm:$0xf]  ;;  %v897_v50 = vld [vmem:[%s28223_s5 + $0x48] sm:$0xff]  ;;  %v17144_v2 = vld [vmem:[%s23916_s29 + $0x38] sm:$0xff] }
  0x35   : > { %21469 = vmatprep.subr.bf16.mxu0 %v23703_v3  ;;  %v896_v49 = vld [vmem:[%s28223_s5 + $0x40] sm:$0xff]  ;;  %v17143_v5 = vld [vmem:[%s23916_s29 + $0x30] sm:$0xff]  ;;  %v17146_v7 = vld [vmem:[%s23916_s29 + $0x48] sm:$0xff] }
  0x36   : > { %v24057_v51 = vpack.c.bf16 %v897_v50, %v896_v49  ;;  %v24069_v53 = vld [vmem:[%s28224_s30] ss:$0 sm:$0xff]  ;;  %v17148_v10 = vld [vmem:[%s23916_s29 + $0x58] sm:$0xf]  ;;  %v17147_v11 = vld [vmem:[%s23916_s29 + $0x50] sm:$0xf] }
  0x37   : > { %21498 = vmatpush3.bf16.msra.mxu1 %v23975_v27  ;;  %v17145_v8 = vld [vmem:[%s23916_s29 + $0x40] sm:$0xff]  ;;  %s28228_s30 = sld [smem:[#allocation20_spill]] }
  0x38   : > { %21471 = vmatpush1.bf16.msra.mxu0 %v23945_v18  ;;  %21499 = vmatprep.subr.bf16.mxu1 %v23703_v3  ;;  %v24122_v39 = vld [vmem:[%s28226_s1] sm:$0xff] }
  0x39   : > { %21472 = vmatprep.subr.bf16.mxu0 %v23703_v3  ;;  %v24127_v41 = vld [vmem:[%s28227_s28] sm:$0xff] }
  0x3b   : > { %21501 = vmatpush3.bf16.msra.mxu1 %v23995_v33 }
  0x3c   : > { %21474 = vmatpush1.bf16.msra.mxu0 %v23965_v24  ;;  %21502 = vmatprep.subr.bf16.mxu1 %v23703_v3 }
  0x3d   : > { %21475 = vmatprep.subr.bf16.mxu0 %v23703_v3  ;;  %s28229_s4 = smov %s28228_s30  ;;  %v24136_v42 = vld [vmem:[%s28228_s30] ss:$0 sm:$0xff]  ;;  %s28235_s30 = sld [smem:[#allocation28_spill]] }
  0x3f   : > { %21504 = vmatpush3.bf16.msra.mxu1 %v24057_v51 }
  0x40   : > { %21477 = vmatpush1.bf16.msra.mxu0 %v23985_v30  ;;  %21505 = vmatprep.subr.bf16.mxu1 %v23703_v3 }
  0x41   : > { %21478 = vmatprep.subr.bf16.mxu0 %v23703_v3 }
  0x43   : > { %s28236_s3 = smov %s28235_s30 }
  0x44   : > { %21480 = vmatpush1.bf16.msra.mxu0 %v23999_v34 }
  0x45   : > { %21481 = vmatprep.subr.bf16.mxu0 %v23703_v3 }
  0x48   : > { %21483 = vmatpush1.bf16.msra.mxu0 %v24011_v37 }
  0x49   : > { %21484 = vmatprep.subr.bf16.mxu0 %v23703_v3 }
  0x4c   : > { %21486 = vmatpush1.bf16.msra.mxu0 %v24021_v40 }
  0x4d   : > { %21487 = vmatprep.subr.bf16.mxu0 %v23703_v3 }
  0x50   : > { %21489 = vmatpush1.bf16.msra.mxu0 %v24031_v43 }
  0x51   : > { %21535 = vmatprep.subr.bf16.mxu0 %v23703_v3 }
  0x53   : > { %870 = vmatmul.mubr.f32.vlgmr.msra.gmra.mrb[0].mxu0 %v762_v44 }
  0x54   : > { %17137 = vmatprep.mubr.msk.f32.mxu0 %vm795_vm0, %v765_v45  ;;  %21537 = vmatpush3.bf16.msra.mxu0 %v23942_v17 }
  0x55   : > { %21538 = vmatprep.subr.bf16.mxu0 %v23703_v3 }
  0x57   : > { %875 = vmatmul.mubr.f32.gmra.mrb[2].mxu0 %v764_v46 }
  0x58   : > { %17138 = vmatprep.mubr.msk.f32.mxu0 %vm795_vm0, %v767_v47  ;;  %21540 = vmatpush3.bf16.msra.mxu0 %v23955_v21 }
  0x59   : > { %21541 = vmatprep.subr.bf16.mxu0 %v23703_v3 }
  0x5b   : > { %880 = vmatmul.mubr.f32.gmra.mrb[4].mxu0 %v766_v48 }
  0x5c   : > { %21543 = vmatpush3.bf16.msra.mxu0 %v23975_v27  ;;  %19014 = vmatprep.mubr.msk.f32.mxu0 %vm23704_vm1, %v23705_v52 }
  0x5d   : > { %21544 = vmatprep.subr.bf16.mxu0 %v23703_v3 }
  0x60   : > { %21546 = vmatpush3.bf16.msra.mxu0 %v23995_v33 }
  0x61   : > { %21547 = vmatprep.subr.bf16.mxu0 %v23703_v3 }
  0x64   : > { %21549 = vmatpush3.bf16.msra.mxu0 %v24057_v51 }
 0x126   : > { %v871_v54 = vpop.f32.mrb[0].mxu0 }
 0x127   : > { %v872_v55 = vadd.f32 %v24069_v53, %v871_v54  ;;  %v873_v56 = vpop.f32.mrb[1].mxu0 }
 0x129   : > { %v885_v57 = vmax.f32 %v872_v55, 0.0 }
 0x12a   : > { %v876_v58 = vpop.f32.mrb[2].mxu0 }
 0x12b   : > { %18986 = vmatmul.mubr.msk.f32.vlgmr.msra.gmra.mrb[0].mxu1 %vm905_vm2, %v885_v57  ;;  %v877_v59 = vadd.f32 %v24069_v53, %v876_v58  ;;  %v878_v60 = vpop.f32.mrb[3].mxu0 }
 0x12c   : > { %21507 = vmatpush1.bf16.msra.mxu1 %v23896_v4  ;;  %18988 = vmatprep.mubr.msk.f32.mxu1 %vm23704_vm1, %v23705_v52 }
 0x12d   : > { %21508 = vmatprep.subr.bf16.mxu1 %v23703_v3  ;;  %v886_v61 = vmax.f32 %v877_v59, 0.0 }
 0x12e   : > { %v881_v62 = vpop.f32.mrb[4].mxu0 }
 0x12f   : > { %v882_v63 = vadd.f32 %v24069_v53, %v881_v62  ;;  %v883_v0 = vpop.f32.mrb[5].mxu0  ;;  %18989 = vmatmul.mubr.msk.f32.gmra.mrb[2].mxu1 %vm905_vm2, %v886_v61  ;;  %v1359_v62 = vld [vmem:[%s28230_s6] sm:$0xff]  ;;  %s28238_s6 = sld [smem:[#allocation27_spill]] }
 0x130   : > { %21510 = vmatpush1.bf16.msra.mxu1 %v23904_v6  ;;  %18991 = vmatprep.mubr.msk.f32.mxu1 %vm23704_vm1, %v23705_v52  ;;  %v1360_v0 = vld [vmem:[%s28231_s25 + $0x8] sm:$0xff] }
 0x131   : > { %21511 = vmatprep.subr.bf16.mxu1 %v23703_v3  ;;  %v887_v1 = vmax.f32 %v882_v63, 0.0 }
 0x133   : > { %18992 = vmatmul.mubr.msk.f32.gmra.mrb[4].mxu1 %vm905_vm2, %v887_v1  ;;  %v1450_v1 = vld [vmem:[%s28232_s2] sm:$0xff]  ;;  %s28239_s2 = sld [smem:[#allocation29_spill]] }
 0x134   : > { %21513 = vmatpush1.bf16.msra.mxu1 %v23919_v9  ;;  %17149 = vmatprep.mubr.msk.f32.mxu1 %vm795_vm0, %v17144_v2  ;;  %v1451_v2 = vld [vmem:[%s28233_s24 + $0x8] sm:$0xff] }
 0x135   : > { %21514 = vmatprep.subr.bf16.mxu1 %v23703_v3 }
 0x138   : > { %21516 = vmatpush1.bf16.msra.mxu1 %v23945_v18 }
 0x139   : > { %21517 = vmatprep.subr.bf16.mxu1 %v23703_v3 }
 0x13c   : > { %21519 = vmatpush1.bf16.msra.mxu1 %v23965_v24 }
 0x13d   : > { %21520 = vmatprep.subr.bf16.mxu1 %v23703_v3 }
 0x140   : > { %21522 = vmatpush1.bf16.msra.mxu1 %v23985_v30 }
 0x141   : > { %21523 = vmatprep.subr.bf16.mxu1 %v23703_v3 }
 0x144   : > { %21525 = vmatpush1.bf16.msra.mxu1 %v23999_v34 }
 0x145   : > { %21526 = vmatprep.subr.bf16.mxu1 %v23703_v3 }
 0x148   : > { %21528 = vmatpush1.bf16.msra.mxu1 %v24011_v37 }
 0x149   : > { %21529 = vmatprep.subr.bf16.mxu1 %v23703_v3 }
 0x14c   : > { %21531 = vmatpush1.bf16.msra.mxu1 %v24021_v40 }
 0x14d   : > { %21532 = vmatprep.subr.bf16.mxu1 %v23703_v3 }
 0x150   : > { %21534 = vmatpush1.bf16.msra.mxu1 %v24031_v43 }
 0x153   : > { %1076 = vmatmul.mubr.f32.vlgmr.msra.gmra.mrb[6].mxu1 %v17143_v5  ;;  %v1361_v5 = vld [vmem:[%s28231_s25 + $0x10] sm:$0xff] }
 0x154   : > { %17150 = vmatprep.mubr.msk.f32.mxu1 %vm795_vm0, %v17146_v7  ;;  %v1362_v7 = vld [vmem:[%s28231_s25 + $0x18] sm:$0xff] }
 0x157   : > { %1081 = vmatmul.mubr.f32.gmra.mrb[8].mxu1 %v17145_v8  ;;  %v1452_v8 = vld [vmem:[%s28233_s24 + $0x10] sm:$0xff] }
 0x158   : > { %17151 = vmatprep.mubr.msk.f32.mxu1 %vm795_vm0, %v17148_v10  ;;  %v1453_v10 = vld [vmem:[%s28233_s24 + $0x18] sm:$0xff] }
 0x15b   : > { %1086 = vmatmul.mubr.f32.gmra.mrb[10].mxu1 %v17147_v11  ;;  %v1187_v11 = vld [vmem:[%s28226_s1 + $0x8] sm:$0x3] }
 0x15c   : > { %19038 = vmatprep.mubr.msk.f32.mxu1 %vm1188_vm3, %v24127_v41 }
 0x1fe   : > { %v981_v12 = vpop.f32.mrb[0].mxu1 }
 0x1ff   : > { %v18987_v13 = vpop.f32.mrb[1].mxu1  ;;  %v982_v45 = vadd.f32 %v24136_v42, %v981_v12  ;;  %v1275_v12 = vld [vmem:[%s28227_s28 + $0x8] sm:$0x3] }
 0x200   : > { %v24176_v13 = vpack.c.bf16 %v1360_v0, %v1359_v62  ;;  %v17170_v62 = vld [vmem:[%s23916_s29 + $0x88] sm:$0xf] }
 0x202   : > { %v986_v14 = vpop.f32.mrb[2].mxu1 }
 0x203   : > { %v18990_v15 = vpop.f32.mrb[3].mxu1  ;;  %v987_v50 = vadd.f32 %v24136_v42, %v986_v14  ;;  %v24178_v14 = vpack.c.bf16 %v1451_v2, %v1450_v1 }
 0x204   : > { %v24182_v15 = vpack.c.bf16 %v1362_v7, %v1361_v5 }
 0x206   : > { %v991_v16 = vpop.f32.mrb[4].mxu1 }
 0x207   : > { %v18993_v19 = vpop.f32.mrb[5].mxu1  ;;  %v992_v58 = vadd.f32 %v24136_v42, %v991_v16  ;;  %v24184_v16 = vpack.c.bf16 %v1453_v10, %v1452_v8 }
 0x208   : > { %v1363_v19 = vld [vmem:[%s28231_s25 + $0x20] sm:$0xff] }
 0x226   : > { %v1077_v20 = vpop.f32.mrb[6].mxu1 }
 0x227   : > { %v1078_v22 = vadd.f32 %v24069_v53, %v1077_v20  ;;  %v1079_v23 = vpop.f32.mrb[7].mxu1  ;;  %v1364_v20 = vld [vmem:[%s28231_s25 + $0x28] sm:$0xff] }
 0x228   : > { %v1455_v23 = vld [vmem:[%s28233_s24 + $0x28] sm:$0xff] }
 0x229   : > { %v1091_v25 = vmax.f32 %v1078_v22, 0.0  ;;  %v1454_v22 = vld [vmem:[%s28233_s24 + $0x20] sm:$0xff] }
 0x22a   : > { %v1082_v26 = vpop.f32.mrb[8].mxu1 }
 0x22b   : > { %v1083_v28 = vadd.f32 %v24069_v53, %v1082_v26  ;;  %v1084_v29 = vpop.f32.mrb[9].mxu1  ;;  %19015 = vmatmul.mubr.msk.f32.vlgmr.msra.gmra.mrb[6].mxu0 %vm905_vm2, %v1091_v25  ;;  %v24206_v25 = vpack.c.bf16 %v1364_v20, %v1363_v19  ;;  %v24208_v26 = vpack.c.bf16 %v1455_v23, %v1454_v22 }
 0x22c   : > { %19017 = vmatprep.mubr.msk.f32.mxu0 %vm23704_vm1, %v23705_v52  ;;  %v1366_v29 = vld [vmem:[%s28231_s25 + $0x38] sm:$0xff] }
 0x22d   : > { %v1092_v31 = vmax.f32 %v1083_v28, 0.0  ;;  %v1365_v28 = vld [vmem:[%s28231_s25 + $0x30] sm:$0xff] }
 0x22e   : > { %v1087_v32 = vpop.f32.mrb[10].mxu1 }
 0x22f   : > { %v1088_v35 = vadd.f32 %v24069_v53, %v1087_v32  ;;  %19018 = vmatmul.mubr.msk.f32.gmra.mrb[8].mxu0 %vm905_vm2, %v1092_v31  ;;  %v1089_v36 = vpop.f32.mrb[11].mxu1  ;;  %v1456_v31 = vld [vmem:[%s28233_s24 + $0x30] sm:$0xff]  ;;  %v1457_v32 = vld [vmem:[%s28233_s24 + $0x38] sm:$0xff] }
 0x230   : > { %19020 = vmatprep.mubr.msk.f32.mxu0 %vm23704_vm1, %v23705_v52  ;;  %v24228_v36 = vpack.c.bf16 %v1457_v32, %v1456_v31 }
 0x231   : > { %v1093_v38 = vmax.f32 %v1088_v35, 0.0  ;;  %v24226_v35 = vpack.c.bf16 %v1366_v29, %v1365_v28  ;;  %v17180_v29 = vld [vmem:[%s23916_s29 + $0x98] sm:$0xff] }
 0x233   : > { %19021 = vmatmul.mubr.msk.f32.gmra.mrb[10].mxu0 %vm905_vm2, %v1093_v38  ;;  %v1367_v38 = vld [vmem:[%s28231_s25 + $0x40] sm:$0xff] }
 0x234   : > { %19029 = vmatprep.mubr.msk.f32.mxu0 %vm1188_vm3, %v24122_v39 }
 0x2fe   : > { %v1169_v44 = vpop.f32.mrb[6].mxu0 }
 0x2ff   : > { %v1170_v46 = vadd.f32 %v24136_v42, %v1169_v44  ;;  %v19016_v47 = vpop.f32.mrb[7].mxu0  ;;  %v1368_v44 = vld [vmem:[%s28231_s25 + $0x48] sm:$0xff] }
 0x300   : > { %v1459_v47 = vld [vmem:[%s28233_s24 + $0x48] sm:$0xff] }
 0x301   : > { %v1183_v48 = vmax.f32 %v982_v45, %v1170_v46  ;;  %v24242_v45 = vpack.c.bf16 %v1368_v44, %v1367_v38  ;;  %v1458_v46 = vld [vmem:[%s28233_s24 + $0x40] sm:$0xff] }
 0x302   : > { %v1174_v49 = vpop.f32.mrb[8].mxu0 }
 0x303   : > { %v1175_v54 = vadd.f32 %v24136_v42, %v1174_v49  ;;  %v19019_v55 = vpop.f32.mrb[9].mxu0 }
 0x305   : > { %v1184_v56 = vmax.f32 %v987_v50, %v1175_v54 }
 0x306   : > { %v1179_v57 = vpop.f32.mrb[10].mxu0 }
 0x307   : > { %v21550_v59 = vpack.c.bf16 %v1184_v56, %v1183_v48  ;;  %v1180_v60 = vadd.f32 %v24136_v42, %v1179_v57  ;;  %v19022_v61 = vpop.f32.mrb[11].mxu0  ;;  %v24250_v48 = vpack.c.bf16 %v1459_v47, %v1458_v46 }
 0x308   : > { %v17167_v61 = vld [vmem:[%s23916_s29 + $0x70] sm:$0xff] }
 0x309   : > { %v1185_v63 = vmax.f32 %v992_v58, %v1180_v60  ;;  %21551 = vmatprep.subr.bf16.mxu0 %v21550_v59  ;;  %21555 = vmatprep.subr.bf16.mxu1 %v21550_v59  ;;  %v17166_v58 = vld [vmem:[%s23916_s29 + $0x68] sm:$0xff]  ;;  %v17168_v60 = vld [vmem:[%s23916_s29 + $0x78] sm:$0xff] }
 0x30a   : > { %21553 = vmatpush3.bf16.msra.mxu0 %v21550_v59  ;;  %21557 = vmatpush3.bf16.msra.mxu1 %v21550_v59  ;;  %v17165_v59 = vld [vmem:[%s23916_s29 + $0x60] sm:$0xff] }
 0x30b   : > { %19027 = vmatprep.subr.msk.mxu0 %vm1195_vm4, %v1185_v63  ;;  %19036 = vmatprep.subr.msk.mxu1 %vm1195_vm4, %v1185_v63 }
 0x30e   : > { %19028 = vmatpush3.msk.msra.mxu0 %vm1195_vm4, %v1185_v63  ;;  %19037 = vmatpush3.msk.msra.mxu1 %vm1195_vm4, %v1185_v63  ;;  %v17169_v63 = vld [vmem:[%s23916_s29 + $0x80] sm:$0xf] }
 0x30f   : > { %19030 = vmatmul.mubr.msk.f32.vlgmr.msra.gmra.mrb[12].mxu0 %vm1188_vm3, %v1187_v11  ;;  %19039 = vmatmul.mubr.msk.f32.vlgmr.msra.gmra.mrb[12].mxu1 %vm1188_vm3, %v1275_v12 }
 0x310   : > { %21559 = vmatprep.subr.bf16.mxu0 %v24176_v13  ;;  %21579 = vmatprep.subr.bf16.mxu1 %v24178_v14 }
 0x311   : > { %21561 = vmatpush3.bf16.msra.mxu0 %v24176_v13  ;;  %21581 = vmatpush3.bf16.msra.mxu1 %v24178_v14 }
 0x312   : > { %21563 = vmatprep.subr.bf16.mxu0 %v24182_v15  ;;  %21583 = vmatprep.subr.bf16.mxu1 %v24184_v16 }
 0x315   : > { %21565 = vmatpush3.bf16.msra.mxu0 %v24182_v15  ;;  %21585 = vmatpush3.bf16.msra.mxu1 %v24184_v16 }
 0x316   : > { %21567 = vmatprep.subr.bf16.mxu0 %v24206_v25  ;;  %21587 = vmatprep.subr.bf16.mxu1 %v24208_v26 }
 0x319   : > { %21569 = vmatpush3.bf16.msra.mxu0 %v24206_v25  ;;  %21589 = vmatpush3.bf16.msra.mxu1 %v24208_v26 }
 0x31a   : > { %21571 = vmatprep.subr.bf16.mxu0 %v24226_v35  ;;  %21591 = vmatprep.subr.bf16.mxu1 %v24228_v36 }
 0x31d   : > { %21573 = vmatpush3.bf16.msra.mxu0 %v24226_v35  ;;  %21593 = vmatpush3.bf16.msra.mxu1 %v24228_v36 }
 0x31e   : > { %21575 = vmatprep.subr.bf16.mxu0 %v24242_v45  ;;  %21595 = vmatprep.subr.bf16.mxu1 %v24250_v48 }
 0x321   : > { %21577 = vmatpush3.bf16.msra.mxu0 %v24242_v45  ;;  %21597 = vmatpush3.bf16.msra.mxu1 %v24250_v48 }
 0x322   : > { %21598 = vmatprep.subr.bf16.mxu0 %v23703_v3  ;;  %21628 = vmatprep.subr.bf16.mxu1 %v23703_v3 }
 0x3e2   : > { %v19031_v49 = vpop.f32.mrb[12].mxu0  ;;  %v19040_v50 = vpop.f32.mrb[12].mxu1 }
 0x3e3   : > { %v1358_v54 = vmax.f32 %v19031_v49, %v19040_v50  ;;  %v1265_v55 = vpop.f32.mrb[13].mxu0  ;;  %v1348_v56 = vpop.f32.mrb[13].mxu1 }
 0x3e4   : > { %v1357_v57 = vmax.f32 %v1265_v55, %v1348_v56 }
 0x3e6   : > { %19061 = vmatprep.mubr.msk.f32.mxu0 %vm905_vm2, %v1357_v57  ;;  %19084 = vmatprep.mubr.msk.f32.mxu1 %vm905_vm2, %v1357_v57 }
 0x3e7   : > { %19062 = vmatmul.mubr.msk.f32.vlgmr.msra.gmra.mrb[14].mxu0 %vm905_vm2, %v1358_v54  ;;  %19085 = vmatmul.mubr.msk.f32.vlgmr.msra.gmra.mrb[14].mxu1 %vm905_vm2, %v1358_v54 }
 0x3e8   : > { %21600 = vmatpush1.bf16.msra.mxu0 %v23896_v4  ;;  %17172 = vmatprep.mubr.msk.f32.mxu0 %vm795_vm0, %v17166_v58 }
 0x3e9   : > { %21601 = vmatprep.subr.bf16.mxu0 %v23703_v3  ;;  %21630 = vmatpush3.bf16.msra.mxu1 %v23942_v17 }
 0x3ea   : > { %21631 = vmatprep.subr.bf16.mxu1 %v23703_v3  ;;  %19107 = vmatprep.mubr.msk.f32.mxu1 %vm23704_vm1, %v23705_v52 }
 0x3ec   : > { %21603 = vmatpush1.bf16.msra.mxu0 %v23904_v6 }
 0x3ed   : > { %21604 = vmatprep.subr.bf16.mxu0 %v23703_v3  ;;  %21633 = vmatpush3.bf16.msra.mxu1 %v23955_v21 }
 0x3ee   : > { %21634 = vmatprep.subr.bf16.mxu1 %v23703_v3 }
 0x3f0   : > { %21606 = vmatpush1.bf16.msra.mxu0 %v23919_v9 }
 0x3f1   : > { %21607 = vmatprep.subr.bf16.mxu0 %v23703_v3  ;;  %21636 = vmatpush3.bf16.msra.mxu1 %v23975_v27 }
 0x3f2   : > { %21637 = vmatprep.subr.bf16.mxu1 %v23703_v3 }
 0x3f4   : > { %21609 = vmatpush1.bf16.msra.mxu0 %v23945_v18 }
 0x3f5   : > { %21610 = vmatprep.subr.bf16.mxu0 %v23703_v3  ;;  %21639 = vmatpush3.bf16.msra.mxu1 %v23995_v33 }
 0x3f6   : > { %21640 = vmatprep.subr.bf16.mxu1 %v23703_v3 }
 0x3f8   : > { %21612 = vmatpush1.bf16.msra.mxu0 %v23965_v24 }
 0x3f9   : > { %21613 = vmatprep.subr.bf16.mxu0 %v23703_v3  ;;  %21642 = vmatpush3.bf16.msra.mxu1 %v24057_v51 }
 0x3fa   : > { %21643 = vmatprep.subr.bf16.mxu1 %v23703_v3 }
 0x3fc   : > { %21615 = vmatpush1.bf16.msra.mxu0 %v23985_v30 }
 0x3fd   : > { %21616 = vmatprep.subr.bf16.mxu0 %v23703_v3 }
 0x400   : > { %21618 = vmatpush1.bf16.msra.mxu0 %v23999_v34 }
 0x401   : > { %21619 = vmatprep.subr.bf16.mxu0 %v23703_v3 }
 0x404   : > { %21621 = vmatpush1.bf16.msra.mxu0 %v24011_v37 }
 0x405   : > { %21622 = vmatprep.subr.bf16.mxu0 %v23703_v3 }
 0x408   : > { %21624 = vmatpush1.bf16.msra.mxu0 %v24021_v40 }
 0x409   : > { %21625 = vmatprep.subr.bf16.mxu0 %v23703_v3 }
 0x40c   : > { %21627 = vmatpush1.bf16.msra.mxu0 %v24031_v43 }
 0x40d   : > { %21673 = vmatprep.subr.bf16.mxu0 %v23703_v3 }
 0x40f   : > { %1651 = vmatmul.mubr.f32.vlgmr.msra.gmra.mrb[16].mxu0 %v17165_v59 }
 0x410   : > { %17173 = vmatprep.mubr.msk.f32.mxu0 %vm795_vm0, %v17168_v60  ;;  %21675 = vmatpush3.bf16.msra.mxu0 %v23942_v17 }
 0x411   : > { %21676 = vmatprep.subr.bf16.mxu0 %v23703_v3 }
 0x413   : > { %1656 = vmatmul.mubr.f32.gmra.mrb[18].mxu0 %v17167_v61 }
 0x414   : > { %17174 = vmatprep.mubr.msk.f32.mxu0 %vm795_vm0, %v17170_v62  ;;  %21678 = vmatpush3.bf16.msra.mxu0 %v23955_v21 }
 0x415   : > { %21679 = vmatprep.subr.bf16.mxu0 %v23703_v3 }
 0x417   : > { %1661 = vmatmul.mubr.f32.gmra.mrb[20].mxu0 %v17169_v63 }
 0x418   : > { %21681 = vmatpush3.bf16.msra.mxu0 %v23975_v27  ;;  %19136 = vmatprep.mubr.msk.f32.mxu0 %vm23704_vm1, %v23705_v52 }
 0x419   : > { %21682 = vmatprep.subr.bf16.mxu0 %v23703_v3 }
 0x41c   : > { %21684 = vmatpush3.bf16.msra.mxu0 %v23995_v33 }
 0x41d   : > { %21685 = vmatprep.subr.bf16.mxu0 %v23703_v3 }
 0x420   : > { %21687 = vmatpush3.bf16.msra.mxu0 %v24057_v51 }
 0x4ba   : > { %v19063_v17 = vpop.f32.mrb[14].mxu0  ;;  %v19086_v0 = vpop.f32.mrb[14].mxu1 }
 0x4bb   : > { %v1536_v1 = vmax.f32 %v19063_v17, %v19086_v0  ;;  %v1441_v21 = vpop.f32.mrb[15].mxu0  ;;  %v1526_v2 = vpop.f32.mrb[15].mxu1 }
 0x4bc   : > { %v1535_v5 = vmax.f32 %v1441_v21, %v1526_v2 }
 0x4bd   : > { %v1538_v7 = vmax.f32 %v1536_v1, 0.0 }
 0x4be   : > { %v1537_v27 = vmax.f32 %v1535_v5, 0.0 }
 0x4bf   : > { %1542 = vst.msk [vmem:[#allocation2 + $0x8] sm:$0x3] %vm1541_vm5, %v1538_v7 }
 0x4c0   : > { %1540 = vst.msk [vmem:[#allocation2] sm:$0xff] %vm1539_vm6, %v1537_v27 }
 0x4e2   : > { %v1652_v8 = vpop.f32.mrb[16].mxu0 }
 0x4e3   : > { %v1653_v33 = vadd.f32 %v24069_v53, %v1652_v8  ;;  %v1654_v10 = vpop.f32.mrb[17].mxu0 }
 0x4e4   : > { %v2053_v10 = vld [vmem:[%s28227_s28 + $0x8] sm:$0x3] }
 0x4e5   : > { %v1666_v11 = vmax.f32 %v1653_v33, 0.0  ;;  %v1967_v33 = vld [vmem:[%s28226_s1 + $0x8] sm:$0x3] }
 0x4e6   : > { %v1657_v51 = vpop.f32.mrb[18].mxu0 }
 0x4e7   : > { %19108 = vmatmul.mubr.msk.f32.vlgmr.msra.gmra.mrb[16].mxu1 %vm905_vm2, %v1666_v11  ;;  %v1658_v12 = vadd.f32 %v24069_v53, %v1657_v51  ;;  %v1659_v19 = vpop.f32.mrb[19].mxu0  ;;  %v17202_v11 = vld [vmem:[%s23916_s29 + $0xc8] sm:$0xff] }
 0x4e8   : > { %21645 = vmatpush1.bf16.msra.mxu1 %v23896_v4  ;;  %19110 = vmatprep.mubr.msk.f32.mxu1 %vm23704_vm1, %v23705_v52  ;;  %v2332_v19 = vld [vmem:[%s28221_s0 + $0x28] sm:$0xff] }
 0x4e9   : > { %21646 = vmatprep.subr.bf16.mxu1 %v23703_v3  ;;  %v1667_v20 = vmax.f32 %v1658_v12, 0.0  ;;  %v2331_v12 = vld [vmem:[%s28221_s0 + $0x20] sm:$0xff] }
 0x4ea   : > { %v1662_v22 = vpop.f32.mrb[20].mxu0 }
 0x4eb   : > { %v1663_v23 = vadd.f32 %v24069_v53, %v1662_v22  ;;  %v1664_v28 = vpop.f32.mrb[21].mxu0  ;;  %19111 = vmatmul.mubr.msk.f32.gmra.mrb[18].mxu1 %vm905_vm2, %v1667_v20  ;;  %v24441_v20 = vpack.c.bf16 %v2332_v19, %v2331_v12  ;;  %v2333_v22 = vld [vmem:[%s28221_s0 + $0x30] sm:$0xff] }
 0x4ec   : > { %21648 = vmatpush1.bf16.msra.mxu1 %v23904_v6  ;;  %19113 = vmatprep.mubr.msk.f32.mxu1 %vm23704_vm1, %v23705_v52  ;;  %v17179_v6 = vld [vmem:[%s23916_s29 + $0x90] sm:$0xff] }
 0x4ed   : > { %21649 = vmatprep.subr.bf16.mxu1 %v23703_v3  ;;  %v1668_v4 = vmax.f32 %v1663_v23, 0.0  ;;  %v2334_v23 = vld [vmem:[%s28221_s0 + $0x38] sm:$0xff] }
 0x4ee   : > { %v24451_v28 = vpack.c.bf16 %v2334_v23, %v2333_v22 }
 0x4ef   : > { %19114 = vmatmul.mubr.msk.f32.gmra.mrb[20].mxu1 %vm905_vm2, %v1668_v4  ;;  %v2335_v4 = vld [vmem:[%s28221_s0 + $0x40] sm:$0xff] }
 0x4f0   : > { %21651 = vmatpush1.bf16.msra.mxu1 %v23919_v9  ;;  %17185 = vmatprep.mubr.msk.f32.mxu1 %vm795_vm0, %v17180_v29  ;;  %v17182_v9 = vld [vmem:[%s23916_s29 + $0xa8] sm:$0xff] }
 0x4f1   : > { %21652 = vmatprep.subr.bf16.mxu1 %v23703_v3  ;;  %v2336_v29 = vld [vmem:[%s28221_s0 + $0x48] sm:$0xff] }
 0x4f4   : > { %21654 = vmatpush1.bf16.msra.mxu1 %v23945_v18  ;;  %v17181_v18 = vld [vmem:[%s23916_s29 + $0xa0] sm:$0xff] }
 0x4f5   : > { %21655 = vmatprep.subr.bf16.mxu1 %v23703_v3 }
 0x4f8   : > { %21657 = vmatpush1.bf16.msra.mxu1 %v23965_v24  ;;  %v17184_v24 = vld [vmem:[%s23916_s29 + $0xb8] sm:$0xf] }
 0x4f9   : > { %21658 = vmatprep.subr.bf16.mxu1 %v23703_v3 }
 0x4fc   : > { %21660 = vmatpush1.bf16.msra.mxu1 %v23985_v30  ;;  %v17183_v30 = vld [vmem:[%s23916_s29 + $0xb0] sm:$0xf] }
 0x4fd   : > { %21661 = vmatprep.subr.bf16.mxu1 %v23703_v3 }
 0x500   : > { %21663 = vmatpush1.bf16.msra.mxu1 %v23999_v34 }
 0x501   : > { %21664 = vmatprep.subr.bf16.mxu1 %v23703_v3 }
 0x504   : > { %21666 = vmatpush1.bf16.msra.mxu1 %v24011_v37 }
 0x505   : > { %21667 = vmatprep.subr.bf16.mxu1 %v23703_v3 }
 0x508   : > { %21669 = vmatpush1.bf16.msra.mxu1 %v24021_v40 }
 0x509   : > { %21670 = vmatprep.subr.bf16.mxu1 %v23703_v3 }
 0x50c   : > { %21672 = vmatpush1.bf16.msra.mxu1 %v24031_v43 }
 0x50f   : > { %1856 = vmatmul.mubr.f32.vlgmr.msra.gmra.mrb[22].mxu1 %v17179_v6  ;;  %v24461_v6 = vpack.c.bf16 %v2336_v29, %v2335_v4  ;;  %v17216_v29 = vld [vmem:[%s23916_s29 + $0xf8] sm:$0xff] }
 0x510   : > { %17186 = vmatprep.mubr.msk.f32.mxu1 %vm795_vm0, %v17182_v9  ;;  %v2337_v9 = vld [vmem:[%s28221_s0 + $0x50] sm:$0xff] }
 0x513   : > { %1861 = vmatmul.mubr.f32.gmra.mrb[24].mxu1 %v17181_v18  ;;  %v2338_v18 = vld [vmem:[%s28221_s0 + $0x58] sm:$0xff] }
 0x514   : > { %17187 = vmatprep.mubr.msk.f32.mxu1 %vm795_vm0, %v17184_v24  ;;  %v24471_v24 = vpack.c.bf16 %v2338_v18, %v2337_v9  ;;  %v17215_v9 = vld [vmem:[%s23916_s29 + $0xf0] sm:$0xff]  ;;  %v17218_v18 = vld [vmem:[%s23916_s29 + $0x108] sm:$0xff] }
 0x517   : > { %1866 = vmatmul.mubr.f32.gmra.mrb[26].mxu1 %v17183_v30  ;;  %v2339_v30 = vld [vmem:[%s28221_s0 + $0x60] sm:$0xff] }
 0x518   : > { %19160 = vmatprep.mubr.msk.f32.mxu1 %vm1188_vm3, %v24127_v41 }
 0x5ba   : > { %v1761_v34 = vpop.f32.mrb[16].mxu1 }
 0x5bb   : > { %v19109_v37 = vpop.f32.mrb[17].mxu1  ;;  %v1762_v60 = vadd.f32 %v24136_v42, %v1761_v34  ;;  %v2340_v34 = vld [vmem:[%s28221_s0 + $0x68] sm:$0xff] }
 0x5bc   : > { %v24481_v37 = vpack.c.bf16 %v2340_v34, %v2339_v30  ;;  %v17217_v30 = vld [vmem:[%s23916_s29 + $0x100] sm:$0xff]  ;;  %v17220_v34 = vld [vmem:[%s23916_s29 + $0x118] sm:$0xf] }
 0x5be   : > { %v1766_v40 = vpop.f32.mrb[18].mxu1 }
 0x5bf   : > { %v19112_v31 = vpop.f32.mrb[19].mxu1  ;;  %v1767_v17 = vadd.f32 %v24136_v42, %v1766_v40  ;;  %v2341_v40 = vld [vmem:[%s28221_s0 + $0x70] sm:$0xff] }
 0x5c0   : > { %v2342_v31 = vld [vmem:[%s28221_s0 + $0x78] sm:$0xff] }
 0x5c2   : > { %v1771_v43 = vpop.f32.mrb[20].mxu1 }
 0x5c3   : > { %v19115_v32 = vpop.f32.mrb[21].mxu1  ;;  %v1772_v5 = vadd.f32 %v24136_v42, %v1771_v43  ;;  %v24491_v43 = vpack.c.bf16 %v2342_v31, %v2341_v40  ;;  %v17219_v40 = vld [vmem:[%s23916_s29 + $0x110] sm:$0xf] }
 0x5c4   : > { %v2343_v32 = vld [vmem:[%s28221_s0 + $0x80] sm:$0xff] }
 0x5e2   : > { %v1857_v38 = vpop.f32.mrb[22].mxu1 }
 0x5e3   : > { %v1858_v44 = vadd.f32 %v24069_v53, %v1857_v38  ;;  %v1859_v46 = vpop.f32.mrb[23].mxu1  ;;  %v2344_v38 = vld [vmem:[%s28221_s0 + $0x88] sm:$0xff] }
 0x5e4   : > { %v2345_v46 = vld [vmem:[%s28221_s0 + $0x90] sm:$0xff] }
 0x5e5   : > { %v1871_v47 = vmax.f32 %v1858_v44, 0.0  ;;  %v24501_v44 = vpack.c.bf16 %v2344_v38, %v2343_v32 }
 0x5e6   : > { %v1862_v49 = vpop.f32.mrb[24].mxu1 }
 0x5e7   : > { %v1863_v50 = vadd.f32 %v24069_v53, %v1862_v49  ;;  %v1864_v54 = vpop.f32.mrb[25].mxu1  ;;  %19137 = vmatmul.mubr.msk.f32.vlgmr.msra.gmra.mrb[22].mxu0 %vm905_vm2, %v1871_v47  ;;  %v2346_v47 = vld [vmem:[%s28221_s0 + $0x98] sm:$0xff] }
 0x5e8   : > { %19139 = vmatprep.mubr.msk.f32.mxu0 %vm23704_vm1, %v23705_v52  ;;  %v24511_v49 = vpack.c.bf16 %v2346_v47, %v2345_v46  ;;  %v17204_v54 = vld [vmem:[%s23916_s29 + $0xd8] sm:$0xff] }
 0x5e9   : > { %v1872_v41 = vmax.f32 %v1863_v50, 0.0  ;;  %v17201_v50 = vld [vmem:[%s23916_s29 + $0xc0] sm:$0xff] }
 0x5ea   : > { %v1867_v55 = vpop.f32.mrb[26].mxu1 }
 0x5eb   : > { %v1868_v56 = vadd.f32 %v24069_v53, %v1867_v55  ;;  %19140 = vmatmul.mubr.msk.f32.gmra.mrb[24].mxu0 %vm905_vm2, %v1872_v41  ;;  %v1869_v57 = vpop.f32.mrb[27].mxu1  ;;  %v17203_v41 = vld [vmem:[%s23916_s29 + $0xd0] sm:$0xff]  ;;  %v17206_v55 = vld [vmem:[%s23916_s29 + $0xe8] sm:$0xf] }
 0x5ec   : > { %19142 = vmatprep.mubr.msk.f32.mxu0 %vm23704_vm1, %v23705_v52  ;;  %v2446_v57 = vld [vmem:[%s28223_s5] sm:$0xff] }
 0x5ed   : > { %v1873_v58 = vmax.f32 %v1868_v56, 0.0  ;;  %v17205_v56 = vld [vmem:[%s23916_s29 + $0xe0] sm:$0xf] }
 0x5ef   : > { %19143 = vmatmul.mubr.msk.f32.gmra.mrb[26].mxu0 %vm905_vm2, %v1873_v58  ;;  %v2447_v58 = vld [vmem:[%s28223_s5 + $0x8] sm:$0xff] }
 0x5f0   : > { %19151 = vmatprep.mubr.msk.f32.mxu0 %vm1188_vm3, %v24122_v39 }
 0x6ba   : > { %v1949_v59 = vpop.f32.mrb[22].mxu0 }
 0x6bb   : > { %v1950_v61 = vadd.f32 %v24136_v42, %v1949_v59  ;;  %v19138_v62 = vpop.f32.mrb[23].mxu0  ;;  %v2448_v59 = vld [vmem:[%s28223_s5 + $0x10] sm:$0xff] }
 0x6bd   : > { %v1963_v63 = vmax.f32 %v1762_v60, %v1950_v61  ;;  %v24534_v60 = vpack.c.bf16 %v2447_v58, %v2446_v57  ;;  %v2449_v61 = vld [vmem:[%s28223_s5 + $0x18] sm:$0xff] }
 0x6be   : > { %v1954_v53 = vpop.f32.mrb[24].mxu0  ;;  %v24540_v62 = vpack.c.bf16 %v2449_v61, %v2448_v59 }
 0x6bf   : > { %v1955_v0 = vadd.f32 %v24136_v42, %v1954_v53  ;;  %v19141_v1 = vpop.f32.mrb[25].mxu0  ;;  %v2451_v53 = vld [vmem:[%s28223_s5 + $0x28] sm:$0xff] }
 0x6c0   : > { %v2453_v1 = vld [vmem:[%s28223_s5 + $0x38] sm:$0xff] }
 0x6c1   : > { %v1964_v21 = vmax.f32 %v1767_v17, %v1955_v0  ;;  %v2452_v0 = vld [vmem:[%s28223_s5 + $0x30] sm:$0xff] }
 0x6c2   : > { %v1959_v2 = vpop.f32.mrb[26].mxu0 }
 0x6c3   : > { %v21688_v7 = vpack.c.bf16 %v1964_v21, %v1963_v63  ;;  %v1960_v39 = vadd.f32 %v24136_v42, %v1959_v2  ;;  %v19144_v27 = vpop.f32.mrb[27].mxu0  ;;  %v2327_v42 = vld [vmem:[%s28221_s0] sm:$0xff]  ;;  %v24564_v21 = vpack.c.bf16 %v2453_v1, %v2452_v0 }
 0x6c4   : > { %v2450_v63 = vld [vmem:[%s28223_s5 + $0x20] sm:$0xff] }
 0x6c5   : > { %v1965_v8 = vmax.f32 %v1772_v5, %v1960_v39  ;;  %21689 = vmatprep.subr.bf16.mxu0 %v21688_v7  ;;  %21693 = vmatprep.subr.bf16.mxu1 %v21688_v7  ;;  %v24552_v17 = vpack.c.bf16 %v2451_v53, %v2450_v63  ;;  %v2454_v2 = vld [vmem:[%s28223_s5 + $0x40] sm:$0xff]  ;;  %v2455_v5 = vld [vmem:[%s28223_s5 + $0x48] sm:$0xff] }
 0x6c6   : > { %21691 = vmatpush3.bf16.msra.mxu0 %v21688_v7  ;;  %21695 = vmatpush3.bf16.msra.mxu1 %v21688_v7  ;;  %v24579_v7 = vpack.c.bf16 %v2455_v5, %v2454_v2  ;;  %v24642_v2 = vld [vmem:[%s28226_s1] sm:$0xff] }
 0x6c7   : > { %19149 = vmatprep.subr.msk.mxu0 %vm1195_vm4, %v1965_v8  ;;  %19158 = vmatprep.subr.msk.mxu1 %vm1195_vm4, %v1965_v8  ;;  %v24647_v5 = vld [vmem:[%s28227_s28] sm:$0xff] }
 0x6ca   : > { %19150 = vmatpush3.msk.msra.mxu0 %vm1195_vm4, %v1965_v8  ;;  %19159 = vmatpush3.msk.msra.mxu1 %vm1195_vm4, %v1965_v8 }
 0x6cb   : > { %19152 = vmatmul.mubr.msk.f32.vlgmr.msra.gmra.mrb[28].mxu0 %vm1188_vm3, %v1967_v33  ;;  %19161 = vmatmul.mubr.msk.f32.vlgmr.msra.gmra.mrb[28].mxu1 %vm1188_vm3, %v2053_v10 }
 0x6cc   : > { %21697 = vmatprep.subr.bf16.mxu0 %v24176_v13  ;;  %21717 = vmatprep.subr.bf16.mxu1 %v24178_v14 }
 0x6cd   : > { %21699 = vmatpush3.bf16.msra.mxu0 %v24176_v13  ;;  %21719 = vmatpush3.bf16.msra.mxu1 %v24178_v14  ;;  %v2328_v13 = vld [vmem:[%s28221_s0 + $0x8] sm:$0xff] }
 0x6ce   : > { %21701 = vmatprep.subr.bf16.mxu0 %v24182_v15  ;;  %21721 = vmatprep.subr.bf16.mxu1 %v24184_v16 }
 0x6d1   : > { %21703 = vmatpush3.bf16.msra.mxu0 %v24182_v15  ;;  %21723 = vmatpush3.bf16.msra.mxu1 %v24184_v16 }
 0x6d2   : > { %21705 = vmatprep.subr.bf16.mxu0 %v24206_v25  ;;  %21725 = vmatprep.subr.bf16.mxu1 %v24208_v26 }
 0x6d5   : > { %21707 = vmatpush3.bf16.msra.mxu0 %v24206_v25  ;;  %21727 = vmatpush3.bf16.msra.mxu1 %v24208_v26 }
 0x6d6   : > { %21709 = vmatprep.subr.bf16.mxu0 %v24226_v35  ;;  %21729 = vmatprep.subr.bf16.mxu1 %v24228_v36 }
 0x6d9   : > { %21711 = vmatpush3.bf16.msra.mxu0 %v24226_v35  ;;  %21731 = vmatpush3.bf16.msra.mxu1 %v24228_v36  ;;  %v24414_v36 = vpack.c.bf16 %v2328_v13, %v2327_v42 }
 0x6da   : > { %21713 = vmatprep.subr.bf16.mxu0 %v24242_v45  ;;  %21733 = vmatprep.subr.bf16.mxu1 %v24250_v48 }
 0x6dd   : > { %21715 = vmatpush3.bf16.msra.mxu0 %v24242_v45  ;;  %21735 = vmatpush3.bf16.msra.mxu1 %v24250_v48  ;;  %v2329_v45 = vld [vmem:[%s28221_s0 + $0x10] sm:$0xff]  ;;  %v2330_v48 = vld [vmem:[%s28221_s0 + $0x18] sm:$0xff] }
 0x6de   : > { %21736 = vmatprep.subr.bf16.mxu0 %v23703_v3  ;;  %21766 = vmatprep.subr.bf16.mxu1 %v23703_v3  ;;  %v24428_v51 = vpack.c.bf16 %v2330_v48, %v2329_v45 }
 0x79e   : > { %v19153_v14 = vpop.f32.mrb[28].mxu0  ;;  %v19162_v15 = vpop.f32.mrb[28].mxu1 }
 0x79f   : > { %v2136_v16 = vmax.f32 %v19153_v14, %v19162_v15  ;;  %v2043_v25 = vpop.f32.mrb[29].mxu0  ;;  %v2126_v26 = vpop.f32.mrb[29].mxu1  ;;  %v24589_v15 = vld [vmem:[%s28225_s27] ss:$0 sm:$0xff] }
 0x7a0   : > { %v2135_v35 = vmax.f32 %v2043_v25, %v2126_v26 }
 0x7a2   : > { %19183 = vmatprep.mubr.msk.f32.mxu0 %vm905_vm2, %v2135_v35  ;;  %19206 = vmatprep.mubr.msk.f32.mxu1 %vm905_vm2, %v2135_v35 }
 0x7a3   : > { %19184 = vmatmul.mubr.msk.f32.vlgmr.msra.gmra.mrb[30].mxu0 %vm905_vm2, %v2136_v16  ;;  %19207 = vmatmul.mubr.msk.f32.vlgmr.msra.gmra.mrb[30].mxu1 %vm905_vm2, %v2136_v16 }
 0x7a4   : > { %21738 = vmatpush1.bf16.msra.mxu0 %v24414_v36  ;;  %17208 = vmatprep.mubr.msk.f32.mxu0 %vm795_vm0, %v17202_v11 }
 0x7a5   : > { %21739 = vmatprep.subr.bf16.mxu0 %v23703_v3  ;;  %19229 = vmatprep.mubr.msk.f32.mxu1 %vm23704_vm1, %v23705_v52 }
 0x7a6   : > { %21768 = vmatpush3.bf16.msra.mxu1 %v24534_v60 }
 0x7a7   : > { %21769 = vmatprep.subr.bf16.mxu1 %v23703_v3 }
 0x7a8   : > { %21741 = vmatpush1.bf16.msra.mxu0 %v24428_v51 }
 0x7a9   : > { %21742 = vmatprep.subr.bf16.mxu0 %v23703_v3 }
 0x7aa   : > { %21771 = vmatpush3.bf16.msra.mxu1 %v24540_v62 }
 0x7ab   : > { %21772 = vmatprep.subr.bf16.mxu1 %v23703_v3 }
 0x7ac   : > { %21744 = vmatpush1.bf16.msra.mxu0 %v24441_v20 }
 0x7ad   : > { %21745 = vmatprep.subr.bf16.mxu0 %v23703_v3 }
 0x7ae   : > { %21774 = vmatpush3.bf16.msra.mxu1 %v24552_v17 }
 0x7af   : > { %21775 = vmatprep.subr.bf16.mxu1 %v23703_v3 }
 0x7b0   : > { %21747 = vmatpush1.bf16.msra.mxu0 %v24451_v28 }
 0x7b1   : > { %21748 = vmatprep.subr.bf16.mxu0 %v23703_v3 }
 0x7b2   : > { %21777 = vmatpush3.bf16.msra.mxu1 %v24564_v21 }
 0x7b3   : > { %21778 = vmatprep.subr.bf16.mxu1 %v23703_v3 }
 0x7b4   : > { %21750 = vmatpush1.bf16.msra.mxu0 %v24461_v6 }
 0x7b5   : > { %21751 = vmatprep.subr.bf16.mxu0 %v23703_v3 }
 0x7b6   : > { %21780 = vmatpush3.bf16.msra.mxu1 %v24579_v7 }
 0x7b7   : > { %21781 = vmatprep.subr.bf16.mxu1 %v23703_v3 }
 0x7b8   : > { %21753 = vmatpush1.bf16.msra.mxu0 %v24471_v24 }
 0x7b9   : > { %21754 = vmatprep.subr.bf16.mxu0 %v23703_v3 }
 0x7bc   : > { %21756 = vmatpush1.bf16.msra.mxu0 %v24481_v37 }
 0x7bd   : > { %21757 = vmatprep.subr.bf16.mxu0 %v23703_v3 }
 0x7c0   : > { %21759 = vmatpush1.bf16.msra.mxu0 %v24491_v43 }
 0x7c1   : > { %21760 = vmatprep.subr.bf16.mxu0 %v23703_v3 }
 0x7c4   : > { %21762 = vmatpush1.bf16.msra.mxu0 %v24501_v44 }
 0x7c5   : > { %21763 = vmatprep.subr.bf16.mxu0 %v23703_v3 }
 0x7c8   : > { %21765 = vmatpush1.bf16.msra.mxu0 %v24511_v49 }
 0x7c9   : > { %21811 = vmatprep.subr.bf16.mxu0 %v23703_v3 }
 0x7cb   : > { %2428 = vmatmul.mubr.f32.vlgmr.msra.gmra.mrb[32].mxu0 %v17201_v50 }
 0x7cc   : > { %17209 = vmatprep.mubr.msk.f32.mxu0 %vm795_vm0, %v17204_v54  ;;  %21813 = vmatpush3.bf16.msra.mxu0 %v24534_v60 }
 0x7cd   : > { %21814 = vmatprep.subr.bf16.mxu0 %v23703_v3 }
 0x7cf   : > { %2433 = vmatmul.mubr.f32.gmra.mrb[34].mxu0 %v17203_v41 }
 0x7d0   : > { %17210 = vmatprep.mubr.msk.f32.mxu0 %vm795_vm0, %v17206_v55  ;;  %21816 = vmatpush3.bf16.msra.mxu0 %v24540_v62 }
 0x7d1   : > { %21817 = vmatprep.subr.bf16.mxu0 %v23703_v3 }
 0x7d3   : > { %2438 = vmatmul.mubr.f32.gmra.mrb[36].mxu0 %v17205_v56 }
 0x7d4   : > { %19258 = vmatprep.mubr.msk.f32.mxu0 %vm23704_vm1, %v23705_v52  ;;  %21819 = vmatpush3.bf16.msra.mxu0 %v24552_v17 }
 0x7d5   : > { %21820 = vmatprep.subr.bf16.mxu0 %v23703_v3 }
 0x7d8   : > { %21822 = vmatpush3.bf16.msra.mxu0 %v24564_v21 }
 0x7d9   : > { %21823 = vmatprep.subr.bf16.mxu0 %v23703_v3 }
 0x7dc   : > { %21825 = vmatpush3.bf16.msra.mxu0 %v24579_v7 }
 0x876   : > { %v19185_v39 = vpop.f32.mrb[30].mxu0  ;;  %v19208_v27 = vpop.f32.mrb[30].mxu1 }
 0x877   : > { %v2314_v8 = vmax.f32 %v19185_v39, %v19208_v27  ;;  %v2219_v33 = vpop.f32.mrb[31].mxu0  ;;  %v2304_v10 = vpop.f32.mrb[31].mxu1  ;;  %v24656_v39 = vld [vmem:[%s28229_s4] ss:$0 sm:$0xff] }
 0x878   : > { %v2313_v42 = vmax.f32 %v2219_v33, %v2304_v10 }
 0x879   : > { %v2316_v13 = vmax.f32 %v2314_v8, 0.0 }
 0x87a   : > { %v2315_v14 = vmax.f32 %v2313_v42, 0.0 }
 0x87b   : > { %2319 = vst.msk [vmem:[#allocation2 + $0x18] sm:$0x3] %vm1541_vm5, %v2316_v13 }
 0x87c   : > { %2318 = vst.msk [vmem:[#allocation2 + $0x10] sm:$0xff] %vm1539_vm6, %v2315_v14 }
 0x89e   : > { %v2429_v16 = vpop.f32.mrb[32].mxu0 }
 0x89f   : > { %v2430_v25 = vadd.f32 %v24589_v15, %v2429_v16  ;;  %v2431_v26 = vpop.f32.mrb[33].mxu0 }
 0x8a1   : > { %v2443_v35 = vmax.f32 %v2430_v25, 0.0 }
 0x8a2   : > { %v2434_v45 = vpop.f32.mrb[34].mxu0 }
 0x8a3   : > { %19230 = vmatmul.mubr.msk.f32.vlgmr.msra.gmra.mrb[32].mxu1 %vm905_vm2, %v2443_v35  ;;  %v2435_v48 = vadd.f32 %v24589_v15, %v2434_v45  ;;  %v2436_v11 = vpop.f32.mrb[35].mxu0 }
 0x8a4   : > { %21783 = vmatpush1.bf16.msra.mxu1 %v24414_v36  ;;  %19232 = vmatprep.mubr.msk.f32.mxu1 %vm23704_vm1, %v23705_v52 }
 0x8a5   : > { %21784 = vmatprep.subr.bf16.mxu1 %v23703_v3  ;;  %v2444_v12 = vmax.f32 %v2435_v48, 0.0 }
 0x8a6   : > { %v2439_v19 = vpop.f32.mrb[36].mxu0 }
 0x8a7   : > { %v2440_v22 = vadd.f32 %v24589_v15, %v2439_v19  ;;  %v2441_v23 = vpop.f32.mrb[37].mxu0  ;;  %19233 = vmatmul.mubr.msk.f32.gmra.mrb[34].mxu1 %vm905_vm2, %v2444_v12  ;;  %v2914_v19 = vld [vmem:[%s28231_s25] sm:$0xff] }
 0x8a8   : > { %21786 = vmatpush1.bf16.msra.mxu1 %v24428_v51  ;;  %19235 = vmatprep.mubr.msk.f32.mxu1 %vm23704_vm1, %v23705_v52  ;;  %v2915_v23 = vld [vmem:[%s28231_s25 + $0x8] sm:$0xff] }
 0x8a9   : > { %21787 = vmatprep.subr.bf16.mxu1 %v23703_v3  ;;  %v2445_v4 = vmax.f32 %v2440_v22, 0.0 }
 0x8ab   : > { %19236 = vmatmul.mubr.msk.f32.gmra.mrb[36].mxu1 %vm905_vm2, %v2445_v4  ;;  %v3005_v4 = vld [vmem:[%s28233_s24] sm:$0xff] }
 0x8ac   : > { %21789 = vmatpush1.bf16.msra.mxu1 %v24441_v20  ;;  %17221 = vmatprep.mubr.msk.f32.mxu1 %vm795_vm0, %v17216_v29  ;;  %v3006_v29 = vld [vmem:[%s28233_s24 + $0x8] sm:$0xff] }
 0x8ad   : > { %21790 = vmatprep.subr.bf16.mxu1 %v23703_v3 }
 0x8b0   : > { %21792 = vmatpush1.bf16.msra.mxu1 %v24451_v28 }
 0x8b1   : > { %21793 = vmatprep.subr.bf16.mxu1 %v23703_v3 }
 0x8b4   : > { %21795 = vmatpush1.bf16.msra.mxu1 %v24461_v6 }
 0x8b5   : > { %21796 = vmatprep.subr.bf16.mxu1 %v23703_v3 }
 0x8b8   : > { %21798 = vmatpush1.bf16.msra.mxu1 %v24471_v24 }
 0x8b9   : > { %21799 = vmatprep.subr.bf16.mxu1 %v23703_v3 }
 0x8bc   : > { %21801 = vmatpush1.bf16.msra.mxu1 %v24481_v37 }
 0x8bd   : > { %21802 = vmatprep.subr.bf16.mxu1 %v23703_v3 }
 0x8c0   : > { %21804 = vmatpush1.bf16.msra.mxu1 %v24491_v43 }
 0x8c1   : > { %21805 = vmatprep.subr.bf16.mxu1 %v23703_v3 }
 0x8c4   : > { %21807 = vmatpush1.bf16.msra.mxu1 %v24501_v44 }
 0x8c5   : > { %21808 = vmatprep.subr.bf16.mxu1 %v23703_v3 }
 0x8c8   : > { %21810 = vmatpush1.bf16.msra.mxu1 %v24511_v49 }
 0x8cb   : > { %2633 = vmatmul.mubr.f32.vlgmr.msra.gmra.mrb[38].mxu1 %v17215_v9  ;;  %v2916_v9 = vld [vmem:[%s28231_s25 + $0x10] sm:$0xff] }
 0x8cc   : > { %17222 = vmatprep.mubr.msk.f32.mxu1 %vm795_vm0, %v17218_v18  ;;  %v2917_v18 = vld [vmem:[%s28231_s25 + $0x18] sm:$0xff] }
 0x8cf   : > { %2638 = vmatmul.mubr.f32.gmra.mrb[40].mxu1 %v17217_v30  ;;  %v3007_v30 = vld [vmem:[%s28233_s24 + $0x10] sm:$0xff] }
 0x8d0   : > { %17223 = vmatprep.mubr.msk.f32.mxu1 %vm795_vm0, %v17220_v34  ;;  %v3008_v34 = vld [vmem:[%s28233_s24 + $0x18] sm:$0xff] }
 0x8d3   : > { %2643 = vmatmul.mubr.f32.gmra.mrb[42].mxu1 %v17219_v40  ;;  %v2744_v40 = vld [vmem:[%s28226_s1 + $0x8] sm:$0x3] }
 0x8d4   : > { %19282 = vmatprep.mubr.msk.f32.mxu1 %vm1188_vm3, %v24647_v5 }
 0x976   : > { %v2538_v31 = vpop.f32.mrb[32].mxu1 }
 0x977   : > { %v19231_v32 = vpop.f32.mrb[33].mxu1  ;;  %v2539_v8 = vadd.f32 %v24656_v39, %v2538_v31  ;;  %v2830_v31 = vld [vmem:[%s28227_s28 + $0x8] sm:$0x3] }
 0x978   : > { %v24696_v32 = vpack.c.bf16 %v2915_v23, %v2914_v19  ;;  %v17242_v19 = vld [vmem:[%s23916_s29 + $0x148] sm:$0xf] }
 0x97a   : > { %v2543_v38 = vpop.f32.mrb[34].mxu1 }
 0x97b   : > { %v19234_v46 = vpop.f32.mrb[35].mxu1  ;;  %v2544_v14 = vadd.f32 %v24656_v39, %v2543_v38  ;;  %v24698_v38 = vpack.c.bf16 %v3006_v29, %v3005_v4 }
 0x97c   : > { %v24702_v46 = vpack.c.bf16 %v2917_v18, %v2916_v9 }
 0x97e   : > { %v2548_v47 = vpop.f32.mrb[36].mxu1 }
 0x97f   : > { %v19237_v50 = vpop.f32.mrb[37].mxu1  ;;  %v2549_v45 = vadd.f32 %v24656_v39, %v2548_v47  ;;  %v24704_v47 = vpack.c.bf16 %v3008_v34, %v3007_v30 }
 0x980   : > { %v2918_v50 = vld [vmem:[%s28231_s25 + $0x20] sm:$0xff] }
 0x99e   : > { %v2634_v54 = vpop.f32.mrb[38].mxu1 }
 0x99f   : > { %v2635_v41 = vadd.f32 %v24589_v15, %v2634_v54  ;;  %v2636_v55 = vpop.f32.mrb[39].mxu1  ;;  %v2919_v54 = vld [vmem:[%s28231_s25 + $0x28] sm:$0xff] }
 0x9a0   : > { %v3010_v55 = vld [vmem:[%s28233_s24 + $0x28] sm:$0xff] }
 0x9a1   : > { %v2648_v56 = vmax.f32 %v2635_v41, 0.0  ;;  %v3009_v41 = vld [vmem:[%s28233_s24 + $0x20] sm:$0xff] }
 0x9a2   : > { %v2639_v57 = vpop.f32.mrb[40].mxu1 }
 0x9a3   : > { %v2640_v58 = vadd.f32 %v24589_v15, %v2639_v57  ;;  %v2641_v59 = vpop.f32.mrb[41].mxu1  ;;  %19259 = vmatmul.mubr.msk.f32.vlgmr.msra.gmra.mrb[38].mxu0 %vm905_vm2, %v2648_v56  ;;  %v24726_v56 = vpack.c.bf16 %v2919_v54, %v2918_v50  ;;  %v24728_v57 = vpack.c.bf16 %v3010_v55, %v3009_v41 }
 0x9a4   : > { %19261 = vmatprep.mubr.msk.f32.mxu0 %vm23704_vm1, %v23705_v52  ;;  %v2921_v59 = vld [vmem:[%s28231_s25 + $0x38] sm:$0xff] }
 0x9a5   : > { %v2649_v61 = vmax.f32 %v2640_v58, 0.0  ;;  %v2920_v58 = vld [vmem:[%s28231_s25 + $0x30] sm:$0xff] }
 0x9a6   : > { %v2644_v63 = vpop.f32.mrb[42].mxu1 }
 0x9a7   : > { %v2645_v53 = vadd.f32 %v24589_v15, %v2644_v63  ;;  %19262 = vmatmul.mubr.msk.f32.gmra.mrb[40].mxu0 %vm905_vm2, %v2649_v61  ;;  %v2646_v0 = vpop.f32.mrb[43].mxu1  ;;  %v3011_v61 = vld [vmem:[%s28233_s24 + $0x30] sm:$0xff]  ;;  %v3012_v63 = vld [vmem:[%s28233_s24 + $0x38] sm:$0xff] }
 0x9a8   : > { %19264 = vmatprep.mubr.msk.f32.mxu0 %vm23704_vm1, %v23705_v52  ;;  %v24748_v0 = vpack.c.bf16 %v3012_v63, %v3011_v61 }
 0x9a9   : > { %v2650_v1 = vmax.f32 %v2645_v53, 0.0  ;;  %v24746_v53 = vpack.c.bf16 %v2921_v59, %v2920_v58  ;;  %v17252_v59 = vld [vmem:[%s23916_s29 + $0x158] sm:$0xff] }
 0x9ab   : > { %19265 = vmatmul.mubr.msk.f32.gmra.mrb[42].mxu0 %vm905_vm2, %v2650_v1  ;;  %v2922_v1 = vld [vmem:[%s28231_s25 + $0x40] sm:$0xff] }
 0x9ac   : > { %19273 = vmatprep.mubr.msk.f32.mxu0 %vm1188_vm3, %v24642_v2 }
 0xa76   : > { %v2726_v27 = vpop.f32.mrb[38].mxu0 }
 0xa77   : > { %v2727_v33 = vadd.f32 %v24656_v39, %v2726_v27  ;;  %v19260_v10 = vpop.f32.mrb[39].mxu0  ;;  %v2923_v27 = vld [vmem:[%s28231_s25 + $0x48] sm:$0xff] }
 0xa78   : > { %v3014_v10 = vld [vmem:[%s28233_s24 + $0x48] sm:$0xff] }
 0xa79   : > { %v2740_v42 = vmax.f32 %v2539_v8, %v2727_v33  ;;  %v24762_v8 = vpack.c.bf16 %v2923_v27, %v2922_v1  ;;  %v3013_v33 = vld [vmem:[%s28233_s24 + $0x40] sm:$0xff] }
 0xa7a   : > { %v2731_v13 = vpop.f32.mrb[40].mxu0 }
 0xa7b   : > { %v2732_v16 = vadd.f32 %v24656_v39, %v2731_v13  ;;  %v19263_v25 = vpop.f32.mrb[41].mxu0 }
 0xa7d   : > { %v2741_v26 = vmax.f32 %v2544_v14, %v2732_v16 }
 0xa7e   : > { %v2736_v35 = vpop.f32.mrb[42].mxu0 }
 0xa7f   : > { %v21826_v48 = vpack.c.bf16 %v2741_v26, %v2740_v42  ;;  %v2737_v11 = vadd.f32 %v24656_v39, %v2736_v35  ;;  %v19266_v12 = vpop.f32.mrb[43].mxu0  ;;  %v24770_v42 = vpack.c.bf16 %v3014_v10, %v3013_v33 }
 0xa80   : > { %v17239_v12 = vld [vmem:[%s23916_s29 + $0x130] sm:$0xff] }
 0xa81   : > { %v2742_v22 = vmax.f32 %v2549_v45, %v2737_v11  ;;  %21827 = vmatprep.subr.bf16.mxu0 %v21826_v48  ;;  %21831 = vmatprep.subr.bf16.mxu1 %v21826_v48  ;;  %v17238_v45 = vld [vmem:[%s23916_s29 + $0x128] sm:$0xff]  ;;  %v17240_v11 = vld [vmem:[%s23916_s29 + $0x138] sm:$0xff] }
 0xa82   : > { %21829 = vmatpush3.bf16.msra.mxu0 %v21826_v48  ;;  %21833 = vmatpush3.bf16.msra.mxu1 %v21826_v48  ;;  %v17237_v48 = vld [vmem:[%s23916_s29 + $0x120] sm:$0xff] }
 0xa83   : > { %19271 = vmatprep.subr.msk.mxu0 %vm1195_vm4, %v2742_v22  ;;  %19280 = vmatprep.subr.msk.mxu1 %vm1195_vm4, %v2742_v22 }
 0xa86   : > { %19272 = vmatpush3.msk.msra.mxu0 %vm1195_vm4, %v2742_v22  ;;  %19281 = vmatpush3.msk.msra.mxu1 %vm1195_vm4, %v2742_v22  ;;  %v17241_v22 = vld [vmem:[%s23916_s29 + $0x140] sm:$0xf] }
 0xa87   : > { %19274 = vmatmul.mubr.msk.f32.vlgmr.msra.gmra.mrb[44].mxu0 %vm1188_vm3, %v2744_v40  ;;  %19283 = vmatmul.mubr.msk.f32.vlgmr.msra.gmra.mrb[44].mxu1 %vm1188_vm3, %v2830_v31 }
 0xa88   : > { %21835 = vmatprep.subr.bf16.mxu0 %v24696_v32  ;;  %21855 = vmatprep.subr.bf16.mxu1 %v24698_v38 }
 0xa89   : > { %21837 = vmatpush3.bf16.msra.mxu0 %v24696_v32  ;;  %21857 = vmatpush3.bf16.msra.mxu1 %v24698_v38 }
 0xa8a   : > { %21839 = vmatprep.subr.bf16.mxu0 %v24702_v46  ;;  %21859 = vmatprep.subr.bf16.mxu1 %v24704_v47 }
 0xa8d   : > { %21841 = vmatpush3.bf16.msra.mxu0 %v24702_v46  ;;  %21861 = vmatpush3.bf16.msra.mxu1 %v24704_v47 }
 0xa8e   : > { %21843 = vmatprep.subr.bf16.mxu0 %v24726_v56  ;;  %21863 = vmatprep.subr.bf16.mxu1 %v24728_v57 }
 0xa91   : > { %21845 = vmatpush3.bf16.msra.mxu0 %v24726_v56  ;;  %21865 = vmatpush3.bf16.msra.mxu1 %v24728_v57 }
 0xa92   : > { %21847 = vmatprep.subr.bf16.mxu0 %v24746_v53  ;;  %21867 = vmatprep.subr.bf16.mxu1 %v24748_v0 }
 0xa95   : > { %21849 = vmatpush3.bf16.msra.mxu0 %v24746_v53  ;;  %21869 = vmatpush3.bf16.msra.mxu1 %v24748_v0 }
 0xa96   : > { %21851 = vmatprep.subr.bf16.mxu0 %v24762_v8  ;;  %21871 = vmatprep.subr.bf16.mxu1 %v24770_v42 }
 0xa99   : > { %21853 = vmatpush3.bf16.msra.mxu0 %v24762_v8  ;;  %21873 = vmatpush3.bf16.msra.mxu1 %v24770_v42 }
 0xa9a   : > { %21874 = vmatprep.subr.bf16.mxu0 %v23703_v3  ;;  %21904 = vmatprep.subr.bf16.mxu1 %v23703_v3 }
 0xb5a   : > { %v19275_v13 = vpop.f32.mrb[44].mxu0  ;;  %v19284_v14 = vpop.f32.mrb[44].mxu1 }
 0xb5b   : > { %v2913_v16 = vmax.f32 %v19275_v13, %v19284_v14  ;;  %v2820_v25 = vpop.f32.mrb[45].mxu0  ;;  %v2903_v26 = vpop.f32.mrb[45].mxu1 }
 0xb5c   : > { %v2912_v35 = vmax.f32 %v2820_v25, %v2903_v26 }
 0xb5e   : > { %19305 = vmatprep.mubr.msk.f32.mxu0 %vm905_vm2, %v2912_v35  ;;  %19328 = vmatprep.mubr.msk.f32.mxu1 %vm905_vm2, %v2912_v35 }
 0xb5f   : > { %19306 = vmatmul.mubr.msk.f32.vlgmr.msra.gmra.mrb[46].mxu0 %vm905_vm2, %v2913_v16  ;;  %19329 = vmatmul.mubr.msk.f32.vlgmr.msra.gmra.mrb[46].mxu1 %vm905_vm2, %v2913_v16 }
 0xb60   : > { %21876 = vmatpush1.bf16.msra.mxu0 %v24414_v36  ;;  %17244 = vmatprep.mubr.msk.f32.mxu0 %vm795_vm0, %v17238_v45 }
 0xb61   : > { %21877 = vmatprep.subr.bf16.mxu0 %v23703_v3  ;;  %21906 = vmatpush3.bf16.msra.mxu1 %v24534_v60 }
 0xb62   : > { %21907 = vmatprep.subr.bf16.mxu1 %v23703_v3  ;;  %19351 = vmatprep.mubr.msk.f32.mxu1 %vm23704_vm1, %v23705_v52 }
 0xb64   : > { %21879 = vmatpush1.bf16.msra.mxu0 %v24428_v51 }
 0xb65   : > { %21880 = vmatprep.subr.bf16.mxu0 %v23703_v3  ;;  %21909 = vmatpush3.bf16.msra.mxu1 %v24540_v62 }
 0xb66   : > { %21910 = vmatprep.subr.bf16.mxu1 %v23703_v3 }
 0xb68   : > { %21882 = vmatpush1.bf16.msra.mxu0 %v24441_v20 }
 0xb69   : > { %21883 = vmatprep.subr.bf16.mxu0 %v23703_v3  ;;  %21912 = vmatpush3.bf16.msra.mxu1 %v24552_v17 }
 0xb6a   : > { %21913 = vmatprep.subr.bf16.mxu1 %v23703_v3 }
 0xb6c   : > { %21885 = vmatpush1.bf16.msra.mxu0 %v24451_v28 }
 0xb6d   : > { %21886 = vmatprep.subr.bf16.mxu0 %v23703_v3  ;;  %21915 = vmatpush3.bf16.msra.mxu1 %v24564_v21 }
 0xb6e   : > { %21916 = vmatprep.subr.bf16.mxu1 %v23703_v3 }
 0xb70   : > { %21888 = vmatpush1.bf16.msra.mxu0 %v24461_v6 }
 0xb71   : > { %21889 = vmatprep.subr.bf16.mxu0 %v23703_v3  ;;  %21918 = vmatpush3.bf16.msra.mxu1 %v24579_v7 }
 0xb72   : > { %21919 = vmatprep.subr.bf16.mxu1 %v23703_v3 }
 0xb74   : > { %21891 = vmatpush1.bf16.msra.mxu0 %v24471_v24 }
 0xb75   : > { %21892 = vmatprep.subr.bf16.mxu0 %v23703_v3 }
 0xb78   : > { %21894 = vmatpush1.bf16.msra.mxu0 %v24481_v37 }
 0xb79   : > { %21895 = vmatprep.subr.bf16.mxu0 %v23703_v3 }
 0xb7c   : > { %21897 = vmatpush1.bf16.msra.mxu0 %v24491_v43 }
 0xb7d   : > { %21898 = vmatprep.subr.bf16.mxu0 %v23703_v3 }
 0xb80   : > { %21900 = vmatpush1.bf16.msra.mxu0 %v24501_v44 }
 0xb81   : > { %21901 = vmatprep.subr.bf16.mxu0 %v23703_v3 }
 0xb84   : > { %21903 = vmatpush1.bf16.msra.mxu0 %v24511_v49 }
 0xb85   : > { %21949 = vmatprep.subr.bf16.mxu0 %v23703_v3 }
 0xb87   : > { %3205 = vmatmul.mubr.f32.vlgmr.msra.gmra.mrb[48].mxu0 %v17237_v48 }
 0xb88   : > { %17245 = vmatprep.mubr.msk.f32.mxu0 %vm795_vm0, %v17240_v11  ;;  %21951 = vmatpush3.bf16.msra.mxu0 %v24534_v60 }
 0xb89   : > { %21952 = vmatprep.subr.bf16.mxu0 %v23703_v3 }
 0xb8b   : > { %3210 = vmatmul.mubr.f32.gmra.mrb[50].mxu0 %v17239_v12 }
 0xb8c   : > { %17246 = vmatprep.mubr.msk.f32.mxu0 %vm795_vm0, %v17242_v19  ;;  %21954 = vmatpush3.bf16.msra.mxu0 %v24540_v62 }
 0xb8d   : > { %21955 = vmatprep.subr.bf16.mxu0 %v23703_v3 }
 0xb8f   : > { %3215 = vmatmul.mubr.f32.gmra.mrb[52].mxu0 %v17241_v22 }
 0xb90   : > { %21957 = vmatpush3.bf16.msra.mxu0 %v24552_v17  ;;  %19380 = vmatprep.mubr.msk.f32.mxu0 %vm23704_vm1, %v23705_v52 }
 0xb91   : > { %21958 = vmatprep.subr.bf16.mxu0 %v23703_v3 }
 0xb94   : > { %21960 = vmatpush3.bf16.msra.mxu0 %v24564_v21 }
 0xb95   : > { %21961 = vmatprep.subr.bf16.mxu0 %v23703_v3 }
 0xb98   : > { %21963 = vmatpush3.bf16.msra.mxu0 %v24579_v7 }
 0xc32   : > { %v19307_v60 = vpop.f32.mrb[46].mxu0  ;;  %v19330_v23 = vpop.f32.mrb[46].mxu1 }
 0xc33   : > { %v3091_v4 = vmax.f32 %v19307_v60, %v19330_v23  ;;  %v2996_v62 = vpop.f32.mrb[47].mxu0  ;;  %v3081_v29 = vpop.f32.mrb[47].mxu1 }
 0xc34   : > { %v3090_v9 = vmax.f32 %v2996_v62, %v3081_v29 }
 0xc35   : > { %v3093_v18 = vmax.f32 %v3091_v4, 0.0 }
 0xc36   : > { %v3092_v30 = vmax.f32 %v3090_v9, 0.0 }
 0xc37   : > { %3096 = vst.msk [vmem:[#allocation2 + $0x28] sm:$0x3] %vm1541_vm5, %v3093_v18 }
 0xc38   : > { %3095 = vst.msk [vmem:[#allocation2 + $0x20] sm:$0xff] %vm1539_vm6, %v3092_v30 }
 0xc5a   : > { %v3206_v17 = vpop.f32.mrb[48].mxu0 }
 0xc5b   : > { %v3207_v34 = vadd.f32 %v24589_v15, %v3206_v17  ;;  %v3208_v21 = vpop.f32.mrb[49].mxu0 }
 0xc5c   : > { %v3607_v21 = vld [vmem:[%s28227_s28 + $0x8] sm:$0x3] }
 0xc5d   : > { %v3220_v40 = vmax.f32 %v3207_v34, 0.0  ;;  %v3521_v34 = vld [vmem:[%s28226_s1 + $0x8] sm:$0x3] }
 0xc5e   : > { %v3211_v31 = vpop.f32.mrb[50].mxu0 }
 0xc5f   : > { %19352 = vmatmul.mubr.msk.f32.vlgmr.msra.gmra.mrb[48].mxu1 %vm905_vm2, %v3220_v40  ;;  %v3212_v7 = vadd.f32 %v24589_v15, %v3211_v31  ;;  %v3213_v50 = vpop.f32.mrb[51].mxu0  ;;  %v17274_v40 = vld [vmem:[%s23916_s29 + $0x188] sm:$0xff] }
 0xc60   : > { %21921 = vmatpush1.bf16.msra.mxu1 %v24414_v36  ;;  %19354 = vmatprep.mubr.msk.f32.mxu1 %vm23704_vm1, %v23705_v52  ;;  %v3886_v50 = vld [vmem:[%s28221_s0 + $0x28] sm:$0xff] }
 0xc61   : > { %21922 = vmatprep.subr.bf16.mxu1 %v23703_v3  ;;  %v3221_v54 = vmax.f32 %v3212_v7, 0.0  ;;  %v3885_v7 = vld [vmem:[%s28221_s0 + $0x20] sm:$0xff] }
 0xc62   : > { %v3216_v41 = vpop.f32.mrb[52].mxu0 }
 0xc63   : > { %v3217_v55 = vadd.f32 %v24589_v15, %v3216_v41  ;;  %v3218_v58 = vpop.f32.mrb[53].mxu0  ;;  %19355 = vmatmul.mubr.msk.f32.gmra.mrb[50].mxu1 %vm905_vm2, %v3221_v54  ;;  %v24961_v54 = vpack.c.bf16 %v3886_v50, %v3885_v7  ;;  %v3887_v41 = vld [vmem:[%s28221_s0 + $0x30] sm:$0xff] }
 0xc64   : > { %21924 = vmatpush1.bf16.msra.mxu1 %v24428_v51  ;;  %19357 = vmatprep.mubr.msk.f32.mxu1 %vm23704_vm1, %v23705_v52  ;;  %v17251_v51 = vld [vmem:[%s23916_s29 + $0x150] sm:$0xff] }
 0xc65   : > { %21925 = vmatprep.subr.bf16.mxu1 %v23703_v3  ;;  %v3222_v36 = vmax.f32 %v3217_v55, 0.0  ;;  %v3888_v55 = vld [vmem:[%s28221_s0 + $0x38] sm:$0xff] }
 0xc66   : > { %v24971_v58 = vpack.c.bf16 %v3888_v55, %v3887_v41 }
 0xc67   : > { %19358 = vmatmul.mubr.msk.f32.gmra.mrb[52].mxu1 %vm905_vm2, %v3222_v36  ;;  %v3889_v36 = vld [vmem:[%s28221_s0 + $0x40] sm:$0xff] }
 0xc68   : > { %21927 = vmatpush1.bf16.msra.mxu1 %v24441_v20  ;;  %17257 = vmatprep.mubr.msk.f32.mxu1 %vm795_vm0, %v17252_v59  ;;  %v17254_v20 = vld [vmem:[%s23916_s29 + $0x168] sm:$0xff] }
 0xc69   : > { %21928 = vmatprep.subr.bf16.mxu1 %v23703_v3  ;;  %v3890_v59 = vld [vmem:[%s28221_s0 + $0x48] sm:$0xff] }
 0xc6c   : > { %21930 = vmatpush1.bf16.msra.mxu1 %v24451_v28  ;;  %v17253_v28 = vld [vmem:[%s23916_s29 + $0x160] sm:$0xff] }
 0xc6d   : > { %21931 = vmatprep.subr.bf16.mxu1 %v23703_v3 }
 0xc70   : > { %21933 = vmatpush1.bf16.msra.mxu1 %v24461_v6  ;;  %v17256_v6 = vld [vmem:[%s23916_s29 + $0x178] sm:$0xf] }
 0xc71   : > { %21934 = vmatprep.subr.bf16.mxu1 %v23703_v3 }
 0xc74   : > { %21936 = vmatpush1.bf16.msra.mxu1 %v24471_v24  ;;  %v17255_v24 = vld [vmem:[%s23916_s29 + $0x170] sm:$0xf] }
 0xc75   : > { %21937 = vmatprep.subr.bf16.mxu1 %v23703_v3 }
 0xc78   : > { %21939 = vmatpush1.bf16.msra.mxu1 %v24481_v37 }
 0xc79   : > { %21940 = vmatprep.subr.bf16.mxu1 %v23703_v3 }
 0xc7c   : > { %21942 = vmatpush1.bf16.msra.mxu1 %v24491_v43 }
 0xc7d   : > { %21943 = vmatprep.subr.bf16.mxu1 %v23703_v3 }
 0xc80   : > { %21945 = vmatpush1.bf16.msra.mxu1 %v24501_v44 }
 0xc81   : > { %21946 = vmatprep.subr.bf16.mxu1 %v23703_v3 }
 0xc84   : > { %21948 = vmatpush1.bf16.msra.mxu1 %v24511_v49 }
 0xc87   : > { %3410 = vmatmul.mubr.f32.vlgmr.msra.gmra.mrb[54].mxu1 %v17251_v51  ;;  %v24981_v51 = vpack.c.bf16 %v3890_v59, %v3889_v36  ;;  %v17288_v59 = vld [vmem:[%s23916_s29 + $0x1b8] sm:$0xff] }
 0xc88   : > { %17258 = vmatprep.mubr.msk.f32.mxu1 %vm795_vm0, %v17254_v20  ;;  %v3891_v20 = vld [vmem:[%s28221_s0 + $0x50] sm:$0xff] }
 0xc8b   : > { %3415 = vmatmul.mubr.f32.gmra.mrb[56].mxu1 %v17253_v28  ;;  %v3892_v28 = vld [vmem:[%s28221_s0 + $0x58] sm:$0xff] }
 0xc8c   : > { %17259 = vmatprep.mubr.msk.f32.mxu1 %vm795_vm0, %v17256_v6  ;;  %v24991_v6 = vpack.c.bf16 %v3892_v28, %v3891_v20  ;;  %v17287_v20 = vld [vmem:[%s23916_s29 + $0x1b0] sm:$0xff]  ;;  %v17290_v28 = vld [vmem:[%s23916_s29 + $0x1c8] sm:$0xff] }
 0xc8f   : > { %3420 = vmatmul.mubr.f32.gmra.mrb[58].mxu1 %v17255_v24  ;;  %v3893_v24 = vld [vmem:[%s28221_s0 + $0x60] sm:$0xff] }
 0xc90   : > { %19404 = vmatprep.mubr.msk.f32.mxu1 %vm1188_vm3, %v24647_v5 }
 0xd32   : > { %v3315_v37 = vpop.f32.mrb[48].mxu1 }
 0xd33   : > { %v19353_v43 = vpop.f32.mrb[49].mxu1  ;;  %v3316_v11 = vadd.f32 %v24656_v39, %v3315_v37  ;;  %v3894_v37 = vld [vmem:[%s28221_s0 + $0x68] sm:$0xff] }
 0xd34   : > { %v25001_v43 = vpack.c.bf16 %v3894_v37, %v3893_v24  ;;  %v17289_v24 = vld [vmem:[%s23916_s29 + $0x1c0] sm:$0xff]  ;;  %v17292_v37 = vld [vmem:[%s23916_s29 + $0x1d8] sm:$0xf] }
 0xd36   : > { %v3320_v44 = vpop.f32.mrb[50].mxu1 }
 0xd37   : > { %v19356_v61 = vpop.f32.mrb[51].mxu1  ;;  %v3321_v60 = vadd.f32 %v24656_v39, %v3320_v44  ;;  %v3895_v44 = vld [vmem:[%s28221_s0 + $0x70] sm:$0xff] }
 0xd38   : > { %v3896_v61 = vld [vmem:[%s28221_s0 + $0x78] sm:$0xff] }
 0xd3a   : > { %v3325_v49 = vpop.f32.mrb[52].mxu1 }
 0xd3b   : > { %v19359_v63 = vpop.f32.mrb[53].mxu1  ;;  %v3326_v9 = vadd.f32 %v24656_v39, %v3325_v49  ;;  %v25011_v49 = vpack.c.bf16 %v3896_v61, %v3895_v44  ;;  %v17291_v44 = vld [vmem:[%s23916_s29 + $0x1d0] sm:$0xf] }
 0xd3c   : > { %v3897_v63 = vld [vmem:[%s28221_s0 + $0x80] sm:$0xff] }
 0xd5a   : > { %v3411_v1 = vpop.f32.mrb[54].mxu1 }
 0xd5b   : > { %v3412_v27 = vadd.f32 %v24589_v15, %v3411_v1  ;;  %v3413_v33 = vpop.f32.mrb[55].mxu1  ;;  %v3898_v1 = vld [vmem:[%s28221_s0 + $0x88] sm:$0xff] }
 0xd5c   : > { %v3899_v33 = vld [vmem:[%s28221_s0 + $0x90] sm:$0xff] }
 0xd5d   : > { %v3425_v10 = vmax.f32 %v3412_v27, 0.0  ;;  %v25021_v27 = vpack.c.bf16 %v3898_v1, %v3897_v63 }
 0xd5e   : > { %v3416_v13 = vpop.f32.mrb[56].mxu1 }
 0xd5f   : > { %v3417_v14 = vadd.f32 %v24589_v15, %v3416_v13  ;;  %v3418_v16 = vpop.f32.mrb[57].mxu1  ;;  %19381 = vmatmul.mubr.msk.f32.vlgmr.msra.gmra.mrb[54].mxu0 %vm905_vm2, %v3425_v10  ;;  %v3900_v10 = vld [vmem:[%s28221_s0 + $0x98] sm:$0xff] }
 0xd60   : > { %19383 = vmatprep.mubr.msk.f32.mxu0 %vm23704_vm1, %v23705_v52  ;;  %v25031_v13 = vpack.c.bf16 %v3900_v10, %v3899_v33  ;;  %v17276_v16 = vld [vmem:[%s23916_s29 + $0x198] sm:$0xff] }
 0xd61   : > { %v3426_v5 = vmax.f32 %v3417_v14, 0.0  ;;  %v17273_v14 = vld [vmem:[%s23916_s29 + $0x180] sm:$0xff] }
 0xd62   : > { %v3421_v25 = vpop.f32.mrb[58].mxu1 }
 0xd63   : > { %v3422_v26 = vadd.f32 %v24589_v15, %v3421_v25  ;;  %19384 = vmatmul.mubr.msk.f32.gmra.mrb[56].mxu0 %vm905_vm2, %v3426_v5  ;;  %v3423_v35 = vpop.f32.mrb[59].mxu1  ;;  %v17275_v5 = vld [vmem:[%s23916_s29 + $0x190] sm:$0xff]  ;;  %v17278_v25 = vld [vmem:[%s23916_s29 + $0x1a8] sm:$0xf] }
 0xd64   : > { %19386 = vmatprep.mubr.msk.f32.mxu0 %vm23704_vm1, %v23705_v52  ;;  %v4000_v35 = vld [vmem:[%s28223_s5] sm:$0xff] }
 0xd65   : > { %v3427_v45 = vmax.f32 %v3422_v26, 0.0  ;;  %v17277_v26 = vld [vmem:[%s23916_s29 + $0x1a0] sm:$0xf] }
 0xd67   : > { %19387 = vmatmul.mubr.msk.f32.gmra.mrb[58].mxu0 %vm905_vm2, %v3427_v45  ;;  %v4001_v45 = vld [vmem:[%s28223_s5 + $0x8] sm:$0xff] }
 0xd68   : > { %19395 = vmatprep.mubr.msk.f32.mxu0 %vm1188_vm3, %v24642_v2 }
 0xe32   : > { %v3503_v48 = vpop.f32.mrb[54].mxu0 }
 0xe33   : > { %v3504_v12 = vadd.f32 %v24656_v39, %v3503_v48  ;;  %v19382_v19 = vpop.f32.mrb[55].mxu0  ;;  %v4002_v48 = vld [vmem:[%s28223_s5 + $0x10] sm:$0xff] }
 0xe35   : > { %v3517_v22 = vmax.f32 %v3316_v11, %v3504_v12  ;;  %v25054_v11 = vpack.c.bf16 %v4001_v45, %v4000_v35  ;;  %v4003_v12 = vld [vmem:[%s28223_s5 + $0x18] sm:$0xff] }
 0xe36   : > { %v3508_v15 = vpop.f32.mrb[56].mxu0  ;;  %v25060_v19 = vpack.c.bf16 %v4003_v12, %v4002_v48 }
 0xe37   : > { %v3509_v23 = vadd.f32 %v24656_v39, %v3508_v15  ;;  %v19385_v4 = vpop.f32.mrb[57].mxu0  ;;  %v4005_v15 = vld [vmem:[%s28223_s5 + $0x28] sm:$0xff] }
 0xe38   : > { %v4007_v4 = vld [vmem:[%s28223_s5 + $0x38] sm:$0xff] }
 0xe39   : > { %v3518_v62 = vmax.f32 %v3321_v60, %v3509_v23  ;;  %v4006_v23 = vld [vmem:[%s28223_s5 + $0x30] sm:$0xff] }
 0xe3a   : > { %v3513_v29 = vpop.f32.mrb[58].mxu0 }
 0xe3b   : > { %v21964_v18 = vpack.c.bf16 %v3518_v62, %v3517_v22  ;;  %v3514_v2 = vadd.f32 %v24656_v39, %v3513_v29  ;;  %v19388_v30 = vpop.f32.mrb[59].mxu0  ;;  %v3881_v39 = vld [vmem:[%s28221_s0] sm:$0xff]  ;;  %v25084_v62 = vpack.c.bf16 %v4007_v4, %v4006_v23 }
 0xe3c   : > { %v4004_v22 = vld [vmem:[%s28223_s5 + $0x20] sm:$0xff] }
 0xe3d   : > { %v3519_v17 = vmax.f32 %v3326_v9, %v3514_v2  ;;  %21965 = vmatprep.subr.bf16.mxu0 %v21964_v18  ;;  %21969 = vmatprep.subr.bf16.mxu1 %v21964_v18  ;;  %v25072_v60 = vpack.c.bf16 %v4005_v15, %v4004_v22  ;;  %v4008_v29 = vld [vmem:[%s28223_s5 + $0x40] sm:$0xff]  ;;  %v4009_v9 = vld [vmem:[%s28223_s5 + $0x48] sm:$0xff] }
 0xe3e   : > { %21967 = vmatpush3.bf16.msra.mxu0 %v21964_v18  ;;  %21971 = vmatpush3.bf16.msra.mxu1 %v21964_v18  ;;  %v25099_v18 = vpack.c.bf16 %v4009_v9, %v4008_v29  ;;  %v25162_v29 = vld [vmem:[%s28226_s1] sm:$0xff] }
 0xe3f   : > { %19393 = vmatprep.subr.msk.mxu0 %vm1195_vm4, %v3519_v17  ;;  %19402 = vmatprep.subr.msk.mxu1 %vm1195_vm4, %v3519_v17  ;;  %v25167_v9 = vld [vmem:[%s28227_s28] sm:$0xff] }
 0xe42   : > { %19394 = vmatpush3.msk.msra.mxu0 %vm1195_vm4, %v3519_v17  ;;  %19403 = vmatpush3.msk.msra.mxu1 %vm1195_vm4, %v3519_v17 }
 0xe43   : > { %19396 = vmatmul.mubr.msk.f32.vlgmr.msra.gmra.mrb[60].mxu0 %vm1188_vm3, %v3521_v34  ;;  %19405 = vmatmul.mubr.msk.f32.vlgmr.msra.gmra.mrb[60].mxu1 %vm1188_vm3, %v3607_v21 }
 0xe44   : > { %21973 = vmatprep.subr.bf16.mxu0 %v24696_v32  ;;  %21993 = vmatprep.subr.bf16.mxu1 %v24698_v38 }
 0xe45   : > { %21975 = vmatpush3.bf16.msra.mxu0 %v24696_v32  ;;  %21995 = vmatpush3.bf16.msra.mxu1 %v24698_v38  ;;  %v3882_v32 = vld [vmem:[%s28221_s0 + $0x8] sm:$0xff] }
 0xe46   : > { %21977 = vmatprep.subr.bf16.mxu0 %v24702_v46  ;;  %21997 = vmatprep.subr.bf16.mxu1 %v24704_v47 }
 0xe49   : > { %21979 = vmatpush3.bf16.msra.mxu0 %v24702_v46  ;;  %21999 = vmatpush3.bf16.msra.mxu1 %v24704_v47 }
 0xe4a   : > { %21981 = vmatprep.subr.bf16.mxu0 %v24726_v56  ;;  %22001 = vmatprep.subr.bf16.mxu1 %v24728_v57 }
 0xe4d   : > { %21983 = vmatpush3.bf16.msra.mxu0 %v24726_v56  ;;  %22003 = vmatpush3.bf16.msra.mxu1 %v24728_v57 }
 0xe4e   : > { %21985 = vmatprep.subr.bf16.mxu0 %v24746_v53  ;;  %22005 = vmatprep.subr.bf16.mxu1 %v24748_v0 }
 0xe51   : > { %21987 = vmatpush3.bf16.msra.mxu0 %v24746_v53  ;;  %22007 = vmatpush3.bf16.msra.mxu1 %v24748_v0  ;;  %v24934_v0 = vpack.c.bf16 %v3882_v32, %v3881_v39 }
 0xe52   : > { %21989 = vmatprep.subr.bf16.mxu0 %v24762_v8  ;;  %22009 = vmatprep.subr.bf16.mxu1 %v24770_v42 }
 0xe55   : > { %21991 = vmatpush3.bf16.msra.mxu0 %v24762_v8  ;;  %22011 = vmatpush3.bf16.msra.mxu1 %v24770_v42  ;;  %v3883_v8 = vld [vmem:[%s28221_s0 + $0x10] sm:$0xff]  ;;  %v3884_v42 = vld [vmem:[%s28221_s0 + $0x18] sm:$0xff] }
 0xe56   : > { %22012 = vmatprep.subr.bf16.mxu0 %v23703_v3  ;;  %22042 = vmatprep.subr.bf16.mxu1 %v23703_v3  ;;  %v24948_v31 = vpack.c.bf16 %v3884_v42, %v3883_v8 }
 0xf16   : > { %v19397_v38 = vpop.f32.mrb[60].mxu0  ;;  %v19406_v46 = vpop.f32.mrb[60].mxu1 }
 0xf17   : > { %v3690_v47 = vmax.f32 %v19397_v38, %v19406_v46  ;;  %v3597_v56 = vpop.f32.mrb[61].mxu0  ;;  %v3680_v57 = vpop.f32.mrb[61].mxu1  ;;  %v25109_v46 = vld [vmem:[%s28225_s27] ss:$0 sm:$0xff] }
 0xf18   : > { %v3689_v53 = vmax.f32 %v3597_v56, %v3680_v57 }
 0xf1a   : > { %19427 = vmatprep.mubr.msk.f32.mxu0 %vm905_vm2, %v3689_v53  ;;  %19450 = vmatprep.mubr.msk.f32.mxu1 %vm905_vm2, %v3689_v53 }
 0xf1b   : > { %19428 = vmatmul.mubr.msk.f32.vlgmr.msra.gmra.mrb[62].mxu0 %vm905_vm2, %v3690_v47  ;;  %19451 = vmatmul.mubr.msk.f32.vlgmr.msra.gmra.mrb[62].mxu1 %vm905_vm2, %v3690_v47 }
 0xf1c   : > { %22014 = vmatpush1.bf16.msra.mxu0 %v24934_v0  ;;  %17280 = vmatprep.mubr.msk.f32.mxu0 %vm795_vm0, %v17274_v40 }
 0xf1d   : > { %22015 = vmatprep.subr.bf16.mxu0 %v23703_v3  ;;  %19473 = vmatprep.mubr.msk.f32.mxu1 %vm23704_vm1, %v23705_v52 }
 0xf1e   : > { %22044 = vmatpush3.bf16.msra.mxu1 %v25054_v11 }
 0xf1f   : > { %22045 = vmatprep.subr.bf16.mxu1 %v23703_v3 }
 0xf20   : > { %22017 = vmatpush1.bf16.msra.mxu0 %v24948_v31 }
 0xf21   : > { %22018 = vmatprep.subr.bf16.mxu0 %v23703_v3 }
 0xf22   : > { %22047 = vmatpush3.bf16.msra.mxu1 %v25060_v19 }
 0xf23   : > { %22048 = vmatprep.subr.bf16.mxu1 %v23703_v3 }
 0xf24   : > { %22020 = vmatpush1.bf16.msra.mxu0 %v24961_v54 }
 0xf25   : > { %22021 = vmatprep.subr.bf16.mxu0 %v23703_v3 }
 0xf26   : > { %22050 = vmatpush3.bf16.msra.mxu1 %v25072_v60 }
 0xf27   : > { %22051 = vmatprep.subr.bf16.mxu1 %v23703_v3 }
 0xf28   : > { %22023 = vmatpush1.bf16.msra.mxu0 %v24971_v58 }
 0xf29   : > { %22024 = vmatprep.subr.bf16.mxu0 %v23703_v3 }
 0xf2a   : > { %22053 = vmatpush3.bf16.msra.mxu1 %v25084_v62 }
 0xf2b   : > { %22054 = vmatprep.subr.bf16.mxu1 %v23703_v3 }
 0xf2c   : > { %22026 = vmatpush1.bf16.msra.mxu0 %v24981_v51 }
 0xf2d   : > { %22027 = vmatprep.subr.bf16.mxu0 %v23703_v3 }
 0xf2e   : > { %22056 = vmatpush3.bf16.msra.mxu1 %v25099_v18 }
 0xf2f   : > { %22057 = vmatprep.subr.bf16.mxu1 %v23703_v3 }
 0xf30   : > { %22029 = vmatpush1.bf16.msra.mxu0 %v24991_v6 }
 0xf31   : > { %22030 = vmatprep.subr.bf16.mxu0 %v23703_v3 }
 0xf34   : > { %22032 = vmatpush1.bf16.msra.mxu0 %v25001_v43 }
 0xf35   : > { %22033 = vmatprep.subr.bf16.mxu0 %v23703_v3 }
 0xf38   : > { %22035 = vmatpush1.bf16.msra.mxu0 %v25011_v49 }
 0xf39   : > { %22036 = vmatprep.subr.bf16.mxu0 %v23703_v3 }
 0xf3c   : > { %22038 = vmatpush1.bf16.msra.mxu0 %v25021_v27 }
 0xf3d   : > { %22039 = vmatprep.subr.bf16.mxu0 %v23703_v3 }
 0xf40   : > { %22041 = vmatpush1.bf16.msra.mxu0 %v25031_v13 }
 0xf41   : > { %22087 = vmatprep.subr.bf16.mxu0 %v23703_v3 }
 0xf43   : > { %3982 = vmatmul.mubr.f32.vlgmr.msra.gmra.mrb[64].mxu0 %v17273_v14 }
 0xf44   : > { %17281 = vmatprep.mubr.msk.f32.mxu0 %vm795_vm0, %v17276_v16  ;;  %22089 = vmatpush3.bf16.msra.mxu0 %v25054_v11 }
 0xf45   : > { %22090 = vmatprep.subr.bf16.mxu0 %v23703_v3 }
 0xf47   : > { %3987 = vmatmul.mubr.f32.gmra.mrb[66].mxu0 %v17275_v5 }
 0xf48   : > { %17282 = vmatprep.mubr.msk.f32.mxu0 %vm795_vm0, %v17278_v25  ;;  %22092 = vmatpush3.bf16.msra.mxu0 %v25060_v19 }
 0xf49   : > { %22093 = vmatprep.subr.bf16.mxu0 %v23703_v3 }
 0xf4b   : > { %3992 = vmatmul.mubr.f32.gmra.mrb[68].mxu0 %v17277_v26 }
 0xf4c   : > { %19502 = vmatprep.mubr.msk.f32.mxu0 %vm23704_vm1, %v23705_v52  ;;  %22095 = vmatpush3.bf16.msra.mxu0 %v25072_v60 }
 0xf4d   : > { %22096 = vmatprep.subr.bf16.mxu0 %v23703_v3 }
 0xf50   : > { %22098 = vmatpush3.bf16.msra.mxu0 %v25084_v62 }
 0xf51   : > { %22099 = vmatprep.subr.bf16.mxu0 %v23703_v3 }
 0xf54   : > { %22101 = vmatpush3.bf16.msra.mxu0 %v25099_v18 }
 0xfee   : > { %v19429_v2 = vpop.f32.mrb[62].mxu0  ;;  %v19452_v30 = vpop.f32.mrb[62].mxu1 }
 0xfef   : > { %v3868_v17 = vmax.f32 %v19429_v2, %v19452_v30  ;;  %v3773_v34 = vpop.f32.mrb[63].mxu0  ;;  %v3858_v21 = vpop.f32.mrb[63].mxu1  ;;  %v25176_v2 = vld [vmem:[%s28229_s4] ss:$0 sm:$0xff] }
 0xff0   : > { %v3867_v39 = vmax.f32 %v3773_v34, %v3858_v21 }
 0xff1   : > { %v3870_v32 = vmax.f32 %v3868_v17, 0.0 }
 0xff2   : > { %v3869_v38 = vmax.f32 %v3867_v39, 0.0 }
 0xff3   : > { %3873 = vst.msk [vmem:[#allocation2 + $0x38] sm:$0x3] %vm1541_vm5, %v3870_v32 }
 0xff4   : > { %3872 = vst.msk [vmem:[#allocation2 + $0x30] sm:$0xff] %vm1539_vm6, %v3869_v38 }
0x1016   : > { %v3983_v47 = vpop.f32.mrb[64].mxu0 }
0x1017   : > { %v3984_v56 = vadd.f32 %v25109_v46, %v3983_v47  ;;  %v3985_v57 = vpop.f32.mrb[65].mxu0 }
0x1019   : > { %v3997_v53 = vmax.f32 %v3984_v56, 0.0 }
0x101a   : > { %v3988_v8 = vpop.f32.mrb[66].mxu0 }
0x101b   : > { %19474 = vmatmul.mubr.msk.f32.vlgmr.msra.gmra.mrb[64].mxu1 %vm905_vm2, %v3997_v53  ;;  %v3989_v42 = vadd.f32 %v25109_v46, %v3988_v8  ;;  %v3990_v40 = vpop.f32.mrb[67].mxu0 }
0x101c   : > { %22059 = vmatpush1.bf16.msra.mxu1 %v24934_v0  ;;  %19476 = vmatprep.mubr.msk.f32.mxu1 %vm23704_vm1, %v23705_v52 }
0x101d   : > { %22060 = vmatprep.subr.bf16.mxu1 %v23703_v3  ;;  %v3998_v7 = vmax.f32 %v3989_v42, 0.0 }
0x101e   : > { %v3993_v50 = vpop.f32.mrb[68].mxu0 }
0x101f   : > { %v3994_v41 = vadd.f32 %v25109_v46, %v3993_v50  ;;  %v3995_v55 = vpop.f32.mrb[69].mxu0  ;;  %19477 = vmatmul.mubr.msk.f32.gmra.mrb[66].mxu1 %vm905_vm2, %v3998_v7  ;;  %v4468_v50 = vld [vmem:[%s28231_s25] sm:$0xff] }
0x1020   : > { %22062 = vmatpush1.bf16.msra.mxu1 %v24948_v31  ;;  %19479 = vmatprep.mubr.msk.f32.mxu1 %vm23704_vm1, %v23705_v52  ;;  %v4469_v55 = vld [vmem:[%s28231_s25 + $0x8] sm:$0xff] }
0x1021   : > { %22063 = vmatprep.subr.bf16.mxu1 %v23703_v3  ;;  %v3999_v36 = vmax.f32 %v3994_v41, 0.0 }
0x1023   : > { %19480 = vmatmul.mubr.msk.f32.gmra.mrb[68].mxu1 %vm905_vm2, %v3999_v36  ;;  %v4559_v36 = vld [vmem:[%s28233_s24] sm:$0xff] }
0x1024   : > { %22065 = vmatpush1.bf16.msra.mxu1 %v24961_v54  ;;  %17293 = vmatprep.mubr.msk.f32.mxu1 %vm795_vm0, %v17288_v59  ;;  %v4560_v59 = vld [vmem:[%s28233_s24 + $0x8] sm:$0xff] }
0x1025   : > { %22066 = vmatprep.subr.bf16.mxu1 %v23703_v3 }
0x1028   : > { %22068 = vmatpush1.bf16.msra.mxu1 %v24971_v58 }
0x1029   : > { %22069 = vmatprep.subr.bf16.mxu1 %v23703_v3 }
0x102c   : > { %22071 = vmatpush1.bf16.msra.mxu1 %v24981_v51 }
0x102d   : > { %22072 = vmatprep.subr.bf16.mxu1 %v23703_v3 }
0x1030   : > { %22074 = vmatpush1.bf16.msra.mxu1 %v24991_v6 }
0x1031   : > { %22075 = vmatprep.subr.bf16.mxu1 %v23703_v3 }
0x1034   : > { %22077 = vmatpush1.bf16.msra.mxu1 %v25001_v43 }
0x1035   : > { %22078 = vmatprep.subr.bf16.mxu1 %v23703_v3 }
0x1038   : > { %22080 = vmatpush1.bf16.msra.mxu1 %v25011_v49 }
0x1039   : > { %22081 = vmatprep.subr.bf16.mxu1 %v23703_v3 }
0x103c   : > { %22083 = vmatpush1.bf16.msra.mxu1 %v25021_v27 }
0x103d   : > { %22084 = vmatprep.subr.bf16.mxu1 %v23703_v3 }
0x1040   : > { %22086 = vmatpush1.bf16.msra.mxu1 %v25031_v13 }
0x1043   : > { %4187 = vmatmul.mubr.f32.vlgmr.msra.gmra.mrb[70].mxu1 %v17287_v20  ;;  %v4470_v20 = vld [vmem:[%s28231_s25 + $0x10] sm:$0xff] }
0x1044   : > { %17294 = vmatprep.mubr.msk.f32.mxu1 %vm795_vm0, %v17290_v28  ;;  %v4471_v28 = vld [vmem:[%s28231_s25 + $0x18] sm:$0xff] }
0x1047   : > { %4192 = vmatmul.mubr.f32.gmra.mrb[72].mxu1 %v17289_v24  ;;  %v4561_v24 = vld [vmem:[%s28233_s24 + $0x10] sm:$0xff] }
0x1048   : > { %17295 = vmatprep.mubr.msk.f32.mxu1 %vm795_vm0, %v17292_v37  ;;  %v4562_v37 = vld [vmem:[%s28233_s24 + $0x18] sm:$0xff] }
0x104b   : > { %4197 = vmatmul.mubr.f32.gmra.mrb[74].mxu1 %v17291_v44  ;;  %v4298_v44 = vld [vmem:[%s28226_s1 + $0x8] sm:$0x3] }
0x104c   : > { %19526 = vmatprep.mubr.msk.f32.mxu1 %vm1188_vm3, %v25167_v9 }
0x10ee   : > { %v4092_v61 = vpop.f32.mrb[64].mxu1 }
0x10ef   : > { %v19475_v63 = vpop.f32.mrb[65].mxu1  ;;  %v4093_v17 = vadd.f32 %v25176_v2, %v4092_v61  ;;  %v4384_v61 = vld [vmem:[%s28227_s28 + $0x8] sm:$0x3] }
0x10f0   : > { %v25216_v63 = vpack.c.bf16 %v4469_v55, %v4468_v50  ;;  %v17314_v50 = vld [vmem:[%s23916_s29 + $0x208] sm:$0xf] }
0x10f2   : > { %v4097_v1 = vpop.f32.mrb[66].mxu1 }
0x10f3   : > { %v19478_v33 = vpop.f32.mrb[67].mxu1  ;;  %v4098_v38 = vadd.f32 %v25176_v2, %v4097_v1  ;;  %v25218_v1 = vpack.c.bf16 %v4560_v59, %v4559_v36 }
0x10f4   : > { %v25222_v33 = vpack.c.bf16 %v4471_v28, %v4470_v20 }
0x10f6   : > { %v4102_v10 = vpop.f32.mrb[68].mxu1 }
0x10f7   : > { %v19481_v14 = vpop.f32.mrb[69].mxu1  ;;  %v4103_v8 = vadd.f32 %v25176_v2, %v4102_v10  ;;  %v25224_v10 = vpack.c.bf16 %v4562_v37, %v4561_v24 }
0x10f8   : > { %v4472_v14 = vld [vmem:[%s28231_s25 + $0x20] sm:$0xff] }
0x1116   : > { %v4188_v16 = vpop.f32.mrb[70].mxu1 }
0x1117   : > { %v4189_v5 = vadd.f32 %v25109_v46, %v4188_v16  ;;  %v4190_v25 = vpop.f32.mrb[71].mxu1  ;;  %v4473_v16 = vld [vmem:[%s28231_s25 + $0x28] sm:$0xff] }
0x1118   : > { %v4564_v25 = vld [vmem:[%s28233_s24 + $0x28] sm:$0xff] }
0x1119   : > { %v4202_v26 = vmax.f32 %v4189_v5, 0.0  ;;  %v4563_v5 = vld [vmem:[%s28233_s24 + $0x20] sm:$0xff] }
0x111a   : > { %v4193_v35 = vpop.f32.mrb[72].mxu1 }
0x111b   : > { %v4194_v45 = vadd.f32 %v25109_v46, %v4193_v35  ;;  %v4195_v48 = vpop.f32.mrb[73].mxu1  ;;  %19503 = vmatmul.mubr.msk.f32.vlgmr.msra.gmra.mrb[70].mxu0 %vm905_vm2, %v4202_v26  ;;  %v25246_v26 = vpack.c.bf16 %v4473_v16, %v4472_v14  ;;  %v25248_v35 = vpack.c.bf16 %v4564_v25, %v4563_v5 }
0x111c   : > { %19505 = vmatprep.mubr.msk.f32.mxu0 %vm23704_vm1, %v23705_v52  ;;  %v4475_v48 = vld [vmem:[%s28231_s25 + $0x38] sm:$0xff] }
0x111d   : > { %v4203_v12 = vmax.f32 %v4194_v45, 0.0  ;;  %v4474_v45 = vld [vmem:[%s28231_s25 + $0x30] sm:$0xff] }
0x111e   : > { %v4198_v22 = vpop.f32.mrb[74].mxu1 }
0x111f   : > { %v4199_v15 = vadd.f32 %v25109_v46, %v4198_v22  ;;  %19506 = vmatmul.mubr.msk.f32.gmra.mrb[72].mxu0 %vm905_vm2, %v4203_v12  ;;  %v4200_v23 = vpop.f32.mrb[75].mxu1  ;;  %v4565_v12 = vld [vmem:[%s28233_s24 + $0x30] sm:$0xff]  ;;  %v4566_v22 = vld [vmem:[%s28233_s24 + $0x38] sm:$0xff] }
0x1120   : > { %19508 = vmatprep.mubr.msk.f32.mxu0 %vm23704_vm1, %v23705_v52  ;;  %v25268_v23 = vpack.c.bf16 %v4566_v22, %v4565_v12 }
0x1121   : > { %v4204_v4 = vmax.f32 %v4199_v15, 0.0  ;;  %v25266_v15 = vpack.c.bf16 %v4475_v48, %v4474_v45  ;;  %v17324_v48 = vld [vmem:[%s23916_s29 + $0x218] sm:$0xff] }
0x1123   : > { %19509 = vmatmul.mubr.msk.f32.gmra.mrb[74].mxu0 %vm905_vm2, %v4204_v4  ;;  %v4476_v4 = vld [vmem:[%s28231_s25 + $0x40] sm:$0xff] }
0x1124   : > { %19517 = vmatprep.mubr.msk.f32.mxu0 %vm1188_vm3, %v25162_v29 }
0x11ee   : > { %v4280_v30 = vpop.f32.mrb[70].mxu0 }
0x11ef   : > { %v4281_v34 = vadd.f32 %v25176_v2, %v4280_v30  ;;  %v19504_v21 = vpop.f32.mrb[71].mxu0  ;;  %v4477_v30 = vld [vmem:[%s28231_s25 + $0x48] sm:$0xff] }
0x11f0   : > { %v4568_v21 = vld [vmem:[%s28233_s24 + $0x48] sm:$0xff] }
0x11f1   : > { %v4294_v39 = vmax.f32 %v4093_v17, %v4281_v34  ;;  %v25282_v17 = vpack.c.bf16 %v4477_v30, %v4476_v4  ;;  %v4567_v34 = vld [vmem:[%s28233_s24 + $0x40] sm:$0xff] }
0x11f2   : > { %v4285_v32 = vpop.f32.mrb[72].mxu0 }
0x11f3   : > { %v4286_v47 = vadd.f32 %v25176_v2, %v4285_v32  ;;  %v19507_v56 = vpop.f32.mrb[73].mxu0 }
0x11f5   : > { %v4295_v57 = vmax.f32 %v4098_v38, %v4286_v47 }
0x11f6   : > { %v4290_v53 = vpop.f32.mrb[74].mxu0 }
0x11f7   : > { %v22102_v42 = vpack.c.bf16 %v4295_v57, %v4294_v39  ;;  %v4291_v40 = vadd.f32 %v25176_v2, %v4290_v53  ;;  %v19510_v7 = vpop.f32.mrb[75].mxu0  ;;  %v25290_v39 = vpack.c.bf16 %v4568_v21, %v4567_v34 }
0x11f8   : > { %v17311_v7 = vld [vmem:[%s23916_s29 + $0x1f0] sm:$0xff] }
0x11f9   : > { %v4296_v41 = vmax.f32 %v4103_v8, %v4291_v40  ;;  %22103 = vmatprep.subr.bf16.mxu0 %v22102_v42  ;;  %22107 = vmatprep.subr.bf16.mxu1 %v22102_v42  ;;  %v17310_v8 = vld [vmem:[%s23916_s29 + $0x1e8] sm:$0xff]  ;;  %v17312_v40 = vld [vmem:[%s23916_s29 + $0x1f8] sm:$0xff] }
0x11fa   : > { %22105 = vmatpush3.bf16.msra.mxu0 %v22102_v42  ;;  %22109 = vmatpush3.bf16.msra.mxu1 %v22102_v42  ;;  %v17309_v42 = vld [vmem:[%s23916_s29 + $0x1e0] sm:$0xff] }
0x11fb   : > { %19515 = vmatprep.subr.msk.mxu0 %vm1195_vm4, %v4296_v41  ;;  %19524 = vmatprep.subr.msk.mxu1 %vm1195_vm4, %v4296_v41 }
0x11fe   : > { %19516 = vmatpush3.msk.msra.mxu0 %vm1195_vm4, %v4296_v41  ;;  %19525 = vmatpush3.msk.msra.mxu1 %vm1195_vm4, %v4296_v41  ;;  %v17313_v41 = vld [vmem:[%s23916_s29 + $0x200] sm:$0xf] }
0x11ff   : > { %19518 = vmatmul.mubr.msk.f32.vlgmr.msra.gmra.mrb[76].mxu0 %vm1188_vm3, %v4298_v44  ;;  %19527 = vmatmul.mubr.msk.f32.vlgmr.msra.gmra.mrb[76].mxu1 %vm1188_vm3, %v4384_v61 }
0x1200   : > { %22111 = vmatprep.subr.bf16.mxu0 %v25216_v63  ;;  %22131 = vmatprep.subr.bf16.mxu1 %v25218_v1 }
0x1201   : > { %22113 = vmatpush3.bf16.msra.mxu0 %v25216_v63  ;;  %22133 = vmatpush3.bf16.msra.mxu1 %v25218_v1 }
0x1202   : > { %22115 = vmatprep.subr.bf16.mxu0 %v25222_v33  ;;  %22135 = vmatprep.subr.bf16.mxu1 %v25224_v10 }
0x1205   : > { %22117 = vmatpush3.bf16.msra.mxu0 %v25222_v33  ;;  %22137 = vmatpush3.bf16.msra.mxu1 %v25224_v10 }
0x1206   : > { %22119 = vmatprep.subr.bf16.mxu0 %v25246_v26  ;;  %22139 = vmatprep.subr.bf16.mxu1 %v25248_v35 }
0x1209   : > { %22121 = vmatpush3.bf16.msra.mxu0 %v25246_v26  ;;  %22141 = vmatpush3.bf16.msra.mxu1 %v25248_v35 }
0x120a   : > { %22123 = vmatprep.subr.bf16.mxu0 %v25266_v15  ;;  %22143 = vmatprep.subr.bf16.mxu1 %v25268_v23 }
0x120d   : > { %22125 = vmatpush3.bf16.msra.mxu0 %v25266_v15  ;;  %22145 = vmatpush3.bf16.msra.mxu1 %v25268_v23 }
0x120e   : > { %22127 = vmatprep.subr.bf16.mxu0 %v25282_v17  ;;  %22147 = vmatprep.subr.bf16.mxu1 %v25290_v39 }
0x1211   : > { %22129 = vmatpush3.bf16.msra.mxu0 %v25282_v17  ;;  %22149 = vmatpush3.bf16.msra.mxu1 %v25290_v39 }
0x1212   : > { %22150 = vmatprep.subr.bf16.mxu0 %v23703_v3  ;;  %22180 = vmatprep.subr.bf16.mxu1 %v23703_v3 }
0x12d2   : > { %v19519_v32 = vpop.f32.mrb[76].mxu0  ;;  %v19528_v38 = vpop.f32.mrb[76].mxu1 }
0x12d3   : > { %v4467_v47 = vmax.f32 %v19519_v32, %v19528_v38  ;;  %v4374_v56 = vpop.f32.mrb[77].mxu0  ;;  %v4457_v57 = vpop.f32.mrb[77].mxu1 }
0x12d4   : > { %v4466_v53 = vmax.f32 %v4374_v56, %v4457_v57 }
0x12d6   : > { %19549 = vmatprep.mubr.msk.f32.mxu0 %vm905_vm2, %v4466_v53  ;;  %19572 = vmatprep.mubr.msk.f32.mxu1 %vm905_vm2, %v4466_v53 }
0x12d7   : > { %19550 = vmatmul.mubr.msk.f32.vlgmr.msra.gmra.mrb[78].mxu0 %vm905_vm2, %v4467_v47  ;;  %19573 = vmatmul.mubr.msk.f32.vlgmr.msra.gmra.mrb[78].mxu1 %vm905_vm2, %v4467_v47 }
0x12d8   : > { %22152 = vmatpush1.bf16.msra.mxu0 %v24934_v0  ;;  %17316 = vmatprep.mubr.msk.f32.mxu0 %vm795_vm0, %v17310_v8 }
0x12d9   : > { %22153 = vmatprep.subr.bf16.mxu0 %v23703_v3  ;;  %22182 = vmatpush3.bf16.msra.mxu1 %v25054_v11 }
0x12da   : > { %22183 = vmatprep.subr.bf16.mxu1 %v23703_v3  ;;  %19595 = vmatprep.mubr.msk.f32.mxu1 %vm23704_vm1, %v23705_v52 }
0x12dc   : > { %22155 = vmatpush1.bf16.msra.mxu0 %v24948_v31 }
0x12dd   : > { %22156 = vmatprep.subr.bf16.mxu0 %v23703_v3  ;;  %22185 = vmatpush3.bf16.msra.mxu1 %v25060_v19 }
0x12de   : > { %22186 = vmatprep.subr.bf16.mxu1 %v23703_v3 }
0x12e0   : > { %22158 = vmatpush1.bf16.msra.mxu0 %v24961_v54 }
0x12e1   : > { %22159 = vmatprep.subr.bf16.mxu0 %v23703_v3  ;;  %22188 = vmatpush3.bf16.msra.mxu1 %v25072_v60 }
0x12e2   : > { %22189 = vmatprep.subr.bf16.mxu1 %v23703_v3 }
0x12e4   : > { %22161 = vmatpush1.bf16.msra.mxu0 %v24971_v58 }
0x12e5   : > { %22162 = vmatprep.subr.bf16.mxu0 %v23703_v3  ;;  %22191 = vmatpush3.bf16.msra.mxu1 %v25084_v62 }
0x12e6   : > { %22192 = vmatprep.subr.bf16.mxu1 %v23703_v3 }
0x12e8   : > { %22164 = vmatpush1.bf16.msra.mxu0 %v24981_v51 }
0x12e9   : > { %22165 = vmatprep.subr.bf16.mxu0 %v23703_v3  ;;  %22194 = vmatpush3.bf16.msra.mxu1 %v25099_v18 }
0x12ea   : > { %22195 = vmatprep.subr.bf16.mxu1 %v23703_v3 }
0x12ec   : > { %22167 = vmatpush1.bf16.msra.mxu0 %v24991_v6 }
0x12ed   : > { %22168 = vmatprep.subr.bf16.mxu0 %v23703_v3 }
0x12f0   : > { %22170 = vmatpush1.bf16.msra.mxu0 %v25001_v43 }
0x12f1   : > { %22171 = vmatprep.subr.bf16.mxu0 %v23703_v3 }
0x12f4   : > { %22173 = vmatpush1.bf16.msra.mxu0 %v25011_v49 }
0x12f5   : > { %22174 = vmatprep.subr.bf16.mxu0 %v23703_v3 }
0x12f8   : > { %22176 = vmatpush1.bf16.msra.mxu0 %v25021_v27 }
0x12f9   : > { %22177 = vmatprep.subr.bf16.mxu0 %v23703_v3 }
0x12fc   : > { %22179 = vmatpush1.bf16.msra.mxu0 %v25031_v13 }
0x12fd   : > { %22225 = vmatprep.subr.bf16.mxu0 %v23703_v3 }
0x12ff   : > { %4759 = vmatmul.mubr.f32.vlgmr.msra.gmra.mrb[80].mxu0 %v17309_v42 }
0x1300   : > { %17317 = vmatprep.mubr.msk.f32.mxu0 %vm795_vm0, %v17312_v40  ;;  %22227 = vmatpush3.bf16.msra.mxu0 %v25054_v11 }
0x1301   : > { %22228 = vmatprep.subr.bf16.mxu0 %v23703_v3 }
0x1303   : > { %4764 = vmatmul.mubr.f32.gmra.mrb[82].mxu0 %v17311_v7 }
0x1304   : > { %17318 = vmatprep.mubr.msk.f32.mxu0 %vm795_vm0, %v17314_v50  ;;  %22230 = vmatpush3.bf16.msra.mxu0 %v25060_v19 }
0x1305   : > { %22231 = vmatprep.subr.bf16.mxu0 %v23703_v3 }
0x1307   : > { %4769 = vmatmul.mubr.f32.gmra.mrb[84].mxu0 %v17313_v41 }
0x1308   : > { %22233 = vmatpush3.bf16.msra.mxu0 %v25072_v60  ;;  %19624 = vmatprep.mubr.msk.f32.mxu0 %vm23704_vm1, %v23705_v52 }
0x1309   : > { %22234 = vmatprep.subr.bf16.mxu0 %v23703_v3 }
0x130c   : > { %22236 = vmatpush3.bf16.msra.mxu0 %v25084_v62 }
0x130d   : > { %22237 = vmatprep.subr.bf16.mxu0 %v23703_v3 }
0x1310   : > { %22239 = vmatpush3.bf16.msra.mxu0 %v25099_v18 }
0x13aa   : > { %v19551_v11 = vpop.f32.mrb[78].mxu0  ;;  %v19574_v55 = vpop.f32.mrb[78].mxu1 }
0x13ab   : > { %v4645_v36 = vmax.f32 %v19551_v11, %v19574_v55  ;;  %v4550_v19 = vpop.f32.mrb[79].mxu0  ;;  %v4635_v59 = vpop.f32.mrb[79].mxu1 }
0x13ac   : > { %v4644_v20 = vmax.f32 %v4550_v19, %v4635_v59 }
0x13ad   : > { %v4647_v28 = vmax.f32 %v4645_v36, 0.0 }
0x13ae   : > { %v4646_v24 = vmax.f32 %v4644_v20, 0.0 }
0x13af   : > { %4650 = vst.msk [vmem:[#allocation2 + $0x48] sm:$0x3] %vm1541_vm5, %v4647_v28 }
0x13b0   : > { %4649 = vst.msk [vmem:[#allocation2 + $0x40] sm:$0xff] %vm1539_vm6, %v4646_v24 }
0x13d2   : > { %v4760_v60 = vpop.f32.mrb[80].mxu0 }
0x13d3   : > { %v4761_v37 = vadd.f32 %v25109_v46, %v4760_v60  ;;  %v4762_v62 = vpop.f32.mrb[81].mxu0 }
0x13d4   : > { %v5161_v62 = vld [vmem:[%s28227_s28 + $0x8] sm:$0x3] }
0x13d5   : > { %v4774_v44 = vmax.f32 %v4761_v37, 0.0  ;;  %v5075_v37 = vld [vmem:[%s28226_s1 + $0x8] sm:$0x3] }
0x13d6   : > { %v4765_v61 = vpop.f32.mrb[82].mxu0 }
0x13d7   : > { %19596 = vmatmul.mubr.msk.f32.vlgmr.msra.gmra.mrb[80].mxu1 %vm905_vm2, %v4774_v44  ;;  %v4766_v18 = vadd.f32 %v25109_v46, %v4765_v61  ;;  %v4767_v14 = vpop.f32.mrb[83].mxu0  ;;  %v17346_v44 = vld [vmem:[%s23916_s29 + $0x248] sm:$0xff] }
0x13d8   : > { %22197 = vmatpush1.bf16.msra.mxu1 %v24934_v0  ;;  %19598 = vmatprep.mubr.msk.f32.mxu1 %vm23704_vm1, %v23705_v52  ;;  %v5440_v14 = vld [vmem:[%s28221_s0 + $0x28] sm:$0xff] }
0x13d9   : > { %22198 = vmatprep.subr.bf16.mxu1 %v23703_v3  ;;  %v4775_v16 = vmax.f32 %v4766_v18, 0.0  ;;  %v5439_v18 = vld [vmem:[%s28221_s0 + $0x20] sm:$0xff] }
0x13da   : > { %v4770_v5 = vpop.f32.mrb[84].mxu0 }
0x13db   : > { %v4771_v25 = vadd.f32 %v25109_v46, %v4770_v5  ;;  %v4772_v45 = vpop.f32.mrb[85].mxu0  ;;  %19599 = vmatmul.mubr.msk.f32.gmra.mrb[82].mxu1 %vm905_vm2, %v4775_v16  ;;  %v25481_v16 = vpack.c.bf16 %v5440_v14, %v5439_v18  ;;  %v5441_v5 = vld [vmem:[%s28221_s0 + $0x30] sm:$0xff] }
0x13dc   : > { %22200 = vmatpush1.bf16.msra.mxu1 %v24948_v31  ;;  %19601 = vmatprep.mubr.msk.f32.mxu1 %vm23704_vm1, %v23705_v52  ;;  %v17323_v31 = vld [vmem:[%s23916_s29 + $0x210] sm:$0xff] }
0x13dd   : > { %22201 = vmatprep.subr.bf16.mxu1 %v23703_v3  ;;  %v4776_v0 = vmax.f32 %v4771_v25, 0.0  ;;  %v5442_v25 = vld [vmem:[%s28221_s0 + $0x38] sm:$0xff] }
0x13de   : > { %v25491_v45 = vpack.c.bf16 %v5442_v25, %v5441_v5 }
0x13df   : > { %19602 = vmatmul.mubr.msk.f32.gmra.mrb[84].mxu1 %vm905_vm2, %v4776_v0  ;;  %v5443_v0 = vld [vmem:[%s28221_s0 + $0x40] sm:$0xff] }
0x13e0   : > { %22203 = vmatpush1.bf16.msra.mxu1 %v24961_v54  ;;  %17329 = vmatprep.mubr.msk.f32.mxu1 %vm795_vm0, %v17324_v48  ;;  %v17326_v54 = vld [vmem:[%s23916_s29 + $0x228] sm:$0xff] }
0x13e1   : > { %22204 = vmatprep.subr.bf16.mxu1 %v23703_v3  ;;  %v5444_v48 = vld [vmem:[%s28221_s0 + $0x48] sm:$0xff] }
0x13e4   : > { %22206 = vmatpush1.bf16.msra.mxu1 %v24971_v58  ;;  %v17325_v58 = vld [vmem:[%s23916_s29 + $0x220] sm:$0xff] }
0x13e5   : > { %22207 = vmatprep.subr.bf16.mxu1 %v23703_v3 }
0x13e8   : > { %22209 = vmatpush1.bf16.msra.mxu1 %v24981_v51  ;;  %v17328_v51 = vld [vmem:[%s23916_s29 + $0x238] sm:$0xf] }
0x13e9   : > { %22210 = vmatprep.subr.bf16.mxu1 %v23703_v3 }
0x13ec   : > { %22212 = vmatpush1.bf16.msra.mxu1 %v24991_v6  ;;  %v17327_v6 = vld [vmem:[%s23916_s29 + $0x230] sm:$0xf] }
0x13ed   : > { %22213 = vmatprep.subr.bf16.mxu1 %v23703_v3 }
0x13f0   : > { %22215 = vmatpush1.bf16.msra.mxu1 %v25001_v43 }
0x13f1   : > { %22216 = vmatprep.subr.bf16.mxu1 %v23703_v3 }
0x13f4   : > { %22218 = vmatpush1.bf16.msra.mxu1 %v25011_v49 }
0x13f5   : > { %22219 = vmatprep.subr.bf16.mxu1 %v23703_v3 }
0x13f8   : > { %22221 = vmatpush1.bf16.msra.mxu1 %v25021_v27 }
0x13f9   : > { %22222 = vmatprep.subr.bf16.mxu1 %v23703_v3 }
0x13fc   : > { %22224 = vmatpush1.bf16.msra.mxu1 %v25031_v13 }
0x13ff   : > { %4964 = vmatmul.mubr.f32.vlgmr.msra.gmra.mrb[86].mxu1 %v17323_v31  ;;  %v25501_v31 = vpack.c.bf16 %v5444_v48, %v5443_v0  ;;  %v17360_v48 = vld [vmem:[%s23916_s29 + $0x278] sm:$0xff] }
0x1400   : > { %17330 = vmatprep.mubr.msk.f32.mxu1 %vm795_vm0, %v17326_v54  ;;  %v5445_v54 = vld [vmem:[%s28221_s0 + $0x50] sm:$0xff] }
0x1403   : > { %4969 = vmatmul.mubr.f32.gmra.mrb[88].mxu1 %v17325_v58  ;;  %v5446_v58 = vld [vmem:[%s28221_s0 + $0x58] sm:$0xff] }
0x1404   : > { %17331 = vmatprep.mubr.msk.f32.mxu1 %vm795_vm0, %v17328_v51  ;;  %v25511_v51 = vpack.c.bf16 %v5446_v58, %v5445_v54  ;;  %v17359_v54 = vld [vmem:[%s23916_s29 + $0x270] sm:$0xff]  ;;  %v17362_v58 = vld [vmem:[%s23916_s29 + $0x288] sm:$0xff] }
0x1407   : > { %4974 = vmatmul.mubr.f32.gmra.mrb[90].mxu1 %v17327_v6  ;;  %v5447_v6 = vld [vmem:[%s28221_s0 + $0x60] sm:$0xff] }
0x1408   : > { %19648 = vmatprep.mubr.msk.f32.mxu1 %vm1188_vm3, %v25167_v9 }
0x14aa   : > { %v4869_v43 = vpop.f32.mrb[80].mxu1 }
0x14ab   : > { %v19597_v49 = vpop.f32.mrb[81].mxu1  ;;  %v4870_v40 = vadd.f32 %v25176_v2, %v4869_v43  ;;  %v5448_v43 = vld [vmem:[%s28221_s0 + $0x68] sm:$0xff] }
0x14ac   : > { %v25521_v49 = vpack.c.bf16 %v5448_v43, %v5447_v6  ;;  %v17361_v6 = vld [vmem:[%s23916_s29 + $0x280] sm:$0xff]  ;;  %v17364_v43 = vld [vmem:[%s23916_s29 + $0x298] sm:$0xf] }
0x14ae   : > { %v4874_v27 = vpop.f32.mrb[82].mxu1 }
0x14af   : > { %v19600_v12 = vpop.f32.mrb[83].mxu1  ;;  %v4875_v11 = vadd.f32 %v25176_v2, %v4874_v27  ;;  %v5449_v27 = vld [vmem:[%s28221_s0 + $0x70] sm:$0xff] }
0x14b0   : > { %v5450_v12 = vld [vmem:[%s28221_s0 + $0x78] sm:$0xff] }
0x14b2   : > { %v4879_v13 = vpop.f32.mrb[84].mxu1 }
0x14b3   : > { %v19603_v22 = vpop.f32.mrb[85].mxu1  ;;  %v4880_v20 = vadd.f32 %v25176_v2, %v4879_v13  ;;  %v25531_v13 = vpack.c.bf16 %v5450_v12, %v5449_v27  ;;  %v17363_v27 = vld [vmem:[%s23916_s29 + $0x290] sm:$0xf] }
0x14b4   : > { %v5451_v22 = vld [vmem:[%s28221_s0 + $0x80] sm:$0xff] }
0x14d2   : > { %v4965_v4 = vpop.f32.mrb[86].mxu1 }
0x14d3   : > { %v4966_v30 = vadd.f32 %v25109_v46, %v4965_v4  ;;  %v4967_v34 = vpop.f32.mrb[87].mxu1  ;;  %v5452_v4 = vld [vmem:[%s28221_s0 + $0x88] sm:$0xff] }
0x14d4   : > { %v5453_v34 = vld [vmem:[%s28221_s0 + $0x90] sm:$0xff] }
0x14d5   : > { %v4979_v21 = vmax.f32 %v4966_v30, 0.0  ;;  %v25541_v30 = vpack.c.bf16 %v5452_v4, %v5451_v22 }
0x14d6   : > { %v4970_v32 = vpop.f32.mrb[88].mxu1 }
0x14d7   : > { %v4971_v38 = vadd.f32 %v25109_v46, %v4970_v32  ;;  %v4972_v47 = vpop.f32.mrb[89].mxu1  ;;  %19625 = vmatmul.mubr.msk.f32.vlgmr.msra.gmra.mrb[86].mxu0 %vm905_vm2, %v4979_v21  ;;  %v5454_v21 = vld [vmem:[%s28221_s0 + $0x98] sm:$0xff] }
0x14d8   : > { %19627 = vmatprep.mubr.msk.f32.mxu0 %vm23704_vm1, %v23705_v52  ;;  %v25551_v32 = vpack.c.bf16 %v5454_v21, %v5453_v34  ;;  %v17348_v47 = vld [vmem:[%s23916_s29 + $0x258] sm:$0xff] }
0x14d9   : > { %v4980_v9 = vmax.f32 %v4971_v38, 0.0  ;;  %v17345_v38 = vld [vmem:[%s23916_s29 + $0x240] sm:$0xff] }
0x14da   : > { %v4975_v56 = vpop.f32.mrb[90].mxu1 }
0x14db   : > { %v4976_v57 = vadd.f32 %v25109_v46, %v4975_v56  ;;  %19628 = vmatmul.mubr.msk.f32.gmra.mrb[88].mxu0 %vm905_vm2, %v4980_v9  ;;  %v4977_v53 = vpop.f32.mrb[91].mxu1  ;;  %v17347_v9 = vld [vmem:[%s23916_s29 + $0x250] sm:$0xff]  ;;  %v17350_v56 = vld [vmem:[%s23916_s29 + $0x268] sm:$0xf] }
0x14dc   : > { %19630 = vmatprep.mubr.msk.f32.mxu0 %vm23704_vm1, %v23705_v52  ;;  %v5554_v53 = vld [vmem:[%s28223_s5] sm:$0xff] }
0x14dd   : > { %v4981_v8 = vmax.f32 %v4976_v57, 0.0  ;;  %v17349_v57 = vld [vmem:[%s23916_s29 + $0x260] sm:$0xf] }
0x14df   : > { %19631 = vmatmul.mubr.msk.f32.gmra.mrb[90].mxu0 %vm905_vm2, %v4981_v8  ;;  %v5555_v8 = vld [vmem:[%s28223_s5 + $0x8] sm:$0xff] }
0x14e0   : > { %19639 = vmatprep.mubr.msk.f32.mxu0 %vm1188_vm3, %v25162_v29 }
0x15aa   : > { %v5057_v42 = vpop.f32.mrb[86].mxu0 }
0x15ab   : > { %v5058_v7 = vadd.f32 %v25176_v2, %v5057_v42  ;;  %v19626_v50 = vpop.f32.mrb[87].mxu0  ;;  %v5556_v42 = vld [vmem:[%s28223_s5 + $0x10] sm:$0xff] }
0x15ad   : > { %v5071_v41 = vmax.f32 %v4870_v40, %v5058_v7  ;;  %v25574_v40 = vpack.c.bf16 %v5555_v8, %v5554_v53  ;;  %v5557_v7 = vld [vmem:[%s28223_s5 + $0x18] sm:$0xff] }
0x15ae   : > { %v5062_v46 = vpop.f32.mrb[88].mxu0  ;;  %v25580_v50 = vpack.c.bf16 %v5557_v7, %v5556_v42 }
0x15af   : > { %v5063_v55 = vadd.f32 %v25176_v2, %v5062_v46  ;;  %v19629_v36 = vpop.f32.mrb[89].mxu0  ;;  %v5559_v46 = vld [vmem:[%s28223_s5 + $0x28] sm:$0xff] }
0x15b0   : > { %v5561_v36 = vld [vmem:[%s28223_s5 + $0x38] sm:$0xff] }
0x15b1   : > { %v5072_v19 = vmax.f32 %v4875_v11, %v5063_v55  ;;  %v5560_v55 = vld [vmem:[%s28223_s5 + $0x30] sm:$0xff] }
0x15b2   : > { %v5067_v59 = vpop.f32.mrb[90].mxu0 }
0x15b3   : > { %v22240_v28 = vpack.c.bf16 %v5072_v19, %v5071_v41  ;;  %v5068_v29 = vadd.f32 %v25176_v2, %v5067_v59  ;;  %v19632_v24 = vpop.f32.mrb[91].mxu0  ;;  %v5435_v2 = vld [vmem:[%s28221_s0] sm:$0xff]  ;;  %v25604_v19 = vpack.c.bf16 %v5561_v36, %v5560_v55 }
0x15b4   : > { %v5558_v41 = vld [vmem:[%s28223_s5 + $0x20] sm:$0xff] }
0x15b5   : > { %v5073_v60 = vmax.f32 %v4880_v20, %v5068_v29  ;;  %22241 = vmatprep.subr.bf16.mxu0 %v22240_v28  ;;  %22245 = vmatprep.subr.bf16.mxu1 %v22240_v28  ;;  %v25592_v11 = vpack.c.bf16 %v5559_v46, %v5558_v41  ;;  %v5562_v59 = vld [vmem:[%s28223_s5 + $0x40] sm:$0xff]  ;;  %v5563_v20 = vld [vmem:[%s28223_s5 + $0x48] sm:$0xff] }
0x15b6   : > { %22243 = vmatpush3.bf16.msra.mxu0 %v22240_v28  ;;  %22247 = vmatpush3.bf16.msra.mxu1 %v22240_v28  ;;  %v25619_v28 = vpack.c.bf16 %v5563_v20, %v5562_v59  ;;  %v25682_v59 = vld [vmem:[%s28226_s1] sm:$0xff] }
0x15b7   : > { %19637 = vmatprep.subr.msk.mxu0 %vm1195_vm4, %v5073_v60  ;;  %19646 = vmatprep.subr.msk.mxu1 %vm1195_vm4, %v5073_v60  ;;  %v25687_v20 = vld [vmem:[%s28227_s28] sm:$0xff] }
0x15ba   : > { %19638 = vmatpush3.msk.msra.mxu0 %vm1195_vm4, %v5073_v60  ;;  %19647 = vmatpush3.msk.msra.mxu1 %vm1195_vm4, %v5073_v60 }
0x15bb   : > { %19640 = vmatmul.mubr.msk.f32.vlgmr.msra.gmra.mrb[92].mxu0 %vm1188_vm3, %v5075_v37  ;;  %19649 = vmatmul.mubr.msk.f32.vlgmr.msra.gmra.mrb[92].mxu1 %vm1188_vm3, %v5161_v62 }
0x15bc   : > { %22249 = vmatprep.subr.bf16.mxu0 %v25216_v63  ;;  %22269 = vmatprep.subr.bf16.mxu1 %v25218_v1 }
0x15bd   : > { %22251 = vmatpush3.bf16.msra.mxu0 %v25216_v63  ;;  %22271 = vmatpush3.bf16.msra.mxu1 %v25218_v1  ;;  %v5436_v63 = vld [vmem:[%s28221_s0 + $0x8] sm:$0xff] }
0x15be   : > { %22253 = vmatprep.subr.bf16.mxu0 %v25222_v33  ;;  %22273 = vmatprep.subr.bf16.mxu1 %v25224_v10 }
0x15c1   : > { %22255 = vmatpush3.bf16.msra.mxu0 %v25222_v33  ;;  %22275 = vmatpush3.bf16.msra.mxu1 %v25224_v10 }
0x15c2   : > { %22257 = vmatprep.subr.bf16.mxu0 %v25246_v26  ;;  %22277 = vmatprep.subr.bf16.mxu1 %v25248_v35 }
0x15c5   : > { %22259 = vmatpush3.bf16.msra.mxu0 %v25246_v26  ;;  %22279 = vmatpush3.bf16.msra.mxu1 %v25248_v35 }
0x15c6   : > { %22261 = vmatprep.subr.bf16.mxu0 %v25266_v15  ;;  %22281 = vmatprep.subr.bf16.mxu1 %v25268_v23 }
0x15c9   : > { %22263 = vmatpush3.bf16.msra.mxu0 %v25266_v15  ;;  %22283 = vmatpush3.bf16.msra.mxu1 %v25268_v23  ;;  %v25454_v23 = vpack.c.bf16 %v5436_v63, %v5435_v2 }
0x15ca   : > { %22265 = vmatprep.subr.bf16.mxu0 %v25282_v17  ;;  %22285 = vmatprep.subr.bf16.mxu1 %v25290_v39 }
0x15cd   : > { %22267 = vmatpush3.bf16.msra.mxu0 %v25282_v17  ;;  %22287 = vmatpush3.bf16.msra.mxu1 %v25290_v39  ;;  %v5437_v17 = vld [vmem:[%s28221_s0 + $0x10] sm:$0xff]  ;;  %v5438_v39 = vld [vmem:[%s28221_s0 + $0x18] sm:$0xff] }
0x15ce   : > { %22288 = vmatprep.subr.bf16.mxu0 %v23703_v3  ;;  %22318 = vmatprep.subr.bf16.mxu1 %v23703_v3  ;;  %v25468_v61 = vpack.c.bf16 %v5438_v39, %v5437_v17 }
0x168e   : > { %v19641_v1 = vpop.f32.mrb[92].mxu0  ;;  %v19650_v33 = vpop.f32.mrb[92].mxu1 }
0x168f   : > { %v5244_v10 = vmax.f32 %v19641_v1, %v19650_v33  ;;  %v5151_v26 = vpop.f32.mrb[93].mxu0  ;;  %v5234_v35 = vpop.f32.mrb[93].mxu1  ;;  %v25629_v33 = vld [vmem:[%s28225_s27] ss:$0 sm:$0xff] }
0x1690   : > { %v5243_v15 = vmax.f32 %v5151_v26, %v5234_v35 }
0x1692   : > { %19671 = vmatprep.mubr.msk.f32.mxu0 %vm905_vm2, %v5243_v15  ;;  %19694 = vmatprep.mubr.msk.f32.mxu1 %vm905_vm2, %v5243_v15 }
0x1693   : > { %19672 = vmatmul.mubr.msk.f32.vlgmr.msra.gmra.mrb[94].mxu0 %vm905_vm2, %v5244_v10  ;;  %19695 = vmatmul.mubr.msk.f32.vlgmr.msra.gmra.mrb[94].mxu1 %vm905_vm2, %v5244_v10 }
0x1694   : > { %22290 = vmatpush1.bf16.msra.mxu0 %v25454_v23  ;;  %17352 = vmatprep.mubr.msk.f32.mxu0 %vm795_vm0, %v17346_v44 }
0x1695   : > { %22291 = vmatprep.subr.bf16.mxu0 %v23703_v3  ;;  %19717 = vmatprep.mubr.msk.f32.mxu1 %vm23704_vm1, %v23705_v52 }
0x1696   : > { %22320 = vmatpush3.bf16.msra.mxu1 %v25574_v40 }
0x1697   : > { %22321 = vmatprep.subr.bf16.mxu1 %v23703_v3 }
0x1698   : > { %22293 = vmatpush1.bf16.msra.mxu0 %v25468_v61 }
0x1699   : > { %22294 = vmatprep.subr.bf16.mxu0 %v23703_v3 }
0x169a   : > { %22323 = vmatpush3.bf16.msra.mxu1 %v25580_v50 }
0x169b   : > { %22324 = vmatprep.subr.bf16.mxu1 %v23703_v3 }
0x169c   : > { %22296 = vmatpush1.bf16.msra.mxu0 %v25481_v16 }
0x169d   : > { %22297 = vmatprep.subr.bf16.mxu0 %v23703_v3 }
0x169e   : > { %22326 = vmatpush3.bf16.msra.mxu1 %v25592_v11 }
0x169f   : > { %22327 = vmatprep.subr.bf16.mxu1 %v23703_v3 }
0x16a0   : > { %22299 = vmatpush1.bf16.msra.mxu0 %v25491_v45 }
0x16a1   : > { %22300 = vmatprep.subr.bf16.mxu0 %v23703_v3 }
0x16a2   : > { %22329 = vmatpush3.bf16.msra.mxu1 %v25604_v19 }
0x16a3   : > { %22330 = vmatprep.subr.bf16.mxu1 %v23703_v3 }
0x16a4   : > { %22302 = vmatpush1.bf16.msra.mxu0 %v25501_v31 }
0x16a5   : > { %22303 = vmatprep.subr.bf16.mxu0 %v23703_v3 }
0x16a6   : > { %22332 = vmatpush3.bf16.msra.mxu1 %v25619_v28 }
0x16a7   : > { %22333 = vmatprep.subr.bf16.mxu1 %v23703_v3 }
0x16a8   : > { %22305 = vmatpush1.bf16.msra.mxu0 %v25511_v51 }
0x16a9   : > { %22306 = vmatprep.subr.bf16.mxu0 %v23703_v3 }
0x16ac   : > { %22308 = vmatpush1.bf16.msra.mxu0 %v25521_v49 }
0x16ad   : > { %22309 = vmatprep.subr.bf16.mxu0 %v23703_v3 }
0x16b0   : > { %22311 = vmatpush1.bf16.msra.mxu0 %v25531_v13 }
0x16b1   : > { %22312 = vmatprep.subr.bf16.mxu0 %v23703_v3 }
0x16b4   : > { %22314 = vmatpush1.bf16.msra.mxu0 %v25541_v30 }
0x16b5   : > { %22315 = vmatprep.subr.bf16.mxu0 %v23703_v3 }
0x16b8   : > { %22317 = vmatpush1.bf16.msra.mxu0 %v25551_v32 }
0x16b9   : > { %22363 = vmatprep.subr.bf16.mxu0 %v23703_v3 }
0x16bb   : > { %5536 = vmatmul.mubr.f32.vlgmr.msra.gmra.mrb[96].mxu0 %v17345_v38 }
0x16bc   : > { %17353 = vmatprep.mubr.msk.f32.mxu0 %vm795_vm0, %v17348_v47  ;;  %22365 = vmatpush3.bf16.msra.mxu0 %v25574_v40 }
0x16bd   : > { %22366 = vmatprep.subr.bf16.mxu0 %v23703_v3 }
0x16bf   : > { %5541 = vmatmul.mubr.f32.gmra.mrb[98].mxu0 %v17347_v9 }
0x16c0   : > { %17354 = vmatprep.mubr.msk.f32.mxu0 %vm795_vm0, %v17350_v56  ;;  %22368 = vmatpush3.bf16.msra.mxu0 %v25580_v50 }
0x16c1   : > { %22369 = vmatprep.subr.bf16.mxu0 %v23703_v3 }
0x16c3   : > { %5546 = vmatmul.mubr.f32.gmra.mrb[100].mxu0 %v17349_v57 }
0x16c4   : > { %19746 = vmatprep.mubr.msk.f32.mxu0 %vm23704_vm1, %v23705_v52  ;;  %22371 = vmatpush3.bf16.msra.mxu0 %v25592_v11 }
0x16c5   : > { %22372 = vmatprep.subr.bf16.mxu0 %v23703_v3 }
0x16c8   : > { %22374 = vmatpush3.bf16.msra.mxu0 %v25604_v19 }
0x16c9   : > { %22375 = vmatprep.subr.bf16.mxu0 %v23703_v3 }
0x16cc   : > { %22377 = vmatpush3.bf16.msra.mxu0 %v25619_v28 }
0x1766   : > { %v19673_v29 = vpop.f32.mrb[94].mxu0  ;;  %v19696_v24 = vpop.f32.mrb[94].mxu1 }
0x1767   : > { %v5422_v60 = vmax.f32 %v19673_v29, %v19696_v24  ;;  %v5327_v37 = vpop.f32.mrb[95].mxu0  ;;  %v5412_v62 = vpop.f32.mrb[95].mxu1  ;;  %v25696_v29 = vld [vmem:[%s28229_s4] ss:$0 sm:$0xff] }
0x1768   : > { %v5421_v2 = vmax.f32 %v5327_v37, %v5412_v62 }
0x1769   : > { %v5424_v63 = vmax.f32 %v5422_v60, 0.0 }
0x176a   : > { %v5423_v1 = vmax.f32 %v5421_v2, 0.0 }
0x176b   : > { %5427 = vst.msk [vmem:[#allocation2 + $0x58] sm:$0x3] %vm1541_vm5, %v5424_v63 }
0x176c   : > { %5426 = vst.msk [vmem:[#allocation2 + $0x50] sm:$0xff] %vm1539_vm6, %v5423_v1 }
0x178e   : > { %v5537_v10 = vpop.f32.mrb[96].mxu0 }
0x178f   : > { %v5538_v26 = vadd.f32 %v25629_v33, %v5537_v10  ;;  %v5539_v35 = vpop.f32.mrb[97].mxu0 }
0x1791   : > { %v5551_v15 = vmax.f32 %v5538_v26, 0.0 }
0x1792   : > { %v5542_v17 = vpop.f32.mrb[98].mxu0 }
0x1793   : > { %19718 = vmatmul.mubr.msk.f32.vlgmr.msra.gmra.mrb[96].mxu1 %vm905_vm2, %v5551_v15  ;;  %v5543_v39 = vadd.f32 %v25629_v33, %v5542_v17  ;;  %v5544_v44 = vpop.f32.mrb[99].mxu0 }
0x1794   : > { %22335 = vmatpush1.bf16.msra.mxu1 %v25454_v23  ;;  %19720 = vmatprep.mubr.msk.f32.mxu1 %vm23704_vm1, %v23705_v52 }
0x1795   : > { %22336 = vmatprep.subr.bf16.mxu1 %v23703_v3  ;;  %v5552_v18 = vmax.f32 %v5543_v39, 0.0 }
0x1796   : > { %v5547_v14 = vpop.f32.mrb[100].mxu0 }
0x1797   : > { %v5548_v5 = vadd.f32 %v25629_v33, %v5547_v14  ;;  %v5549_v25 = vpop.f32.mrb[101].mxu0  ;;  %19721 = vmatmul.mubr.msk.f32.gmra.mrb[98].mxu1 %vm905_vm2, %v5552_v18  ;;  %v6022_v14 = vld [vmem:[%s28231_s25] sm:$0xff] }
0x1798   : > { %22338 = vmatpush1.bf16.msra.mxu1 %v25468_v61  ;;  %19723 = vmatprep.mubr.msk.f32.mxu1 %vm23704_vm1, %v23705_v52  ;;  %v6023_v25 = vld [vmem:[%s28231_s25 + $0x8] sm:$0xff] }
0x1799   : > { %22339 = vmatprep.subr.bf16.mxu1 %v23703_v3  ;;  %v5553_v0 = vmax.f32 %v5548_v5, 0.0 }
0x179b   : > { %19724 = vmatmul.mubr.msk.f32.gmra.mrb[100].mxu1 %vm905_vm2, %v5553_v0  ;;  %v6113_v0 = vld [vmem:[%s28233_s24] sm:$0xff] }
0x179c   : > { %22341 = vmatpush1.bf16.msra.mxu1 %v25481_v16  ;;  %17365 = vmatprep.mubr.msk.f32.mxu1 %vm795_vm0, %v17360_v48  ;;  %v6114_v48 = vld [vmem:[%s28233_s24 + $0x8] sm:$0xff] }
0x179d   : > { %22342 = vmatprep.subr.bf16.mxu1 %v23703_v3 }
0x17a0   : > { %22344 = vmatpush1.bf16.msra.mxu1 %v25491_v45 }
0x17a1   : > { %22345 = vmatprep.subr.bf16.mxu1 %v23703_v3 }
0x17a4   : > { %22347 = vmatpush1.bf16.msra.mxu1 %v25501_v31 }
0x17a5   : > { %22348 = vmatprep.subr.bf16.mxu1 %v23703_v3 }
0x17a8   : > { %22350 = vmatpush1.bf16.msra.mxu1 %v25511_v51 }
0x17a9   : > { %22351 = vmatprep.subr.bf16.mxu1 %v23703_v3 }
0x17ac   : > { %22353 = vmatpush1.bf16.msra.mxu1 %v25521_v49 }
0x17ad   : > { %22354 = vmatprep.subr.bf16.mxu1 %v23703_v3 }
0x17b0   : > { %22356 = vmatpush1.bf16.msra.mxu1 %v25531_v13 }
0x17b1   : > { %22357 = vmatprep.subr.bf16.mxu1 %v23703_v3 }
0x17b4   : > { %22359 = vmatpush1.bf16.msra.mxu1 %v25541_v30 }
0x17b5   : > { %22360 = vmatprep.subr.bf16.mxu1 %v23703_v3 }
0x17b8   : > { %22362 = vmatpush1.bf16.msra.mxu1 %v25551_v32 }
0x17bb   : > { %5741 = vmatmul.mubr.f32.vlgmr.msra.gmra.mrb[102].mxu1 %v17359_v54  ;;  %v6024_v54 = vld [vmem:[%s28231_s25 + $0x10] sm:$0xff] }
0x17bc   : > { %17366 = vmatprep.mubr.msk.f32.mxu1 %vm795_vm0, %v17362_v58  ;;  %v6025_v58 = vld [vmem:[%s28231_s25 + $0x18] sm:$0xff] }
0x17bf   : > { %5746 = vmatmul.mubr.f32.gmra.mrb[104].mxu1 %v17361_v6  ;;  %v6115_v6 = vld [vmem:[%s28233_s24 + $0x10] sm:$0xff] }
0x17c0   : > { %17367 = vmatprep.mubr.msk.f32.mxu1 %vm795_vm0, %v17364_v43  ;;  %v6116_v43 = vld [vmem:[%s28233_s24 + $0x18] sm:$0xff] }
0x17c3   : > { %5751 = vmatmul.mubr.f32.gmra.mrb[106].mxu1 %v17363_v27  ;;  %v5852_v27 = vld [vmem:[%s28226_s1 + $0x8] sm:$0x3] }
0x17c4   : > { %19770 = vmatprep.mubr.msk.f32.mxu1 %vm1188_vm3, %v25687_v20 }
0x1866   : > { %v5646_v12 = vpop.f32.mrb[96].mxu1 }
0x1867   : > { %v19719_v22 = vpop.f32.mrb[97].mxu1  ;;  %v5647_v60 = vadd.f32 %v25696_v29, %v5646_v12  ;;  %v5938_v12 = vld [vmem:[%s28227_s28 + $0x8] sm:$0x3] }
0x1868   : > { %v25736_v22 = vpack.c.bf16 %v6023_v25, %v6022_v14  ;;  %v17386_v14 = vld [vmem:[%s23916_s29 + $0x2c8] sm:$0xf] }
0x186a   : > { %v5651_v4 = vpop.f32.mrb[98].mxu1 }
0x186b   : > { %v19722_v34 = vpop.f32.mrb[99].mxu1  ;;  %v5652_v1 = vadd.f32 %v25696_v29, %v5651_v4  ;;  %v25738_v4 = vpack.c.bf16 %v6114_v48, %v6113_v0 }
0x186c   : > { %v25742_v34 = vpack.c.bf16 %v6025_v58, %v6024_v54 }
0x186e   : > { %v5656_v21 = vpop.f32.mrb[100].mxu1 }
0x186f   : > { %v19725_v38 = vpop.f32.mrb[101].mxu1  ;;  %v5657_v17 = vadd.f32 %v25696_v29, %v5656_v21  ;;  %v25744_v21 = vpack.c.bf16 %v6116_v43, %v6115_v6 }
0x1870   : > { %v6026_v38 = vld [vmem:[%s28231_s25 + $0x20] sm:$0xff] }
0x188e   : > { %v5742_v47 = vpop.f32.mrb[102].mxu1 }
0x188f   : > { %v5743_v9 = vadd.f32 %v25629_v33, %v5742_v47  ;;  %v5744_v56 = vpop.f32.mrb[103].mxu1  ;;  %v6027_v47 = vld [vmem:[%s28231_s25 + $0x28] sm:$0xff] }
0x1890   : > { %v6118_v56 = vld [vmem:[%s28233_s24 + $0x28] sm:$0xff] }
0x1891   : > { %v5756_v57 = vmax.f32 %v5743_v9, 0.0  ;;  %v6117_v9 = vld [vmem:[%s28233_s24 + $0x20] sm:$0xff] }
0x1892   : > { %v5747_v53 = vpop.f32.mrb[104].mxu1 }
0x1893   : > { %v5748_v8 = vadd.f32 %v25629_v33, %v5747_v53  ;;  %v5749_v42 = vpop.f32.mrb[105].mxu1  ;;  %19747 = vmatmul.mubr.msk.f32.vlgmr.msra.gmra.mrb[102].mxu0 %vm905_vm2, %v5756_v57  ;;  %v25766_v57 = vpack.c.bf16 %v6027_v47, %v6026_v38  ;;  %v25768_v53 = vpack.c.bf16 %v6118_v56, %v6117_v9 }
0x1894   : > { %19749 = vmatprep.mubr.msk.f32.mxu0 %vm23704_vm1, %v23705_v52  ;;  %v6029_v42 = vld [vmem:[%s28231_s25 + $0x38] sm:$0xff] }
0x1895   : > { %v5757_v7 = vmax.f32 %v5748_v8, 0.0  ;;  %v6028_v8 = vld [vmem:[%s28231_s25 + $0x30] sm:$0xff] }
0x1896   : > { %v5752_v41 = vpop.f32.mrb[106].mxu1 }
0x1897   : > { %v5753_v46 = vadd.f32 %v25629_v33, %v5752_v41  ;;  %19750 = vmatmul.mubr.msk.f32.gmra.mrb[104].mxu0 %vm905_vm2, %v5757_v7  ;;  %v5754_v55 = vpop.f32.mrb[107].mxu1  ;;  %v6119_v7 = vld [vmem:[%s28233_s24 + $0x30] sm:$0xff]  ;;  %v6120_v41 = vld [vmem:[%s28233_s24 + $0x38] sm:$0xff] }
0x1898   : > { %19752 = vmatprep.mubr.msk.f32.mxu0 %vm23704_vm1, %v23705_v52  ;;  %v25788_v55 = vpack.c.bf16 %v6120_v41, %v6119_v7 }
0x1899   : > { %v5758_v36 = vmax.f32 %v5753_v46, 0.0  ;;  %v25786_v46 = vpack.c.bf16 %v6029_v42, %v6028_v8  ;;  %v17396_v42 = vld [vmem:[%s23916_s29 + $0x2d8] sm:$0xff] }
0x189b   : > { %19753 = vmatmul.mubr.msk.f32.gmra.mrb[106].mxu0 %vm905_vm2, %v5758_v36  ;;  %v6030_v36 = vld [vmem:[%s28231_s25 + $0x40] sm:$0xff] }
0x189c   : > { %19761 = vmatprep.mubr.msk.f32.mxu0 %vm1188_vm3, %v25682_v59 }
0x1966   : > { %v5834_v24 = vpop.f32.mrb[102].mxu0 }
0x1967   : > { %v5835_v37 = vadd.f32 %v25696_v29, %v5834_v24  ;;  %v19748_v62 = vpop.f32.mrb[103].mxu0  ;;  %v6031_v24 = vld [vmem:[%s28231_s25 + $0x48] sm:$0xff] }
0x1968   : > { %v6122_v62 = vld [vmem:[%s28233_s24 + $0x48] sm:$0xff] }
0x1969   : > { %v5848_v2 = vmax.f32 %v5647_v60, %v5835_v37  ;;  %v25802_v60 = vpack.c.bf16 %v6031_v24, %v6030_v36  ;;  %v6121_v37 = vld [vmem:[%s28233_s24 + $0x40] sm:$0xff] }
0x196a   : > { %v5839_v63 = vpop.f32.mrb[104].mxu0 }
0x196b   : > { %v5840_v10 = vadd.f32 %v25696_v29, %v5839_v63  ;;  %v19751_v26 = vpop.f32.mrb[105].mxu0 }
0x196d   : > { %v5849_v35 = vmax.f32 %v5652_v1, %v5840_v10 }
0x196e   : > { %v5844_v15 = vpop.f32.mrb[106].mxu0 }
0x196f   : > { %v22378_v39 = vpack.c.bf16 %v5849_v35, %v5848_v2  ;;  %v5845_v44 = vadd.f32 %v25696_v29, %v5844_v15  ;;  %v19754_v18 = vpop.f32.mrb[107].mxu0  ;;  %v25810_v2 = vpack.c.bf16 %v6122_v62, %v6121_v37 }
0x1970   : > { %v17383_v18 = vld [vmem:[%s23916_s29 + $0x2b0] sm:$0xff] }
0x1971   : > { %v5850_v5 = vmax.f32 %v5657_v17, %v5845_v44  ;;  %22379 = vmatprep.subr.bf16.mxu0 %v22378_v39  ;;  %22383 = vmatprep.subr.bf16.mxu1 %v22378_v39  ;;  %v17382_v17 = vld [vmem:[%s23916_s29 + $0x2a8] sm:$0xff]  ;;  %v17384_v44 = vld [vmem:[%s23916_s29 + $0x2b8] sm:$0xff] }
0x1972   : > { %22381 = vmatpush3.bf16.msra.mxu0 %v22378_v39  ;;  %22385 = vmatpush3.bf16.msra.mxu1 %v22378_v39  ;;  %v17381_v39 = vld [vmem:[%s23916_s29 + $0x2a0] sm:$0xff] }
0x1973   : > { %19759 = vmatprep.subr.msk.mxu0 %vm1195_vm4, %v5850_v5  ;;  %19768 = vmatprep.subr.msk.mxu1 %vm1195_vm4, %v5850_v5 }
0x1976   : > { %19760 = vmatpush3.msk.msra.mxu0 %vm1195_vm4, %v5850_v5  ;;  %19769 = vmatpush3.msk.msra.mxu1 %vm1195_vm4, %v5850_v5  ;;  %v17385_v5 = vld [vmem:[%s23916_s29 + $0x2c0] sm:$0xf] }
0x1977   : > { %19762 = vmatmul.mubr.msk.f32.vlgmr.msra.gmra.mrb[108].mxu0 %vm1188_vm3, %v5852_v27  ;;  %19771 = vmatmul.mubr.msk.f32.vlgmr.msra.gmra.mrb[108].mxu1 %vm1188_vm3, %v5938_v12 }
0x1978   : > { %22387 = vmatprep.subr.bf16.mxu0 %v25736_v22  ;;  %22407 = vmatprep.subr.bf16.mxu1 %v25738_v4 }
0x1979   : > { %22389 = vmatpush3.bf16.msra.mxu0 %v25736_v22  ;;  %22409 = vmatpush3.bf16.msra.mxu1 %v25738_v4 }
0x197a   : > { %22391 = vmatprep.subr.bf16.mxu0 %v25742_v34  ;;  %22411 = vmatprep.subr.bf16.mxu1 %v25744_v21 }
0x197d   : > { %22393 = vmatpush3.bf16.msra.mxu0 %v25742_v34  ;;  %22413 = vmatpush3.bf16.msra.mxu1 %v25744_v21 }
0x197e   : > { %22395 = vmatprep.subr.bf16.mxu0 %v25766_v57  ;;  %22415 = vmatprep.subr.bf16.mxu1 %v25768_v53 }
0x1981   : > { %22397 = vmatpush3.bf16.msra.mxu0 %v25766_v57  ;;  %22417 = vmatpush3.bf16.msra.mxu1 %v25768_v53 }
0x1982   : > { %22399 = vmatprep.subr.bf16.mxu0 %v25786_v46  ;;  %22419 = vmatprep.subr.bf16.mxu1 %v25788_v55 }
0x1985   : > { %22401 = vmatpush3.bf16.msra.mxu0 %v25786_v46  ;;  %22421 = vmatpush3.bf16.msra.mxu1 %v25788_v55 }
0x1986   : > { %22403 = vmatprep.subr.bf16.mxu0 %v25802_v60  ;;  %22423 = vmatprep.subr.bf16.mxu1 %v25810_v2 }
0x1989   : > { %22405 = vmatpush3.bf16.msra.mxu0 %v25802_v60  ;;  %22425 = vmatpush3.bf16.msra.mxu1 %v25810_v2 }
0x198a   : > { %22426 = vmatprep.subr.bf16.mxu0 %v23703_v3  ;;  %22456 = vmatprep.subr.bf16.mxu1 %v23703_v3 }
0x1a4a   : > { %v19763_v63 = vpop.f32.mrb[108].mxu0  ;;  %v19772_v1 = vpop.f32.mrb[108].mxu1 }
0x1a4b   : > { %v6021_v10 = vmax.f32 %v19763_v63, %v19772_v1  ;;  %v5928_v26 = vpop.f32.mrb[109].mxu0  ;;  %v6011_v35 = vpop.f32.mrb[109].mxu1 }
0x1a4c   : > { %v6020_v15 = vmax.f32 %v5928_v26, %v6011_v35 }
0x1a4e   : > { %19793 = vmatprep.mubr.msk.f32.mxu0 %vm905_vm2, %v6020_v15  ;;  %19816 = vmatprep.mubr.msk.f32.mxu1 %vm905_vm2, %v6020_v15 }
0x1a4f   : > { %19794 = vmatmul.mubr.msk.f32.vlgmr.msra.gmra.mrb[110].mxu0 %vm905_vm2, %v6021_v10  ;;  %19817 = vmatmul.mubr.msk.f32.vlgmr.msra.gmra.mrb[110].mxu1 %vm905_vm2, %v6021_v10 }
0x1a50   : > { %22428 = vmatpush1.bf16.msra.mxu0 %v25454_v23  ;;  %17388 = vmatprep.mubr.msk.f32.mxu0 %vm795_vm0, %v17382_v17 }
0x1a51   : > { %22429 = vmatprep.subr.bf16.mxu0 %v23703_v3  ;;  %22458 = vmatpush3.bf16.msra.mxu1 %v25574_v40 }
0x1a52   : > { %22459 = vmatprep.subr.bf16.mxu1 %v23703_v3  ;;  %19839 = vmatprep.mubr.msk.f32.mxu1 %vm23704_vm1, %v23705_v52 }
0x1a54   : > { %22431 = vmatpush1.bf16.msra.mxu0 %v25468_v61 }
0x1a55   : > { %22432 = vmatprep.subr.bf16.mxu0 %v23703_v3  ;;  %22461 = vmatpush3.bf16.msra.mxu1 %v25580_v50 }
0x1a56   : > { %22462 = vmatprep.subr.bf16.mxu1 %v23703_v3 }
0x1a58   : > { %22434 = vmatpush1.bf16.msra.mxu0 %v25481_v16 }
0x1a59   : > { %22435 = vmatprep.subr.bf16.mxu0 %v23703_v3  ;;  %22464 = vmatpush3.bf16.msra.mxu1 %v25592_v11 }
0x1a5a   : > { %22465 = vmatprep.subr.bf16.mxu1 %v23703_v3 }
0x1a5c   : > { %22437 = vmatpush1.bf16.msra.mxu0 %v25491_v45 }
0x1a5d   : > { %22438 = vmatprep.subr.bf16.mxu0 %v23703_v3  ;;  %22467 = vmatpush3.bf16.msra.mxu1 %v25604_v19 }
0x1a5e   : > { %22468 = vmatprep.subr.bf16.mxu1 %v23703_v3 }
0x1a60   : > { %22440 = vmatpush1.bf16.msra.mxu0 %v25501_v31 }
0x1a61   : > { %22441 = vmatprep.subr.bf16.mxu0 %v23703_v3  ;;  %22470 = vmatpush3.bf16.msra.mxu1 %v25619_v28 }
0x1a62   : > { %22471 = vmatprep.subr.bf16.mxu1 %v23703_v3 }
0x1a64   : > { %22443 = vmatpush1.bf16.msra.mxu0 %v25511_v51 }
0x1a65   : > { %22444 = vmatprep.subr.bf16.mxu0 %v23703_v3 }
0x1a68   : > { %22446 = vmatpush1.bf16.msra.mxu0 %v25521_v49 }
0x1a69   : > { %22447 = vmatprep.subr.bf16.mxu0 %v23703_v3 }
0x1a6c   : > { %22449 = vmatpush1.bf16.msra.mxu0 %v25531_v13 }
0x1a6d   : > { %22450 = vmatprep.subr.bf16.mxu0 %v23703_v3 }
0x1a70   : > { %22452 = vmatpush1.bf16.msra.mxu0 %v25541_v30 }
0x1a71   : > { %22453 = vmatprep.subr.bf16.mxu0 %v23703_v3 }
0x1a74   : > { %22455 = vmatpush1.bf16.msra.mxu0 %v25551_v32 }
0x1a75   : > { %22501 = vmatprep.subr.bf16.mxu0 %v23703_v3 }
0x1a77   : > { %6313 = vmatmul.mubr.f32.vlgmr.msra.gmra.mrb[112].mxu0 %v17381_v39 }
0x1a78   : > { %17389 = vmatprep.mubr.msk.f32.mxu0 %vm795_vm0, %v17384_v44  ;;  %22503 = vmatpush3.bf16.msra.mxu0 %v25574_v40 }
0x1a79   : > { %22504 = vmatprep.subr.bf16.mxu0 %v23703_v3 }
0x1a7b   : > { %6318 = vmatmul.mubr.f32.gmra.mrb[114].mxu0 %v17383_v18 }
0x1a7c   : > { %17390 = vmatprep.mubr.msk.f32.mxu0 %vm795_vm0, %v17386_v14  ;;  %22506 = vmatpush3.bf16.msra.mxu0 %v25580_v50 }
0x1a7d   : > { %22507 = vmatprep.subr.bf16.mxu0 %v23703_v3 }
0x1a7f   : > { %6323 = vmatmul.mubr.f32.gmra.mrb[116].mxu0 %v17385_v5 }
0x1a80   : > { %22509 = vmatpush3.bf16.msra.mxu0 %v25592_v11  ;;  %19868 = vmatprep.mubr.msk.f32.mxu0 %vm23704_vm1, %v23705_v52 }
0x1a81   : > { %22510 = vmatprep.subr.bf16.mxu0 %v23703_v3 }
0x1a84   : > { %22512 = vmatpush3.bf16.msra.mxu0 %v25604_v19 }
0x1a85   : > { %22513 = vmatprep.subr.bf16.mxu0 %v23703_v3 }
0x1a88   : > { %22515 = vmatpush3.bf16.msra.mxu0 %v25619_v28 }
0x1b22   : > { %v19795_v40 = vpop.f32.mrb[110].mxu0  ;;  %v19818_v25 = vpop.f32.mrb[110].mxu1 }
0x1b23   : > { %v6199_v0 = vmax.f32 %v19795_v40, %v19818_v25  ;;  %v6104_v50 = vpop.f32.mrb[111].mxu0  ;;  %v6189_v48 = vpop.f32.mrb[111].mxu1 }
0x1b24   : > { %v6198_v54 = vmax.f32 %v6104_v50, %v6189_v48 }
0x1b25   : > { %v6201_v58 = vmax.f32 %v6199_v0, 0.0 }
0x1b26   : > { %v6200_v6 = vmax.f32 %v6198_v54, 0.0 }
0x1b27   : > { %6204 = vst.msk [vmem:[#allocation2 + $0x68] sm:$0x3] %vm1541_vm5, %v6201_v58 }
0x1b28   : > { %6203 = vst.msk [vmem:[#allocation2 + $0x60] sm:$0xff] %vm1539_vm6, %v6200_v6 }
0x1b4a   : > { %v6314_v11 = vpop.f32.mrb[112].mxu0 }
0x1b4b   : > { %v6315_v43 = vadd.f32 %v25629_v33, %v6314_v11  ;;  %v6316_v19 = vpop.f32.mrb[113].mxu0 }
0x1b4c   : > { %v6715_v19 = vld [vmem:[%s28227_s28 + $0x8] sm:$0x3] }
0x1b4d   : > { %v6328_v27 = vmax.f32 %v6315_v43, 0.0  ;;  %v6629_v43 = vld [vmem:[%s28226_s1 + $0x8] sm:$0x3] }
0x1b4e   : > { %v6319_v12 = vpop.f32.mrb[114].mxu0 }
0x1b4f   : > { %19840 = vmatmul.mubr.msk.f32.vlgmr.msra.gmra.mrb[112].mxu1 %vm905_vm2, %v6328_v27  ;;  %v6320_v28 = vadd.f32 %v25629_v33, %v6319_v12  ;;  %v6321_v38 = vpop.f32.mrb[115].mxu0  ;;  %v17418_v27 = vld [vmem:[%s23916_s29 + $0x308] sm:$0xff] }
0x1b50   : > { %22473 = vmatpush1.bf16.msra.mxu1 %v25454_v23  ;;  %19842 = vmatprep.mubr.msk.f32.mxu1 %vm23704_vm1, %v23705_v52  ;;  %v6994_v38 = vld [vmem:[%s28221_s0 + $0x28] sm:$0xff] }
0x1b51   : > { %22474 = vmatprep.subr.bf16.mxu1 %v23703_v3  ;;  %v6329_v47 = vmax.f32 %v6320_v28, 0.0  ;;  %v6993_v28 = vld [vmem:[%s28221_s0 + $0x20] sm:$0xff] }
0x1b52   : > { %v6324_v9 = vpop.f32.mrb[116].mxu0 }
0x1b53   : > { %v6325_v56 = vadd.f32 %v25629_v33, %v6324_v9  ;;  %v6326_v8 = vpop.f32.mrb[117].mxu0  ;;  %19843 = vmatmul.mubr.msk.f32.gmra.mrb[114].mxu1 %vm905_vm2, %v6329_v47  ;;  %v26001_v47 = vpack.c.bf16 %v6994_v38, %v6993_v28  ;;  %v6995_v9 = vld [vmem:[%s28221_s0 + $0x30] sm:$0xff] }
0x1b54   : > { %22476 = vmatpush1.bf16.msra.mxu1 %v25468_v61  ;;  %19845 = vmatprep.mubr.msk.f32.mxu1 %vm23704_vm1, %v23705_v52  ;;  %v17395_v61 = vld [vmem:[%s23916_s29 + $0x2d0] sm:$0xff] }
0x1b55   : > { %22477 = vmatprep.subr.bf16.mxu1 %v23703_v3  ;;  %v6330_v23 = vmax.f32 %v6325_v56, 0.0  ;;  %v6996_v56 = vld [vmem:[%s28221_s0 + $0x38] sm:$0xff] }
0x1b56   : > { %v26011_v8 = vpack.c.bf16 %v6996_v56, %v6995_v9 }
0x1b57   : > { %19846 = vmatmul.mubr.msk.f32.gmra.mrb[116].mxu1 %vm905_vm2, %v6330_v23  ;;  %v6997_v23 = vld [vmem:[%s28221_s0 + $0x40] sm:$0xff] }
0x1b58   : > { %22479 = vmatpush1.bf16.msra.mxu1 %v25481_v16  ;;  %17401 = vmatprep.mubr.msk.f32.mxu1 %vm795_vm0, %v17396_v42  ;;  %v17398_v16 = vld [vmem:[%s23916_s29 + $0x2e8] sm:$0xff] }
0x1b59   : > { %22480 = vmatprep.subr.bf16.mxu1 %v23703_v3  ;;  %v6998_v42 = vld [vmem:[%s28221_s0 + $0x48] sm:$0xff] }
0x1b5c   : > { %22482 = vmatpush1.bf16.msra.mxu1 %v25491_v45  ;;  %v17397_v45 = vld [vmem:[%s23916_s29 + $0x2e0] sm:$0xff] }
0x1b5d   : > { %22483 = vmatprep.subr.bf16.mxu1 %v23703_v3 }
0x1b60   : > { %22485 = vmatpush1.bf16.msra.mxu1 %v25501_v31  ;;  %v17400_v31 = vld [vmem:[%s23916_s29 + $0x2f8] sm:$0xf] }
0x1b61   : > { %22486 = vmatprep.subr.bf16.mxu1 %v23703_v3 }
0x1b64   : > { %22488 = vmatpush1.bf16.msra.mxu1 %v25511_v51  ;;  %v17399_v51 = vld [vmem:[%s23916_s29 + $0x2f0] sm:$0xf] }
0x1b65   : > { %22489 = vmatprep.subr.bf16.mxu1 %v23703_v3 }
0x1b68   : > { %22491 = vmatpush1.bf16.msra.mxu1 %v25521_v49 }
0x1b69   : > { %22492 = vmatprep.subr.bf16.mxu1 %v23703_v3 }
0x1b6c   : > { %22494 = vmatpush1.bf16.msra.mxu1 %v25531_v13 }
0x1b6d   : > { %22495 = vmatprep.subr.bf16.mxu1 %v23703_v3 }
0x1b70   : > { %22497 = vmatpush1.bf16.msra.mxu1 %v25541_v30 }
0x1b71   : > { %22498 = vmatprep.subr.bf16.mxu1 %v23703_v3 }
0x1b74   : > { %22500 = vmatpush1.bf16.msra.mxu1 %v25551_v32 }
0x1b77   : > { %6518 = vmatmul.mubr.f32.vlgmr.msra.gmra.mrb[118].mxu1 %v17395_v61  ;;  %v26021_v61 = vpack.c.bf16 %v6998_v42, %v6997_v23  ;;  %v17432_v42 = vld [vmem:[%s23916_s29 + $0x338] sm:$0xff] }
0x1b78   : > { %17402 = vmatprep.mubr.msk.f32.mxu1 %vm795_vm0, %v17398_v16  ;;  %v6999_v16 = vld [vmem:[%s28221_s0 + $0x50] sm:$0xff] }
0x1b7b   : > { %6523 = vmatmul.mubr.f32.gmra.mrb[120].mxu1 %v17397_v45  ;;  %v7000_v45 = vld [vmem:[%s28221_s0 + $0x58] sm:$0xff] }
0x1b7c   : > { %17403 = vmatprep.mubr.msk.f32.mxu1 %vm795_vm0, %v17400_v31  ;;  %v26031_v31 = vpack.c.bf16 %v7000_v45, %v6999_v16  ;;  %v17431_v16 = vld [vmem:[%s23916_s29 + $0x330] sm:$0xff]  ;;  %v17434_v45 = vld [vmem:[%s23916_s29 + $0x348] sm:$0xff] }
0x1b7f   : > { %6528 = vmatmul.mubr.f32.gmra.mrb[122].mxu1 %v17399_v51  ;;  %v7001_v51 = vld [vmem:[%s28221_s0 + $0x60] sm:$0xff] }
0x1b80   : > { %19892 = vmatprep.mubr.msk.f32.mxu1 %vm1188_vm3, %v25687_v20 }
0x1c22   : > { %v6423_v49 = vpop.f32.mrb[112].mxu1 }
0x1c23   : > { %v19841_v13 = vpop.f32.mrb[113].mxu1  ;;  %v6424_v44 = vadd.f32 %v25696_v29, %v6423_v49  ;;  %v7002_v49 = vld [vmem:[%s28221_s0 + $0x68] sm:$0xff] }
0x1c24   : > { %v26041_v13 = vpack.c.bf16 %v7002_v49, %v7001_v51  ;;  %v17433_v51 = vld [vmem:[%s23916_s29 + $0x340] sm:$0xff]  ;;  %v17436_v49 = vld [vmem:[%s23916_s29 + $0x358] sm:$0xf] }
0x1c26   : > { %v6428_v30 = vpop.f32.mrb[114].mxu1 }
0x1c27   : > { %v19844_v7 = vpop.f32.mrb[115].mxu1  ;;  %v6429_v40 = vadd.f32 %v25696_v29, %v6428_v30  ;;  %v7003_v30 = vld [vmem:[%s28221_s0 + $0x70] sm:$0xff] }
0x1c28   : > { %v7004_v7 = vld [vmem:[%s28221_s0 + $0x78] sm:$0xff] }
0x1c2a   : > { %v6433_v32 = vpop.f32.mrb[116].mxu1 }
0x1c2b   : > { %v19847_v41 = vpop.f32.mrb[117].mxu1  ;;  %v6434_v54 = vadd.f32 %v25696_v29, %v6433_v32  ;;  %v26051_v32 = vpack.c.bf16 %v7004_v7, %v7003_v30  ;;  %v17435_v30 = vld [vmem:[%s23916_s29 + $0x350] sm:$0xf] }
0x1c2c   : > { %v7005_v41 = vld [vmem:[%s28221_s0 + $0x80] sm:$0xff] }
0x1c4a   : > { %v6519_v36 = vpop.f32.mrb[118].mxu1 }
0x1c4b   : > { %v6520_v24 = vadd.f32 %v25629_v33, %v6519_v36  ;;  %v6521_v37 = vpop.f32.mrb[119].mxu1  ;;  %v7006_v36 = vld [vmem:[%s28221_s0 + $0x88] sm:$0xff] }
0x1c4c   : > { %v7007_v37 = vld [vmem:[%s28221_s0 + $0x90] sm:$0xff] }
0x1c4d   : > { %v6533_v62 = vmax.f32 %v6520_v24, 0.0  ;;  %v26061_v24 = vpack.c.bf16 %v7006_v36, %v7005_v41 }
0x1c4e   : > { %v6524_v63 = vpop.f32.mrb[120].mxu1 }
0x1c4f   : > { %v6525_v1 = vadd.f32 %v25629_v33, %v6524_v63  ;;  %v6526_v10 = vpop.f32.mrb[121].mxu1  ;;  %19869 = vmatmul.mubr.msk.f32.vlgmr.msra.gmra.mrb[118].mxu0 %vm905_vm2, %v6533_v62  ;;  %v7008_v62 = vld [vmem:[%s28221_s0 + $0x98] sm:$0xff] }
0x1c50   : > { %19871 = vmatprep.mubr.msk.f32.mxu0 %vm23704_vm1, %v23705_v52  ;;  %v26071_v63 = vpack.c.bf16 %v7008_v62, %v7007_v37  ;;  %v17420_v10 = vld [vmem:[%s23916_s29 + $0x318] sm:$0xff] }
0x1c51   : > { %v6534_v20 = vmax.f32 %v6525_v1, 0.0  ;;  %v17417_v1 = vld [vmem:[%s23916_s29 + $0x300] sm:$0xff] }
0x1c52   : > { %v6529_v26 = vpop.f32.mrb[122].mxu1 }
0x1c53   : > { %v6530_v35 = vadd.f32 %v25629_v33, %v6529_v26  ;;  %19872 = vmatmul.mubr.msk.f32.gmra.mrb[120].mxu0 %vm905_vm2, %v6534_v20  ;;  %v6531_v15 = vpop.f32.mrb[123].mxu1  ;;  %v17419_v20 = vld [vmem:[%s23916_s29 + $0x310] sm:$0xff]  ;;  %v17422_v26 = vld [vmem:[%s23916_s29 + $0x328] sm:$0xf] }
0x1c54   : > { %19874 = vmatprep.mubr.msk.f32.mxu0 %vm23704_vm1, %v23705_v52  ;;  %v7108_v15 = vld [vmem:[%s28223_s5] sm:$0xff] }
0x1c55   : > { %v6535_v17 = vmax.f32 %v6530_v35, 0.0  ;;  %v17421_v35 = vld [vmem:[%s23916_s29 + $0x320] sm:$0xf] }
0x1c57   : > { %19875 = vmatmul.mubr.msk.f32.gmra.mrb[122].mxu0 %vm905_vm2, %v6535_v17  ;;  %v7109_v17 = vld [vmem:[%s28223_s5 + $0x8] sm:$0xff] }
0x1c58   : > { %19883 = vmatprep.mubr.msk.f32.mxu0 %vm1188_vm3, %v25682_v59 }
0x1d22   : > { %v6611_v39 = vpop.f32.mrb[118].mxu0 }
0x1d23   : > { %v6612_v18 = vadd.f32 %v25696_v29, %v6611_v39  ;;  %v19870_v14 = vpop.f32.mrb[119].mxu0  ;;  %v7110_v39 = vld [vmem:[%s28223_s5 + $0x10] sm:$0xff] }
0x1d25   : > { %v6625_v5 = vmax.f32 %v6424_v44, %v6612_v18  ;;  %v26094_v44 = vpack.c.bf16 %v7109_v17, %v7108_v15  ;;  %v7111_v18 = vld [vmem:[%s28223_s5 + $0x18] sm:$0xff] }
0x1d26   : > { %v6616_v33 = vpop.f32.mrb[120].mxu0  ;;  %v26100_v14 = vpack.c.bf16 %v7111_v18, %v7110_v39 }
0x1d27   : > { %v6617_v25 = vadd.f32 %v25696_v29, %v6616_v33  ;;  %v19873_v0 = vpop.f32.mrb[121].mxu0  ;;  %v7113_v33 = vld [vmem:[%s28223_s5 + $0x28] sm:$0xff] }
0x1d28   : > { %v7115_v0 = vld [vmem:[%s28223_s5 + $0x38] sm:$0xff] }
0x1d29   : > { %v6626_v50 = vmax.f32 %v6429_v40, %v6617_v25  ;;  %v7114_v25 = vld [vmem:[%s28223_s5 + $0x30] sm:$0xff] }
0x1d2a   : > { %v6621_v48 = vpop.f32.mrb[122].mxu0 }
0x1d2b   : > { %v22516_v58 = vpack.c.bf16 %v6626_v50, %v6625_v5  ;;  %v6622_v59 = vadd.f32 %v25696_v29, %v6621_v48  ;;  %v19876_v6 = vpop.f32.mrb[123].mxu0  ;;  %v6989_v29 = vld [vmem:[%s28221_s0] sm:$0xff]  ;;  %v26124_v50 = vpack.c.bf16 %v7115_v0, %v7114_v25 }
0x1d2c   : > { %v7112_v5 = vld [vmem:[%s28223_s5 + $0x20] sm:$0xff] }
0x1d2d   : > { %v6627_v11 = vmax.f32 %v6434_v54, %v6622_v59  ;;  %22517 = vmatprep.subr.bf16.mxu0 %v22516_v58  ;;  %22521 = vmatprep.subr.bf16.mxu1 %v22516_v58  ;;  %v26112_v40 = vpack.c.bf16 %v7113_v33, %v7112_v5  ;;  %v7116_v48 = vld [vmem:[%s28223_s5 + $0x40] sm:$0xff]  ;;  %v7117_v54 = vld [vmem:[%s28223_s5 + $0x48] sm:$0xff] }
0x1d2e   : > { %22519 = vmatpush3.bf16.msra.mxu0 %v22516_v58  ;;  %22523 = vmatpush3.bf16.msra.mxu1 %v22516_v58  ;;  %v26139_v58 = vpack.c.bf16 %v7117_v54, %v7116_v48  ;;  %v26202_v48 = vld [vmem:[%s28226_s1] sm:$0xff] }
0x1d2f   : > { %19881 = vmatprep.subr.msk.mxu0 %vm1195_vm4, %v6627_v11  ;;  %19890 = vmatprep.subr.msk.mxu1 %vm1195_vm4, %v6627_v11  ;;  %v26207_v54 = vld [vmem:[%s28227_s28] sm:$0xff] }
0x1d32   : > { %19882 = vmatpush3.msk.msra.mxu0 %vm1195_vm4, %v6627_v11  ;;  %19891 = vmatpush3.msk.msra.mxu1 %vm1195_vm4, %v6627_v11 }
0x1d33   : > { %19884 = vmatmul.mubr.msk.f32.vlgmr.msra.gmra.mrb[124].mxu0 %vm1188_vm3, %v6629_v43  ;;  %19893 = vmatmul.mubr.msk.f32.vlgmr.msra.gmra.mrb[124].mxu1 %vm1188_vm3, %v6715_v19 }
0x1d34   : > { %22525 = vmatprep.subr.bf16.mxu0 %v25736_v22  ;;  %22545 = vmatprep.subr.bf16.mxu1 %v25738_v4 }
0x1d35   : > { %22527 = vmatpush3.bf16.msra.mxu0 %v25736_v22  ;;  %22547 = vmatpush3.bf16.msra.mxu1 %v25738_v4  ;;  %v6990_v22 = vld [vmem:[%s28221_s0 + $0x8] sm:$0xff] }
0x1d36   : > { %22529 = vmatprep.subr.bf16.mxu0 %v25742_v34  ;;  %22549 = vmatprep.subr.bf16.mxu1 %v25744_v21 }
0x1d39   : > { %22531 = vmatpush3.bf16.msra.mxu0 %v25742_v34  ;;  %22551 = vmatpush3.bf16.msra.mxu1 %v25744_v21 }
0x1d3a   : > { %22533 = vmatprep.subr.bf16.mxu0 %v25766_v57  ;;  %22553 = vmatprep.subr.bf16.mxu1 %v25768_v53 }
0x1d3d   : > { %22535 = vmatpush3.bf16.msra.mxu0 %v25766_v57  ;;  %22555 = vmatpush3.bf16.msra.mxu1 %v25768_v53 }
0x1d3e   : > { %22537 = vmatprep.subr.bf16.mxu0 %v25786_v46  ;;  %22557 = vmatprep.subr.bf16.mxu1 %v25788_v55 }
0x1d41   : > { %22539 = vmatpush3.bf16.msra.mxu0 %v25786_v46  ;;  %22559 = vmatpush3.bf16.msra.mxu1 %v25788_v55  ;;  %v25974_v55 = vpack.c.bf16 %v6990_v22, %v6989_v29 }
0x1d42   : > { %22541 = vmatprep.subr.bf16.mxu0 %v25802_v60  ;;  %22561 = vmatprep.subr.bf16.mxu1 %v25810_v2 }
0x1d45   : > { %22543 = vmatpush3.bf16.msra.mxu0 %v25802_v60  ;;  %22563 = vmatpush3.bf16.msra.mxu1 %v25810_v2  ;;  %v6991_v60 = vld [vmem:[%s28221_s0 + $0x10] sm:$0xff]  ;;  %v6992_v2 = vld [vmem:[%s28221_s0 + $0x18] sm:$0xff]  ;;  %s17780_s0 = sshll.u32 %s28241_s22, 4 }
0x1d46   : > { %22564 = vmatprep.subr.bf16.mxu0 %v23703_v3  ;;  %22594 = vmatprep.subr.bf16.mxu1 %v23703_v3  ;;  %v25988_v12 = vpack.c.bf16 %v6992_v2, %v6991_v60 }
0x1e06   : > { %v19885_v4 = vpop.f32.mrb[124].mxu0  ;;  %v19894_v34 = vpop.f32.mrb[124].mxu1 }
0x1e07   : > { %v6798_v21 = vmax.f32 %v19885_v4, %v19894_v34  ;;  %v6705_v57 = vpop.f32.mrb[125].mxu0  ;;  %v6788_v53 = vpop.f32.mrb[125].mxu1  ;;  %v26149_v34 = vld [vmem:[%s28225_s27] ss:$0 sm:$0xff] }
0x1e08   : > { %v6797_v46 = vmax.f32 %v6705_v57, %v6788_v53 }
0x1e0a   : > { %19915 = vmatprep.mubr.msk.f32.mxu0 %vm905_vm2, %v6797_v46  ;;  %19938 = vmatprep.mubr.msk.f32.mxu1 %vm905_vm2, %v6797_v46 }
0x1e0b   : > { %19916 = vmatmul.mubr.msk.f32.vlgmr.msra.gmra.mrb[126].mxu0 %vm905_vm2, %v6798_v21  ;;  %19939 = vmatmul.mubr.msk.f32.vlgmr.msra.gmra.mrb[126].mxu1 %vm905_vm2, %v6798_v21 }
0x1e0c   : > { %22566 = vmatpush1.bf16.msra.mxu0 %v25974_v55  ;;  %17424 = vmatprep.mubr.msk.f32.mxu0 %vm795_vm0, %v17418_v27 }
0x1e0d   : > { %22567 = vmatprep.subr.bf16.mxu0 %v23703_v3  ;;  %19961 = vmatprep.mubr.msk.f32.mxu1 %vm23704_vm1, %v23705_v52 }
0x1e0e   : > { %22596 = vmatpush3.bf16.msra.mxu1 %v26094_v44 }
0x1e0f   : > { %22597 = vmatprep.subr.bf16.mxu1 %v23703_v3 }
0x1e10   : > { %22569 = vmatpush1.bf16.msra.mxu0 %v25988_v12 }
0x1e11   : > { %22570 = vmatprep.subr.bf16.mxu0 %v23703_v3 }
0x1e12   : > { %22599 = vmatpush3.bf16.msra.mxu1 %v26100_v14 }
0x1e13   : > { %22600 = vmatprep.subr.bf16.mxu1 %v23703_v3 }
0x1e14   : > { %22572 = vmatpush1.bf16.msra.mxu0 %v26001_v47 }
0x1e15   : > { %22573 = vmatprep.subr.bf16.mxu0 %v23703_v3 }
0x1e16   : > { %22602 = vmatpush3.bf16.msra.mxu1 %v26112_v40 }
0x1e17   : > { %22603 = vmatprep.subr.bf16.mxu1 %v23703_v3 }
0x1e18   : > { %22575 = vmatpush1.bf16.msra.mxu0 %v26011_v8 }
0x1e19   : > { %22576 = vmatprep.subr.bf16.mxu0 %v23703_v3 }
0x1e1a   : > { %22605 = vmatpush3.bf16.msra.mxu1 %v26124_v50 }
0x1e1b   : > { %22606 = vmatprep.subr.bf16.mxu1 %v23703_v3 }
0x1e1c   : > { %22578 = vmatpush1.bf16.msra.mxu0 %v26021_v61 }
0x1e1d   : > { %22579 = vmatprep.subr.bf16.mxu0 %v23703_v3 }
0x1e1e   : > { %22608 = vmatpush3.bf16.msra.mxu1 %v26139_v58 }
0x1e1f   : > { %22609 = vmatprep.subr.bf16.mxu1 %v23703_v3 }
0x1e20   : > { %22581 = vmatpush1.bf16.msra.mxu0 %v26031_v31 }
0x1e21   : > { %22582 = vmatprep.subr.bf16.mxu0 %v23703_v3 }
0x1e24   : > { %22584 = vmatpush1.bf16.msra.mxu0 %v26041_v13 }
0x1e25   : > { %22585 = vmatprep.subr.bf16.mxu0 %v23703_v3 }
0x1e28   : > { %22587 = vmatpush1.bf16.msra.mxu0 %v26051_v32 }
0x1e29   : > { %22588 = vmatprep.subr.bf16.mxu0 %v23703_v3 }
0x1e2c   : > { %22590 = vmatpush1.bf16.msra.mxu0 %v26061_v24 }
0x1e2d   : > { %22591 = vmatprep.subr.bf16.mxu0 %v23703_v3 }
0x1e30   : > { %22593 = vmatpush1.bf16.msra.mxu0 %v26071_v63 }
0x1e31   : > { %22639 = vmatprep.subr.bf16.mxu0 %v23703_v3 }
0x1e33   : > { %7090 = vmatmul.mubr.f32.vlgmr.msra.gmra.mrb[128].mxu0 %v17417_v1 }
0x1e34   : > { %17425 = vmatprep.mubr.msk.f32.mxu0 %vm795_vm0, %v17420_v10  ;;  %22641 = vmatpush3.bf16.msra.mxu0 %v26094_v44 }
0x1e35   : > { %22642 = vmatprep.subr.bf16.mxu0 %v23703_v3 }
0x1e37   : > { %7095 = vmatmul.mubr.f32.gmra.mrb[130].mxu0 %v17419_v20 }
0x1e38   : > { %17426 = vmatprep.mubr.msk.f32.mxu0 %vm795_vm0, %v17422_v26  ;;  %22644 = vmatpush3.bf16.msra.mxu0 %v26100_v14 }
0x1e39   : > { %22645 = vmatprep.subr.bf16.mxu0 %v23703_v3 }
0x1e3b   : > { %7100 = vmatmul.mubr.f32.gmra.mrb[132].mxu0 %v17421_v35 }
0x1e3c   : > { %19990 = vmatprep.mubr.msk.f32.mxu0 %vm23704_vm1, %v23705_v52  ;;  %22647 = vmatpush3.bf16.msra.mxu0 %v26112_v40 }
0x1e3d   : > { %22648 = vmatprep.subr.bf16.mxu0 %v23703_v3 }
0x1e40   : > { %22650 = vmatpush3.bf16.msra.mxu0 %v26124_v50 }
0x1e41   : > { %22651 = vmatprep.subr.bf16.mxu0 %v23703_v3 }
0x1e44   : > { %22653 = vmatpush3.bf16.msra.mxu0 %v26139_v58 }
0x1ede   : > { %v19917_v59 = vpop.f32.mrb[126].mxu0  ;;  %v19940_v6 = vpop.f32.mrb[126].mxu1 }
0x1edf   : > { %v6976_v11 = vmax.f32 %v19917_v59, %v19940_v6  ;;  %v6881_v43 = vpop.f32.mrb[127].mxu0  ;;  %v6966_v19 = vpop.f32.mrb[127].mxu1  ;;  %v26216_v59 = vld [vmem:[%s28229_s4] ss:$0 sm:$0xff] }
0x1ee0   : > { %v6975_v29 = vmax.f32 %v6881_v43, %v6966_v19 }
0x1ee1   : > { %v6978_v22 = vmax.f32 %v6976_v11, 0.0 }
0x1ee2   : > { %v6977_v4 = vmax.f32 %v6975_v29, 0.0 }
0x1ee3   : > { %6981 = vst.msk [vmem:[#allocation2 + $0x78] sm:$0x3] %vm1541_vm5, %v6978_v22 }
0x1ee4   : > { %6980 = vst.msk [vmem:[#allocation2 + $0x70] sm:$0xff] %vm1539_vm6, %v6977_v4 }
0x1f06   : > { %v7091_v21 = vpop.f32.mrb[128].mxu0 }
0x1f07   : > { %v7092_v57 = vadd.f32 %v26149_v34, %v7091_v21  ;;  %v7093_v53 = vpop.f32.mrb[129].mxu0 }
0x1f09   : > { %v7105_v46 = vmax.f32 %v7092_v57, 0.0 }
0x1f0a   : > { %v7096_v60 = vpop.f32.mrb[130].mxu0 }
0x1f0b   : > { %19962 = vmatmul.mubr.msk.f32.vlgmr.msra.gmra.mrb[128].mxu1 %vm905_vm2, %v7105_v46  ;;  %v7097_v2 = vadd.f32 %v26149_v34, %v7096_v60  ;;  %v7098_v27 = vpop.f32.mrb[131].mxu0 }
0x1f0c   : > { %22611 = vmatpush1.bf16.msra.mxu1 %v25974_v55  ;;  %19964 = vmatprep.mubr.msk.f32.mxu1 %vm23704_vm1, %v23705_v52 }
0x1f0d   : > { %22612 = vmatprep.subr.bf16.mxu1 %v23703_v3  ;;  %v7106_v28 = vmax.f32 %v7097_v2, 0.0 }
0x1f0e   : > { %v7101_v38 = vpop.f32.mrb[132].mxu0 }
0x1f0f   : > { %v7102_v9 = vadd.f32 %v26149_v34, %v7101_v38  ;;  %v7103_v56 = vpop.f32.mrb[133].mxu0  ;;  %19965 = vmatmul.mubr.msk.f32.gmra.mrb[130].mxu1 %vm905_vm2, %v7106_v28  ;;  %v7576_v38 = vld [vmem:[%s28231_s25] sm:$0xff] }
0x1f10   : > { %22614 = vmatpush1.bf16.msra.mxu1 %v25988_v12  ;;  %19967 = vmatprep.mubr.msk.f32.mxu1 %vm23704_vm1, %v23705_v52  ;;  %v7577_v56 = vld [vmem:[%s28231_s25 + $0x8] sm:$0xff] }
0x1f11   : > { %22615 = vmatprep.subr.bf16.mxu1 %v23703_v3  ;;  %v7107_v23 = vmax.f32 %v7102_v9, 0.0 }
0x1f13   : > { %19968 = vmatmul.mubr.msk.f32.gmra.mrb[132].mxu1 %vm905_vm2, %v7107_v23  ;;  %v7667_v23 = vld [vmem:[%s28233_s24] sm:$0xff] }
0x1f14   : > { %22617 = vmatpush1.bf16.msra.mxu1 %v26001_v47  ;;  %17437 = vmatprep.mubr.msk.f32.mxu1 %vm795_vm0, %v17432_v42  ;;  %v7668_v42 = vld [vmem:[%s28233_s24 + $0x8] sm:$0xff] }
0x1f15   : > { %22618 = vmatprep.subr.bf16.mxu1 %v23703_v3 }
0x1f18   : > { %22620 = vmatpush1.bf16.msra.mxu1 %v26011_v8 }
0x1f19   : > { %22621 = vmatprep.subr.bf16.mxu1 %v23703_v3 }
0x1f1c   : > { %22623 = vmatpush1.bf16.msra.mxu1 %v26021_v61 }
0x1f1d   : > { %22624 = vmatprep.subr.bf16.mxu1 %v23703_v3 }
0x1f20   : > { %22626 = vmatpush1.bf16.msra.mxu1 %v26031_v31 }
0x1f21   : > { %22627 = vmatprep.subr.bf16.mxu1 %v23703_v3 }
0x1f24   : > { %22629 = vmatpush1.bf16.msra.mxu1 %v26041_v13 }
0x1f25   : > { %22630 = vmatprep.subr.bf16.mxu1 %v23703_v3 }
0x1f28   : > { %22632 = vmatpush1.bf16.msra.mxu1 %v26051_v32 }
0x1f29   : > { %22633 = vmatprep.subr.bf16.mxu1 %v23703_v3 }
0x1f2c   : > { %22635 = vmatpush1.bf16.msra.mxu1 %v26061_v24 }
0x1f2d   : > { %22636 = vmatprep.subr.bf16.mxu1 %v23703_v3 }
0x1f30   : > { %22638 = vmatpush1.bf16.msra.mxu1 %v26071_v63 }
0x1f33   : > { %7295 = vmatmul.mubr.f32.vlgmr.msra.gmra.mrb[134].mxu1 %v17431_v16  ;;  %v7578_v16 = vld [vmem:[%s28231_s25 + $0x10] sm:$0xff] }
0x1f34   : > { %17438 = vmatprep.mubr.msk.f32.mxu1 %vm795_vm0, %v17434_v45  ;;  %v7579_v45 = vld [vmem:[%s28231_s25 + $0x18] sm:$0xff] }
0x1f37   : > { %7300 = vmatmul.mubr.f32.gmra.mrb[136].mxu1 %v17433_v51  ;;  %v7669_v51 = vld [vmem:[%s28233_s24 + $0x10] sm:$0xff] }
0x1f38   : > { %17439 = vmatprep.mubr.msk.f32.mxu1 %vm795_vm0, %v17436_v49  ;;  %v7670_v49 = vld [vmem:[%s28233_s24 + $0x18] sm:$0xff] }
0x1f3b   : > { %7305 = vmatmul.mubr.f32.gmra.mrb[138].mxu1 %v17435_v30  ;;  %v7406_v30 = vld [vmem:[%s28226_s1 + $0x8] sm:$0x3] }
0x1f3c   : > { %20014 = vmatprep.mubr.msk.f32.mxu1 %vm1188_vm3, %v26207_v54 }
0x1fde   : > { %v7200_v7 = vpop.f32.mrb[128].mxu1 }
0x1fdf   : > { %v19963_v41 = vpop.f32.mrb[129].mxu1  ;;  %v7201_v11 = vadd.f32 %v26216_v59, %v7200_v7  ;;  %v7492_v7 = vld [vmem:[%s28227_s28 + $0x8] sm:$0x3] }
0x1fe0   : > { %v26256_v41 = vpack.c.bf16 %v7577_v56, %v7576_v38  ;;  %v17458_v38 = vld [vmem:[%s23916_s29 + $0x388] sm:$0xf] }
0x1fe2   : > { %v7205_v36 = vpop.f32.mrb[130].mxu1 }
0x1fe3   : > { %v19966_v37 = vpop.f32.mrb[131].mxu1  ;;  %v7206_v4 = vadd.f32 %v26216_v59, %v7205_v36  ;;  %v26258_v36 = vpack.c.bf16 %v7668_v42, %v7667_v23 }
0x1fe4   : > { %v26262_v37 = vpack.c.bf16 %v7579_v45, %v7578_v16 }
0x1fe6   : > { %v7210_v62 = vpop.f32.mrb[132].mxu1 }
0x1fe7   : > { %v19969_v1 = vpop.f32.mrb[133].mxu1  ;;  %v7211_v60 = vadd.f32 %v26216_v59, %v7210_v62  ;;  %v26264_v62 = vpack.c.bf16 %v7670_v49, %v7669_v51 }
0x1fe8   : > { %v7580_v1 = vld [vmem:[%s28231_s25 + $0x20] sm:$0xff] }
0x2006   : > { %v7296_v10 = vpop.f32.mrb[134].mxu1 }
0x2007   : > { %v7297_v20 = vadd.f32 %v26149_v34, %v7296_v10  ;;  %v7298_v26 = vpop.f32.mrb[135].mxu1  ;;  %v7581_v10 = vld [vmem:[%s28231_s25 + $0x28] sm:$0xff] }
0x2008   : > { %v7672_v26 = vld [vmem:[%s28233_s24 + $0x28] sm:$0xff] }
0x2009   : > { %v7310_v35 = vmax.f32 %v7297_v20, 0.0  ;;  %v7671_v20 = vld [vmem:[%s28233_s24 + $0x20] sm:$0xff] }
0x200a   : > { %v7301_v15 = vpop.f32.mrb[136].mxu1 }
0x200b   : > { %v7302_v17 = vadd.f32 %v26149_v34, %v7301_v15  ;;  %v7303_v39 = vpop.f32.mrb[137].mxu1  ;;  %19991 = vmatmul.mubr.msk.f32.vlgmr.msra.gmra.mrb[134].mxu0 %vm905_vm2, %v7310_v35  ;;  %v26286_v35 = vpack.c.bf16 %v7581_v10, %v7580_v1  ;;  %v26288_v15 = vpack.c.bf16 %v7672_v26, %v7671_v20 }
0x200c   : > { %19993 = vmatprep.mubr.msk.f32.mxu0 %vm23704_vm1, %v23705_v52  ;;  %v7583_v39 = vld [vmem:[%s28231_s25 + $0x38] sm:$0xff] }
0x200d   : > { %v7311_v18 = vmax.f32 %v7302_v17, 0.0  ;;  %v7582_v17 = vld [vmem:[%s28231_s25 + $0x30] sm:$0xff] }
0x200e   : > { %v7306_v5 = vpop.f32.mrb[138].mxu1 }
0x200f   : > { %v7307_v33 = vadd.f32 %v26149_v34, %v7306_v5  ;;  %19994 = vmatmul.mubr.msk.f32.gmra.mrb[136].mxu0 %vm905_vm2, %v7311_v18  ;;  %v7308_v25 = vpop.f32.mrb[139].mxu1  ;;  %v7673_v18 = vld [vmem:[%s28233_s24 + $0x30] sm:$0xff]  ;;  %v7674_v5 = vld [vmem:[%s28233_s24 + $0x38] sm:$0xff] }
0x2010   : > { %19996 = vmatprep.mubr.msk.f32.mxu0 %vm23704_vm1, %v23705_v52  ;;  %v26308_v25 = vpack.c.bf16 %v7674_v5, %v7673_v18 }
0x2011   : > { %v7312_v0 = vmax.f32 %v7307_v33, 0.0  ;;  %v26306_v33 = vpack.c.bf16 %v7583_v39, %v7582_v17  ;;  %v17468_v39 = vld [vmem:[%s23916_s29 + $0x398] sm:$0xff] }
0x2013   : > { %19997 = vmatmul.mubr.msk.f32.gmra.mrb[138].mxu0 %vm905_vm2, %v7312_v0  ;;  %v7584_v0 = vld [vmem:[%s28231_s25 + $0x40] sm:$0xff] }
0x2014   : > { %20005 = vmatprep.mubr.msk.f32.mxu0 %vm1188_vm3, %v26202_v48 }
0x20de   : > { %v7388_v6 = vpop.f32.mrb[134].mxu0 }
0x20df   : > { %v7389_v43 = vadd.f32 %v26216_v59, %v7388_v6  ;;  %v19992_v19 = vpop.f32.mrb[135].mxu0  ;;  %v7585_v6 = vld [vmem:[%s28231_s25 + $0x48] sm:$0xff] }
0x20e0   : > { %v7676_v19 = vld [vmem:[%s28233_s24 + $0x48] sm:$0xff] }
0x20e1   : > { %v7402_v29 = vmax.f32 %v7201_v11, %v7389_v43  ;;  %v26322_v11 = vpack.c.bf16 %v7585_v6, %v7584_v0  ;;  %v7675_v43 = vld [vmem:[%s28233_s24 + $0x40] sm:$0xff] }
0x20e2   : > { %v7393_v22 = vpop.f32.mrb[136].mxu0 }
0x20e3   : > { %v7394_v21 = vadd.f32 %v26216_v59, %v7393_v22  ;;  %v19995_v57 = vpop.f32.mrb[137].mxu0 }
0x20e5   : > { %v7403_v53 = vmax.f32 %v7206_v4, %v7394_v21 }
0x20e6   : > { %v7398_v46 = vpop.f32.mrb[138].mxu0 }
0x20e7   : > { %v22654_v2 = vpack.c.bf16 %v7403_v53, %v7402_v29  ;;  %v7399_v27 = vadd.f32 %v26216_v59, %v7398_v46  ;;  %v19998_v28 = vpop.f32.mrb[139].mxu0  ;;  %v26330_v29 = vpack.c.bf16 %v7676_v19, %v7675_v43 }
0x20e8   : > { %v17455_v28 = vld [vmem:[%s23916_s29 + $0x370] sm:$0xff] }
0x20e9   : > { %v7404_v9 = vmax.f32 %v7211_v60, %v7399_v27  ;;  %22655 = vmatprep.subr.bf16.mxu0 %v22654_v2  ;;  %22659 = vmatprep.subr.bf16.mxu1 %v22654_v2  ;;  %v17454_v60 = vld [vmem:[%s23916_s29 + $0x368] sm:$0xff]  ;;  %v17456_v27 = vld [vmem:[%s23916_s29 + $0x378] sm:$0xff] }
0x20ea   : > { %22657 = vmatpush3.bf16.msra.mxu0 %v22654_v2  ;;  %22661 = vmatpush3.bf16.msra.mxu1 %v22654_v2  ;;  %v17453_v2 = vld [vmem:[%s23916_s29 + $0x360] sm:$0xff] }
0x20eb   : > { %20003 = vmatprep.subr.msk.mxu0 %vm1195_vm4, %v7404_v9  ;;  %20012 = vmatprep.subr.msk.mxu1 %vm1195_vm4, %v7404_v9 }
0x20ee   : > { %20004 = vmatpush3.msk.msra.mxu0 %vm1195_vm4, %v7404_v9  ;;  %20013 = vmatpush3.msk.msra.mxu1 %vm1195_vm4, %v7404_v9  ;;  %v17457_v9 = vld [vmem:[%s23916_s29 + $0x380] sm:$0xf] }
0x20ef   : > { %20006 = vmatmul.mubr.msk.f32.vlgmr.msra.gmra.mrb[140].mxu0 %vm1188_vm3, %v7406_v30  ;;  %20015 = vmatmul.mubr.msk.f32.vlgmr.msra.gmra.mrb[140].mxu1 %vm1188_vm3, %v7492_v7 }
0x20f0   : > { %22663 = vmatprep.subr.bf16.mxu0 %v26256_v41  ;;  %22683 = vmatprep.subr.bf16.mxu1 %v26258_v36 }
0x20f1   : > { %22665 = vmatpush3.bf16.msra.mxu0 %v26256_v41  ;;  %22685 = vmatpush3.bf16.msra.mxu1 %v26258_v36 }
0x20f2   : > { %22667 = vmatprep.subr.bf16.mxu0 %v26262_v37  ;;  %22687 = vmatprep.subr.bf16.mxu1 %v26264_v62 }
0x20f5   : > { %22669 = vmatpush3.bf16.msra.mxu0 %v26262_v37  ;;  %22689 = vmatpush3.bf16.msra.mxu1 %v26264_v62 }
0x20f6   : > { %22671 = vmatprep.subr.bf16.mxu0 %v26286_v35  ;;  %22691 = vmatprep.subr.bf16.mxu1 %v26288_v15 }
0x20f9   : > { %22673 = vmatpush3.bf16.msra.mxu0 %v26286_v35  ;;  %22693 = vmatpush3.bf16.msra.mxu1 %v26288_v15 }
0x20fa   : > { %22675 = vmatprep.subr.bf16.mxu0 %v26306_v33  ;;  %22695 = vmatprep.subr.bf16.mxu1 %v26308_v25 }
0x20fd   : > { %22677 = vmatpush3.bf16.msra.mxu0 %v26306_v33  ;;  %22697 = vmatpush3.bf16.msra.mxu1 %v26308_v25 }
0x20fe   : > { %22679 = vmatprep.subr.bf16.mxu0 %v26322_v11  ;;  %22699 = vmatprep.subr.bf16.mxu1 %v26330_v29 }
0x2101   : > { %22681 = vmatpush3.bf16.msra.mxu0 %v26322_v11  ;;  %22701 = vmatpush3.bf16.msra.mxu1 %v26330_v29 }
0x2102   : > { %22702 = vmatprep.subr.bf16.mxu0 %v23703_v3  ;;  %22732 = vmatprep.subr.bf16.mxu1 %v23703_v3 }
0x21c2   : > { %v20007_v22 = vpop.f32.mrb[140].mxu0  ;;  %v20016_v4 = vpop.f32.mrb[140].mxu1 }
0x21c3   : > { %v7575_v21 = vmax.f32 %v20007_v22, %v20016_v4  ;;  %v7482_v57 = vpop.f32.mrb[141].mxu0  ;;  %v7565_v53 = vpop.f32.mrb[141].mxu1 }
0x21c4   : > { %v7574_v46 = vmax.f32 %v7482_v57, %v7565_v53 }
0x21c6   : > { %20037 = vmatprep.mubr.msk.f32.mxu0 %vm905_vm2, %v7574_v46  ;;  %20060 = vmatprep.mubr.msk.f32.mxu1 %vm905_vm2, %v7574_v46 }
0x21c7   : > { %20038 = vmatmul.mubr.msk.f32.vlgmr.msra.gmra.mrb[142].mxu0 %vm905_vm2, %v7575_v21  ;;  %20061 = vmatmul.mubr.msk.f32.vlgmr.msra.gmra.mrb[142].mxu1 %vm905_vm2, %v7575_v21 }
0x21c8   : > { %22704 = vmatpush1.bf16.msra.mxu0 %v25974_v55  ;;  %17460 = vmatprep.mubr.msk.f32.mxu0 %vm795_vm0, %v17454_v60 }
0x21c9   : > { %22705 = vmatprep.subr.bf16.mxu0 %v23703_v3  ;;  %22734 = vmatpush3.bf16.msra.mxu1 %v26094_v44 }
0x21ca   : > { %22735 = vmatprep.subr.bf16.mxu1 %v23703_v3  ;;  %20083 = vmatprep.mubr.msk.f32.mxu1 %vm23704_vm1, %v23705_v52 }
0x21cc   : > { %22707 = vmatpush1.bf16.msra.mxu0 %v25988_v12 }
0x21cd   : > { %22708 = vmatprep.subr.bf16.mxu0 %v23703_v3  ;;  %22737 = vmatpush3.bf16.msra.mxu1 %v26100_v14 }
0x21ce   : > { %22738 = vmatprep.subr.bf16.mxu1 %v23703_v3 }
0x21d0   : > { %22710 = vmatpush1.bf16.msra.mxu0 %v26001_v47 }
0x21d1   : > { %22711 = vmatprep.subr.bf16.mxu0 %v23703_v3  ;;  %22740 = vmatpush3.bf16.msra.mxu1 %v26112_v40 }
0x21d2   : > { %22741 = vmatprep.subr.bf16.mxu1 %v23703_v3 }
0x21d4   : > { %22713 = vmatpush1.bf16.msra.mxu0 %v26011_v8 }
0x21d5   : > { %22714 = vmatprep.subr.bf16.mxu0 %v23703_v3  ;;  %22743 = vmatpush3.bf16.msra.mxu1 %v26124_v50 }
0x21d6   : > { %22744 = vmatprep.subr.bf16.mxu1 %v23703_v3 }
0x21d8   : > { %22716 = vmatpush1.bf16.msra.mxu0 %v26021_v61 }
0x21d9   : > { %22717 = vmatprep.subr.bf16.mxu0 %v23703_v3  ;;  %22746 = vmatpush3.bf16.msra.mxu1 %v26139_v58 }
0x21da   : > { %22747 = vmatprep.subr.bf16.mxu1 %v23703_v3 }
0x21dc   : > { %22719 = vmatpush1.bf16.msra.mxu0 %v26031_v31 }
0x21dd   : > { %22720 = vmatprep.subr.bf16.mxu0 %v23703_v3 }
0x21e0   : > { %22722 = vmatpush1.bf16.msra.mxu0 %v26041_v13 }
0x21e1   : > { %22723 = vmatprep.subr.bf16.mxu0 %v23703_v3 }
0x21e4   : > { %22725 = vmatpush1.bf16.msra.mxu0 %v26051_v32 }
0x21e5   : > { %22726 = vmatprep.subr.bf16.mxu0 %v23703_v3 }
0x21e8   : > { %22728 = vmatpush1.bf16.msra.mxu0 %v26061_v24 }
0x21e9   : > { %22729 = vmatprep.subr.bf16.mxu0 %v23703_v3 }
0x21ec   : > { %22731 = vmatpush1.bf16.msra.mxu0 %v26071_v63 }
0x21ed   : > { %22777 = vmatprep.subr.bf16.mxu0 %v23703_v3 }
0x21ef   : > { %7867 = vmatmul.mubr.f32.vlgmr.msra.gmra.mrb[144].mxu0 %v17453_v2 }
0x21f0   : > { %17461 = vmatprep.mubr.msk.f32.mxu0 %vm795_vm0, %v17456_v27  ;;  %22779 = vmatpush3.bf16.msra.mxu0 %v26094_v44 }
0x21f1   : > { %22780 = vmatprep.subr.bf16.mxu0 %v23703_v3 }
0x21f3   : > { %7872 = vmatmul.mubr.f32.gmra.mrb[146].mxu0 %v17455_v28 }
0x21f4   : > { %17462 = vmatprep.mubr.msk.f32.mxu0 %vm795_vm0, %v17458_v38  ;;  %22782 = vmatpush3.bf16.msra.mxu0 %v26100_v14 }
0x21f5   : > { %22783 = vmatprep.subr.bf16.mxu0 %v23703_v3 }
0x21f7   : > { %7877 = vmatmul.mubr.f32.gmra.mrb[148].mxu0 %v17457_v9 }
0x21f8   : > { %22785 = vmatpush3.bf16.msra.mxu0 %v26112_v40  ;;  %20112 = vmatprep.mubr.msk.f32.mxu0 %vm23704_vm1, %v23705_v52 }
0x21f9   : > { %22786 = vmatprep.subr.bf16.mxu0 %v23703_v3 }
0x21fc   : > { %22788 = vmatpush3.bf16.msra.mxu0 %v26124_v50 }
0x21fd   : > { %22789 = vmatprep.subr.bf16.mxu0 %v23703_v3 }
0x2200   : > { %22791 = vmatpush3.bf16.msra.mxu0 %v26139_v58 }
0x229a   : > { %v20039_v44 = vpop.f32.mrb[142].mxu0  ;;  %v20062_v56 = vpop.f32.mrb[142].mxu1 }
0x229b   : > { %v7753_v23 = vmax.f32 %v20039_v44, %v20062_v56  ;;  %v7658_v14 = vpop.f32.mrb[143].mxu0  ;;  %v7743_v42 = vpop.f32.mrb[143].mxu1 }
0x229c   : > { %v7752_v16 = vmax.f32 %v7658_v14, %v7743_v42 }
0x229d   : > { %v7755_v45 = vmax.f32 %v7753_v23, 0.0 }
0x229e   : > { %v7754_v51 = vmax.f32 %v7752_v16, 0.0 }
0x229f   : > { %7758 = vst.msk [vmem:[#allocation2 + $0x88] sm:$0x3] %vm1541_vm5, %v7755_v45 }
0x22a0   : > { %7757 = vst.msk [vmem:[#allocation2 + $0x80] sm:$0xff] %vm1539_vm6, %v7754_v51 }
0x22c2   : > { %v7868_v40 = vpop.f32.mrb[144].mxu0 }
0x22c3   : > { %v7869_v49 = vadd.f32 %v26149_v34, %v7868_v40  ;;  %v7870_v50 = vpop.f32.mrb[145].mxu0 }
0x22c4   : > { %v8269_v50 = vld [vmem:[%s28227_s28 + $0x8] sm:$0x3] }
0x22c5   : > { %v7882_v30 = vmax.f32 %v7869_v49, 0.0  ;;  %v8183_v49 = vld [vmem:[%s28226_s1 + $0x8] sm:$0x3] }
0x22c6   : > { %v7873_v7 = vpop.f32.mrb[146].mxu0 }
0x22c7   : > { %20084 = vmatmul.mubr.msk.f32.vlgmr.msra.gmra.mrb[144].mxu1 %vm905_vm2, %v7882_v30  ;;  %v7874_v58 = vadd.f32 %v26149_v34, %v7873_v7  ;;  %v7875_v1 = vpop.f32.mrb[147].mxu0  ;;  %v17491_v7 = vld [vmem:[%s28234_s23 + $0x28] sm:$0xff] }
0x22c8   : > { %22749 = vmatpush1.bf16.msra.mxu1 %v25974_v55  ;;  %20086 = vmatprep.mubr.msk.f32.mxu1 %vm23704_vm1, %v23705_v52  ;;  %v26529_v1 = vld [vmem:[%s28234_s23 + $0x20] sm:$0xff] }
0x22c9   : > { %22750 = vmatprep.subr.bf16.mxu1 %v23703_v3  ;;  %v7883_v10 = vmax.f32 %v7874_v58, 0.0  ;;  %v17492_v58 = vld [vmem:[%s28234_s23 + $0x30] sm:$0xff] }
0x22ca   : > { %v7878_v20 = vpop.f32.mrb[148].mxu0 }
0x22cb   : > { %v7879_v26 = vadd.f32 %v26149_v34, %v7878_v20  ;;  %v7880_v17 = vpop.f32.mrb[149].mxu0  ;;  %20087 = vmatmul.mubr.msk.f32.gmra.mrb[146].mxu1 %vm905_vm2, %v7883_v10  ;;  %v26531_v10 = vpack.c.bf16 %v17492_v58, %v17491_v7  ;;  %v8544_v20 = vld [vmem:[#allocation2] sm:$0xff]  ;;  %v17534_v7 = vld [vmem:[%s28234_s23 + $0x148] sm:$0xff]  ;;  %v26827_v58 = vld [vmem:[%s28234_s23 + $0x138] sm:$0xff] }
0x22cc   : > { %22752 = vmatpush1.bf16.msra.mxu1 %v25988_v12  ;;  %20089 = vmatprep.mubr.msk.f32.mxu1 %vm23704_vm1, %v23705_v52  ;;  %v17467_v12 = vld [vmem:[%s23916_s29 + $0x390] sm:$0xff]  ;;  %v17494_v17 = vld [vmem:[%s28234_s23 + $0x40] sm:$0xff] }
0x22cd   : > { %22753 = vmatprep.subr.bf16.mxu1 %v23703_v3  ;;  %v7884_v55 = vmax.f32 %v7879_v26, 0.0  ;;  %v17493_v26 = vld [vmem:[%s28234_s23 + $0x38] sm:$0xff] }
0x22cf   : > { %20090 = vmatmul.mubr.msk.f32.gmra.mrb[148].mxu1 %vm905_vm2, %v7884_v55  ;;  %v26543_v55 = vld [vmem:[#allocation2 + $0x10] sm:$0xff] }
0x22d0   : > { %22755 = vmatpush1.bf16.msra.mxu1 %v26001_v47  ;;  %17473 = vmatprep.mubr.msk.f32.mxu1 %vm795_vm0, %v17468_v39  ;;  %v17470_v47 = vld [vmem:[%s23916_s29 + $0x3a8] sm:$0xff]  ;;  %v26550_v39 = vpack.c.bf16 %v17494_v17, %v17493_v26  ;;  %v17535_v26 = vld [vmem:[%s28234_s23 + $0x150] sm:$0xff]  ;;  %v17536_v17 = vld [vmem:[%s28234_s23 + $0x158] sm:$0xff] }
0x22d1   : > { %22756 = vmatprep.subr.bf16.mxu1 %v23703_v3 }
0x22d4   : > { %22758 = vmatpush1.bf16.msra.mxu1 %v26011_v8  ;;  %v17469_v8 = vld [vmem:[%s23916_s29 + $0x3a0] sm:$0xff] }
0x22d5   : > { %22759 = vmatprep.subr.bf16.mxu1 %v23703_v3 }
0x22d8   : > { %22761 = vmatpush1.bf16.msra.mxu1 %v26021_v61  ;;  %v17472_v61 = vld [vmem:[%s23916_s29 + $0x3b8] sm:$0xf] }
0x22d9   : > { %22762 = vmatprep.subr.bf16.mxu1 %v23703_v3 }
0x22dc   : > { %22764 = vmatpush1.bf16.msra.mxu1 %v26031_v31  ;;  %v17471_v31 = vld [vmem:[%s23916_s29 + $0x3b0] sm:$0xf]  ;;  %s28243_s29 = sld [smem:[#allocation30_spill]] }
0x22dd   : > { %22765 = vmatprep.subr.bf16.mxu1 %v23703_v3 }
0x22e0   : > { %22767 = vmatpush1.bf16.msra.mxu1 %v26041_v13 }
0x22e1   : > { %22768 = vmatprep.subr.bf16.mxu1 %v23703_v3 }
0x22e2   : > { %s28244_s1 = smov %s28243_s29 }
0x22e4   : > { %22770 = vmatpush1.bf16.msra.mxu1 %v26051_v32 }
0x22e5   : > { %22771 = vmatprep.subr.bf16.mxu1 %v23703_v3 }
0x22e8   : > { %22773 = vmatpush1.bf16.msra.mxu1 %v26061_v24 }
0x22e9   : > { %22774 = vmatprep.subr.bf16.mxu1 %v23703_v3 }
0x22ec   : > { %22776 = vmatpush1.bf16.msra.mxu1 %v26071_v63 }
0x22ef   : > { %8072 = vmatmul.mubr.f32.vlgmr.msra.gmra.mrb[150].mxu1 %v17467_v12  ;;  %v17497_v12 = vld [vmem:[%s28234_s23 + $0x50] sm:$0xff] }
0x22f0   : > { %17474 = vmatprep.mubr.msk.f32.mxu1 %vm795_vm0, %v17470_v47  ;;  %v17498_v47 = vld [vmem:[%s28234_s23 + $0x58] sm:$0xff] }
0x22f3   : > { %8077 = vmatmul.mubr.f32.gmra.mrb[152].mxu1 %v17469_v8  ;;  %v26571_v8 = vld [vmem:[%s28234_s23 + $0x48] sm:$0xff] }
0x22f4   : > { %17475 = vmatprep.mubr.msk.f32.mxu1 %vm795_vm0, %v17472_v61  ;;  %v26573_v61 = vpack.c.bf16 %v17498_v47, %v17497_v12  ;;  %v26849_v12 = vpack.c.bf16 %v17536_v17, %v17535_v26  ;;  %v26864_v47 = vld [vmem:[%s28234_s23 + $0x160] sm:$0xff]  ;;  %v10154_v26 = vld [vmem:[%s28157_s14 + $0x18] sm:$0xff] }
0x22f7   : > { %8082 = vmatmul.mubr.f32.gmra.mrb[154].mxu1 %v17471_v31  ;;  %v8624_v31 = vld [vmem:[#allocation2 + $0x1] sm:$0xff] }
0x22f8   : > { %20136 = vmatprep.mubr.msk.f32.mxu1 %vm1188_vm3, %v26207_v54 }
0x239a   : > { %v7977_v13 = vpop.f32.mrb[144].mxu1 }
0x239b   : > { %v20085_v32 = vpop.f32.mrb[145].mxu1  ;;  %v7978_v27 = vadd.f32 %v26216_v59, %v7977_v13  ;;  %v17499_v13 = vld [vmem:[%s28234_s23 + $0x60] sm:$0xff] }
0x239c   : > { %v17500_v32 = vld [vmem:[%s28234_s23 + $0x68] sm:$0xff] }
0x239e   : > { %v7982_v24 = vpop.f32.mrb[146].mxu1 }
0x239f   : > { %v20088_v18 = vpop.f32.mrb[147].mxu1  ;;  %v7983_v44 = vadd.f32 %v26216_v59, %v7982_v24  ;;  %v26585_v24 = vld [vmem:[#allocation2 + $0x11] sm:$0xff] }
0x23a0   : > { %v26592_v18 = vpack.c.bf16 %v17500_v32, %v17499_v13 }
0x23a2   : > { %v7987_v63 = vpop.f32.mrb[148].mxu1 }
0x23a3   : > { %v20091_v5 = vpop.f32.mrb[149].mxu1  ;;  %v7988_v16 = vadd.f32 %v26216_v59, %v7987_v63  ;;  %v17503_v63 = vld [vmem:[%s28234_s23 + $0x78] sm:$0xff] }
0x23a4   : > { %v17504_v5 = vld [vmem:[%s28234_s23 + $0x80] sm:$0xff] }
0x23c2   : > { %v8073_v0 = vpop.f32.mrb[150].mxu1 }
0x23c3   : > { %v8074_v6 = vadd.f32 %v26149_v34, %v8073_v0  ;;  %v8075_v43 = vpop.f32.mrb[151].mxu1  ;;  %v26613_v0 = vld [vmem:[%s28234_s23 + $0x70] sm:$0xff] }
0x23c4   : > { %v8705_v43 = vld [vmem:[#allocation2 + $0x2] sm:$0xff] }
0x23c5   : > { %v8087_v19 = vmax.f32 %v8074_v6, 0.0  ;;  %v26615_v6 = vpack.c.bf16 %v17504_v5, %v17503_v63 }
0x23c6   : > { %v8078_v22 = vpop.f32.mrb[152].mxu1 }
0x23c7   : > { %v8079_v4 = vadd.f32 %v26149_v34, %v8078_v22  ;;  %v8080_v21 = vpop.f32.mrb[153].mxu1  ;;  %20113 = vmatmul.mubr.msk.f32.vlgmr.msra.gmra.mrb[150].mxu0 %vm905_vm2, %v8087_v19  ;;  %v17505_v19 = vld [vmem:[%s28234_s23 + $0x88] sm:$0xff]  ;;  %v17506_v22 = vld [vmem:[%s28234_s23 + $0x90] sm:$0xff] }
0x23c8   : > { %20115 = vmatprep.mubr.msk.f32.mxu0 %vm23704_vm1, %v23705_v52  ;;  %v26634_v21 = vpack.c.bf16 %v17506_v22, %v17505_v19 }
0x23c9   : > { %v8088_v54 = vmax.f32 %v8079_v4, 0.0  ;;  %v26627_v4 = vld [vmem:[#allocation2 + $0x12] sm:$0xff] }
0x23ca   : > { %v8083_v57 = vpop.f32.mrb[154].mxu1 }
0x23cb   : > { %v8084_v53 = vadd.f32 %v26149_v34, %v8083_v57  ;;  %20116 = vmatmul.mubr.msk.f32.gmra.mrb[152].mxu0 %vm905_vm2, %v8088_v54  ;;  %v8085_v46 = vpop.f32.mrb[155].mxu1  ;;  %v17509_v54 = vld [vmem:[%s28234_s23 + $0xa0] sm:$0xff]  ;;  %v17510_v57 = vld [vmem:[%s28234_s23 + $0xa8] sm:$0xff] }
0x23cc   : > { %20118 = vmatprep.mubr.msk.f32.mxu0 %vm23704_vm1, %v23705_v52  ;;  %v26657_v46 = vpack.c.bf16 %v17510_v57, %v17509_v54 }
0x23cd   : > { %v8089_v60 = vmax.f32 %v8084_v53, 0.0  ;;  %v26655_v53 = vld [vmem:[%s28234_s23 + $0x98] sm:$0xff] }
0x23cf   : > { %20119 = vmatmul.mubr.msk.f32.gmra.mrb[154].mxu0 %vm905_vm2, %v8089_v60  ;;  %v17511_v60 = vld [vmem:[%s28234_s23 + $0xb0] sm:$0xff] }
0x23d0   : > { %20127 = vmatprep.mubr.msk.f32.mxu0 %vm1188_vm3, %v26202_v48 }
0x249a   : > { %v8165_v2 = vpop.f32.mrb[150].mxu0 }
0x249b   : > { %v8166_v28 = vadd.f32 %v26216_v59, %v8165_v2  ;;  %v20114_v38 = vpop.f32.mrb[151].mxu0  ;;  %v17512_v2 = vld [vmem:[%s28234_s23 + $0xb8] sm:$0xff] }
0x249c   : > { %v17515_v38 = vld [vmem:[%s28234_s23 + $0xc8] sm:$0xff] }
0x249d   : > { %v8179_v9 = vmax.f32 %v7978_v27, %v8166_v28  ;;  %v26670_v27 = vld [vmem:[#allocation2 + $0x20] sm:$0xff]  ;;  %v26677_v28 = vpack.c.bf16 %v17512_v2, %v17511_v60 }
0x249e   : > { %v8170_v34 = vpop.f32.mrb[152].mxu0  ;;  %v10074_v60 = vld [vmem:[%s28156_s13] sm:$0xff] }
0x249f   : > { %v8171_v56 = vadd.f32 %v26216_v59, %v8170_v34  ;;  %v20117_v23 = vpop.f32.mrb[153].mxu0  ;;  %v26698_v34 = vld [vmem:[%s28234_s23 + $0xc0] sm:$0xff] }
0x24a0   : > { %v17518_v23 = vld [vmem:[%s28234_s23 + $0xe0] sm:$0xff] }
0x24a1   : > { %v8180_v14 = vmax.f32 %v7983_v44, %v8171_v56  ;;  %v17517_v56 = vld [vmem:[%s28234_s23 + $0xd8] sm:$0xff] }
0x24a2   : > { %v8175_v42 = vpop.f32.mrb[154].mxu0 }
0x24a3   : > { %v22792_v45 = vpack.c.bf16 %v8180_v14, %v8179_v9  ;;  %v8176_v48 = vadd.f32 %v26216_v59, %v8175_v42  ;;  %v20120_v51 = vpop.f32.mrb[155].mxu0  ;;  %v8545_v59 = vld [vmem:[%s28234_s23] sm:$0xff]  ;;  %v17516_v9 = vld [vmem:[%s28234_s23 + $0xd0] sm:$0xff]  ;;  %v26720_v42 = vpack.c.bf16 %v17518_v23, %v17517_v56  ;;  %v10075_v23 = vld [vmem:[%s28156_s13 + $0x8] sm:$0xff] }
0x24a4   : > { %v26700_v44 = vpack.c.bf16 %v17516_v9, %v17515_v38  ;;  %v26713_v14 = vld [vmem:[#allocation2 + $0x21] sm:$0xff] }
0x24a5   : > { %v8181_v40 = vmax.f32 %v7988_v16, %v8176_v48  ;;  %22793 = vmatprep.subr.bf16.mxu0 %v22792_v45  ;;  %22797 = vmatprep.subr.bf16.mxu1 %v22792_v45  ;;  %v17521_v16 = vld [vmem:[%s28234_s23 + $0xf0] sm:$0xff]  ;;  %v26741_v48 = vld [vmem:[%s28234_s23 + $0xe8] sm:$0xff] }
0x24a6   : > { %22795 = vmatpush3.bf16.msra.mxu0 %v22792_v45  ;;  %22799 = vmatpush3.bf16.msra.mxu1 %v22792_v45  ;;  %v17522_v45 = vld [vmem:[%s28234_s23 + $0xf8] sm:$0xff] }
0x24a7   : > { %20125 = vmatprep.subr.msk.mxu0 %vm1195_vm4, %v8181_v40  ;;  %20134 = vmatprep.subr.msk.mxu1 %vm1195_vm4, %v8181_v40  ;;  %v26743_v51 = vpack.c.bf16 %v17522_v45, %v17521_v16  ;;  %v10151_v16 = vld [vmem:[%s28157_s14] sm:$0xff]  ;;  %v10152_v45 = vld [vmem:[%s28157_s14 + $0x8] sm:$0xff] }
0x24aa   : > { %20126 = vmatpush3.msk.msra.mxu0 %vm1195_vm4, %v8181_v40  ;;  %20135 = vmatpush3.msk.msra.mxu1 %vm1195_vm4, %v8181_v40  ;;  %v17523_v40 = vld [vmem:[%s28234_s23 + $0x100] sm:$0xff] }
0x24ab   : > { %20128 = vmatmul.mubr.msk.f32.vlgmr.msra.gmra.mrb[156].mxu0 %vm1188_vm3, %v8183_v49  ;;  %20137 = vmatmul.mubr.msk.f32.vlgmr.msra.gmra.mrb[156].mxu1 %vm1188_vm3, %v8269_v50  ;;  %v17524_v49 = vld [vmem:[%s28234_s23 + $0x108] sm:$0xff] }
0x24ac   : > { %22801 = vmatprep.subr.bf16.mxu0 %v26256_v41  ;;  %22821 = vmatprep.subr.bf16.mxu1 %v26258_v36  ;;  %v26756_v50 = vld [vmem:[#allocation2 + $0x22] sm:$0xff] }
0x24ad   : > { %22803 = vmatpush3.bf16.msra.mxu0 %v26256_v41  ;;  %22823 = vmatpush3.bf16.msra.mxu1 %v26258_v36  ;;  %v8546_v41 = vld [vmem:[%s28234_s23 + $0x8] sm:$0xff] }
0x24ae   : > { %22805 = vmatprep.subr.bf16.mxu0 %v26262_v37  ;;  %22825 = vmatprep.subr.bf16.mxu1 %v26264_v62 }
0x24b1   : > { %22807 = vmatpush3.bf16.msra.mxu0 %v26262_v37  ;;  %22827 = vmatpush3.bf16.msra.mxu1 %v26264_v62 }
0x24b2   : > { %22809 = vmatprep.subr.bf16.mxu0 %v26286_v35  ;;  %22829 = vmatprep.subr.bf16.mxu1 %v26288_v15 }
0x24b5   : > { %22811 = vmatpush3.bf16.msra.mxu0 %v26286_v35  ;;  %22831 = vmatpush3.bf16.msra.mxu1 %v26288_v15 }
0x24b6   : > { %22813 = vmatprep.subr.bf16.mxu0 %v26306_v33  ;;  %22833 = vmatprep.subr.bf16.mxu1 %v26308_v25 }
0x24b9   : > { %22815 = vmatpush3.bf16.msra.mxu0 %v26306_v33  ;;  %22835 = vmatpush3.bf16.msra.mxu1 %v26308_v25  ;;  %v26494_v25 = vpack.c.bf16 %v8546_v41, %v8545_v59  ;;  %v26763_v59 = vpack.c.bf16 %v17524_v49, %v17523_v40  ;;  %v17527_v41 = vld [vmem:[%s28234_s23 + $0x118] sm:$0xff]  ;;  %v9924_v49 = vld [vmem:[%s28154_s11] sm:$0xf] }
0x24ba   : > { %22817 = vmatprep.subr.bf16.mxu0 %v26322_v11  ;;  %22837 = vmatprep.subr.bf16.mxu1 %v26330_v29 }
0x24bd   : > { %22819 = vmatpush3.bf16.msra.mxu0 %v26322_v11  ;;  %22839 = vmatpush3.bf16.msra.mxu1 %v26330_v29  ;;  %v8547_v11 = vld [vmem:[%s28234_s23 + $0x10] sm:$0xff]  ;;  %v8548_v29 = vld [vmem:[%s28234_s23 + $0x18] sm:$0xff] }
0x24be   : > { %22840 = vmatprep.subr.bf16.mxu0 %v23703_v3  ;;  %22894 = vmatprep.subr.bf16.mxu1 %v23703_v3  ;;  %v26508_v30 = vpack.c.bf16 %v8548_v29, %v8547_v11  ;;  %v17533_v29 = vld [vmem:[%s28234_s23 + $0x140] sm:$0xff] }
0x257e   : > { %v20129_v36 = vpop.f32.mrb[156].mxu0  ;;  %v20138_v37 = vpop.f32.mrb[156].mxu1 }
0x257f   : > { %v8352_v62 = vmax.f32 %v20129_v36, %v20138_v37  ;;  %v8259_v35 = vpop.f32.mrb[157].mxu0  ;;  %v8342_v15 = vpop.f32.mrb[157].mxu1  ;;  %v17528_v36 = vld [vmem:[%s28234_s23 + $0x120] sm:$0xff]  ;;  %v26784_v37 = vld [vmem:[%s28234_s23 + $0x110] sm:$0xff] }
0x2580   : > { %v8351_v33 = vmax.f32 %v8259_v35, %v8342_v15  ;;  %v17529_v35 = vld [vmem:[%s28234_s23 + $0x128] sm:$0xff]  ;;  %v17530_v15 = vld [vmem:[%s28234_s23 + $0x130] sm:$0xff] }
0x2581   : > { %v26806_v11 = vpack.c.bf16 %v17530_v15, %v17529_v35  ;;  %v26909_v35 = vpack.c.bf16 %v10152_v45, %v10151_v16  ;;  %v10076_v15 = vld [vmem:[%s28156_s13 + $0x10] sm:$0xff]  ;;  %v17626_v16 = vld [vmem:[%s28234_s23 + $0x68] sm:$0xff] }
0x2582   : > { %20159 = vmatprep.mubr.msk.f32.mxu0 %vm905_vm2, %v8351_v33  ;;  %20182 = vmatprep.mubr.msk.f32.mxu1 %vm905_vm2, %v8351_v33  ;;  %v26799_v33 = vld [vmem:[#allocation2 + $0x30] sm:$0xff] }
0x2583   : > { %20160 = vmatmul.mubr.msk.f32.vlgmr.msra.gmra.mrb[158].mxu0 %vm905_vm2, %v8352_v62  ;;  %20183 = vmatmul.mubr.msk.f32.vlgmr.msra.gmra.mrb[158].mxu1 %vm905_vm2, %v8352_v62  ;;  %v26786_v62 = vpack.c.bf16 %v17528_v36, %v17527_v41  ;;  %v9999_v41 = vld [vmem:[%s28155_s12] sm:$0xf]  ;;  %v26907_v36 = vpack.c.bf16 %v10075_v23, %v10074_v60 }
0x2584   : > { %22842 = vmatpush3.bf16.msra.mxu0 %v26494_v25  ;;  %22896 = vmatpush3.bf16.msra.mxu1 %v26494_v25  ;;  %v17625_v23 = vld [vmem:[%s28234_s23 + $0x60] sm:$0xff] }
0x2585   : > { %22843 = vmatprep.subr.bf16.mxu0 %v23703_v3  ;;  %22897 = vmatprep.subr.bf16.mxu1 %v23703_v3  ;;  %v27266_v45 = vpack.c.bf16 %v17626_v16, %v17625_v23 }
0x2586   : > { %20195 = vmatprep.mubr.msk.f32.mxu0 %vm23704_vm1, %v23705_v52  ;;  %20312 = vmatprep.mubr.msk.f32.mxu1 %vm23704_vm1, %v23705_v52 }
0x2588   : > { %22845 = vmatpush3.bf16.msra.mxu0 %v26508_v30  ;;  %22899 = vmatpush3.bf16.msra.mxu1 %v26508_v30 }
0x2589   : > { %20193 = vmatprep.subr.mxu0 %v23705_v52  ;;  %20310 = vmatprep.subr.mxu1 %v23705_v52 }
0x258c   : > { %20194 = vmatpush3.msra.mxu0 %v26529_v1  ;;  %20311 = vmatpush3.msra.mxu1 %v26529_v1 }
0x258d   : > { %20196 = vmatmul.mubr.msk.f32.vlgmr.msra.gmra.mrb[160].mxu0 %vm1539_vm6, %v8544_v20  ;;  %22846 = vmatprep.subr.bf16.mxu0 %v23703_v3  ;;  %v26829_v20 = vpack.c.bf16 %v17534_v7, %v17533_v29  ;;  %v10077_v29 = vld [vmem:[%s28156_s13 + $0x18] sm:$0xff]  ;;  %v10153_v7 = vld [vmem:[%s28157_s14 + $0x10] sm:$0xff] }
0x258e   : > { %20313 = vmatmul.mubr.msk.f32.vlgmr.msra.gmra.mrb[160].mxu1 %vm1539_vm6, %v26543_v55  ;;  %22900 = vmatprep.subr.bf16.mxu1 %v23703_v3  ;;  %v26929_v17 = vpack.c.bf16 %v10077_v29, %v10076_v15  ;;  %v17632_v15 = vld [vmem:[%s28234_s23 + $0x90] sm:$0xff] }
0x258f   : > { %22848 = vmatpush3.bf16.msra.mxu0 %v26531_v10  ;;  %22902 = vmatpush3.bf16.msra.mxu1 %v26531_v10 }
0x2590   : > { %22849 = vmatprep.subr.bf16.mxu0 %v23703_v3  ;;  %22903 = vmatprep.subr.bf16.mxu1 %v23703_v3 }
0x2591   : > { %20208 = vmatprep.mubr.msk.f32.mxu0 %vm23704_vm1, %v23705_v52  ;;  %20325 = vmatprep.mubr.msk.f32.mxu1 %vm23704_vm1, %v23705_v52 }
0x2593   : > { %22851 = vmatpush3.bf16.msra.mxu0 %v26550_v39  ;;  %22905 = vmatpush3.bf16.msra.mxu1 %v26550_v39 }
0x2594   : > { %20206 = vmatprep.subr.mxu0 %v23705_v52  ;;  %20323 = vmatprep.subr.mxu1 %v23705_v52 }
0x2597   : > { %20207 = vmatpush3.msra.mxu0 %v26571_v8  ;;  %20324 = vmatpush3.msra.mxu1 %v26571_v8 }
0x2598   : > { %20209 = vmatmul.mubr.msk.f32.vlgmr.msra.gmra.mrb[160].mxu0 %vm1539_vm6, %v8624_v31  ;;  %22852 = vmatprep.subr.bf16.mxu0 %v23703_v3  ;;  %v26868_v31 = vld [vmem:[#allocation2 + $0x32] sm:$0xff] }
0x2599   : > { %20326 = vmatmul.mubr.msk.f32.vlgmr.msra.gmra.mrb[160].mxu1 %vm1539_vm6, %v26585_v24  ;;  %22906 = vmatprep.subr.bf16.mxu1 %v23703_v3 }
0x259a   : > { %22854 = vmatpush3.bf16.msra.mxu0 %v26573_v61  ;;  %22908 = vmatpush3.bf16.msra.mxu1 %v26573_v61 }
0x259b   : > { %22855 = vmatprep.subr.bf16.mxu0 %v23703_v3  ;;  %22909 = vmatprep.subr.bf16.mxu1 %v23703_v3 }
0x259c   : > { %20221 = vmatprep.mubr.msk.f32.mxu0 %vm23704_vm1, %v23705_v52  ;;  %20338 = vmatprep.mubr.msk.f32.mxu1 %vm23704_vm1, %v23705_v52 }
0x259e   : > { %22857 = vmatpush3.bf16.msra.mxu0 %v26592_v18  ;;  %22911 = vmatpush3.bf16.msra.mxu1 %v26592_v18 }
0x259f   : > { %20219 = vmatprep.subr.mxu0 %v23705_v52  ;;  %20336 = vmatprep.subr.mxu1 %v23705_v52 }
0x25a2   : > { %20220 = vmatpush3.msra.mxu0 %v26613_v0  ;;  %20337 = vmatpush3.msra.mxu1 %v26613_v0 }
0x25a3   : > { %20222 = vmatmul.mubr.msk.f32.vlgmr.msra.gmra.mrb[160].mxu0 %vm1539_vm6, %v8705_v43  ;;  %22858 = vmatprep.subr.bf16.mxu0 %v23703_v3 }
0x25a4   : > { %20339 = vmatmul.mubr.msk.f32.vlgmr.msra.gmra.mrb[160].mxu1 %vm1539_vm6, %v26627_v4  ;;  %22912 = vmatprep.subr.bf16.mxu1 %v23703_v3 }
0x25a5   : > { %22860 = vmatpush3.bf16.msra.mxu0 %v26615_v6  ;;  %22914 = vmatpush3.bf16.msra.mxu1 %v26615_v6 }
0x25a6   : > { %22861 = vmatprep.subr.bf16.mxu0 %v23703_v3  ;;  %22915 = vmatprep.subr.bf16.mxu1 %v23703_v3 }
0x25a7   : > { %20234 = vmatprep.mubr.msk.f32.mxu0 %vm23704_vm1, %v23705_v52  ;;  %20351 = vmatprep.mubr.msk.f32.mxu1 %vm23704_vm1, %v23705_v52 }
0x25a9   : > { %22863 = vmatpush3.bf16.msra.mxu0 %v26634_v21  ;;  %22917 = vmatpush3.bf16.msra.mxu1 %v26634_v21 }
0x25aa   : > { %20232 = vmatprep.subr.mxu0 %v23705_v52  ;;  %20349 = vmatprep.subr.mxu1 %v23705_v52 }
0x25ad   : > { %20233 = vmatpush3.msra.mxu0 %v26655_v53  ;;  %20350 = vmatpush3.msra.mxu1 %v26655_v53 }
0x25ae   : > { %20235 = vmatmul.mubr.msk.f32.vlgmr.msra.gmra.mrb[160].mxu0 %vm1539_vm6, %v26543_v55  ;;  %22864 = vmatprep.subr.bf16.mxu0 %v23703_v3  ;;  %v26842_v55 = vld [vmem:[#allocation2 + $0x31] sm:$0xff] }
0x25af   : > { %20352 = vmatmul.mubr.msk.f32.vlgmr.msra.gmra.mrb[160].mxu1 %vm1539_vm6, %v26670_v27  ;;  %22918 = vmatprep.subr.bf16.mxu1 %v23703_v3 }
0x25b0   : > { %22866 = vmatpush3.bf16.msra.mxu0 %v26657_v46  ;;  %22920 = vmatpush3.bf16.msra.mxu1 %v26657_v46 }
0x25b1   : > { %22867 = vmatprep.subr.bf16.mxu0 %v23703_v3  ;;  %22921 = vmatprep.subr.bf16.mxu1 %v23703_v3 }
0x25b2   : > { %20247 = vmatprep.mubr.msk.f32.mxu0 %vm23704_vm1, %v23705_v52  ;;  %20364 = vmatprep.mubr.msk.f32.mxu1 %vm23704_vm1, %v23705_v52 }
0x25b4   : > { %22869 = vmatpush3.bf16.msra.mxu0 %v26677_v28  ;;  %22923 = vmatpush3.bf16.msra.mxu1 %v26677_v28 }
0x25b5   : > { %20245 = vmatprep.subr.mxu0 %v23705_v52  ;;  %20362 = vmatprep.subr.mxu1 %v23705_v52 }
0x25b8   : > { %20246 = vmatpush3.msra.mxu0 %v26698_v34  ;;  %20363 = vmatpush3.msra.mxu1 %v26698_v34 }
0x25b9   : > { %20248 = vmatmul.mubr.msk.f32.vlgmr.msra.gmra.mrb[160].mxu0 %vm1539_vm6, %v26585_v24  ;;  %22870 = vmatprep.subr.bf16.mxu0 %v23703_v3 }
0x25ba   : > { %20365 = vmatmul.mubr.msk.f32.vlgmr.msra.gmra.mrb[160].mxu1 %vm1539_vm6, %v26713_v14  ;;  %22924 = vmatprep.subr.bf16.mxu1 %v23703_v3 }
0x25bb   : > { %22872 = vmatpush3.bf16.msra.mxu0 %v26700_v44  ;;  %22926 = vmatpush3.bf16.msra.mxu1 %v26700_v44 }
0x25bc   : > { %22873 = vmatprep.subr.bf16.mxu0 %v23703_v3  ;;  %22927 = vmatprep.subr.bf16.mxu1 %v23703_v3 }
0x25bd   : > { %20260 = vmatprep.mubr.msk.f32.mxu0 %vm23704_vm1, %v23705_v52  ;;  %20377 = vmatprep.mubr.msk.f32.mxu1 %vm23704_vm1, %v23705_v52 }
0x25bf   : > { %22875 = vmatpush3.bf16.msra.mxu0 %v26720_v42  ;;  %22929 = vmatpush3.bf16.msra.mxu1 %v26720_v42 }
0x25c0   : > { %20258 = vmatprep.subr.mxu0 %v23705_v52  ;;  %20375 = vmatprep.subr.mxu1 %v23705_v52 }
0x25c3   : > { %20259 = vmatpush3.msra.mxu0 %v26741_v48  ;;  %20376 = vmatpush3.msra.mxu1 %v26741_v48 }
0x25c4   : > { %20261 = vmatmul.mubr.msk.f32.vlgmr.msra.gmra.mrb[160].mxu0 %vm1539_vm6, %v26627_v4  ;;  %22876 = vmatprep.subr.bf16.mxu0 %v23703_v3  ;;  %v26885_v4 = vld [vmem:[%s28153_s10] ss:$0 sm:$0xff] }
0x25c5   : > { %20378 = vmatmul.mubr.msk.f32.vlgmr.msra.gmra.mrb[160].mxu1 %vm1539_vm6, %v26756_v50  ;;  %22930 = vmatprep.subr.bf16.mxu1 %v23703_v3 }
0x25c6   : > { %22878 = vmatpush3.bf16.msra.mxu0 %v26743_v51  ;;  %22932 = vmatpush3.bf16.msra.mxu1 %v26743_v51 }
0x25c7   : > { %22879 = vmatprep.subr.bf16.mxu0 %v23703_v3  ;;  %22933 = vmatprep.subr.bf16.mxu1 %v23703_v3 }
0x25c8   : > { %20273 = vmatprep.mubr.msk.f32.mxu0 %vm23704_vm1, %v23705_v52  ;;  %20390 = vmatprep.mubr.msk.f32.mxu1 %vm23704_vm1, %v23705_v52 }
0x25ca   : > { %22881 = vmatpush3.bf16.msra.mxu0 %v26763_v59  ;;  %22935 = vmatpush3.bf16.msra.mxu1 %v26763_v59 }
0x25cb   : > { %20271 = vmatprep.subr.mxu0 %v23705_v52  ;;  %20388 = vmatprep.subr.mxu1 %v23705_v52 }
0x25ce   : > { %20272 = vmatpush3.msra.mxu0 %v26784_v37  ;;  %20389 = vmatpush3.msra.mxu1 %v26784_v37 }
0x25cf   : > { %20274 = vmatmul.mubr.msk.f32.vlgmr.msra.gmra.mrb[160].mxu0 %vm1539_vm6, %v26670_v27  ;;  %22882 = vmatprep.subr.bf16.mxu0 %v23703_v3 }
0x25d0   : > { %20391 = vmatmul.mubr.msk.f32.vlgmr.msra.gmra.mrb[160].mxu1 %vm1539_vm6, %v26799_v33  ;;  %22936 = vmatprep.subr.bf16.mxu1 %v23703_v3 }
0x25d1   : > { %22884 = vmatpush3.bf16.msra.mxu0 %v26786_v62  ;;  %22938 = vmatpush3.bf16.msra.mxu1 %v26786_v62 }
0x25d2   : > { %22885 = vmatprep.subr.bf16.mxu0 %v23703_v3  ;;  %22939 = vmatprep.subr.bf16.mxu1 %v23703_v3 }
0x25d3   : > { %20286 = vmatprep.mubr.msk.f32.mxu0 %vm23704_vm1, %v23705_v52  ;;  %20403 = vmatprep.mubr.msk.f32.mxu1 %vm23704_vm1, %v23705_v52 }
0x25d5   : > { %22887 = vmatpush3.bf16.msra.mxu0 %v26806_v11  ;;  %22941 = vmatpush3.bf16.msra.mxu1 %v26806_v11 }
0x25d6   : > { %20284 = vmatprep.subr.mxu0 %v23705_v52  ;;  %20401 = vmatprep.subr.mxu1 %v23705_v52 }
0x25d9   : > { %20285 = vmatpush3.msra.mxu0 %v26827_v58  ;;  %20402 = vmatpush3.msra.mxu1 %v26827_v58 }
0x25da   : > { %20287 = vmatmul.mubr.msk.f32.vlgmr.msra.gmra.mrb[160].mxu0 %vm1539_vm6, %v26713_v14  ;;  %22888 = vmatprep.subr.bf16.mxu0 %v23703_v3 }
0x25db   : > { %20404 = vmatmul.mubr.msk.f32.vlgmr.msra.gmra.mrb[160].mxu1 %vm1539_vm6, %v26842_v55  ;;  %22942 = vmatprep.subr.bf16.mxu1 %v23703_v3 }
0x25dc   : > { %22890 = vmatpush3.bf16.msra.mxu0 %v26829_v20  ;;  %22944 = vmatpush3.bf16.msra.mxu1 %v26829_v20 }
0x25dd   : > { %22891 = vmatprep.subr.bf16.mxu0 %v23703_v3  ;;  %22945 = vmatprep.subr.bf16.mxu1 %v23703_v3 }
0x25de   : > { %20299 = vmatprep.mubr.msk.f32.mxu0 %vm23704_vm1, %v23705_v52  ;;  %20416 = vmatprep.mubr.msk.f32.mxu1 %vm23704_vm1, %v23705_v52 }
0x25e0   : > { %22893 = vmatpush3.bf16.msra.mxu0 %v26849_v12  ;;  %22947 = vmatpush3.bf16.msra.mxu1 %v26849_v12 }
0x25e1   : > { %20297 = vmatprep.subr.mxu0 %v23705_v52  ;;  %20414 = vmatprep.subr.mxu1 %v23705_v52 }
0x25e4   : > { %20298 = vmatpush3.msra.mxu0 %v26864_v47  ;;  %20415 = vmatpush3.msra.mxu1 %v26864_v47 }
0x25e5   : > { %20300 = vmatmul.mubr.msk.f32.vlgmr.msra.gmra.mrb[160].mxu0 %vm1539_vm6, %v26756_v50  ;;  %20417 = vmatmul.mubr.msk.f32.vlgmr.msra.gmra.mrb[160].mxu1 %vm1539_vm6, %v26868_v31 }
0x25e6   : > { %20419 = vmatprep.subr.mxu0 %v23705_v52  ;;  %20424 = vmatprep.subr.mxu1 %v23705_v52 }
0x25e7   : > { %20421 = vmatprep.mubr.msk.f32.mxu0 %vm23704_vm1, %v23705_v52  ;;  %20426 = vmatprep.mubr.msk.f32.mxu1 %vm23704_vm1, %v23705_v52 }
0x2656   : > { %v20161_v13 = vpop.f32.mrb[158].mxu0  ;;  %v20184_v32 = vpop.f32.mrb[158].mxu1 }
0x2657   : > { %v8530_v24 = vmax.f32 %v20161_v13, %v20184_v32  ;;  %v8435_v63 = vpop.f32.mrb[159].mxu0  ;;  %v8520_v5 = vpop.f32.mrb[159].mxu1  ;;  %v26931_v13 = vpack.c.bf16 %v10154_v26, %v10153_v7  ;;  %v17635_v7 = vld [vmem:[%s28234_s23 + $0xa0] sm:$0xff]  ;;  %v17636_v26 = vld [vmem:[%s28234_s23 + $0xa8] sm:$0xff] }
0x2658   : > { %v8529_v43 = vmax.f32 %v8435_v63, %v8520_v5 }
0x2659   : > { %v8532_v19 = vmax.f32 %v8530_v24, 0.0 }
0x265a   : > { %v8531_v22 = vmax.f32 %v8529_v43, 0.0 }
0x265b   : > { %8535 = vst.msk [vmem:[#allocation2 + $0x98] sm:$0x3] %vm1541_vm5, %v8532_v19  ;;  %v17618_v19 = vld [vmem:[%s28234_s23 + $0x30] sm:$0xff] }
0x265c   : > { %8534 = vst.msk [vmem:[#allocation2 + $0x90] sm:$0xff] %vm1539_vm6, %v8531_v22  ;;  %v27205_v22 = vld [vmem:[%s28234_s23 + $0x20] sm:$0xff] }
0x26b8   : > { %v9267_v54 = vpop.f32.mrb[160].mxu0  ;;  %v9918_v57 = vpop.f32.mrb[160].mxu1 }
0x26b9   : > { %v23422_v2 = vadd.f32 %v26885_v4, %v9267_v54  ;;  %v23423_v38 = vadd.f32 %v26885_v4, %v9918_v57  ;;  %v20301_v9 = vpop.f32.mrb[161].mxu0  ;;  %v20418_v56 = vpop.f32.mrb[161].mxu1  ;;  %v17619_v54 = vld [vmem:[%s28234_s23 + $0x38] sm:$0xff]  ;;  %v17620_v57 = vld [vmem:[%s28234_s23 + $0x40] sm:$0xff] }
0x26ba   : > { %v27225_v60 = vpack.c.bf16 %v17620_v57, %v17619_v54  ;;  %v27246_v9 = vld [vmem:[%s28234_s23 + $0x48] sm:$0xff]  ;;  %v27541_v54 = vld [vmem:[#allocation2 + $0x72] sm:$0xff] }
0x26bb   : > { %v9923_v40 = vmax.f32 %v23422_v2, %v23423_v38  ;;  %v17623_v2 = vld [vmem:[%s28234_s23 + $0x50] sm:$0xff]  ;;  %v17624_v38 = vld [vmem:[%s28234_s23 + $0x58] sm:$0xff] }
0x26bc   : > { %v27248_v56 = vpack.c.bf16 %v17624_v38, %v17623_v2 }
0x26bd   : > { %20420 = vmatpush3.msra.mxu0 %v9923_v40  ;;  %20425 = vmatpush3.msra.mxu1 %v9923_v40  ;;  %v17629_v40 = vld [vmem:[%s28234_s23 + $0x78] sm:$0xff] }
0x26be   : > { %20422 = vmatmul.mubr.msk.f32.vlgmr.msra.gmra.mrb[162].mxu0 %vm9925_vm7, %v9924_v49  ;;  %20427 = vmatmul.mubr.msk.f32.vlgmr.msra.gmra.mrb[162].mxu1 %vm9925_vm7, %v9999_v41  ;;  %v17630_v49 = vld [vmem:[%s28234_s23 + $0x80] sm:$0xff]  ;;  %v27287_v41 = vld [vmem:[%s28234_s23 + $0x70] sm:$0xff] }
0x26bf   : > { %22948 = vmatprep.subr.bf16.mxu0 %v23703_v3  ;;  %22954 = vmatprep.subr.bf16.mxu1 %v23703_v3 }
0x26c0   : > { %22950 = vmatpush3.bf16.msra.mxu0 %v26907_v36  ;;  %22956 = vmatpush3.bf16.msra.mxu1 %v26909_v35 }
0x26c1   : > { %22951 = vmatprep.subr.bf16.mxu0 %v23703_v3  ;;  %22957 = vmatprep.subr.bf16.mxu1 %v23703_v3 }
0x26c2   : > { %20437 = vmatprep.mubr.msk.f32.mxu0 %vm23704_vm1, %v23705_v52  ;;  %20448 = vmatprep.mubr.msk.f32.mxu1 %vm23704_vm1, %v23705_v52 }
0x26c4   : > { %22953 = vmatpush3.bf16.msra.mxu0 %v26929_v17  ;;  %22959 = vmatpush3.bf16.msra.mxu1 %v26931_v13 }
0x26c5   : > { %22960 = vmatprep.subr.bf16.mxu0 %v23703_v3  ;;  %23014 = vmatprep.subr.bf16.mxu1 %v23703_v3 }
0x2791   : > { %v9995_v32 = vpop.f32.mrb[162].mxu0  ;;  %v10069_v24 = vpop.f32.mrb[162].mxu1 }
0x2792   : > { %v10073_v63 = vmax.f32 %v9995_v32, %v10069_v24  ;;  %v20423_v5 = vpop.f32.mrb[163].mxu0  ;;  %v20428_v43 = vpop.f32.mrb[163].mxu1  ;;  %v17637_v32 = vld [vmem:[%s28234_s23 + $0xb0] sm:$0xff]  ;;  %v17638_v24 = vld [vmem:[%s28234_s23 + $0xb8] sm:$0xff] }
0x2793   : > { %v27350_v5 = vpack.c.bf16 %v17638_v24, %v17637_v32  ;;  %v17641_v43 = vld [vmem:[%s28234_s23 + $0xc8] sm:$0xff] }
0x2794   : > { %20438 = vmatmul.mubr.msk.f32.vlgmr.msra.gmra.mrb[164].mxu0 %vm795_vm0, %v10073_v63  ;;  %20449 = vmatmul.mubr.msk.f32.vlgmr.msra.gmra.mrb[164].mxu1 %vm795_vm0, %v10073_v63  ;;  %v27343_v63 = vld [vmem:[#allocation2 + $0x60] sm:$0xff] }
0x2795   : > { %22962 = vmatpush3.bf16.msra.mxu0 %v26494_v25  ;;  %23016 = vmatpush3.bf16.msra.mxu1 %v26494_v25  ;;  %v27022_v25 = vld [vmem:[#allocation2 + $0x40] sm:$0xff] }
0x2796   : > { %22963 = vmatprep.subr.bf16.mxu0 %v23703_v3  ;;  %23017 = vmatprep.subr.bf16.mxu1 %v23703_v3 }
0x2797   : > { %20461 = vmatprep.mubr.msk.f32.mxu0 %vm23704_vm1, %v23705_v52  ;;  %20578 = vmatprep.mubr.msk.f32.mxu1 %vm23704_vm1, %v23705_v52 }
0x2799   : > { %22965 = vmatpush3.bf16.msra.mxu0 %v26508_v30  ;;  %23019 = vmatpush3.bf16.msra.mxu1 %v26508_v30  ;;  %v27044_v30 = vld [vmem:[#allocation2 + $0x41] sm:$0xff] }
0x279a   : > { %20459 = vmatprep.subr.mxu0 %v23705_v52  ;;  %20576 = vmatprep.subr.mxu1 %v23705_v52 }
0x279d   : > { %20460 = vmatpush3.msra.mxu0 %v26529_v1  ;;  %20577 = vmatpush3.msra.mxu1 %v26529_v1  ;;  %v27066_v1 = vld [vmem:[#allocation2 + $0x42] sm:$0xff] }
0x279e   : > { %20462 = vmatmul.mubr.msk.f32.vlgmr.msra.gmra.mrb[166].mxu0 %vm1539_vm6, %v26670_v27  ;;  %22966 = vmatprep.subr.bf16.mxu0 %v23703_v3 }
0x279f   : > { %20579 = vmatmul.mubr.msk.f32.vlgmr.msra.gmra.mrb[166].mxu1 %vm1539_vm6, %v26799_v33  ;;  %23020 = vmatprep.subr.bf16.mxu1 %v23703_v3 }
0x27a0   : > { %22968 = vmatpush3.bf16.msra.mxu0 %v26531_v10  ;;  %23022 = vmatpush3.bf16.msra.mxu1 %v26531_v10  ;;  %v27088_v10 = vld [vmem:[#allocation2 + $0x50] sm:$0xff] }
0x27a1   : > { %22969 = vmatprep.subr.bf16.mxu0 %v23703_v3  ;;  %23023 = vmatprep.subr.bf16.mxu1 %v23703_v3 }
0x27a2   : > { %20474 = vmatprep.mubr.msk.f32.mxu0 %vm23704_vm1, %v23705_v52  ;;  %20591 = vmatprep.mubr.msk.f32.mxu1 %vm23704_vm1, %v23705_v52 }
0x27a4   : > { %22971 = vmatpush3.bf16.msra.mxu0 %v26550_v39  ;;  %23025 = vmatpush3.bf16.msra.mxu1 %v26550_v39  ;;  %v27110_v39 = vld [vmem:[#allocation2 + $0x51] sm:$0xff] }
0x27a5   : > { %20472 = vmatprep.subr.mxu0 %v23705_v52  ;;  %20589 = vmatprep.subr.mxu1 %v23705_v52 }
0x27a8   : > { %20473 = vmatpush3.msra.mxu0 %v26571_v8  ;;  %20590 = vmatpush3.msra.mxu1 %v26571_v8  ;;  %v27129_v8 = vld [vmem:[#allocation2 + $0x52] sm:$0xff] }
0x27a9   : > { %20475 = vmatmul.mubr.msk.f32.vlgmr.msra.gmra.mrb[166].mxu0 %vm1539_vm6, %v26713_v14  ;;  %22972 = vmatprep.subr.bf16.mxu0 %v23703_v3 }
0x27aa   : > { %20592 = vmatmul.mubr.msk.f32.vlgmr.msra.gmra.mrb[166].mxu1 %vm1539_vm6, %v26842_v55  ;;  %23026 = vmatprep.subr.bf16.mxu1 %v23703_v3 }
0x27ab   : > { %22974 = vmatpush3.bf16.msra.mxu0 %v26573_v61  ;;  %23028 = vmatpush3.bf16.msra.mxu1 %v26573_v61 }
0x27ac   : > { %22975 = vmatprep.subr.bf16.mxu0 %v23703_v3  ;;  %23029 = vmatprep.subr.bf16.mxu1 %v23703_v3 }
0x27ad   : > { %20487 = vmatprep.mubr.msk.f32.mxu0 %vm23704_vm1, %v23705_v52  ;;  %20604 = vmatprep.mubr.msk.f32.mxu1 %vm23704_vm1, %v23705_v52 }
0x27af   : > { %22977 = vmatpush3.bf16.msra.mxu0 %v26592_v18  ;;  %23031 = vmatpush3.bf16.msra.mxu1 %v26592_v18 }
0x27b0   : > { %20485 = vmatprep.subr.mxu0 %v23705_v52  ;;  %20602 = vmatprep.subr.mxu1 %v23705_v52 }
0x27b3   : > { %20486 = vmatpush3.msra.mxu0 %v26613_v0  ;;  %20603 = vmatpush3.msra.mxu1 %v26613_v0 }
0x27b4   : > { %20488 = vmatmul.mubr.msk.f32.vlgmr.msra.gmra.mrb[166].mxu0 %vm1539_vm6, %v26756_v50  ;;  %22978 = vmatprep.subr.bf16.mxu0 %v23703_v3  ;;  %v11922_v50 = vld [vmem:[%s28234_s23] sm:$0xff] }
0x27b5   : > { %20605 = vmatmul.mubr.msk.f32.vlgmr.msra.gmra.mrb[166].mxu1 %vm1539_vm6, %v26868_v31  ;;  %23032 = vmatprep.subr.bf16.mxu1 %v23703_v3 }
0x27b6   : > { %22980 = vmatpush3.bf16.msra.mxu0 %v26615_v6  ;;  %23034 = vmatpush3.bf16.msra.mxu1 %v26615_v6 }
0x27b7   : > { %22981 = vmatprep.subr.bf16.mxu0 %v23703_v3  ;;  %23035 = vmatprep.subr.bf16.mxu1 %v23703_v3 }
0x27b8   : > { %20500 = vmatprep.mubr.msk.f32.mxu0 %vm23704_vm1, %v23705_v52  ;;  %20617 = vmatprep.mubr.msk.f32.mxu1 %vm23704_vm1, %v23705_v52 }
0x27ba   : > { %22983 = vmatpush3.bf16.msra.mxu0 %v26634_v21  ;;  %23037 = vmatpush3.bf16.msra.mxu1 %v26634_v21 }
0x27bb   : > { %20498 = vmatprep.subr.mxu0 %v23705_v52  ;;  %20615 = vmatprep.subr.mxu1 %v23705_v52 }
0x27be   : > { %20499 = vmatpush3.msra.mxu0 %v26655_v53  ;;  %20616 = vmatpush3.msra.mxu1 %v26655_v53 }
0x27bf   : > { %20501 = vmatmul.mubr.msk.f32.vlgmr.msra.gmra.mrb[166].mxu0 %vm1539_vm6, %v26799_v33  ;;  %22984 = vmatprep.subr.bf16.mxu0 %v23703_v3 }
0x27c0   : > { %20618 = vmatmul.mubr.msk.f32.vlgmr.msra.gmra.mrb[166].mxu1 %vm1539_vm6, %v27022_v25  ;;  %23038 = vmatprep.subr.bf16.mxu1 %v23703_v3 }
0x27c1   : > { %22986 = vmatpush3.bf16.msra.mxu0 %v26657_v46  ;;  %23040 = vmatpush3.bf16.msra.mxu1 %v26657_v46 }
0x27c2   : > { %22987 = vmatprep.subr.bf16.mxu0 %v23703_v3  ;;  %23041 = vmatprep.subr.bf16.mxu1 %v23703_v3 }
0x27c3   : > { %20513 = vmatprep.mubr.msk.f32.mxu0 %vm23704_vm1, %v23705_v52  ;;  %20630 = vmatprep.mubr.msk.f32.mxu1 %vm23704_vm1, %v23705_v52 }
0x27c5   : > { %22989 = vmatpush3.bf16.msra.mxu0 %v26677_v28  ;;  %23043 = vmatpush3.bf16.msra.mxu1 %v26677_v28 }
0x27c6   : > { %20511 = vmatprep.subr.mxu0 %v23705_v52  ;;  %20628 = vmatprep.subr.mxu1 %v23705_v52 }
0x27c9   : > { %20512 = vmatpush3.msra.mxu0 %v26698_v34  ;;  %20629 = vmatpush3.msra.mxu1 %v26698_v34 }
0x27ca   : > { %20514 = vmatmul.mubr.msk.f32.vlgmr.msra.gmra.mrb[166].mxu0 %vm1539_vm6, %v26842_v55  ;;  %22990 = vmatprep.subr.bf16.mxu0 %v23703_v3  ;;  %v11924_v55 = vld [vmem:[%s28234_s23 + $0x10] sm:$0xff] }
0x27cb   : > { %20631 = vmatmul.mubr.msk.f32.vlgmr.msra.gmra.mrb[166].mxu1 %vm1539_vm6, %v27044_v30  ;;  %23044 = vmatprep.subr.bf16.mxu1 %v23703_v3 }
0x27cc   : > { %22992 = vmatpush3.bf16.msra.mxu0 %v26700_v44  ;;  %23046 = vmatpush3.bf16.msra.mxu1 %v26700_v44 }
0x27cd   : > { %22993 = vmatprep.subr.bf16.mxu0 %v23703_v3  ;;  %23047 = vmatprep.subr.bf16.mxu1 %v23703_v3 }
0x27ce   : > { %20526 = vmatprep.mubr.msk.f32.mxu0 %vm23704_vm1, %v23705_v52  ;;  %20643 = vmatprep.mubr.msk.f32.mxu1 %vm23704_vm1, %v23705_v52 }
0x27d0   : > { %22995 = vmatpush3.bf16.msra.mxu0 %v26720_v42  ;;  %23049 = vmatpush3.bf16.msra.mxu1 %v26720_v42 }
0x27d1   : > { %20524 = vmatprep.subr.mxu0 %v23705_v52  ;;  %20641 = vmatprep.subr.mxu1 %v23705_v52 }
0x27d4   : > { %20525 = vmatpush3.msra.mxu0 %v26741_v48  ;;  %20642 = vmatpush3.msra.mxu1 %v26741_v48  ;;  %v11609_v48 = vld [vmem:[%s28154_s11] sm:$0xf] }
0x27d5   : > { %20527 = vmatmul.mubr.msk.f32.vlgmr.msra.gmra.mrb[166].mxu0 %vm1539_vm6, %v26868_v31  ;;  %22996 = vmatprep.subr.bf16.mxu0 %v23703_v3  ;;  %v17617_v31 = vld [vmem:[%s28234_s23 + $0x28] sm:$0xff] }
0x27d6   : > { %20644 = vmatmul.mubr.msk.f32.vlgmr.msra.gmra.mrb[166].mxu1 %vm1539_vm6, %v27066_v1  ;;  %23050 = vmatprep.subr.bf16.mxu1 %v23703_v3 }
0x27d7   : > { %22998 = vmatpush3.bf16.msra.mxu0 %v26743_v51  ;;  %23052 = vmatpush3.bf16.msra.mxu1 %v26743_v51  ;;  %v11683_v51 = vld [vmem:[%s28155_s12] sm:$0xf] }
0x27d8   : > { %22999 = vmatprep.subr.bf16.mxu0 %v23703_v3  ;;  %23053 = vmatprep.subr.bf16.mxu1 %v23703_v3 }
0x27d9   : > { %20539 = vmatprep.mubr.msk.f32.mxu0 %vm23704_vm1, %v23705_v52  ;;  %20656 = vmatprep.mubr.msk.f32.mxu1 %vm23704_vm1, %v23705_v52 }
0x27db   : > { %23001 = vmatpush3.bf16.msra.mxu0 %v26763_v59  ;;  %23055 = vmatpush3.bf16.msra.mxu1 %v26763_v59  ;;  %v11923_v59 = vld [vmem:[%s28234_s23 + $0x8] sm:$0xff] }
0x27dc   : > { %20537 = vmatprep.subr.mxu0 %v23705_v52  ;;  %20654 = vmatprep.subr.mxu1 %v23705_v52  ;;  %v27172_v33 = vpack.c.bf16 %v11923_v59, %v11922_v50  ;;  %v27472_v50 = vld [vmem:[#allocation2 + $0x70] sm:$0xff] }
0x27df   : > { %20538 = vmatpush3.msra.mxu0 %v26784_v37  ;;  %20655 = vmatpush3.msra.mxu1 %v26784_v37 }
0x27e0   : > { %20540 = vmatmul.mubr.msk.f32.vlgmr.msra.gmra.mrb[166].mxu0 %vm1539_vm6, %v27022_v25  ;;  %23002 = vmatprep.subr.bf16.mxu0 %v23703_v3 }
0x27e1   : > { %20657 = vmatmul.mubr.msk.f32.vlgmr.msra.gmra.mrb[166].mxu1 %vm1539_vm6, %v27088_v10  ;;  %23056 = vmatprep.subr.bf16.mxu1 %v23703_v3 }
0x27e2   : > { %23004 = vmatpush3.bf16.msra.mxu0 %v26786_v62  ;;  %23058 = vmatpush3.bf16.msra.mxu1 %v26786_v62 }
0x27e3   : > { %23005 = vmatprep.subr.bf16.mxu0 %v23703_v3  ;;  %23059 = vmatprep.subr.bf16.mxu1 %v23703_v3 }
0x27e4   : > { %20552 = vmatprep.mubr.msk.f32.mxu0 %vm23704_vm1, %v23705_v52  ;;  %20669 = vmatprep.mubr.msk.f32.mxu1 %vm23704_vm1, %v23705_v52 }
0x27e6   : > { %23007 = vmatpush3.bf16.msra.mxu0 %v26806_v11  ;;  %23061 = vmatpush3.bf16.msra.mxu1 %v26806_v11 }
0x27e7   : > { %20550 = vmatprep.subr.mxu0 %v23705_v52  ;;  %20667 = vmatprep.subr.mxu1 %v23705_v52 }
0x27ea   : > { %20551 = vmatpush3.msra.mxu0 %v26827_v58  ;;  %20668 = vmatpush3.msra.mxu1 %v26827_v58 }
0x27eb   : > { %20553 = vmatmul.mubr.msk.f32.vlgmr.msra.gmra.mrb[166].mxu0 %vm1539_vm6, %v27044_v30  ;;  %23008 = vmatprep.subr.bf16.mxu0 %v23703_v3 }
0x27ec   : > { %20670 = vmatmul.mubr.msk.f32.vlgmr.msra.gmra.mrb[166].mxu1 %vm1539_vm6, %v27110_v39  ;;  %23062 = vmatprep.subr.bf16.mxu1 %v23703_v3 }
0x27ed   : > { %23010 = vmatpush3.bf16.msra.mxu0 %v26829_v20  ;;  %23064 = vmatpush3.bf16.msra.mxu1 %v26829_v20 }
0x27ee   : > { %23011 = vmatprep.subr.bf16.mxu0 %v23703_v3  ;;  %23065 = vmatprep.subr.bf16.mxu1 %v23703_v3 }
0x27ef   : > { %20565 = vmatprep.mubr.msk.f32.mxu0 %vm23704_vm1, %v23705_v52  ;;  %20682 = vmatprep.mubr.msk.f32.mxu1 %vm23704_vm1, %v23705_v52 }
0x27f1   : > { %23013 = vmatpush3.bf16.msra.mxu0 %v26849_v12  ;;  %23067 = vmatpush3.bf16.msra.mxu1 %v26849_v12  ;;  %v11925_v12 = vld [vmem:[%s28234_s23 + $0x18] sm:$0xff] }
0x27f2   : > { %20563 = vmatprep.subr.mxu0 %v23705_v52  ;;  %20680 = vmatprep.subr.mxu1 %v23705_v52 }
0x27f5   : > { %20564 = vmatpush3.msra.mxu0 %v26864_v47  ;;  %20681 = vmatpush3.msra.mxu1 %v26864_v47  ;;  %v27184_v47 = vpack.c.bf16 %v11925_v12, %v11924_v55  ;;  %v17662_v55 = vld [vmem:[%s28234_s23 + $0x158] sm:$0xff] }
0x27f6   : > { %20566 = vmatmul.mubr.msk.f32.vlgmr.msra.gmra.mrb[166].mxu0 %vm1539_vm6, %v27066_v1  ;;  %20683 = vmatmul.mubr.msk.f32.vlgmr.msra.gmra.mrb[166].mxu1 %vm1539_vm6, %v27129_v8  ;;  %v27515_v12 = vld [vmem:[#allocation2 + $0x71] sm:$0xff] }
0x27f7   : > { %20685 = vmatprep.subr.mxu0 %v23705_v52  ;;  %20690 = vmatprep.subr.mxu1 %v23705_v52 }
0x27f8   : > { %20687 = vmatprep.mubr.msk.f32.mxu0 %vm23704_vm1, %v23705_v52  ;;  %20692 = vmatprep.mubr.msk.f32.mxu1 %vm23704_vm1, %v23705_v52 }
0x2867   : > { %v10147_v61 = vpop.f32.mrb[164].mxu0  ;;  %v10221_v18 = vpop.f32.mrb[164].mxu1 }
0x2868   : > { %v10225_v0 = vmax.f32 %v10147_v61, %v10221_v18  ;;  %v20439_v6 = vpop.f32.mrb[165].mxu0  ;;  %v20450_v21 = vpop.f32.mrb[165].mxu1  ;;  %v17644_v61 = vld [vmem:[%s28234_s23 + $0xe0] sm:$0xff] }
0x2869   : > { %v27386_v18 = vld [vmem:[#allocation2 + $0x61] sm:$0xff]  ;;  %v17648_v6 = vld [vmem:[%s28234_s23 + $0xf8] sm:$0xff] }
0x286a   : > { %v10226_v53 = vmax.f32 %v10225_v0, 0.0  ;;  %v27414_v21 = vld [vmem:[%s28234_s23 + $0xe8] sm:$0xff] }
0x286c   : > { %10228 = vst.msk [vmem:[#allocation3] sm:$0xf] %vm10227_vm8, %v10226_v53 }
0x28c9   : > { %v10952_v46 = vpop.f32.mrb[166].mxu0  ;;  %v11603_v27 = vpop.f32.mrb[166].mxu1 }
0x28ca   : > { %v23424_v28 = vadd.f32 %v26885_v4, %v10952_v46  ;;  %v23425_v34 = vadd.f32 %v26885_v4, %v11603_v27  ;;  %v20567_v44 = vpop.f32.mrb[167].mxu0  ;;  %v20684_v14 = vpop.f32.mrb[167].mxu1  ;;  %v27207_v4 = vpack.c.bf16 %v17618_v19, %v17617_v31  ;;  %v17649_v46 = vld [vmem:[%s28234_s23 + $0x100] sm:$0xff]  ;;  %v17650_v27 = vld [vmem:[%s28234_s23 + $0x108] sm:$0xff] }
0x28cb   : > { %v17654_v44 = vld [vmem:[%s28234_s23 + $0x120] sm:$0xff]  ;;  %v27457_v14 = vld [vmem:[%s28234_s23 + $0x110] sm:$0xff] }
0x28cc   : > { %v11608_v42 = vmax.f32 %v23424_v28, %v23425_v34  ;;  %v27429_v28 = vld [vmem:[#allocation2 + $0x62] sm:$0xff]  ;;  %v27436_v34 = vpack.c.bf16 %v17650_v27, %v17649_v46 }
0x28cd   : > { %v27537_v19 = vld [vmem:[%s28234_s23 + $0x160] sm:$0xff] }
0x28ce   : > { %20686 = vmatpush3.msra.mxu0 %v11608_v42  ;;  %20691 = vmatpush3.msra.mxu1 %v11608_v42  ;;  %v13367_v46 = vld [vmem:[%s28155_s12] sm:$0xf] }
0x28cf   : > { %20688 = vmatmul.mubr.msk.f32.vlgmr.msra.gmra.mrb[168].mxu0 %vm9925_vm7, %v11609_v48  ;;  %20693 = vmatmul.mubr.msk.f32.vlgmr.msra.gmra.mrb[168].mxu1 %vm9925_vm7, %v11683_v51  ;;  %v17655_v48 = vld [vmem:[%s28234_s23 + $0x128] sm:$0xff]  ;;  %v17656_v51 = vld [vmem:[%s28234_s23 + $0x130] sm:$0xff] }
0x28d0   : > { %23068 = vmatprep.subr.bf16.mxu0 %v23703_v3  ;;  %23074 = vmatprep.subr.bf16.mxu1 %v23703_v3  ;;  %v27479_v59 = vpack.c.bf16 %v17656_v51, %v17655_v48  ;;  %v13445_v48 = vld [vmem:[%s28156_s13 + $0x18] sm:$0xff]  ;;  %v13521_v51 = vld [vmem:[%s28157_s14 + $0x10] sm:$0xff] }
0x28d1   : > { %23070 = vmatpush3.bf16.msra.mxu0 %v26907_v36  ;;  %23076 = vmatpush3.bf16.msra.mxu1 %v26909_v35  ;;  %v27289_v36 = vpack.c.bf16 %v17630_v49, %v17629_v40  ;;  %v17631_v35 = vld [vmem:[%s28234_s23 + $0x88] sm:$0xff]  ;;  %v27557_v49 = vld [vmem:[%s28153_s10] ss:$0 sm:$0xff] }
0x28d2   : > { %23071 = vmatprep.subr.bf16.mxu0 %v23703_v3  ;;  %23077 = vmatprep.subr.bf16.mxu1 %v23703_v3  ;;  %v27307_v29 = vpack.c.bf16 %v17632_v15, %v17631_v35 }
0x28d3   : > { %20703 = vmatprep.mubr.msk.f32.mxu0 %vm23704_vm1, %v23705_v52  ;;  %20714 = vmatprep.mubr.msk.f32.mxu1 %vm23704_vm1, %v23705_v52 }
0x28d5   : > { %23073 = vmatpush3.bf16.msra.mxu0 %v26929_v17  ;;  %23079 = vmatpush3.bf16.msra.mxu1 %v26931_v13  ;;  %v27328_v17 = vld [vmem:[%s28234_s23 + $0x98] sm:$0xff]  ;;  %v27330_v13 = vpack.c.bf16 %v17636_v26, %v17635_v7  ;;  %v13442_v7 = vld [vmem:[%s28156_s13] sm:$0xff] }
0x28d6   : > { %23080 = vmatprep.subr.bf16.mxu0 %v23703_v3  ;;  %23134 = vmatprep.subr.bf16.mxu1 %v23703_v3 }
0x29a2   : > { %v11679_v37 = vpop.f32.mrb[168].mxu0  ;;  %v11753_v62 = vpop.f32.mrb[168].mxu1 }
0x29a3   : > { %v11757_v11 = vmax.f32 %v11679_v37, %v11753_v62  ;;  %v20689_v58 = vpop.f32.mrb[169].mxu0  ;;  %v20694_v20 = vpop.f32.mrb[169].mxu1  ;;  %v17659_v37 = vld [vmem:[%s28234_s23 + $0x140] sm:$0xff]  ;;  %v17660_v62 = vld [vmem:[%s28234_s23 + $0x148] sm:$0xff] }
0x29a4   : > { %v27502_v58 = vpack.c.bf16 %v17660_v62, %v17659_v37  ;;  %v17661_v20 = vld [vmem:[%s28234_s23 + $0x150] sm:$0xff]  ;;  %v13522_v37 = vld [vmem:[%s28157_s14 + $0x18] sm:$0xff] }
0x29a5   : > { %20704 = vmatmul.mubr.msk.f32.vlgmr.msra.gmra.mrb[170].mxu0 %vm795_vm0, %v11757_v11  ;;  %20715 = vmatmul.mubr.msk.f32.vlgmr.msra.gmra.mrb[170].mxu1 %vm795_vm0, %v11757_v11  ;;  %v27500_v11 = vld [vmem:[%s28234_s23 + $0x138] sm:$0xff]  ;;  %v27522_v31 = vpack.c.bf16 %v17662_v55, %v17661_v20  ;;  %v27603_v20 = vpack.c.bf16 %v13522_v37, %v13521_v51  ;;  %v17759_v51 = vld [vmem:[%s28158_s15 + $0x68] sm:$0xff] }
0x29a6   : > { %23082 = vmatpush3.bf16.msra.mxu0 %v27172_v33  ;;  %23136 = vmatpush3.bf16.msra.mxu1 %v27172_v33 }
0x29a7   : > { %23083 = vmatprep.subr.bf16.mxu0 %v23703_v3  ;;  %23137 = vmatprep.subr.bf16.mxu1 %v23703_v3 }
0x29a8   : > { %20727 = vmatprep.mubr.msk.f32.mxu0 %vm23704_vm1, %v23705_v52  ;;  %20844 = vmatprep.mubr.msk.f32.mxu1 %vm23704_vm1, %v23705_v52 }
0x29aa   : > { %23085 = vmatpush3.bf16.msra.mxu0 %v27184_v47  ;;  %23139 = vmatpush3.bf16.msra.mxu1 %v27184_v47 }
0x29ab   : > { %20725 = vmatprep.subr.mxu0 %v23705_v52  ;;  %20842 = vmatprep.subr.mxu1 %v23705_v52 }
0x29ae   : > { %20726 = vmatpush3.msra.mxu0 %v27205_v22  ;;  %20843 = vmatpush3.msra.mxu1 %v27205_v22 }
0x29af   : > { %20728 = vmatmul.mubr.msk.f32.vlgmr.msra.gmra.mrb[172].mxu0 %vm1539_vm6, %v27022_v25  ;;  %23086 = vmatprep.subr.bf16.mxu0 %v23703_v3  ;;  %v17642_v25 = vld [vmem:[%s28234_s23 + $0xd0] sm:$0xff] }
0x29b0   : > { %20845 = vmatmul.mubr.msk.f32.vlgmr.msra.gmra.mrb[172].mxu1 %vm1539_vm6, %v27088_v10  ;;  %23140 = vmatprep.subr.bf16.mxu1 %v23703_v3 }
0x29b1   : > { %23088 = vmatpush3.bf16.msra.mxu0 %v27207_v4  ;;  %23142 = vmatpush3.bf16.msra.mxu1 %v27207_v4 }
0x29b2   : > { %23089 = vmatprep.subr.bf16.mxu0 %v23703_v3  ;;  %23143 = vmatprep.subr.bf16.mxu1 %v23703_v3 }
0x29b3   : > { %20740 = vmatprep.mubr.msk.f32.mxu0 %vm23704_vm1, %v23705_v52  ;;  %20857 = vmatprep.mubr.msk.f32.mxu1 %vm23704_vm1, %v23705_v52 }
0x29b5   : > { %23091 = vmatpush3.bf16.msra.mxu0 %v27225_v60  ;;  %23145 = vmatpush3.bf16.msra.mxu1 %v27225_v60 }
0x29b6   : > { %20738 = vmatprep.subr.mxu0 %v23705_v52  ;;  %20855 = vmatprep.subr.mxu1 %v23705_v52 }
0x29b9   : > { %20739 = vmatpush3.msra.mxu0 %v27246_v9  ;;  %20856 = vmatpush3.msra.mxu1 %v27246_v9 }
0x29ba   : > { %20741 = vmatmul.mubr.msk.f32.vlgmr.msra.gmra.mrb[172].mxu0 %vm1539_vm6, %v27044_v30  ;;  %23092 = vmatprep.subr.bf16.mxu0 %v23703_v3  ;;  %v27371_v30 = vld [vmem:[%s28234_s23 + $0xc0] sm:$0xff] }
0x29bb   : > { %20858 = vmatmul.mubr.msk.f32.vlgmr.msra.gmra.mrb[172].mxu1 %vm1539_vm6, %v27110_v39  ;;  %23146 = vmatprep.subr.bf16.mxu1 %v23703_v3 }
0x29bc   : > { %23094 = vmatpush3.bf16.msra.mxu0 %v27248_v56  ;;  %23148 = vmatpush3.bf16.msra.mxu1 %v27248_v56 }
0x29bd   : > { %23095 = vmatprep.subr.bf16.mxu0 %v23703_v3  ;;  %23149 = vmatprep.subr.bf16.mxu1 %v23703_v3 }
0x29be   : > { %20753 = vmatprep.mubr.msk.f32.mxu0 %vm23704_vm1, %v23705_v52  ;;  %20870 = vmatprep.mubr.msk.f32.mxu1 %vm23704_vm1, %v23705_v52 }
0x29c0   : > { %23097 = vmatpush3.bf16.msra.mxu0 %v27266_v45  ;;  %23151 = vmatpush3.bf16.msra.mxu1 %v27266_v45 }
0x29c1   : > { %20751 = vmatprep.subr.mxu0 %v23705_v52  ;;  %20868 = vmatprep.subr.mxu1 %v23705_v52 }
0x29c4   : > { %20752 = vmatpush3.msra.mxu0 %v27287_v41  ;;  %20869 = vmatpush3.msra.mxu1 %v27287_v41 }
0x29c5   : > { %20754 = vmatmul.mubr.msk.f32.vlgmr.msra.gmra.mrb[172].mxu0 %vm1539_vm6, %v27066_v1  ;;  %23098 = vmatprep.subr.bf16.mxu0 %v23703_v3  ;;  %v27373_v1 = vpack.c.bf16 %v17642_v25, %v17641_v43  ;;  %v13443_v25 = vld [vmem:[%s28156_s13 + $0x8] sm:$0xff] }
0x29c6   : > { %20871 = vmatmul.mubr.msk.f32.vlgmr.msra.gmra.mrb[172].mxu1 %vm1539_vm6, %v27129_v8  ;;  %23152 = vmatprep.subr.bf16.mxu1 %v23703_v3  ;;  %v27579_v27 = vpack.c.bf16 %v13443_v25, %v13442_v7 }
0x29c7   : > { %23100 = vmatpush3.bf16.msra.mxu0 %v27289_v36  ;;  %23154 = vmatpush3.bf16.msra.mxu1 %v27289_v36 }
0x29c8   : > { %23101 = vmatprep.subr.bf16.mxu0 %v23703_v3  ;;  %23155 = vmatprep.subr.bf16.mxu1 %v23703_v3 }
0x29c9   : > { %20766 = vmatprep.mubr.msk.f32.mxu0 %vm23704_vm1, %v23705_v52  ;;  %20883 = vmatprep.mubr.msk.f32.mxu1 %vm23704_vm1, %v23705_v52 }
0x29cb   : > { %23103 = vmatpush3.bf16.msra.mxu0 %v27307_v29  ;;  %23157 = vmatpush3.bf16.msra.mxu1 %v27307_v29 }
0x29cc   : > { %20764 = vmatprep.subr.mxu0 %v23705_v52  ;;  %20881 = vmatprep.subr.mxu1 %v23705_v52 }
0x29cf   : > { %20765 = vmatpush3.msra.mxu0 %v27328_v17  ;;  %20882 = vmatpush3.msra.mxu1 %v27328_v17 }
0x29d0   : > { %20767 = vmatmul.mubr.msk.f32.vlgmr.msra.gmra.mrb[172].mxu0 %vm1539_vm6, %v27088_v10  ;;  %23104 = vmatprep.subr.bf16.mxu0 %v23703_v3  ;;  %v17643_v10 = vld [vmem:[%s28234_s23 + $0xd8] sm:$0xff] }
0x29d1   : > { %20884 = vmatmul.mubr.msk.f32.vlgmr.msra.gmra.mrb[172].mxu1 %vm1539_vm6, %v27343_v63  ;;  %23158 = vmatprep.subr.bf16.mxu1 %v23703_v3  ;;  %v27393_v0 = vpack.c.bf16 %v17644_v61, %v17643_v10  ;;  %v13519_v10 = vld [vmem:[%s28157_s14] sm:$0xff]  ;;  %v13520_v61 = vld [vmem:[%s28157_s14 + $0x8] sm:$0xff] }
0x29d2   : > { %23106 = vmatpush3.bf16.msra.mxu0 %v27330_v13  ;;  %23160 = vmatpush3.bf16.msra.mxu1 %v27330_v13 }
0x29d3   : > { %23107 = vmatprep.subr.bf16.mxu0 %v23703_v3  ;;  %23161 = vmatprep.subr.bf16.mxu1 %v23703_v3 }
0x29d4   : > { %20779 = vmatprep.mubr.msk.f32.mxu0 %vm23704_vm1, %v23705_v52  ;;  %20896 = vmatprep.mubr.msk.f32.mxu1 %vm23704_vm1, %v23705_v52 }
0x29d6   : > { %23109 = vmatpush3.bf16.msra.mxu0 %v27350_v5  ;;  %23163 = vmatpush3.bf16.msra.mxu1 %v27350_v5 }
0x29d7   : > { %20777 = vmatprep.subr.mxu0 %v23705_v52  ;;  %20894 = vmatprep.subr.mxu1 %v23705_v52 }
0x29da   : > { %20778 = vmatpush3.msra.mxu0 %v27371_v30  ;;  %20895 = vmatpush3.msra.mxu1 %v27371_v30 }
0x29db   : > { %20780 = vmatmul.mubr.msk.f32.vlgmr.msra.gmra.mrb[172].mxu0 %vm1539_vm6, %v27110_v39  ;;  %23110 = vmatprep.subr.bf16.mxu0 %v23703_v3  ;;  %v17647_v39 = vld [vmem:[%s28234_s23 + $0xf0] sm:$0xff] }
0x29dc   : > { %20897 = vmatmul.mubr.msk.f32.vlgmr.msra.gmra.mrb[172].mxu1 %vm1539_vm6, %v27386_v18  ;;  %23164 = vmatprep.subr.bf16.mxu1 %v23703_v3  ;;  %v27416_v53 = vpack.c.bf16 %v17648_v6, %v17647_v39  ;;  %v13293_v6 = vld [vmem:[%s28154_s11] sm:$0xf] }
0x29dd   : > { %23112 = vmatpush3.bf16.msra.mxu0 %v27373_v1  ;;  %23166 = vmatpush3.bf16.msra.mxu1 %v27373_v1 }
0x29de   : > { %23113 = vmatprep.subr.bf16.mxu0 %v23703_v3  ;;  %23167 = vmatprep.subr.bf16.mxu1 %v23703_v3 }
0x29df   : > { %20792 = vmatprep.mubr.msk.f32.mxu0 %vm23704_vm1, %v23705_v52  ;;  %20909 = vmatprep.mubr.msk.f32.mxu1 %vm23704_vm1, %v23705_v52 }
0x29e1   : > { %23115 = vmatpush3.bf16.msra.mxu0 %v27393_v0  ;;  %23169 = vmatpush3.bf16.msra.mxu1 %v27393_v0 }
0x29e2   : > { %20790 = vmatprep.subr.mxu0 %v23705_v52  ;;  %20907 = vmatprep.subr.mxu1 %v23705_v52 }
0x29e5   : > { %20791 = vmatpush3.msra.mxu0 %v27414_v21  ;;  %20908 = vmatpush3.msra.mxu1 %v27414_v21 }
0x29e6   : > { %20793 = vmatmul.mubr.msk.f32.vlgmr.msra.gmra.mrb[172].mxu0 %vm1539_vm6, %v27129_v8  ;;  %23116 = vmatprep.subr.bf16.mxu0 %v23703_v3  ;;  %v17653_v8 = vld [vmem:[%s28234_s23 + $0x118] sm:$0xff] }
0x29e7   : > { %20910 = vmatmul.mubr.msk.f32.vlgmr.msra.gmra.mrb[172].mxu1 %vm1539_vm6, %v27429_v28  ;;  %23170 = vmatprep.subr.bf16.mxu1 %v23703_v3  ;;  %v27459_v42 = vpack.c.bf16 %v17654_v44, %v17653_v8  ;;  %v27581_v8 = vpack.c.bf16 %v13520_v61, %v13519_v10  ;;  %v13444_v44 = vld [vmem:[%s28156_s13 + $0x10] sm:$0xff]  ;;  %v17752_v10 = vld [vmem:[%s28158_s15 + $0x40] sm:$0xff]  ;;  %v17753_v61 = vld [vmem:[%s28158_s15 + $0x48] sm:$0xff] }
0x29e8   : > { %23118 = vmatpush3.bf16.msra.mxu0 %v27416_v53  ;;  %23172 = vmatpush3.bf16.msra.mxu1 %v27416_v53  ;;  %v27601_v62 = vpack.c.bf16 %v13445_v48, %v13444_v44  ;;  %v17758_v48 = vld [vmem:[%s28158_s15 + $0x60] sm:$0xff] }
0x29e9   : > { %23119 = vmatprep.subr.bf16.mxu0 %v23703_v3  ;;  %23173 = vmatprep.subr.bf16.mxu1 %v23703_v3  ;;  %v23339_v37 = vpack.c.bf16 %v17759_v51, %v17758_v48  ;;  %v16962_v48 = vld [vmem:[%s28235_s30] sm:$0xff]  ;;  %v16963_v51 = vld [vmem:[%s28236_s3 + $0x8] sm:$0xff] }
0x29ea   : > { %20805 = vmatprep.mubr.msk.f32.mxu0 %vm23704_vm1, %v23705_v52  ;;  %20922 = vmatprep.mubr.msk.f32.mxu1 %vm23704_vm1, %v23705_v52 }
0x29ec   : > { %23121 = vmatpush3.bf16.msra.mxu0 %v27436_v34  ;;  %23175 = vmatpush3.bf16.msra.mxu1 %v27436_v34 }
0x29ed   : > { %20803 = vmatprep.subr.mxu0 %v23705_v52  ;;  %20920 = vmatprep.subr.mxu1 %v23705_v52 }
0x29f0   : > { %20804 = vmatpush3.msra.mxu0 %v27457_v14  ;;  %20921 = vmatpush3.msra.mxu1 %v27457_v14 }
0x29f1   : > { %20806 = vmatmul.mubr.msk.f32.vlgmr.msra.gmra.mrb[172].mxu0 %vm1539_vm6, %v27343_v63  ;;  %23122 = vmatprep.subr.bf16.mxu0 %v23703_v3 }
0x29f2   : > { %20923 = vmatmul.mubr.msk.f32.vlgmr.msra.gmra.mrb[172].mxu1 %vm1539_vm6, %v27472_v50  ;;  %23176 = vmatprep.subr.bf16.mxu1 %v23703_v3 }
0x29f3   : > { %23124 = vmatpush3.bf16.msra.mxu0 %v27459_v42  ;;  %23178 = vmatpush3.bf16.msra.mxu1 %v27459_v42 }
0x29f4   : > { %23125 = vmatprep.subr.bf16.mxu0 %v23703_v3  ;;  %23179 = vmatprep.subr.bf16.mxu1 %v23703_v3 }
0x29f5   : > { %20818 = vmatprep.mubr.msk.f32.mxu0 %vm23704_vm1, %v23705_v52  ;;  %20935 = vmatprep.mubr.msk.f32.mxu1 %vm23704_vm1, %v23705_v52 }
0x29f7   : > { %23127 = vmatpush3.bf16.msra.mxu0 %v27479_v59  ;;  %23181 = vmatpush3.bf16.msra.mxu1 %v27479_v59 }
0x29f8   : > { %20816 = vmatprep.subr.mxu0 %v23705_v52  ;;  %20933 = vmatprep.subr.mxu1 %v23705_v52 }
0x29fb   : > { %20817 = vmatpush3.msra.mxu0 %v27500_v11  ;;  %20934 = vmatpush3.msra.mxu1 %v27500_v11 }
0x29fc   : > { %20819 = vmatmul.mubr.msk.f32.vlgmr.msra.gmra.mrb[172].mxu0 %vm1539_vm6, %v27386_v18  ;;  %23128 = vmatprep.subr.bf16.mxu0 %v23703_v3 }
0x29fd   : > { %20936 = vmatmul.mubr.msk.f32.vlgmr.msra.gmra.mrb[172].mxu1 %vm1539_vm6, %v27515_v12  ;;  %23182 = vmatprep.subr.bf16.mxu1 %v23703_v3 }
0x29fe   : > { %23130 = vmatpush3.bf16.msra.mxu0 %v27502_v58  ;;  %23184 = vmatpush3.bf16.msra.mxu1 %v27502_v58 }
0x29ff   : > { %23131 = vmatprep.subr.bf16.mxu0 %v23703_v3  ;;  %23185 = vmatprep.subr.bf16.mxu1 %v23703_v3 }
0x2a00   : > { %20831 = vmatprep.mubr.msk.f32.mxu0 %vm23704_vm1, %v23705_v52  ;;  %20948 = vmatprep.mubr.msk.f32.mxu1 %vm23704_vm1, %v23705_v52 }
0x2a02   : > { %23133 = vmatpush3.bf16.msra.mxu0 %v27522_v31  ;;  %23187 = vmatpush3.bf16.msra.mxu1 %v27522_v31 }
0x2a03   : > { %20829 = vmatprep.subr.mxu0 %v23705_v52  ;;  %20946 = vmatprep.subr.mxu1 %v23705_v52 }
0x2a06   : > { %20830 = vmatpush3.msra.mxu0 %v27537_v19  ;;  %20947 = vmatpush3.msra.mxu1 %v27537_v19 }
0x2a07   : > { %20832 = vmatmul.mubr.msk.f32.vlgmr.msra.gmra.mrb[172].mxu0 %vm1539_vm6, %v27429_v28  ;;  %20949 = vmatmul.mubr.msk.f32.vlgmr.msra.gmra.mrb[172].mxu1 %vm1539_vm6, %v27541_v54 }
0x2a08   : > { %20951 = vmatprep.subr.mxu0 %v23705_v52  ;;  %20956 = vmatprep.subr.mxu1 %v23705_v52 }
0x2a09   : > { %20953 = vmatprep.mubr.msk.f32.mxu0 %vm23704_vm1, %v23705_v52  ;;  %20958 = vmatprep.mubr.msk.f32.mxu1 %vm23704_vm1, %v23705_v52 }
0x2a78   : > { %v11831_v57 = vpop.f32.mrb[170].mxu0  ;;  %v11905_v2 = vpop.f32.mrb[170].mxu1 }
0x2a79   : > { %v11909_v38 = vmax.f32 %v11831_v57, %v11905_v2  ;;  %v20705_v23 = vpop.f32.mrb[171].mxu0  ;;  %v20716_v16 = vpop.f32.mrb[171].mxu1 }
0x2a7b   : > { %v11910_v40 = vmax.f32 %v11909_v38, 0.0 }
0x2a7d   : > { %11912 = vst.msk [vmem:[#allocation3 + $0x4] sm:$0xf] %vm10227_vm8, %v11910_v40  ;;  %v17746_v40 = vld [vmem:[%s28158_s15 + $0x20] sm:$0xff] }
0x2a84   : > { %v15523_v16 = vld [vmem:[#allocation3 + $0x4] sm:$0x3]  ;;  %v15679_v25 = vld [vmem:[#allocation3 + $0x6] sm:$0x3] }
0x2a85   : > { %v15601_v7 = vld [vmem:[#allocation3 + $0x5] sm:$0x3] }
0x2ada   : > { %v12636_v35 = vpop.f32.mrb[172].mxu0  ;;  %v13287_v15 = vpop.f32.mrb[172].mxu1 }
0x2adb   : > { %v23426_v26 = vadd.f32 %v27557_v49, %v12636_v35  ;;  %v23427_v32 = vadd.f32 %v27557_v49, %v13287_v15  ;;  %v20833_v24 = vpop.f32.mrb[173].mxu0  ;;  %v20950_v43 = vpop.f32.mrb[173].mxu1  ;;  %v15367_v15 = vld [vmem:[#allocation3 + $0x1] sm:$0x3] }
0x2adc   : > { %v15445_v43 = vld [vmem:[#allocation3 + $0x2] sm:$0x3] }
0x2add   : > { %v13292_v39 = vmax.f32 %v23426_v26, %v23427_v32  ;;  %v17749_v26 = vld [vmem:[%s28158_s15 + $0x30] sm:$0xff]  ;;  %v17750_v32 = vld [vmem:[%s28158_s15 + $0x38] sm:$0xff] }
0x2ade   : > { %v23330_v24 = vpack.c.bf16 %v17750_v32, %v17749_v26  ;;  %v16886_v32 = vld [vmem:[%s28164_s21 + $0x60] sm:$0xff] }
0x2adf   : > { %20952 = vmatpush3.msra.mxu0 %v13292_v39  ;;  %20957 = vmatpush3.msra.mxu1 %v13292_v39  ;;  %v23333_v39 = vpack.c.bf16 %v17753_v61, %v17752_v10 }
0x2ae0   : > { %20954 = vmatmul.mubr.msk.f32.vlgmr.msra.gmra.mrb[174].mxu0 %vm9925_vm7, %v13293_v6  ;;  %20959 = vmatmul.mubr.msk.f32.vlgmr.msra.gmra.mrb[174].mxu1 %vm9925_vm7, %v13367_v46  ;;  %v17755_v46 = vld [vmem:[%s28158_s15 + $0x50] sm:$0xff] }
0x2ae1   : > { %23188 = vmatprep.subr.bf16.mxu0 %v23703_v3  ;;  %23194 = vmatprep.subr.bf16.mxu1 %v23703_v3 }
0x2ae2   : > { %23190 = vmatpush3.bf16.msra.mxu0 %v27579_v27  ;;  %23196 = vmatpush3.bf16.msra.mxu1 %v27581_v8 }
0x2ae3   : > { %23191 = vmatprep.subr.bf16.mxu0 %v23703_v3  ;;  %23197 = vmatprep.subr.bf16.mxu1 %v23703_v3 }
0x2ae4   : > { %20969 = vmatprep.mubr.msk.f32.mxu0 %vm23704_vm1, %v23705_v52  ;;  %20980 = vmatprep.mubr.msk.f32.mxu1 %vm23704_vm1, %v23705_v52 }
0x2ae6   : > { %23193 = vmatpush3.bf16.msra.mxu0 %v27601_v62  ;;  %23199 = vmatpush3.bf16.msra.mxu1 %v27603_v20 }
0x2ae7   : > { %23200 = vmatprep.subr.bf16.mxu0 %v23703_v3  ;;  %23254 = vmatprep.subr.bf16.mxu1 %v23703_v3 }
0x2bb3   : > { %v13363_v55 = vpop.f32.mrb[174].mxu0  ;;  %v13437_v57 = vpop.f32.mrb[174].mxu1 }
0x2bb4   : > { %v13441_v2 = vmax.f32 %v13363_v55, %v13437_v57  ;;  %v20955_v38 = vpop.f32.mrb[175].mxu0  ;;  %v20960_v23 = vpop.f32.mrb[175].mxu1  ;;  %v17762_v55 = vld [vmem:[%s28158_s15 + $0x78] sm:$0xff] }
0x2bb5   : > { %v17765_v38 = vld [vmem:[%s28158_s15 + $0x88] sm:$0xff] }
0x2bb6   : > { %20970 = vmatmul.mubr.msk.f32.vlgmr.msra.gmra.mrb[176].mxu0 %vm795_vm0, %v13441_v2  ;;  %20981 = vmatmul.mubr.msk.f32.vlgmr.msra.gmra.mrb[176].mxu1 %vm795_vm0, %v13441_v2  ;;  %v17764_v2 = vld [vmem:[%s28158_s15 + $0x80] sm:$0xff] }
0x2bb7   : > { %23202 = vmatpush3.bf16.msra.mxu0 %v27172_v33  ;;  %23256 = vmatpush3.bf16.msra.mxu1 %v27172_v33  ;;  %v14085_v33 = vld [vmem:[#allocation2 + $0x80] sm:$0xff]  ;;  %v23345_v23 = vpack.c.bf16 %v17765_v38, %v17764_v2  ;;  %v16968_v38 = vld [vmem:[%s28236_s3 + $0x30] sm:$0xff] }
0x2bb8   : > { %23203 = vmatprep.subr.bf16.mxu0 %v23703_v3  ;;  %23257 = vmatprep.subr.bf16.mxu1 %v23703_v3 }
0x2bb9   : > { %20993 = vmatprep.mubr.msk.f32.mxu0 %vm23704_vm1, %v23705_v52  ;;  %21110 = vmatprep.mubr.msk.f32.mxu1 %vm23704_vm1, %v23705_v52 }
0x2bbb   : > { %23205 = vmatpush3.bf16.msra.mxu0 %v27184_v47  ;;  %23259 = vmatpush3.bf16.msra.mxu1 %v27184_v47  ;;  %v14165_v47 = vld [vmem:[#allocation2 + $0x81] sm:$0xff] }
0x2bbc   : > { %20991 = vmatprep.subr.mxu0 %v23705_v52  ;;  %21108 = vmatprep.subr.mxu1 %v23705_v52 }
0x2bbf   : > { %20992 = vmatpush3.msra.mxu0 %v27205_v22  ;;  %21109 = vmatpush3.msra.mxu1 %v27205_v22  ;;  %v14245_v22 = vld [vmem:[#allocation2 + $0x82] sm:$0xff] }
0x2bc0   : > { %20994 = vmatmul.mubr.msk.f32.vlgmr.msra.gmra.mrb[178].mxu0 %vm1539_vm6, %v27343_v63  ;;  %23206 = vmatprep.subr.bf16.mxu0 %v23703_v3 }
0x2bc1   : > { %21111 = vmatmul.mubr.msk.f32.vlgmr.msra.gmra.mrb[178].mxu1 %vm1539_vm6, %v27472_v50  ;;  %23260 = vmatprep.subr.bf16.mxu1 %v23703_v3 }
0x2bc2   : > { %23208 = vmatpush3.bf16.msra.mxu0 %v27207_v4  ;;  %23262 = vmatpush3.bf16.msra.mxu1 %v27207_v4  ;;  %v14751_v4 = vld [vmem:[#allocation2 + $0x90] sm:$0xff] }
0x2bc3   : > { %23209 = vmatprep.subr.bf16.mxu0 %v23703_v3  ;;  %23263 = vmatprep.subr.bf16.mxu1 %v23703_v3 }
0x2bc4   : > { %21006 = vmatprep.mubr.msk.f32.mxu0 %vm23704_vm1, %v23705_v52  ;;  %21123 = vmatprep.mubr.msk.f32.mxu1 %vm23704_vm1, %v23705_v52 }
0x2bc6   : > { %23211 = vmatpush3.bf16.msra.mxu0 %v27225_v60  ;;  %23265 = vmatpush3.bf16.msra.mxu1 %v27225_v60  ;;  %v14826_v60 = vld [vmem:[#allocation2 + $0x91] sm:$0xff] }
0x2bc7   : > { %21004 = vmatprep.subr.mxu0 %v23705_v52  ;;  %21121 = vmatprep.subr.mxu1 %v23705_v52 }
0x2bca   : > { %21005 = vmatpush3.msra.mxu0 %v27246_v9  ;;  %21122 = vmatpush3.msra.mxu1 %v27246_v9  ;;  %v14901_v9 = vld [vmem:[#allocation2 + $0x92] sm:$0xff] }
0x2bcb   : > { %21007 = vmatmul.mubr.msk.f32.vlgmr.msra.gmra.mrb[178].mxu0 %vm1539_vm6, %v27386_v18  ;;  %23212 = vmatprep.subr.bf16.mxu0 %v23703_v3 }
0x2bcc   : > { %21124 = vmatmul.mubr.msk.f32.vlgmr.msra.gmra.mrb[178].mxu1 %vm1539_vm6, %v27515_v12  ;;  %23266 = vmatprep.subr.bf16.mxu1 %v23703_v3 }
0x2bcd   : > { %23214 = vmatpush3.bf16.msra.mxu0 %v27248_v56  ;;  %23268 = vmatpush3.bf16.msra.mxu1 %v27248_v56 }
0x2bce   : > { %23215 = vmatprep.subr.bf16.mxu0 %v23703_v3  ;;  %23269 = vmatprep.subr.bf16.mxu1 %v23703_v3 }
0x2bcf   : > { %21019 = vmatprep.mubr.msk.f32.mxu0 %vm23704_vm1, %v23705_v52  ;;  %21136 = vmatprep.mubr.msk.f32.mxu1 %vm23704_vm1, %v23705_v52 }
0x2bd1   : > { %23217 = vmatpush3.bf16.msra.mxu0 %v27266_v45  ;;  %23271 = vmatpush3.bf16.msra.mxu1 %v27266_v45 }
0x2bd2   : > { %21017 = vmatprep.subr.mxu0 %v23705_v52  ;;  %21134 = vmatprep.subr.mxu1 %v23705_v52 }
0x2bd5   : > { %21018 = vmatpush3.msra.mxu0 %v27287_v41  ;;  %21135 = vmatpush3.msra.mxu1 %v27287_v41 }
0x2bd6   : > { %21020 = vmatmul.mubr.msk.f32.vlgmr.msra.gmra.mrb[178].mxu0 %vm1539_vm6, %v27429_v28  ;;  %23218 = vmatprep.subr.bf16.mxu0 %v23703_v3  ;;  %v15290_v28 = vld [vmem:[%s28158_s15] sm:$0xff] }
0x2bd7   : > { %21137 = vmatmul.mubr.msk.f32.vlgmr.msra.gmra.mrb[178].mxu1 %vm1539_vm6, %v27541_v54  ;;  %23272 = vmatprep.subr.bf16.mxu1 %v23703_v3 }
0x2bd8   : > { %23220 = vmatpush3.bf16.msra.mxu0 %v27289_v36  ;;  %23274 = vmatpush3.bf16.msra.mxu1 %v27289_v36 }
0x2bd9   : > { %23221 = vmatprep.subr.bf16.mxu0 %v23703_v3  ;;  %23275 = vmatprep.subr.bf16.mxu1 %v23703_v3 }
0x2bda   : > { %21032 = vmatprep.mubr.msk.f32.mxu0 %vm23704_vm1, %v23705_v52  ;;  %21149 = vmatprep.mubr.msk.f32.mxu1 %vm23704_vm1, %v23705_v52 }
0x2bdc   : > { %23223 = vmatpush3.bf16.msra.mxu0 %v27307_v29  ;;  %23277 = vmatpush3.bf16.msra.mxu1 %v27307_v29 }
0x2bdd   : > { %21030 = vmatprep.subr.mxu0 %v23705_v52  ;;  %21147 = vmatprep.subr.mxu1 %v23705_v52 }
0x2be0   : > { %21031 = vmatpush3.msra.mxu0 %v27328_v17  ;;  %21148 = vmatpush3.msra.mxu1 %v27328_v17 }
0x2be1   : > { %21033 = vmatmul.mubr.msk.f32.vlgmr.msra.gmra.mrb[178].mxu0 %vm1539_vm6, %v27472_v50  ;;  %23224 = vmatprep.subr.bf16.mxu0 %v23703_v3 }
0x2be2   : > { %21150 = vmatmul.mubr.msk.f32.vlgmr.msra.gmra.mrb[178].mxu1 %vm1539_vm6, %v14085_v33  ;;  %23278 = vmatprep.subr.bf16.mxu1 %v23703_v3 }
0x2be3   : > { %23226 = vmatpush3.bf16.msra.mxu0 %v27330_v13  ;;  %23280 = vmatpush3.bf16.msra.mxu1 %v27330_v13 }
0x2be4   : > { %23227 = vmatprep.subr.bf16.mxu0 %v23703_v3  ;;  %23281 = vmatprep.subr.bf16.mxu1 %v23703_v3 }
0x2be5   : > { %21045 = vmatprep.mubr.msk.f32.mxu0 %vm23704_vm1, %v23705_v52  ;;  %21162 = vmatprep.mubr.msk.f32.mxu1 %vm23704_vm1, %v23705_v52 }
0x2be7   : > { %23229 = vmatpush3.bf16.msra.mxu0 %v27350_v5  ;;  %23283 = vmatpush3.bf16.msra.mxu1 %v27350_v5 }
0x2be8   : > { %21043 = vmatprep.subr.mxu0 %v23705_v52  ;;  %21160 = vmatprep.subr.mxu1 %v23705_v52 }
0x2beb   : > { %21044 = vmatpush3.msra.mxu0 %v27371_v30  ;;  %21161 = vmatpush3.msra.mxu1 %v27371_v30 }
0x2bec   : > { %21046 = vmatmul.mubr.msk.f32.vlgmr.msra.gmra.mrb[178].mxu0 %vm1539_vm6, %v27515_v12  ;;  %23230 = vmatprep.subr.bf16.mxu0 %v23703_v3  ;;  %v17743_v12 = vld [vmem:[%s28158_s15 + $0x10] sm:$0xff] }
0x2bed   : > { %21163 = vmatmul.mubr.msk.f32.vlgmr.msra.gmra.mrb[178].mxu1 %vm1539_vm6, %v14165_v47  ;;  %23284 = vmatprep.subr.bf16.mxu1 %v23703_v3 }
0x2bee   : > { %23232 = vmatpush3.bf16.msra.mxu0 %v27373_v1  ;;  %23286 = vmatpush3.bf16.msra.mxu1 %v27373_v1 }
0x2bef   : > { %23233 = vmatprep.subr.bf16.mxu0 %v23703_v3  ;;  %23287 = vmatprep.subr.bf16.mxu1 %v23703_v3 }
0x2bf0   : > { %21058 = vmatprep.mubr.msk.f32.mxu0 %vm23704_vm1, %v23705_v52  ;;  %21175 = vmatprep.mubr.msk.f32.mxu1 %vm23704_vm1, %v23705_v52 }
0x2bf2   : > { %23235 = vmatpush3.bf16.msra.mxu0 %v27393_v0  ;;  %23289 = vmatpush3.bf16.msra.mxu1 %v27393_v0 }
0x2bf3   : > { %21056 = vmatprep.subr.mxu0 %v23705_v52  ;;  %21173 = vmatprep.subr.mxu1 %v23705_v52 }
0x2bf6   : > { %21057 = vmatpush3.msra.mxu0 %v27414_v21  ;;  %21174 = vmatpush3.msra.mxu1 %v27414_v21  ;;  %v14977_v21 = vld [vmem:[%s28154_s11] sm:$0xf] }
0x2bf7   : > { %21059 = vmatmul.mubr.msk.f32.vlgmr.msra.gmra.mrb[178].mxu0 %vm1539_vm6, %v27541_v54  ;;  %23236 = vmatprep.subr.bf16.mxu0 %v23703_v3  ;;  %v15289_v54 = vld [vmem:[#allocation3] sm:$0x3] }
0x2bf8   : > { %21176 = vmatmul.mubr.msk.f32.vlgmr.msra.gmra.mrb[178].mxu1 %vm1539_vm6, %v14245_v22  ;;  %23290 = vmatprep.subr.bf16.mxu1 %v23703_v3 }
0x2bf9   : > { %23238 = vmatpush3.bf16.msra.mxu0 %v27416_v53  ;;  %23292 = vmatpush3.bf16.msra.mxu1 %v27416_v53  ;;  %v15051_v53 = vld [vmem:[%s28155_s12] sm:$0xf] }
0x2bfa   : > { %23239 = vmatprep.subr.bf16.mxu0 %v23703_v3  ;;  %23293 = vmatprep.subr.bf16.mxu1 %v23703_v3 }
0x2bfb   : > { %21071 = vmatprep.mubr.msk.f32.mxu0 %vm23704_vm1, %v23705_v52  ;;  %21188 = vmatprep.mubr.msk.f32.mxu1 %vm23704_vm1, %v23705_v52 }
0x2bfd   : > { %23241 = vmatpush3.bf16.msra.mxu0 %v27436_v34  ;;  %23295 = vmatpush3.bf16.msra.mxu1 %v27436_v34  ;;  %v15291_v34 = vld [vmem:[%s28158_s15 + $0x8] sm:$0xff] }
0x2bfe   : > { %21069 = vmatprep.subr.mxu0 %v23705_v52  ;;  %21186 = vmatprep.subr.mxu1 %v23705_v52  ;;  %v23321_v50 = vpack.c.bf16 %v15291_v34, %v15290_v28  ;;  %v16794_v28 = vld [vmem:[%s28162_s19] sm:$0xf] }
0x2bff   : > { %v16874_v34 = vld [vmem:[%s28164_s21] sm:$0xff] }
0x2c01   : > { %21070 = vmatpush3.msra.mxu0 %v27457_v14  ;;  %21187 = vmatpush3.msra.mxu1 %v27457_v14 }
0x2c02   : > { %21072 = vmatmul.mubr.msk.f32.vlgmr.msra.gmra.mrb[178].mxu0 %vm1539_vm6, %v14085_v33  ;;  %23242 = vmatprep.subr.bf16.mxu0 %v23703_v3 }
0x2c03   : > { %21189 = vmatmul.mubr.msk.f32.vlgmr.msra.gmra.mrb[178].mxu1 %vm1539_vm6, %v14751_v4  ;;  %23296 = vmatprep.subr.bf16.mxu1 %v23703_v3 }
0x2c04   : > { %23244 = vmatpush3.bf16.msra.mxu0 %v27459_v42  ;;  %23298 = vmatpush3.bf16.msra.mxu1 %v27459_v42 }
0x2c05   : > { %23245 = vmatprep.subr.bf16.mxu0 %v23703_v3  ;;  %23299 = vmatprep.subr.bf16.mxu1 %v23703_v3 }
0x2c06   : > { %21084 = vmatprep.mubr.msk.f32.mxu0 %vm23704_vm1, %v23705_v52  ;;  %21201 = vmatprep.mubr.msk.f32.mxu1 %vm23704_vm1, %v23705_v52 }
0x2c08   : > { %23247 = vmatpush3.bf16.msra.mxu0 %v27479_v59  ;;  %23301 = vmatpush3.bf16.msra.mxu1 %v27479_v59 }
0x2c09   : > { %21082 = vmatprep.subr.mxu0 %v23705_v52  ;;  %21199 = vmatprep.subr.mxu1 %v23705_v52 }
0x2c0c   : > { %21083 = vmatpush3.msra.mxu0 %v27500_v11  ;;  %21200 = vmatpush3.msra.mxu1 %v27500_v11 }
0x2c0d   : > { %21085 = vmatmul.mubr.msk.f32.vlgmr.msra.gmra.mrb[178].mxu0 %vm1539_vm6, %v14165_v47  ;;  %23248 = vmatprep.subr.bf16.mxu0 %v23703_v3 }
0x2c0e   : > { %21202 = vmatmul.mubr.msk.f32.vlgmr.msra.gmra.mrb[178].mxu1 %vm1539_vm6, %v14826_v60  ;;  %23302 = vmatprep.subr.bf16.mxu1 %v23703_v3 }
0x2c0f   : > { %23250 = vmatpush3.bf16.msra.mxu0 %v27502_v58  ;;  %23304 = vmatpush3.bf16.msra.mxu1 %v27502_v58 }
0x2c10   : > { %23251 = vmatprep.subr.bf16.mxu0 %v23703_v3  ;;  %23305 = vmatprep.subr.bf16.mxu1 %v23703_v3 }
0x2c11   : > { %21097 = vmatprep.mubr.msk.f32.mxu0 %vm23704_vm1, %v23705_v52  ;;  %21214 = vmatprep.mubr.msk.f32.mxu1 %vm23704_vm1, %v23705_v52 }
0x2c13   : > { %23253 = vmatpush3.bf16.msra.mxu0 %v27522_v31  ;;  %23307 = vmatpush3.bf16.msra.mxu1 %v27522_v31  ;;  %v17744_v31 = vld [vmem:[%s28158_s15 + $0x18] sm:$0xff] }
0x2c14   : > { %21095 = vmatprep.subr.mxu0 %v23705_v52  ;;  %21212 = vmatprep.subr.mxu1 %v23705_v52 }
0x2c17   : > { %21096 = vmatpush3.msra.mxu0 %v27537_v19  ;;  %21213 = vmatpush3.msra.mxu1 %v27537_v19  ;;  %v23324_v19 = vpack.c.bf16 %v17744_v31, %v17743_v12  ;;  %v16879_v12 = vld [vmem:[%s28164_s21 + $0x28] sm:$0xff] }
0x2c18   : > { %21098 = vmatmul.mubr.msk.f32.vlgmr.msra.gmra.mrb[178].mxu0 %vm1539_vm6, %v14245_v22  ;;  %21215 = vmatmul.mubr.msk.f32.vlgmr.msra.gmra.mrb[178].mxu1 %vm1539_vm6, %v14901_v9 }
0x2c19   : > { %21217 = vmatprep.subr.mxu0 %v23705_v52  ;;  %21222 = vmatprep.subr.mxu1 %v23705_v52 }
0x2c1a   : > { %21219 = vmatprep.mubr.msk.f32.mxu0 %vm23704_vm1, %v23705_v52  ;;  %21224 = vmatprep.mubr.msk.f32.mxu1 %vm23704_vm1, %v23705_v52 }
0x2c89   : > { %v13515_v56 = vpop.f32.mrb[176].mxu0  ;;  %v13589_v45 = vpop.f32.mrb[176].mxu1 }
0x2c8a   : > { %v13593_v41 = vmax.f32 %v13515_v56, %v13589_v45  ;;  %v20971_v36 = vpop.f32.mrb[177].mxu0  ;;  %v20982_v29 = vpop.f32.mrb[177].mxu1 }
0x2c8c   : > { %v13594_v17 = vmax.f32 %v13593_v41, 0.0 }
0x2c8e   : > { %13596 = vst.msk [vmem:[#allocation3 + $0x8] sm:$0xf] %vm10227_vm8, %v13594_v17  ;;  %v16647_v17 = vld [vmem:[%s28160_s17] sm:$0xff] }
0x2c95   : > { %v15757_v6 = vld [vmem:[#allocation3 + $0x8] sm:$0x3] }
0x2c96   : > { %v15835_v44 = vld [vmem:[#allocation3 + $0x9] sm:$0x3] }
0x2ceb   : > { %v14320_v13 = vpop.f32.mrb[178].mxu0  ;;  %v14971_v63 = vpop.f32.mrb[178].mxu1 }
0x2cec   : > { %v23428_v5 = vadd.f32 %v27557_v49, %v14320_v13  ;;  %v23429_v30 = vadd.f32 %v27557_v49, %v14971_v63  ;;  %v21099_v1 = vpop.f32.mrb[179].mxu0  ;;  %v21216_v18 = vpop.f32.mrb[179].mxu1  ;;  %v17747_v49 = vld [vmem:[%s28158_s15 + $0x28] sm:$0xff]  ;;  %v16721_v13 = vld [vmem:[%s28161_s18] sm:$0xff] }
0x2ced   : > { %v23327_v35 = vpack.c.bf16 %v17747_v49, %v17746_v40  ;;  %v17741_v63 = vld [vmem:[%s28159_s16] ss:$0 sm:$0xff]  ;;  %v16883_v49 = vld [vmem:[%s28164_s21 + $0x48] sm:$0xff] }
0x2cee   : > { %v14976_v0 = vmax.f32 %v23428_v5, %v23429_v30  ;;  %v16882_v40 = vld [vmem:[%s28164_s21 + $0x40] sm:$0xff] }
0x2cf0   : > { %21218 = vmatpush3.msra.mxu0 %v14976_v0  ;;  %21223 = vmatpush3.msra.mxu1 %v14976_v0 }
0x2cf1   : > { %21220 = vmatmul.mubr.msk.f32.vlgmr.msra.gmra.mrb[180].mxu0 %vm9925_vm7, %v14977_v21  ;;  %21225 = vmatmul.mubr.msk.f32.vlgmr.msra.gmra.mrb[180].mxu1 %vm9925_vm7, %v15051_v53 }
0x2cf2   : > { %23308 = vmatprep.subr.bf16.mxu0 %v23703_v3  ;;  %23314 = vmatprep.subr.bf16.mxu1 %v23703_v3 }
0x2cf3   : > { %23310 = vmatpush3.bf16.msra.mxu0 %v27579_v27  ;;  %23316 = vmatpush3.bf16.msra.mxu1 %v27581_v8  ;;  %v17756_v27 = vld [vmem:[%s28158_s15 + $0x58] sm:$0xff] }
0x2cf4   : > { %23311 = vmatprep.subr.bf16.mxu0 %v23703_v3  ;;  %23317 = vmatprep.subr.bf16.mxu1 %v23703_v3  ;;  %v23336_v8 = vpack.c.bf16 %v17756_v27, %v17755_v46  ;;  %v16888_v27 = vld [vmem:[%s28164_s21 + $0x70] sm:$0xff] }
0x2cf5   : > { %21235 = vmatprep.mubr.msk.f32.mxu0 %vm23704_vm1, %v23705_v52  ;;  %21246 = vmatprep.mubr.msk.f32.mxu1 %vm23704_vm1, %v23705_v52 }
0x2cf7   : > { %23313 = vmatpush3.bf16.msra.mxu0 %v27601_v62  ;;  %23319 = vmatpush3.bf16.msra.mxu1 %v27603_v20  ;;  %v15913_v62 = vld [vmem:[#allocation3 + $0xa] sm:$0x3]  ;;  %v17761_v20 = vld [vmem:[%s28158_s15 + $0x70] sm:$0xff] }
0x2cf8   : > { %23320 = vmatprep.subr.bf16.mxu0 %v23703_v3  ;;  %23347 = vmatprep.subr.bf16.mxu1 %v23703_v3  ;;  %v23342_v57 = vpack.c.bf16 %v17762_v55, %v17761_v20  ;;  %v16966_v55 = vld [vmem:[%s28236_s3 + $0x20] sm:$0xff] }
0x2dc4   : > { %v15047_v14 = vpop.f32.mrb[180].mxu0  ;;  %v15121_v42 = vpop.f32.mrb[180].mxu1 }
0x2dc5   : > { %v15125_v59 = vmax.f32 %v15047_v14, %v15121_v42  ;;  %v21221_v11 = vpop.f32.mrb[181].mxu0  ;;  %v21226_v58 = vpop.f32.mrb[181].mxu1  ;;  %v16875_v14 = vld [vmem:[%s28164_s21 + $0x8] sm:$0xff]  ;;  %v16876_v42 = vld [vmem:[%s28164_s21 + $0x10] sm:$0xff] }
0x2dc6   : > { %v16878_v58 = vld [vmem:[%s28164_s21 + $0x20] sm:$0xff] }
0x2dc7   : > { %21236 = vmatmul.mubr.msk.f32.vlgmr.msra.gmra.mrb[182].mxu0 %vm795_vm0, %v15125_v59  ;;  %21247 = vmatmul.mubr.msk.f32.vlgmr.msra.gmra.mrb[182].mxu1 %vm795_vm0, %v15125_v59  ;;  %v16877_v59 = vld [vmem:[%s28164_s21 + $0x18] sm:$0xff]  ;;  %v23381_v31 = vpack.c.bf16 %v16879_v12, %v16878_v58 }
0x2dc8   : > { %23322 = vmatpush3.bf16.msra.mxu0 %v23321_v50  ;;  %23349 = vmatpush3.bf16.msra.mxu1 %v23321_v50  ;;  %v23375_v50 = vpack.c.bf16 %v16875_v14, %v16874_v34  ;;  %v23378_v11 = vpack.c.bf16 %v16877_v59, %v16876_v42  ;;  %v16978_v34 = vld [vmem:[%s28239_s2] sm:$0x1]  ;;  %s28100_s2 = scalar_lea.hbm %s28243_s29, %s17780_s0 }
0x2dc9   : > { %21253 = vmatprep.mubr.msk.f32.mxu0 %vm23704_vm1, %v23705_v52  ;;  %21316 = vmatprep.mubr.msk.f32.mxu1 %vm23704_vm1, %v23705_v52 }
0x2dca   : > { %23323 = vmatprep.subr.bf16.mxu0 %v23703_v3  ;;  %23350 = vmatprep.subr.bf16.mxu1 %v23703_v3 }
0x2dcb   : > { %21254 = vmatmul.mubr.msk.f32.vlgmr.msra.gmra.mrb[184].mxu0 %vm15292_vm9, %v15289_v54  ;;  %21317 = vmatmul.mubr.msk.f32.vlgmr.msra.gmra.mrb[184].mxu1 %vm15292_vm9, %v15523_v16  ;;  %v16881_v54 = vld [vmem:[%s28164_s21 + $0x38] sm:$0xff] }
0x2dcc   : > { %23325 = vmatpush3.bf16.msra.mxu0 %v23324_v19  ;;  %23352 = vmatpush3.bf16.msra.mxu1 %v23324_v19  ;;  %v16880_v19 = vld [vmem:[%s28164_s21 + $0x30] sm:$0xff] }
0x2dcd   : > { %21260 = vmatprep.mubr.msk.f32.mxu0 %vm23704_vm1, %v23705_v52  ;;  %21323 = vmatprep.mubr.msk.f32.mxu1 %vm23704_vm1, %v23705_v52 }
0x2dce   : > { %23326 = vmatprep.subr.bf16.mxu0 %v23703_v3  ;;  %23353 = vmatprep.subr.bf16.mxu1 %v23703_v3 }
0x2dd3   : > { %21261 = vmatmul.mubr.msk.f32.vlgmr.msra.gmra.mrb[184].mxu0 %vm15292_vm9, %v15367_v15  ;;  %21324 = vmatmul.mubr.msk.f32.vlgmr.msra.gmra.mrb[184].mxu1 %vm15292_vm9, %v15601_v7  ;;  %v16884_v15 = vld [vmem:[%s28164_s21 + $0x50] sm:$0xff] }
0x2dd4   : > { %23328 = vmatpush3.bf16.msra.mxu0 %v23327_v35  ;;  %23355 = vmatpush3.bf16.msra.mxu1 %v23327_v35  ;;  %v23387_v35 = vpack.c.bf16 %v16883_v49, %v16882_v40 }
0x2dd5   : > { %21267 = vmatprep.mubr.msk.f32.mxu0 %vm23704_vm1, %v23705_v52  ;;  %21330 = vmatprep.mubr.msk.f32.mxu1 %vm23704_vm1, %v23705_v52 }
0x2dd6   : > { %23329 = vmatprep.subr.bf16.mxu0 %v23703_v3  ;;  %23356 = vmatprep.subr.bf16.mxu1 %v23703_v3 }
0x2ddb   : > { %21268 = vmatmul.mubr.msk.f32.vlgmr.msra.gmra.mrb[184].mxu0 %vm15292_vm9, %v15445_v43  ;;  %21331 = vmatmul.mubr.msk.f32.vlgmr.msra.gmra.mrb[184].mxu1 %vm15292_vm9, %v15679_v25 }
0x2ddc   : > { %23331 = vmatpush3.bf16.msra.mxu0 %v23330_v24  ;;  %23358 = vmatpush3.bf16.msra.mxu1 %v23330_v24  ;;  %v16887_v24 = vld [vmem:[%s28164_s21 + $0x68] sm:$0xff] }
0x2ddd   : > { %21274 = vmatprep.mubr.msk.f32.mxu0 %vm23704_vm1, %v23705_v52  ;;  %21337 = vmatprep.mubr.msk.f32.mxu1 %vm23704_vm1, %v23705_v52  ;;  %v23393_v43 = vpack.c.bf16 %v16887_v24, %v16886_v32 }
0x2dde   : > { %23332 = vmatprep.subr.bf16.mxu0 %v23703_v3  ;;  %23359 = vmatprep.subr.bf16.mxu1 %v23703_v3 }
0x2de3   : > { %21275 = vmatmul.mubr.msk.f32.vlgmr.msra.gmra.mrb[184].mxu0 %vm15292_vm9, %v15523_v16  ;;  %21338 = vmatmul.mubr.msk.f32.vlgmr.msra.gmra.mrb[184].mxu1 %vm15292_vm9, %v15757_v6  ;;  %v23384_v16 = vpack.c.bf16 %v16881_v54, %v16880_v19 }
0x2de4   : > { %23334 = vmatpush3.bf16.msra.mxu0 %v23333_v39  ;;  %23361 = vmatpush3.bf16.msra.mxu1 %v23333_v39 }
0x2de5   : > { %21281 = vmatprep.mubr.msk.f32.mxu0 %vm23704_vm1, %v23705_v52  ;;  %21344 = vmatprep.mubr.msk.f32.mxu1 %vm23704_vm1, %v23705_v52 }
0x2de6   : > { %23335 = vmatprep.subr.bf16.mxu0 %v23703_v3  ;;  %23362 = vmatprep.subr.bf16.mxu1 %v23703_v3 }
0x2deb   : > { %21282 = vmatmul.mubr.msk.f32.vlgmr.msra.gmra.mrb[184].mxu0 %vm15292_vm9, %v15601_v7  ;;  %21345 = vmatmul.mubr.msk.f32.vlgmr.msra.gmra.mrb[184].mxu1 %vm15292_vm9, %v15835_v44  ;;  %v16885_v7 = vld [vmem:[%s28164_s21 + $0x58] sm:$0xff] }
0x2dec   : > { %23337 = vmatpush3.bf16.msra.mxu0 %v23336_v8  ;;  %23364 = vmatpush3.bf16.msra.mxu1 %v23336_v8  ;;  %v23390_v26 = vpack.c.bf16 %v16885_v7, %v16884_v15  ;;  %v16889_v8 = vld [vmem:[%s28164_s21 + $0x78] sm:$0xff] }
0x2ded   : > { %21288 = vmatprep.mubr.msk.f32.mxu0 %vm23704_vm1, %v23705_v52  ;;  %21351 = vmatprep.mubr.msk.f32.mxu1 %vm23704_vm1, %v23705_v52 }
0x2dee   : > { %23338 = vmatprep.subr.bf16.mxu0 %v23703_v3  ;;  %23365 = vmatprep.subr.bf16.mxu1 %v23703_v3 }
0x2df3   : > { %21289 = vmatmul.mubr.msk.f32.vlgmr.msra.gmra.mrb[184].mxu0 %vm15292_vm9, %v15679_v25  ;;  %21352 = vmatmul.mubr.msk.f32.vlgmr.msra.gmra.mrb[184].mxu1 %vm15292_vm9, %v15913_v62 }
0x2df4   : > { %23340 = vmatpush3.bf16.msra.mxu0 %v23339_v37  ;;  %21295 = vmatprep.mubr.msk.f32.mxu0 %vm23704_vm1, %v23705_v52 }
0x2df5   : > { %23341 = vmatprep.subr.bf16.mxu0 %v23703_v3  ;;  %23367 = vmatpush3.bf16.msra.mxu1 %v23339_v37  ;;  %v23399_v37 = vpack.c.bf16 %v16963_v51, %v16962_v48 }
0x2df6   : > { %21358 = vmatprep.mubr.msk.f32.mxu1 %vm23704_vm1, %v23705_v52  ;;  %23368 = vmatprep.subr.bf16.mxu1 %v23703_v3 }
0x2dfb   : > { %21296 = vmatmul.mubr.msk.f32.vlgmr.msra.gmra.mrb[184].mxu0 %vm15292_vm9, %v15757_v6 }
0x2dfc   : > { %23343 = vmatpush3.bf16.msra.mxu0 %v23342_v57  ;;  %21302 = vmatprep.mubr.msk.f32.mxu0 %vm23704_vm1, %v23705_v52 }
0x2dfd   : > { %23344 = vmatprep.subr.bf16.mxu0 %v23703_v3 }
0x2e03   : > { %21303 = vmatmul.mubr.msk.f32.vlgmr.msra.gmra.mrb[184].mxu0 %vm15292_vm9, %v15835_v44  ;;  %v23396_v44 = vpack.c.bf16 %v16889_v8, %v16888_v27 }
0x2e04   : > { %23346 = vmatpush3.bf16.msra.mxu0 %v23345_v23  ;;  %21309 = vmatprep.mubr.msk.f32.mxu0 %vm23704_vm1, %v23705_v52 }
0x2e05   : > { %21375 = vmatprep.subr.mxu0 %v23705_v52 }
0x2e0b   : > { %21310 = vmatmul.mubr.msk.f32.vlgmr.msra.gmra.mrb[184].mxu0 %vm15292_vm9, %v15913_v62  ;;  %v16965_v62 = vld [vmem:[%s28236_s3 + $0x18] sm:$0xff] }
0x2e0c   : > { %21377 = vmatprep.mubr.msk.f32.mxu0 %vm23704_vm1, %v23705_v52  ;;  %21376 = vmatpush3.msra.mxu0 %v16647_v17 }
0x2e0d   : > { %21385 = vmatprep.subr.mxu0 %v23705_v52 }
0x2e9a   : > { %v15199_v33 = vpop.f32.mrb[182].mxu0  ;;  %v15273_v47 = vpop.f32.mrb[182].mxu1 }
0x2e9b   : > { %v15277_v22 = vmax.f32 %v15199_v33, %v15273_v47  ;;  %v21237_v4 = vpop.f32.mrb[183].mxu0  ;;  %v21248_v60 = vpop.f32.mrb[183].mxu1  ;;  %v16970_v47 = vld [vmem:[%s28236_s3 + $0x40] sm:$0xff] }
0x2e9c   : > { %v16972_v60 = vld [vmem:[%s28236_s3 + $0x50] sm:$0xff] }
0x2e9d   : > { %v15278_v9 = vmax.f32 %v15277_v22, 0.0  ;;  %v16971_v22 = vld [vmem:[%s28236_s3 + $0x48] sm:$0xff] }
0x2e9e   : > { %v23411_v4 = vpack.c.bf16 %v16971_v22, %v16970_v47 }
0x2e9f   : > { %15280 = vst.msk [vmem:[#allocation3 + $0xc] sm:$0xf] %vm10227_vm8, %v15278_v9  ;;  %v16973_v9 = vld [vmem:[%s28236_s3 + $0x58] sm:$0xff] }
0x2ea6   : > { %v16417_v56 = vld [vmem:[#allocation3 + $0xc] sm:$0x3]  ;;  %v16567_v41 = vld [vmem:[#allocation3 + $0xe] sm:$0x3] }
0x2ea7   : > { %21359 = vmatmul.mubr.msk.f32.vlgmr.msra.gmra.mrb[184].mxu1 %vm15292_vm9, %v16417_v56  ;;  %v16492_v45 = vld [vmem:[#allocation3 + $0xd] sm:$0x3]  ;;  %v23414_v56 = vpack.c.bf16 %v16973_v9, %v16972_v60 }
0x2ea8   : > { %23370 = vmatpush3.bf16.msra.mxu1 %v23342_v57  ;;  %21365 = vmatprep.mubr.msk.f32.mxu1 %vm23704_vm1, %v23705_v52  ;;  %v16967_v57 = vld [vmem:[%s28236_s3 + $0x28] sm:$0xff] }
0x2ea9   : > { %23371 = vmatprep.subr.bf16.mxu1 %v23703_v3  ;;  %v23405_v2 = vpack.c.bf16 %v16967_v57, %v16966_v55 }
0x2eaf   : > { %21366 = vmatmul.mubr.msk.f32.vlgmr.msra.gmra.mrb[184].mxu1 %vm15292_vm9, %v16492_v45  ;;  %v16974_v45 = vld [vmem:[%s28236_s3 + $0x60] sm:$0xff] }
0x2eb0   : > { %23373 = vmatpush3.bf16.msra.mxu1 %v23345_v23  ;;  %21372 = vmatprep.mubr.msk.f32.mxu1 %vm23704_vm1, %v23705_v52  ;;  %v16969_v23 = vld [vmem:[%s28236_s3 + $0x38] sm:$0xff] }
0x2eb1   : > { %21380 = vmatprep.subr.mxu1 %v23705_v52  ;;  %v23408_v33 = vpack.c.bf16 %v16969_v23, %v16968_v38 }
0x2eb7   : > { %21373 = vmatmul.mubr.msk.f32.vlgmr.msra.gmra.mrb[184].mxu1 %vm15292_vm9, %v16567_v41  ;;  %v16975_v41 = vld [vmem:[%s28236_s3 + $0x68] sm:$0xff] }
0x2eb8   : > { %21382 = vmatprep.mubr.msk.f32.mxu1 %vm23704_vm1, %v23705_v52  ;;  %21381 = vmatpush3.msra.mxu1 %v16721_v13 }
0x2eb9   : > { %23374 = vmatprep.subr.bf16.mxu1 %v23703_v3 }
0x2ede   : > { %v15986_v36 = vpop.f32.mrb[184].mxu0 }
0x2edf   : > { %v21311_v29 = vpop.f32.mrb[185].mxu0  ;;  %v23430_v30 = vadd.f32 %v17741_v63, %v15986_v36  ;;  %v23417_v36 = vpack.c.bf16 %v16975_v41, %v16974_v45 }
0x2ee0   : > { %v16795_v29 = vld [vmem:[%s28237_s20] sm:$0x1]  ;;  %s28240_s20 = sld [smem:[#allocation8_spill]] }
0x2ee6   : > { %s755_s26 = sand.u32 1, %s28240_s20   ;;  %s23706_s20 = smov [#allocation4]  }
0x2ee7   : > { %s756_s30 = scalar_lea.vmem [#allocation4], %s755_s26  ;;  %s23643_s22 = sshll.u32 %s23706_s20, 4  ;;  %s23644_s22 = int_to_ptr.vmem [resolvable:$false] %s23643_s22 }
0x2ee8   : > { %s17075_s9 = sshll.u32 %s756_s30, 4  ;;  %s23645_s5 = scalar_lea.vmem %s23644_s22, 32  ;;  %s28102_s9 = int_to_ptr.vmem [resolvable:$true] %s17075_s9 }
0x2ee9   : > { %s23639_s4 = scalar_lea.vmem %s28102_s9, 16  ;;  %p23646_p0 = scmp.lt.s32.totalorder %s28102_s9, %s23644_s22 }
0x2eea   : > { %p23640_p11 = scmp.ne.s32.totalorder %s28102_s9, %s23639_s4  ;;  %p23647_p1 = scmp.lt.s32.totalorder %s23645_s5, %s23639_s4 }
0x2eec   : > { %p23641_p12 = pnand %p23640_p11, %p23875_p5  ;;  %p23648_p2 = por %p23647_p1, %p23646_p0 }
0x2eee   : > { %p23642_p13 = pneg %p23641_p12 }
0x2ef0   : > { %p23649_p3 = pnand %p23648_p2, %p23642_p13 }
0x2f8a   : > { %v16637_v5 = vpop.f32.mrb[184].mxu1 }
0x2f8b   : > { %v23431_v1 = vadd.f32 %v17741_v63, %v16637_v5  ;;  %v21374_v18 = vpop.f32.mrb[185].mxu1 }
0x2f8d   : > { %v16642_v0 = vmax.f32 %v23430_v30, %v23431_v1  ;;  %v16976_v30 = vld [vmem:[%s28236_s3 + $0x70] sm:$0xff]  ;;  %v16977_v1 = vld [vmem:[%s28236_s3 + $0x78] sm:$0xff] }
0x2f8e   : > { %v23420_v18 = vpack.c.bf16 %v16977_v1, %v16976_v30 }
0x2f8f   : > { %v16644_v21 = vrot.slane %v16642_v0, 1 }
0x2f91   : > { %v16646_v53 = vmax.f32 %v16642_v0, %v16644_v21 }
0x2f93   : > { %21378 = vmatmul.mubr.msk.f32.vlgmr.msra.gmra.mrb[186].mxu0 %vm9925_vm7, %v16646_v53  ;;  %21383 = vmatmul.mubr.msk.f32.vlgmr.msra.gmra.mrb[186].mxu1 %vm9925_vm7, %v16646_v53 }
0x2f94   : > { %21387 = vmatprep.mubr.msk.f32.mxu0 %vm23704_vm1, %v23705_v52  ;;  %21422 = vmatprep.mubr.msk.f32.mxu1 %vm23704_vm1, %v23705_v52 }
0x2f95   : > { %21386 = vmatpush3.msk.msra.mxu0 %vm1195_vm4, %v16794_v28  ;;  %23376 = vmatpush3.bf16.msra.mxu1 %v23375_v50 }
0x2f96   : > { %23398 = vmatprep.subr.bf16.mxu0 %v23703_v3  ;;  %23377 = vmatprep.subr.bf16.mxu1 %v23703_v3 }
0x2f99   : > { %23379 = vmatpush3.bf16.msra.mxu1 %v23378_v11 }
0x2f9a   : > { %23380 = vmatprep.subr.bf16.mxu1 %v23703_v3 }
0x2f9d   : > { %23382 = vmatpush3.bf16.msra.mxu1 %v23381_v31 }
0x2f9e   : > { %23383 = vmatprep.subr.bf16.mxu1 %v23703_v3 }
0x2fa1   : > { %23385 = vmatpush3.bf16.msra.mxu1 %v23384_v16 }
0x2fa2   : > { %23386 = vmatprep.subr.bf16.mxu1 %v23703_v3 }
0x2fa5   : > { %23388 = vmatpush3.bf16.msra.mxu1 %v23387_v35 }
0x2fa6   : > { %23389 = vmatprep.subr.bf16.mxu1 %v23703_v3 }
0x2fa9   : > { %23391 = vmatpush3.bf16.msra.mxu1 %v23390_v26 }
0x2faa   : > { %23392 = vmatprep.subr.bf16.mxu1 %v23703_v3 }
0x2fad   : > { %23394 = vmatpush3.bf16.msra.mxu1 %v23393_v43 }
0x2fae   : > { %23395 = vmatprep.subr.bf16.mxu1 %v23703_v3 }
0x2fb1   : > { %23397 = vmatpush3.bf16.msra.mxu1 %v23396_v44 }
0x3066   : > { %v16717_v25 = vpop.f32.mrb[186].mxu0  ;;  %v16788_v10 = vpop.f32.mrb[186].mxu1 }
0x3067   : > { %v16792_v61 = vmax.f32 %v16717_v25, %v16788_v10  ;;  %v21379_v39 = vpop.f32.mrb[187].mxu0  ;;  %v21384_v6 = vpop.f32.mrb[187].mxu1 }
0x3069   : > { %v16793_v46 = vmax.f32 %v16792_v61, 0.0 }
0x306b   : > { %21388 = vmatmul.mubr.msk.f32.vlgmr.msra.gmra.mrb[188].mxu0 %vm16796_vm10, %v16793_v46 }
0x306c   : > { %21457 = vmatprep.mubr.msk.f32.mxu0 %vm23704_vm1, %v23705_v52  ;;  %v16964_v52 = vld [vmem:[%s28236_s3 + $0x10] sm:$0xff]  ;;  %23400 = vmatpush3.bf16.msra.mxu0 %v23399_v37  ;;  %s17063_s3 = scalar_lea.sflag [#allocation5], %s755_s26 }
0x306d   : > { %v23402_v20 = vpack.c.bf16 %v16965_v62, %v16964_v52  ;;  %23401 = vmatprep.subr.bf16.mxu0 %v23703_v3 }
0x3070   : > { %23403 = vmatpush3.bf16.msra.mxu0 %v23402_v20 }
0x3071   : > { %23404 = vmatprep.subr.bf16.mxu0 %v23703_v3 }
0x3074   : > { %23406 = vmatpush3.bf16.msra.mxu0 %v23405_v2 }
0x3075   : > { %23407 = vmatprep.subr.bf16.mxu0 %v23703_v3 }
0x3078   : > { %23409 = vmatpush3.bf16.msra.mxu0 %v23408_v33 }
0x3079   : > { %23410 = vmatprep.subr.bf16.mxu0 %v23703_v3 }
0x307c   : > { %23412 = vmatpush3.bf16.msra.mxu0 %v23411_v4 }
0x307d   : > { %23413 = vmatprep.subr.bf16.mxu0 %v23703_v3 }
0x3080   : > { %23415 = vmatpush3.bf16.msra.mxu0 %v23414_v56 }
0x3081   : > { %23416 = vmatprep.subr.bf16.mxu0 %v23703_v3 }
0x3084   : > { %23418 = vmatpush3.bf16.msra.mxu0 %v23417_v36 }
0x3085   : > { %23419 = vmatprep.subr.bf16.mxu0 %v23703_v3  ;;  %v16890_v3 = vld [vmem:[%s28238_s6] sm:$0x1] }
0x3088   : > { %23421 = vmatpush3.bf16.msra.mxu0 %v23420_v18 }
0x313e   : > { %v16869_v17 = vpop.f32.mrb[188].mxu0 }
0x313f   : > { %v16870_v13 = vadd.f32 %v16869_v17, %v16795_v29  ;;  %v21389_v63 = vpop.f32.mrb[189].mxu0 }
0x3141   : > { %v16873_v5 = vmax.f32 %v16870_v13, 0.0 }
0x3143   : > { %21423 = vmatmul.mubr.f32.vlgmr.msra.gmra.mrb[188].mxu1 %v16873_v5 }
0x3216   : > { %v16957_v0 = vpop.f32.mrb[188].mxu1 }
0x3217   : > { %v16958_v21 = vadd.f32 %v16957_v0, %v16890_v3  ;;  %v21424_v53 = vpop.f32.mrb[189].mxu1 }
0x3219   : > { %v16961_v28 = vmax.f32 %v16958_v21, 0.0 }
0x321b   : > { %21458 = vmatmul.mubr.f32.vlgmr.msra.gmra.mrb[190].mxu0 %v16961_v28 }
0x32ee   : > { %v17045_v14 = vpop.f32.mrb[190].mxu0 }
0x32ef   : > { %v17046_v42 = vadd.f32 %v17045_v14, %v16978_v34  ;;  %v21459_v50 = vpop.f32.mrb[191].mxu0 }
0x32f1   : > { %v17050_v59 = vsel %vm17049_vm11, %v17046_v42, -inf }
0x32f2   : > { %17051 = vmax.xlane.f32.xlu0 %v17050_v59 }
0x337f   : > { %v17052_v11 = vpop.xlane.xlu0 %17051 }
0x3380   : > { %v17053_v58 = vsub.f32 %v17046_v42, %v17052_v11 }
0x3382   : > { %v17054_v12 = vmul.f32 1.442695, %v17053_v58 }
0x3384   : > { %23635 = vpow2.f32 %v17054_v12 }
0x338e   : > { %v23636_v31 = vpop.eup %23635 }
0x338f   : > { %v17056_v19 = vsel %vm17049_vm11, %v23636_v31, 0.0 }
0x3390   : > { %17057 = vadd.xlane.f32.xlu0 %v17056_v19 }
0x341d   : > { %v17058_v54 = vpop.xlane.xlu0 %17057 }
0x341e   : > { %23637 = vrcp.f32 %v17058_v54 }
0x3428   : > { %v23638_v16 = vpop.eup %23637 }
0x3429   : > { %v17060_v40 = vmul.f32 %v23638_v16, %v23636_v31 }
0x342b   : > { %17061 = vst.msk [vmem:[%s756_s30] sm:$0x1] %vm17049_vm11, %v17060_v40 }
0x342c   : > { %23652 = shalt.err (!%p23649_p3)
}
0x342d   : > { %s23653_s26 = scalar_lea.hbm %s28100_s2, 16  ;;  %s23657_s6 = scalar_lea.hbm %s28244_s1, 32 }
0x342e   : > { %p23654_p4 = scmp.ne.s32.totalorder %s28100_s2, %s23653_s26  ;;  %p23658_p9 = scmp.lt.u32.totalorder %s28100_s2, %s28244_s1 }
0x342f   : > { %p23659_p10 = scmp.lt.u32.totalorder %s23657_s6, %s23653_s26  ;;  %p23661_p12 = scmp.lt.u32.totalorder %s23653_s26, %s28100_s2 }
0x3430   : > { %p23655_p7 = pnand %p23654_p4, %p23875_p5 }
0x3431   : > { %p23660_p11 = por %p23659_p10, %p23658_p9 }
0x3432   : > { %p23656_p8 = pneg %p23655_p7 }
0x3433   : > { %p23662_p13 = por %p23661_p12, %p23660_p11 }
0x3435   : > { %p23663_p0 = pnand %p23662_p13, %p23656_p8 }
0x3437   : > { %23666 = shalt.err (!%p23663_p0)
}
0x3438   : > { %23593 = dma.vmem_to_hbm [thread:$0]  (%p23875_p5), %s28102_s9, 16, %s28100_s2, %s17063_s3  }
0x3439 PF: > { %s28245_s4 = sld [smem:[#allocation10_spill]]  ;;  %s28246_s5 = sld [smem:[#allocation7_spill]] }
0x343f   : > { %p23599_p1 = scmp.ge.s32.totalorder %s28245_s4, 2  ;;  %s17087_s22 = sand.u32 1, %s28246_s5  }
0x3440   : > { %s17088_s0 = scalar_lea.sflag [#allocation5], %s17087_s22 }
0x3441   : > { %p23596_p2 = pnand %p23599_p1, %p23879_p6 }
0x3443   : > { %23684 = dma.done.wait (!%p23596_p2), %s17088_s0, 16  }
0x3444   : > { %23686 = vsyncadd (!%p23596_p2), %s17088_s0, 4294967280  ;;  %s28248_s30 = sld [smem:[#allocation12_spill]]  ;;  %s28249_s29 = sld [smem:[#allocation8_spill]] }
0x3445   : > { %s28250_s2 = sld [smem:[#allocation9_spill]]  ;;  %s28251_s6 = sld [smem:[#allocation13_spill]] }
0x344a   : > { %p35_p3 = scmp.ge.s32.totalorder %s28248_s30, 4  }
0x344c   :  { %37 = sbr.rel (!%p35_p3) target bundleno = 19 (0x13), region = 202 }
0x3453   :  { %17092 = vsyncpa [#allocation5], 1 }
0x3454   :  { %17094 = vsyncpa [#allocation5 + $0x1], 1 }

</bundles_post_ra>
